<compile_context>
chip_gen: v7x
topology: tpu7x:2x2x1
jax: 0.10.0
libtpu: 0.0.40
codegen_flags: <defaults>
</compile_context>

<pallas_src>
import functools

import jax
import jax.numpy as jnp
from jax.experimental import pallas as pl
from jax.experimental.pallas import tpu as pltpu

MXU_DTYPE = jnp.bfloat16            # MXU input precision (f32 accumulation)
VMEM_LIMIT = 48 * 1024 * 1024       # raise scoped VMEM; <=48MiB for v7x headroom


def _round_up(x, m):
    return ((x + m - 1) // m) * m


def _dot_f32(a, b):
    return jnp.dot(a, b, preferred_element_type=jnp.float32)


# ----------------------------------------------------------------------------
# Fused [Conv3x3 -> ResidualStack] stage kernel
# ----------------------------------------------------------------------------
# Activations are kept flattened as (P, C) rows over the zero-padded
# (H+2) x (W+2) grid of one image.  `ext_ref` is a VMEM scratch with `margin`
# rows above/below; its halo is zeroed once per image and the body is
# rewritten (ring forced to zero via `mask`) before every conv.  Each 3x3
# conv is one matmul of the 9-tap packed slab against a (9*C, Cout) weight.

def _stage_kernel(x_ref, mask_ref, hw_ref, hb_ref, rw3_ref, rb3_ref,
                  rw1_ref, rb1_ref, o_ref, ext_ref, xcur_ref, *,
                  H, W, P, Wp, margin, n_blocks):
    m = margin
    c_mid = ext_ref.shape[1]
    total = ext_ref.shape[0]
    mask = mask_ref[...]                                     # (P, 1)

    # Zero only the halo rows (8-aligned stores).  The few body rows covered
    # by the trailing store are rewritten by every body store below before
    # any read, so no uninitialized data is ever consumed.
    ext_ref[0:m, :] = jnp.zeros((m, c_mid), jnp.float32)
    tail = m + 8 * (P // 8)
    ext_ref[tail:, :] = jnp.zeros((total - tail, c_mid), jnp.float32)

    offs = tuple(di * Wp + dj for di in (-1, 0, 1) for dj in (-1, 0, 1))

    def conv3x3(value, w, bias):
        # value: (P, c_mid) activation on the padded grid.
        ext_ref[m:m + P, :] = value * mask                   # ring -> 0
        slab = jnp.concatenate(
            [ext_ref[m + d:m + d + P, :] for d in offs], axis=-1)
        return _dot_f32(slab.astype(MXU_DTYPE), w) + bias    # one MXU matmul

    # head 3x3 conv (input channels zero-padded up to c_mid in the wrapper)
    xcur_ref[...] = conv3x3(x_ref[0], hw_ref[...], hb_ref[...])

    # TODO(synk): ResidualStack internals are not part of the spec; the
    # standard VQ-VAE block is used: x += Conv1x1(ReLU(Conv3x3(ReLU(x)))),
    # with a final ReLU after the stack.
    for blk in range(n_blocks):
        x = xcur_ref[...]
        h = conv3x3(jnp.maximum(x, 0.0), rw3_ref[blk], rb3_ref[blk])
        h = jnp.maximum(h, 0.0).astype(MXU_DTYPE)
        h = _dot_f32(h, rw1_ref[blk]) + rb1_ref[blk]
        xcur_ref[...] = x + h

    # Final ReLU; store interior rows only (the pad ring never reaches HBM).
    for y in range(H):
        r0 = (y + 1) * Wp + 1
        o_ref[0, y] = jnp.maximum(xcur_ref[r0:r0 + W, :], 0.0)


def fused_stage(x, head_w, head_b, res_blocks):
    """x: (N, H, W, C_in) NHWC. head: 3x3 conv C_in->C, then residual stack."""
    N, H, W, c_in = x.shape
    c_mid = head_w.shape[0]
    c_res = res_blocks[0]['w1'].shape[0]
    n_blocks = len(res_blocks)
    assert c_in <= c_mid              # holds for every stage of this model
    Hp, Wp = H + 2, W + 2
    P = Hp * Wp
    margin = _round_up(Wp + 1, 8)

    xp = jnp.pad(x, ((0, 0), (1, 1), (1, 1), (0, c_mid - c_in)))
    xp = xp.reshape(N, P, c_mid).astype(jnp.float32)
    mask = jnp.pad(jnp.ones((H, W), jnp.float32), ((1, 1), (1, 1))).reshape(P, 1)

    # Tap-packed weights: (9*c_mid, Cout) so each conv is one matmul.
    hw = jnp.transpose(head_w, (2, 3, 1, 0))                 # (3,3,Cin,Cout)
    hw = jnp.pad(hw, ((0, 0), (0, 0), (0, c_mid - c_in), (0, 0)))
    hw = hw.reshape(9 * c_mid, c_mid).astype(MXU_DTYPE)
    hb = head_b.reshape(1, c_mid).astype(jnp.float32)
    rw3 = jnp.stack(
        [jnp.transpose(b['w1'], (2, 3, 1, 0)).reshape(9 * c_mid, c_res)
         for b in res_blocks], axis=0).astype(MXU_DTYPE)     # (nb, 9C, Cres)
    rb3 = jnp.stack([b['b1'].reshape(1, c_res) for b in res_blocks],
                    axis=0).astype(jnp.float32)
    rw1 = jnp.stack([b['w2'][:, :, 0, 0].T for b in res_blocks],
                    axis=0).astype(MXU_DTYPE)                # (nb, Cres, C)
    rb1 = jnp.stack([b['b2'].reshape(1, c_mid) for b in res_blocks],
                    axis=0).astype(jnp.float32)

    kernel = functools.partial(_stage_kernel, H=H, W=W, P=P, Wp=Wp,
                               margin=margin, n_blocks=n_blocks)
    out = pl.pallas_call(
        kernel,
        out_shape=jax.ShapeDtypeStruct((N, H, W, c_mid), jnp.float32),
        grid=(N,),
        in_specs=[
            pl.BlockSpec((1, P, c_mid), lambda n: (n, 0, 0)),
            pl.BlockSpec((P, 1), lambda n: (0, 0)),
            pl.BlockSpec((9 * c_mid, c_mid), lambda n: (0, 0)),
            pl.BlockSpec((1, c_mid), lambda n: (0, 0)),
            pl.BlockSpec((n_blocks, 9 * c_mid, c_res), lambda n: (0, 0, 0)),
            pl.BlockSpec((n_blocks, 1, c_res), lambda n: (0, 0, 0)),
            pl.BlockSpec((n_blocks, c_res, c_mid), lambda n: (0, 0, 0)),
            pl.BlockSpec((n_blocks, 1, c_mid), lambda n: (0, 0, 0)),
        ],
        out_specs=pl.BlockSpec((1, H, W, c_mid), lambda n: (n, 0, 0, 0)),
        scratch_shapes=[pltpu.VMEM((2 * margin + P, c_mid), jnp.float32),
                        pltpu.VMEM((P, c_mid), jnp.float32)],
        compiler_params=pltpu.CompilerParams(
            dimension_semantics=("parallel",),
            vmem_limit_bytes=VMEM_LIMIT),
    )(xp, mask, hw, hb, rw3, rb3, rw1, rb1)
    return out


# ----------------------------------------------------------------------------
# Stride-2 4x4 conv (pad=1) via input phase split (space-to-batch)
# ----------------------------------------------------------------------------
# All 16 taps packed into one matmul: slab (P, 16*c_pad) @ (16*c_pad, Cout).

def _conv4x4s2_kernel(x_ref, w_ref, b_ref, o_ref, acc_ref, *,
                      P, Wo1, Ho, Wo, relu):
    # x_ref: (1, 4, P + margin, c_pad) phase-split padded input of one image.
    slabs = []
    for ky in range(4):
        for kx in range(4):
            ph = (ky % 2) * 2 + (kx % 2)
            d = (ky // 2) * Wo1 + (kx // 2)
            slabs.append(x_ref[0, ph, d:d + P, :])
    slab = jnp.concatenate(slabs, axis=-1).astype(MXU_DTYPE)   # (P, 16*c_pad)
    acc = _dot_f32(slab, w_ref[...]) + b_ref[...]
    if relu:
        acc = jnp.maximum(acc, 0.0)
    acc_ref[...] = acc
    for yo in range(Ho):
        o_ref[0, yo] = acc_ref[yo * Wo1:yo * Wo1 + Wo, :]       # interior only


def conv4x4_stride2(x, w, bias, relu=False):
    """4x4 / stride-2 / pad-1 conv, NHWC. w: PyTorch layout (Cout, Cin, 4, 4)."""
    N, H, W, c_in = x.shape
    c_out = w.shape[0]
    Ho, Wo = H // 2, W // 2
    Ho1, Wo1 = Ho + 1, Wo + 1
    P = Ho1 * Wo1
    margin = Wo1 + 2
    c_pad = _round_up(c_in, 8)

    xp = jnp.pad(x, ((0, 0), (1, 1), (1, 1), (0, c_pad - c_in))).astype(jnp.float32)
    phases = jnp.stack([xp[:, pi::2, pj::2, :]
                        for pi in (0, 1) for pj in (0, 1)], axis=1)
    phases = phases.reshape(N, 4, P, c_pad)
    phases = jnp.pad(phases, ((0, 0), (0, 0), (0, margin), (0, 0)))

    wt = jnp.transpose(w, (2, 3, 1, 0))                       # (4,4,Cin,Cout)
    wt = jnp.pad(wt, ((0, 0), (0, 0), (0, c_pad - c_in), (0, 0)))
    wt = wt.reshape(16 * c_pad, c_out).astype(MXU_DTYPE)
    b2 = bias.reshape(1, c_out).astype(jnp.float32)

    kernel = functools.partial(_conv4x4s2_kernel, P=P, Wo1=Wo1, Ho=Ho, Wo=Wo,
                               relu=relu)
    out = pl.pallas_call(
        kernel,
        out_shape=jax.ShapeDtypeStruct((N, Ho, Wo, c_out), jnp.float32),
        grid=(N,),
        in_specs=[
            pl.BlockSpec((1, 4, P + margin, c_pad), lambda n: (n, 0, 0, 0)),
            pl.BlockSpec((16 * c_pad, c_out), lambda n: (0, 0)),
            pl.BlockSpec((1, c_out), lambda n: (0, 0)),
        ],
        out_specs=pl.BlockSpec((1, Ho, Wo, c_out), lambda n: (n, 0, 0, 0)),
        scratch_shapes=[pltpu.VMEM((P, c_out), jnp.float32)],
        compiler_params=pltpu.CompilerParams(
            dimension_semantics=("parallel",),
            vmem_limit_bytes=VMEM_LIMIT),
    )(phases, wt, b2)
    return out


# ----------------------------------------------------------------------------
# Transposed 4x4 conv, stride 2, pad 1 -- sub-pixel decomposition
# ----------------------------------------------------------------------------
# out[2y+r, 2x+c] uses input shifts (ay, ax) in {-1,0,1}^2 with kernel taps:
#   r==0: ay=0 -> ty=1, ay=-1 -> ty=3 ;  r==1: ay=0 -> ty=2, ay=+1 -> ty=0
# All 4 output phases are produced by ONE matmul against a block-sparse
# packed weight (9*Cin, 4*Cout); inactive (shift, phase) blocks are zero.

_CT_TAP = ({0: 1, -1: 3}, {0: 2, 1: 0})


def _convt4x4s2_kernel(x_ref, w_ref, b_ref, o_ref, acc_ref, *,
                       P, Wp, H, W, margin, relu):
    m = margin
    offs = tuple(ay * Wp + ax for ay in (-1, 0, 1) for ax in (-1, 0, 1))
    slab = jnp.concatenate(
        [x_ref[0, m + d:m + d + P, :] for d in offs],
        axis=-1).astype(MXU_DTYPE)                            # (P, 9*Cin)
    acc = _dot_f32(slab, w_ref[...]) + b_ref[...]             # (P, 4*Cout)
    if relu:
        acc = jnp.maximum(acc, 0.0)
    acc_ref[...] = acc
    for y in range(H):                                        # interior only
        r0 = (y + 1) * Wp + 1
        o_ref[0, y] = acc_ref[r0:r0 + W, :]


def conv_transpose4x4_stride2(x, w, bias, relu=False):
    """x NHWC; w PyTorch ConvTranspose2d layout (Cin, Cout, 4, 4)."""
    N, H, W, c_in = x.shape
    c_out = w.shape[1]
    Hp, Wp = H + 2, W + 2
    P = Hp * Wp
    margin = Wp + 1

    xp = jnp.pad(x, ((0, 0), (1, 1), (1, 1), (0, 0))).astype(jnp.float32)
    xp = xp.reshape(N, P, c_in)
    xp = jnp.pad(xp, ((0, 0), (margin, margin), (0, 0)))

    zero = jnp.zeros((c_in, c_out), jnp.float32)
    rows = []
    for ay in (-1, 0, 1):
        for ax in (-1, 0, 1):
            cols = []
            for r in (0, 1):
                for c in (0, 1):
                    ty = _CT_TAP[r].get(ay)
                    tx = _CT_TAP[c].get(ax)
                    cols.append(zero if (ty is None or tx is None)
                                else w[:, :, ty, tx].astype(jnp.float32))
            rows.append(jnp.concatenate(cols, axis=1))
    wt = jnp.concatenate(rows, axis=0).astype(MXU_DTYPE)      # (9*Cin, 4*Cout)
    b4 = jnp.tile(bias.reshape(1, c_out), (1, 4)).astype(jnp.float32)

    kernel = functools.partial(_convt4x4s2_kernel, P=P, Wp=Wp, H=H, W=W,
                               margin=margin, relu=relu)
    out = pl.pallas_call(
        kernel,
        out_shape=jax.ShapeDtypeStruct((N, H, W, 4 * c_out), jnp.float32),
        grid=(N,),
        in_specs=[
            pl.BlockSpec((1, P + 2 * margin, c_in), lambda n: (n, 0, 0)),
            pl.BlockSpec((9 * c_in, 4 * c_out), lambda n: (0, 0)),
            pl.BlockSpec((1, 4 * c_out), lambda n: (0, 0)),
        ],
        out_specs=pl.BlockSpec((1, H, W, 4 * c_out), lambda n: (n, 0, 0, 0)),
        scratch_shapes=[pltpu.VMEM((P, 4 * c_out), jnp.float32)],
        compiler_params=pltpu.CompilerParams(
            dimension_semantics=("parallel",),
            vmem_limit_bytes=VMEM_LIMIT),
    )(xp, wt, b4)
    # depth-to-space: phase-packed channels -> interleaved (2H, 2W)
    out = out.reshape(N, H, W, 2, 2, c_out)
    out = jnp.transpose(out, (0, 1, 3, 2, 4, 5)).reshape(N, 2 * H, 2 * W, c_out)
    return out


# ----------------------------------------------------------------------------
# Fused pre-VQ 1x1 conv + vector quantization (row-tiled, parallel grid)
# ----------------------------------------------------------------------------

def _prevq_vq_kernel(x_ref, w_ref, b_ref, e_ref, et_ref, e2_ref,
                     pre_ref, q_ref, idx_ref):
    pre = _dot_f32(x_ref[...].astype(MXU_DTYPE), w_ref[...]) + b_ref[...]
    pre_ref[...] = pre
    # distances up to a per-row constant (|x|^2 dropped: argmin-invariant);
    # kept in f32 so the nearest-neighbour choice is stable.
    d = e2_ref[...] - 2.0 * _dot_f32(pre, et_ref[...])        # (M, Kc)
    kc = d.shape[-1]
    dmin = jnp.min(d, axis=-1, keepdims=True)
    iota = jax.lax.broadcasted_iota(jnp.int32, d.shape, 1)
    idx = jnp.min(jnp.where(d <= dmin, iota, kc), axis=-1)    # first occurrence
    idx = jnp.minimum(idx, kc - 1)                            # guard NaN rows
    onehot = (iota == idx[:, None]).astype(jnp.float32)
    q_ref[...] = _dot_f32(onehot, e_ref[...])
    idx_ref[...] = idx[:, None].astype(jnp.int32)


def prevq_and_quantize(x, w1x1, b1x1, codebook, commitment_cost):
    """Fused 1x1 conv (pre_vq) + VQ.  x: (N, H, W, Cin) NHWC."""
    # TODO(synk): VectorQuantizeEMA internals not given; inference path only
    # (nearest-neighbour lookup, straight-through, commitment loss); no EMA
    # statistics / codebook update / perplexity.
    N, H, W, c_in = x.shape
    Kc, D = codebook.shape
    M = N * H * W
    flat = x.reshape(M, c_in).astype(jnp.float32)
    wm = w1x1[:, :, 0, 0].T.astype(MXU_DTYPE)     # (Cin, D)
    b2 = b1x1.reshape(1, D).astype(jnp.float32)
    e = codebook.astype(jnp.float32)
    et = e.T                                      # (D, Kc) hoisted transpose
    e2 = jnp.sum(e * e, axis=-1).reshape(1, Kc)   # hoisted codebook norms

    tm = M                                        # row tile (grows with M)
    for cand in (512, 256, 128, 64, 32, 16, 8):
        if M % cand == 0:
            tm = cand
            break

    pre, q, idx = pl.pallas_call(
        _prevq_vq_kernel,
        out_shape=(jax.ShapeDtypeStruct((M, D), jnp.float32),
                   jax.ShapeDtypeStruct((M, D), jnp.float32),
                   jax.ShapeDtypeStruct((M, 1), jnp.int32)),
        grid=(M // tm,),
        in_specs=[
            pl.BlockSpec((tm, c_in), lambda i: (i, 0)),
            pl.BlockSpec((c_in, D), lambda i: (0, 0)),
            pl.BlockSpec((1, D), lambda i: (0, 0)),
            pl.BlockSpec((Kc, D), lambda i: (0, 0)),
            pl.BlockSpec((D, Kc), lambda i: (0, 0)),
            pl.BlockSpec((1, Kc), lambda i: (0, 0)),
        ],
        out_specs=[
            pl.BlockSpec((tm, D), lambda i: (i, 0)),
            pl.BlockSpec((tm, D), lambda i: (i, 0)),
            pl.BlockSpec((tm, 1), lambda i: (i, 0)),
        ],
        compiler_params=pltpu.CompilerParams(
            dimension_semantics=("parallel",),
            vmem_limit_bytes=VMEM_LIMIT),
    )(flat, wm, b2, e, et, e2)

    pre = pre.reshape(N, H, W, D)
    q = q.reshape(N, H, W, D)
    idx = idx.reshape(N, H, W)
    e_latent_loss = jnp.mean((jax.lax.stop_gradient(q) - pre) ** 2)
    loss = commitment_cost * e_latent_loss
    quantize = pre + jax.lax.stop_gradient(q - pre)           # straight-through
    return {'quantize': quantize, 'encoding_indices': idx, 'loss': loss}


# ----------------------------------------------------------------------------
# Model
# ----------------------------------------------------------------------------

def encoder_b_fwd(x, p):
    x = conv4x4_stride2(x, p['c1']['w'], p['c1']['b'], relu=True)
    x = conv4x4_stride2(x, p['c2']['w'], p['c2']['b'], relu=True)
    return fused_stage(x, p['c3']['w'], p['c3']['b'], p['res'])


def encoder_t_fwd(x, p):
    x = conv4x4_stride2(x, p['c1']['w'], p['c1']['b'], relu=True)
    return fused_stage(x, p['c2']['w'], p['c2']['b'], p['res'])


def decoder_fwd(x, p, scale):
    x = fused_stage(x, p['c1']['w'], p['c1']['b'], p['res'])
    if scale == 2:
        x = conv_transpose4x4_stride2(x, p['ct1']['w'], p['ct1']['b'])
    else:
        x = conv_transpose4x4_stride2(x, p['ct1']['w'], p['ct1']['b'], relu=True)
        x = conv_transpose4x4_stride2(x, p['ct2']['w'], p['ct2']['b'])
    return x


def vqvae2_forward(params, x_nchw, commitment_cost=0.25):
    # layout: NCHW interface -> NHWC internal -> NCHW outputs
    x = jnp.transpose(x_nchw, (0, 2, 3, 1)).astype(jnp.float32)

    enc_b = encoder_b_fwd(x, params['encoder_b'])
    enc_t = encoder_t_fwd(enc_b, params['encoder_t'])
    vq_top = prevq_and_quantize(enc_t, params['pre_vq_t']['w'],
                                params['pre_vq_t']['b'],
                                params['vq_t_codebook'], commitment_cost)
    up = conv_transpose4x4_stride2(vq_top['quantize'],
                                   params['upsample']['w'],
                                   params['upsample']['b'])
    cat_b = jnp.concatenate([enc_b, up], axis=-1)
    vq_bottom = prevq_and_quantize(cat_b, params['pre_vq_b']['w'],
                                   params['pre_vq_b']['b'],
                                   params['vq_b_codebook'], commitment_cost)

    dec_t = decoder_fwd(vq_top['quantize'], params['decoder_t'], scale=2)
    cat = jnp.concatenate([vq_bottom['quantize'], dec_t], axis=-1)
    recon = decoder_fwd(cat, params['decoder'], scale=4)

    recon = jnp.transpose(recon, (0, 3, 1, 2))
    vq_top_out = {**vq_top,
                  'quantize': jnp.transpose(vq_top['quantize'], (0, 3, 1, 2))}
    vq_bottom_out = {**vq_bottom,
                     'quantize': jnp.transpose(vq_bottom['quantize'], (0, 3, 1, 2))}
    return recon, vq_bottom_out, vq_top_out


# ----------------------------------------------------------------------------
# Deterministic parameter initialization (PyTorch-layout weights)
# ----------------------------------------------------------------------------

def _conv_p(key, cout, cin, k):
    kw, kb = jax.random.split(key)
    scale = 1.0 / jnp.sqrt(cin * k * k)
    return {'w': jax.random.uniform(kw, (cout, cin, k, k), jnp.float32, -scale, scale),
            'b': jax.random.uniform(kb, (cout,), jnp.float32, -scale, scale)}


def _convt_p(key, cin, cout, k):
    kw, kb = jax.random.split(key)
    scale = 1.0 / jnp.sqrt(cin * k * k)
    return {'w': jax.random.uniform(kw, (cin, cout, k, k), jnp.float32, -scale, scale),
            'b': jax.random.uniform(kb, (cout,), jnp.float32, -scale, scale)}


def _res_blocks(key, nblocks, ch, res_ch):
    blocks = []
    for _ in range(nblocks):
        k1, k2, key = jax.random.split(key, 3)
        p1 = _conv_p(k1, res_ch, ch, 3)
        p2 = _conv_p(k2, ch, res_ch, 1)
        blocks.append({'w1': p1['w'], 'b1': p1['b'],
                       'w2': p2['w'], 'b2': p2['b']})
    return blocks


def init_params(key, in_channels, num_channels, num_residual_blocks,
                num_residual_channels, codebook_size, codebook_dim):
    keys = jax.random.split(key, 32)
    ki = iter(keys)
    nc, nr, nrc, cd = num_channels, num_residual_blocks, num_residual_channels, codebook_dim
    params = {}
    params['encoder_b'] = {
        'c1': _conv_p(next(ki), nc // 2, in_channels, 4),
        'c2': _conv_p(next(ki), nc, nc // 2, 4),
        'c3': _conv_p(next(ki), nc, nc, 3),
        'res': _res_blocks(next(ki), nr, nc, nrc),
    }
    params['encoder_t'] = {
        'c1': _conv_p(next(ki), nc // 2, nc, 4),
        'c2': _conv_p(next(ki), nc, nc // 2, 3),
        'res': _res_blocks(next(ki), nr, nc, nrc),
    }
    params['pre_vq_t'] = _conv_p(next(ki), cd, nc, 1)
    params['pre_vq_b'] = _conv_p(next(ki), cd, nc + cd, 1)
    params['vq_t_codebook'] = jax.random.normal(next(ki), (codebook_size, cd), jnp.float32)
    params['vq_b_codebook'] = jax.random.normal(next(ki), (codebook_size, cd), jnp.float32)
    params['upsample'] = _convt_p(next(ki), cd, cd, 4)
    params['decoder_t'] = {
        'c1': _conv_p(next(ki), cd, cd, 3),
        'res': _res_blocks(next(ki), nr, cd, nrc),
        'ct1': _convt_p(next(ki), cd, cd, 4),
    }
    params['decoder'] = {
        'c1': _conv_p(next(ki), 2 * cd, 2 * cd, 3),
        'res': _res_blocks(next(ki), nr, 2 * cd, nrc),
        'ct1': _convt_p(next(ki), 2 * cd, cd, 4),
        'ct2': _convt_p(next(ki), cd, in_channels, 4),
    }
    return params


# ----------------------------------------------------------------------------

if __name__ == "__main__":
    in_channels = 3
    num_channels = 16
    num_residual_blocks = 2
    num_residual_channels = 8
    codebook_size = 32
    codebook_dim = 8

    key = jax.random.PRNGKey(0)
    kp, kx = jax.random.split(key)
    params = init_params(kp, in_channels, num_channels, num_residual_blocks,
                         num_residual_channels, codebook_size, codebook_dim)
    x = jax.random.normal(kx, (2, in_channels, 16, 16), jnp.float32)

    fwd = jax.jit(vqvae2_forward)
    recon, vq_bottom, vq_top = fwd(params, x)
    jax.block_until_ready(recon)
    jax.block_until_ready(vq_bottom['quantize'])
    jax.block_until_ready(vq_top['quantize'])

    assert recon.shape == (2, in_channels, 16, 16)
    assert vq_bottom['quantize'].shape == (2, codebook_dim, 4, 4)
    assert vq_top['quantize'].shape == (2, codebook_dim, 2, 2)
    assert vq_bottom['encoding_indices'].shape == (2, 4, 4)
    assert vq_top['encoding_indices'].shape == (2, 2, 2)
    print("KERNEL_OK")
</pallas_src>

<mosaic_0001>
module attributes {stable_mosaic.version = 11 : i64} {
  func.func @_conv4x4s2_kernel(%arg0: i32, %arg1: memref<1x4x92x8xf32, #tpu.memory_space<vmem>>, %arg2: memref<128x8xbf16, #tpu.memory_space<vmem>>, %arg3: memref<1x8xf32, #tpu.memory_space<vmem>>, %arg4: memref<1x8x8x8xf32, #tpu.memory_space<vmem>>, %arg5: memref<81x8xf32, #tpu.memory_space<vmem>>) attributes {dimension_semantics = [#tpu.dimension_semantics<parallel>], iteration_bounds = array<i64: 2>, scalar_prefetch = 0 : i64, scratch_operands = 1 : i64, tpu.core_type = #tpu.core_type<tc>, window_params = [{transform_indices = @transform_0, window_bounds = array<i64: 1, 4, 92, 8>}, {pipeline_mode = #tpu.pipeline_mode<synchronous>, transform_indices = @transform_1, window_bounds = array<i64: 128, 8>}, {pipeline_mode = #tpu.pipeline_mode<synchronous>, transform_indices = @transform_2, window_bounds = array<i64: 1, 8>}, {transform_indices = @transform_3, window_bounds = array<i64: 1, 8, 8, 8>}]} {
    %c0 = arith.constant 0 : index
    %c0_0 = arith.constant 0 : index
    %c0_1 = arith.constant 0 : index
    %c0_2 = arith.constant 0 : index
    %0 = vector.load %arg1[%c0, %c0_0, %c0_1, %c0_2] : memref<1x4x92x8xf32, #tpu.memory_space<vmem>>, vector<1x1x81x8xf32>
    %1 = vector.shape_cast %0 : vector<1x1x81x8xf32> to vector<81x8xf32>
    %c0_3 = arith.constant 0 : index
    %c1 = arith.constant 1 : index
    %c0_4 = arith.constant 0 : index
    %c0_5 = arith.constant 0 : index
    %2 = vector.load %arg1[%c0_3, %c1, %c0_4, %c0_5] : memref<1x4x92x8xf32, #tpu.memory_space<vmem>>, vector<1x1x81x8xf32>
    %3 = vector.shape_cast %2 : vector<1x1x81x8xf32> to vector<81x8xf32>
    %c0_6 = arith.constant 0 : index
    %c0_7 = arith.constant 0 : index
    %c1_8 = arith.constant 1 : index
    %c0_9 = arith.constant 0 : index
    %4 = vector.load %arg1[%c0_6, %c0_7, %c1_8, %c0_9] : memref<1x4x92x8xf32, #tpu.memory_space<vmem>>, vector<1x1x81x8xf32>
    %5 = vector.shape_cast %4 : vector<1x1x81x8xf32> to vector<81x8xf32>
    %c0_10 = arith.constant 0 : index
    %c1_11 = arith.constant 1 : index
    %c1_12 = arith.constant 1 : index
    %c0_13 = arith.constant 0 : index
    %6 = vector.load %arg1[%c0_10, %c1_11, %c1_12, %c0_13] : memref<1x4x92x8xf32, #tpu.memory_space<vmem>>, vector<1x1x81x8xf32>
    %7 = vector.shape_cast %6 : vector<1x1x81x8xf32> to vector<81x8xf32>
    %c0_14 = arith.constant 0 : index
    %c2 = arith.constant 2 : index
    %c0_15 = arith.constant 0 : index
    %c0_16 = arith.constant 0 : index
    %8 = vector.load %arg1[%c0_14, %c2, %c0_15, %c0_16] : memref<1x4x92x8xf32, #tpu.memory_space<vmem>>, vector<1x1x81x8xf32>
    %9 = vector.shape_cast %8 : vector<1x1x81x8xf32> to vector<81x8xf32>
    %c0_17 = arith.constant 0 : index
    %c3 = arith.constant 3 : index
    %c0_18 = arith.constant 0 : index
    %c0_19 = arith.constant 0 : index
    %10 = vector.load %arg1[%c0_17, %c3, %c0_18, %c0_19] : memref<1x4x92x8xf32, #tpu.memory_space<vmem>>, vector<1x1x81x8xf32>
    %11 = vector.shape_cast %10 : vector<1x1x81x8xf32> to vector<81x8xf32>
    %c0_20 = arith.constant 0 : index
    %c2_21 = arith.constant 2 : index
    %c1_22 = arith.constant 1 : index
    %c0_23 = arith.constant 0 : index
    %12 = vector.load %arg1[%c0_20, %c2_21, %c1_22, %c0_23] : memref<1x4x92x8xf32, #tpu.memory_space<vmem>>, vector<1x1x81x8xf32>
    %13 = vector.shape_cast %12 : vector<1x1x81x8xf32> to vector<81x8xf32>
    %c0_24 = arith.constant 0 : index
    %c3_25 = arith.constant 3 : index
    %c1_26 = arith.constant 1 : index
    %c0_27 = arith.constant 0 : index
    %14 = vector.load %arg1[%c0_24, %c3_25, %c1_26, %c0_27] : memref<1x4x92x8xf32, #tpu.memory_space<vmem>>, vector<1x1x81x8xf32>
    %15 = vector.shape_cast %14 : vector<1x1x81x8xf32> to vector<81x8xf32>
    %c0_28 = arith.constant 0 : index
    %c0_29 = arith.constant 0 : index
    %c9 = arith.constant 9 : index
    %c0_30 = arith.constant 0 : index
    %16 = vector.load %arg1[%c0_28, %c0_29, %c9, %c0_30] : memref<1x4x92x8xf32, #tpu.memory_space<vmem>>, vector<1x1x81x8xf32>
    %17 = vector.shape_cast %16 : vector<1x1x81x8xf32> to vector<81x8xf32>
    %c0_31 = arith.constant 0 : index
    %c1_32 = arith.constant 1 : index
    %c9_33 = arith.constant 9 : index
    %c0_34 = arith.constant 0 : index
    %18 = vector.load %arg1[%c0_31, %c1_32, %c9_33, %c0_34] : memref<1x4x92x8xf32, #tpu.memory_space<vmem>>, vector<1x1x81x8xf32>
    %19 = vector.shape_cast %18 : vector<1x1x81x8xf32> to vector<81x8xf32>
    %c0_35 = arith.constant 0 : index
    %c0_36 = arith.constant 0 : index
    %c10 = arith.constant 10 : index
    %c0_37 = arith.constant 0 : index
    %20 = vector.load %arg1[%c0_35, %c0_36, %c10, %c0_37] : memref<1x4x92x8xf32, #tpu.memory_space<vmem>>, vector<1x1x81x8xf32>
    %21 = vector.shape_cast %20 : vector<1x1x81x8xf32> to vector<81x8xf32>
    %c0_38 = arith.constant 0 : index
    %c1_39 = arith.constant 1 : index
    %c10_40 = arith.constant 10 : index
    %c0_41 = arith.constant 0 : index
    %22 = vector.load %arg1[%c0_38, %c1_39, %c10_40, %c0_41] : memref<1x4x92x8xf32, #tpu.memory_space<vmem>>, vector<1x1x81x8xf32>
    %23 = vector.shape_cast %22 : vector<1x1x81x8xf32> to vector<81x8xf32>
    %c0_42 = arith.constant 0 : index
    %c2_43 = arith.constant 2 : index
    %c9_44 = arith.constant 9 : index
    %c0_45 = arith.constant 0 : index
    %24 = vector.load %arg1[%c0_42, %c2_43, %c9_44, %c0_45] : memref<1x4x92x8xf32, #tpu.memory_space<vmem>>, vector<1x1x81x8xf32>
    %25 = vector.shape_cast %24 : vector<1x1x81x8xf32> to vector<81x8xf32>
    %c0_46 = arith.constant 0 : index
    %c3_47 = arith.constant 3 : index
    %c9_48 = arith.constant 9 : index
    %c0_49 = arith.constant 0 : index
    %26 = vector.load %arg1[%c0_46, %c3_47, %c9_48, %c0_49] : memref<1x4x92x8xf32, #tpu.memory_space<vmem>>, vector<1x1x81x8xf32>
    %27 = vector.shape_cast %26 : vector<1x1x81x8xf32> to vector<81x8xf32>
    %c0_50 = arith.constant 0 : index
    %c2_51 = arith.constant 2 : index
    %c10_52 = arith.constant 10 : index
    %c0_53 = arith.constant 0 : index
    %28 = vector.load %arg1[%c0_50, %c2_51, %c10_52, %c0_53] : memref<1x4x92x8xf32, #tpu.memory_space<vmem>>, vector<1x1x81x8xf32>
    %29 = vector.shape_cast %28 : vector<1x1x81x8xf32> to vector<81x8xf32>
    %c0_54 = arith.constant 0 : index
    %c3_55 = arith.constant 3 : index
    %c10_56 = arith.constant 10 : index
    %c0_57 = arith.constant 0 : index
    %30 = vector.load %arg1[%c0_54, %c3_55, %c10_56, %c0_57] : memref<1x4x92x8xf32, #tpu.memory_space<vmem>>, vector<1x1x81x8xf32>
    %31 = vector.shape_cast %30 : vector<1x1x81x8xf32> to vector<81x8xf32>
    %32 = tpu.concatenate %1, %3, %5, %7, %9, %11, %13, %15, %17, %19, %21, %23, %25, %27, %29, %31 in 1 : vector<81x8xf32>, vector<81x8xf32>, vector<81x8xf32>, vector<81x8xf32>, vector<81x8xf32>, vector<81x8xf32>, vector<81x8xf32>, vector<81x8xf32>, vector<81x8xf32>, vector<81x8xf32>, vector<81x8xf32>, vector<81x8xf32>, vector<81x8xf32>, vector<81x8xf32>, vector<81x8xf32>, vector<81x8xf32> -> vector<81x128xf32>
    %33 = arith.truncf %32 : vector<81x128xf32> to vector<81x128xbf16>
    %c0_58 = arith.constant 0 : index
    %c0_59 = arith.constant 0 : index
    %34 = vector.load %arg2[%c0_58, %c0_59] : memref<128x8xbf16, #tpu.memory_space<vmem>>, vector<128x8xbf16>
    %cst = arith.constant dense<0.000000e+00> : vector<81x8xf32>
    %35 = tpu.matmul %33, %34, %cst {dimension_numbers = #tpu.dot_dimension_numbers<[1], [0], [0], [1], [0, 0, 1, 1], [], []>} : vector<81x128xbf16>, vector<128x8xbf16>, vector<81x8xf32> -> vector<81x8xf32>
    %c0_60 = arith.constant 0 : index
    %c0_61 = arith.constant 0 : index
    %36 = vector.load %arg3[%c0_60, %c0_61] : memref<1x8xf32, #tpu.memory_space<vmem>>, vector<1x8xf32>
    %37 = vector.broadcast %36 : vector<1x8xf32> to vector<81x8xf32>
    %38 = arith.addf %35, %37 : vector<81x8xf32>
    %cst_62 = arith.constant 0.000000e+00 : f32
    %39 = vector.broadcast %cst_62 : f32 to vector<81x8xf32>
    %40 = arith.maximumf %38, %39 : vector<81x8xf32>
    %c0_63 = arith.constant 0 : index
    %c0_64 = arith.constant 0 : index
    %41 = vector.load %arg5[%c0_63, %c0_64] : memref<81x8xf32, #tpu.memory_space<vmem>>, vector<81x8xf32>
    tpu.vector_store %arg5[%c0_63, %c0_64], %40 {strides = array<i32>} : memref<81x8xf32, #tpu.memory_space<vmem>>, vector<81x8xf32>,
    %c0_65 = arith.constant 0 : index
    %c0_66 = arith.constant 0 : index
    %42 = vector.load %arg5[%c0_65, %c0_66] : memref<81x8xf32, #tpu.memory_space<vmem>>, vector<8x8xf32>
    %c0_67 = arith.constant 0 : index
    %c0_68 = arith.constant 0 : index
    %c0_69 = arith.constant 0 : index
    %c0_70 = arith.constant 0 : index
    %43 = vector.load %arg4[%c0_67, %c0_68, %c0_69, %c0_70] : memref<1x8x8x8xf32, #tpu.memory_space<vmem>>, vector<1x1x8x8xf32>
    %44 = vector.shape_cast %43 : vector<1x1x8x8xf32> to vector<8x8xf32>
    %45 = vector.shape_cast %42 : vector<8x8xf32> to vector<1x1x8x8xf32>
    tpu.vector_store %arg4[%c0_67, %c0_68, %c0_69, %c0_70], %45 {strides = array<i32>} : memref<1x8x8x8xf32, #tpu.memory_space<vmem>>, vector<1x1x8x8xf32>,
    %c9_71 = arith.constant 9 : index
    %c0_72 = arith.constant 0 : index
    %46 = vector.load %arg5[%c9_71, %c0_72] : memref<81x8xf32, #tpu.memory_space<vmem>>, vector<8x8xf32>
    %c0_73 = arith.constant 0 : index
    %c1_74 = arith.constant 1 : index
    %c0_75 = arith.constant 0 : index
    %c0_76 = arith.constant 0 : index
    %47 = vector.load %arg4[%c0_73, %c1_74, %c0_75, %c0_76] : memref<1x8x8x8xf32, #tpu.memory_space<vmem>>, vector<1x1x8x8xf32>
    %48 = vector.shape_cast %47 : vector<1x1x8x8xf32> to vector<8x8xf32>
    %49 = vector.shape_cast %46 : vector<8x8xf32> to vector<1x1x8x8xf32>
    tpu.vector_store %arg4[%c0_73, %c1_74, %c0_75, %c0_76], %49 {strides = array<i32>} : memref<1x8x8x8xf32, #tpu.memory_space<vmem>>, vector<1x1x8x8xf32>,
    %c18 = arith.constant 18 : index
    %c0_77 = arith.constant 0 : index
    %50 = vector.load %arg5[%c18, %c0_77] : memref<81x8xf32, #tpu.memory_space<vmem>>, vector<8x8xf32>
    %c0_78 = arith.constant 0 : index
    %c2_79 = arith.constant 2 : index
    %c0_80 = arith.constant 0 : index
    %c0_81 = arith.constant 0 : index
    %51 = vector.load %arg4[%c0_78, %c2_79, %c0_80, %c0_81] : memref<1x8x8x8xf32, #tpu.memory_space<vmem>>, vector<1x1x8x8xf32>
    %52 = vector.shape_cast %51 : vector<1x1x8x8xf32> to vector<8x8xf32>
    %53 = vector.shape_cast %50 : vector<8x8xf32> to vector<1x1x8x8xf32>
    tpu.vector_store %arg4[%c0_78, %c2_79, %c0_80, %c0_81], %53 {strides = array<i32>} : memref<1x8x8x8xf32, #tpu.memory_space<vmem>>, vector<1x1x8x8xf32>,
    %c27 = arith.constant 27 : index
    %c0_82 = arith.constant 0 : index
    %54 = vector.load %arg5[%c27, %c0_82] : memref<81x8xf32, #tpu.memory_space<vmem>>, vector<8x8xf32>
    %c0_83 = arith.constant 0 : index
    %c3_84 = arith.constant 3 : index
    %c0_85 = arith.constant 0 : index
    %c0_86 = arith.constant 0 : index
    %55 = vector.load %arg4[%c0_83, %c3_84, %c0_85, %c0_86] : memref<1x8x8x8xf32, #tpu.memory_space<vmem>>, vector<1x1x8x8xf32>
    %56 = vector.shape_cast %55 : vector<1x1x8x8xf32> to vector<8x8xf32>
    %57 = vector.shape_cast %54 : vector<8x8xf32> to vector<1x1x8x8xf32>
    tpu.vector_store %arg4[%c0_83, %c3_84, %c0_85, %c0_86], %57 {strides = array<i32>} : memref<1x8x8x8xf32, #tpu.memory_space<vmem>>, vector<1x1x8x8xf32>,
    %c36 = arith.constant 36 : index
    %c0_87 = arith.constant 0 : index
    %58 = vector.load %arg5[%c36, %c0_87] : memref<81x8xf32, #tpu.memory_space<vmem>>, vector<8x8xf32>
    %c0_88 = arith.constant 0 : index
    %c4 = arith.constant 4 : index
    %c0_89 = arith.constant 0 : index
    %c0_90 = arith.constant 0 : index
    %59 = vector.load %arg4[%c0_88, %c4, %c0_89, %c0_90] : memref<1x8x8x8xf32, #tpu.memory_space<vmem>>, vector<1x1x8x8xf32>
    %60 = vector.shape_cast %59 : vector<1x1x8x8xf32> to vector<8x8xf32>
    %61 = vector.shape_cast %58 : vector<8x8xf32> to vector<1x1x8x8xf32>
    tpu.vector_store %arg4[%c0_88, %c4, %c0_89, %c0_90], %61 {strides = array<i32>} : memref<1x8x8x8xf32, #tpu.memory_space<vmem>>, vector<1x1x8x8xf32>,
    %c45 = arith.constant 45 : index
    %c0_91 = arith.constant 0 : index
    %62 = vector.load %arg5[%c45, %c0_91] : memref<81x8xf32, #tpu.memory_space<vmem>>, vector<8x8xf32>
    %c0_92 = arith.constant 0 : index
    %c5 = arith.constant 5 : index
    %c0_93 = arith.constant 0 : index
    %c0_94 = arith.constant 0 : index
    %63 = vector.load %arg4[%c0_92, %c5, %c0_93, %c0_94] : memref<1x8x8x8xf32, #tpu.memory_space<vmem>>, vector<1x1x8x8xf32>
    %64 = vector.shape_cast %63 : vector<1x1x8x8xf32> to vector<8x8xf32>
    %65 = vector.shape_cast %62 : vector<8x8xf32> to vector<1x1x8x8xf32>
    tpu.vector_store %arg4[%c0_92, %c5, %c0_93, %c0_94], %65 {strides = array<i32>} : memref<1x8x8x8xf32, #tpu.memory_space<vmem>>, vector<1x1x8x8xf32>,
    %c54 = arith.constant 54 : index
    %c0_95 = arith.constant 0 : index
    %66 = vector.load %arg5[%c54, %c0_95] : memref<81x8xf32, #tpu.memory_space<vmem>>, vector<8x8xf32>
    %c0_96 = arith.constant 0 : index
    %c6 = arith.constant 6 : index
    %c0_97 = arith.constant 0 : index
    %c0_98 = arith.constant 0 : index
    %67 = vector.load %arg4[%c0_96, %c6, %c0_97, %c0_98] : memref<1x8x8x8xf32, #tpu.memory_space<vmem>>, vector<1x1x8x8xf32>
    %68 = vector.shape_cast %67 : vector<1x1x8x8xf32> to vector<8x8xf32>
    %69 = vector.shape_cast %66 : vector<8x8xf32> to vector<1x1x8x8xf32>
    tpu.vector_store %arg4[%c0_96, %c6, %c0_97, %c0_98], %69 {strides = array<i32>} : memref<1x8x8x8xf32, #tpu.memory_space<vmem>>, vector<1x1x8x8xf32>,
    %c63 = arith.constant 63 : index
    %c0_99 = arith.constant 0 : index
    %70 = vector.load %arg5[%c63, %c0_99] : memref<81x8xf32, #tpu.memory_space<vmem>>, vector<8x8xf32>
    %c0_100 = arith.constant 0 : index
    %c7 = arith.constant 7 : index
    %c0_101 = arith.constant 0 : index
    %c0_102 = arith.constant 0 : index
    %71 = vector.load %arg4[%c0_100, %c7, %c0_101, %c0_102] : memref<1x8x8x8xf32, #tpu.memory_space<vmem>>, vector<1x1x8x8xf32>
    %72 = vector.shape_cast %71 : vector<1x1x8x8xf32> to vector<8x8xf32>
    %73 = vector.shape_cast %70 : vector<8x8xf32> to vector<1x1x8x8xf32>
    tpu.vector_store %arg4[%c0_100, %c7, %c0_101, %c0_102], %73 {strides = array<i32>} : memref<1x8x8x8xf32, #tpu.memory_space<vmem>>, vector<1x1x8x8xf32>,
    return
  }
  func.func @transform_0(%arg0: i32) -> (i32, i32, i32, i32) {
    %c0_i32 = arith.constant 0 : i32
    %c0_i32_0 = arith.constant 0 : i32
    %c0_i32_1 = arith.constant 0 : i32
    %c0_i32_2 = arith.constant 0 : i32
    return %arg0, %c0_i32, %c0_i32_0, %c0_i32_1 : i32, i32, i32, i32
  }
  func.func @transform_1(%arg0: i32) -> (i32, i32) {
    %c0_i32 = arith.constant 0 : i32
    %c0_i32_0 = arith.constant 0 : i32
    %c0_i32_1 = arith.constant 0 : i32
    return %c0_i32, %c0_i32_0 : i32, i32
  }
  func.func @transform_2(%arg0: i32) -> (i32, i32) {
    %c0_i32 = arith.constant 0 : i32
    %c0_i32_0 = arith.constant 0 : i32
    %c0_i32_1 = arith.constant 0 : i32
    return %c0_i32, %c0_i32_0 : i32, i32
  }
  func.func @transform_3(%arg0: i32) -> (i32, i32, i32, i32) {
    %c0_i32 = arith.constant 0 : i32
    %c0_i32_0 = arith.constant 0 : i32
    %c0_i32_1 = arith.constant 0 : i32
    %c0_i32_2 = arith.constant 0 : i32
    return %arg0, %c0_i32, %c0_i32_0, %c0_i32_1 : i32, i32, i32, i32
  }
}

module attributes {stable_mosaic.version = 11 : i64} {
  func.func @_conv4x4s2_kernel(%arg0: i32, %arg1: memref<1x4x32x8xf32, #tpu.memory_space<vmem>>, %arg2: memref<128x16xbf16, #tpu.memory_space<vmem>>, %arg3: memref<1x16xf32, #tpu.memory_space<vmem>>, %arg4: memref<1x4x4x16xf32, #tpu.memory_space<vmem>>, %arg5: memref<25x16xf32, #tpu.memory_space<vmem>>) attributes {dimension_semantics = [#tpu.dimension_semantics<parallel>], iteration_bounds = array<i64: 2>, scalar_prefetch = 0 : i64, scratch_operands = 1 : i64, tpu.core_type = #tpu.core_type<tc>, window_params = [{transform_indices = @transform_0, window_bounds = array<i64: 1, 4, 32, 8>}, {pipeline_mode = #tpu.pipeline_mode<synchronous>, transform_indices = @transform_1, window_bounds = array<i64: 128, 16>}, {pipeline_mode = #tpu.pipeline_mode<synchronous>, transform_indices = @transform_2, window_bounds = array<i64: 1, 16>}, {transform_indices = @transform_3, window_bounds = array<i64: 1, 4, 4, 16>}]} {
    %c0 = arith.constant 0 : index
    %c0_0 = arith.constant 0 : index
    %c0_1 = arith.constant 0 : index
    %c0_2 = arith.constant 0 : index
    %0 = vector.load %arg1[%c0, %c0_0, %c0_1, %c0_2] : memref<1x4x32x8xf32, #tpu.memory_space<vmem>>, vector<1x1x25x8xf32>
    %1 = vector.shape_cast %0 : vector<1x1x25x8xf32> to vector<25x8xf32>
    %c0_3 = arith.constant 0 : index
    %c1 = arith.constant 1 : index
    %c0_4 = arith.constant 0 : index
    %c0_5 = arith.constant 0 : index
    %2 = vector.load %arg1[%c0_3, %c1, %c0_4, %c0_5] : memref<1x4x32x8xf32, #tpu.memory_space<vmem>>, vector<1x1x25x8xf32>
    %3 = vector.shape_cast %2 : vector<1x1x25x8xf32> to vector<25x8xf32>
    %c0_6 = arith.constant 0 : index
    %c0_7 = arith.constant 0 : index
    %c1_8 = arith.constant 1 : index
    %c0_9 = arith.constant 0 : index
    %4 = vector.load %arg1[%c0_6, %c0_7, %c1_8, %c0_9] : memref<1x4x32x8xf32, #tpu.memory_space<vmem>>, vector<1x1x25x8xf32>
    %5 = vector.shape_cast %4 : vector<1x1x25x8xf32> to vector<25x8xf32>
    %c0_10 = arith.constant 0 : index
    %c1_11 = arith.constant 1 : index
    %c1_12 = arith.constant 1 : index
    %c0_13 = arith.constant 0 : index
    %6 = vector.load %arg1[%c0_10, %c1_11, %c1_12, %c0_13] : memref<1x4x32x8xf32, #tpu.memory_space<vmem>>, vector<1x1x25x8xf32>
    %7 = vector.shape_cast %6 : vector<1x1x25x8xf32> to vector<25x8xf32>
    %c0_14 = arith.constant 0 : index
    %c2 = arith.constant 2 : index
    %c0_15 = arith.constant 0 : index
    %c0_16 = arith.constant 0 : index
    %8 = vector.load %arg1[%c0_14, %c2, %c0_15, %c0_16] : memref<1x4x32x8xf32, #tpu.memory_space<vmem>>, vector<1x1x25x8xf32>
    %9 = vector.shape_cast %8 : vector<1x1x25x8xf32> to vector<25x8xf32>
    %c0_17 = arith.constant 0 : index
    %c3 = arith.constant 3 : index
    %c0_18 = arith.constant 0 : index
    %c0_19 = arith.constant 0 : index
    %10 = vector.load %arg1[%c0_17, %c3, %c0_18, %c0_19] : memref<1x4x32x8xf32, #tpu.memory_space<vmem>>, vector<1x1x25x8xf32>
    %11 = vector.shape_cast %10 : vector<1x1x25x8xf32> to vector<25x8xf32>
    %c0_20 = arith.constant 0 : index
    %c2_21 = arith.constant 2 : index
    %c1_22 = arith.constant 1 : index
    %c0_23 = arith.constant 0 : index
    %12 = vector.load %arg1[%c0_20, %c2_21, %c1_22, %c0_23] : memref<1x4x32x8xf32, #tpu.memory_space<vmem>>, vector<1x1x25x8xf32>
    %13 = vector.shape_cast %12 : vector<1x1x25x8xf32> to vector<25x8xf32>
    %c0_24 = arith.constant 0 : index
    %c3_25 = arith.constant 3 : index
    %c1_26 = arith.constant 1 : index
    %c0_27 = arith.constant 0 : index
    %14 = vector.load %arg1[%c0_24, %c3_25, %c1_26, %c0_27] : memref<1x4x32x8xf32, #tpu.memory_space<vmem>>, vector<1x1x25x8xf32>
    %15 = vector.shape_cast %14 : vector<1x1x25x8xf32> to vector<25x8xf32>
    %c0_28 = arith.constant 0 : index
    %c0_29 = arith.constant 0 : index
    %c5 = arith.constant 5 : index
    %c0_30 = arith.constant 0 : index
    %16 = vector.load %arg1[%c0_28, %c0_29, %c5, %c0_30] : memref<1x4x32x8xf32, #tpu.memory_space<vmem>>, vector<1x1x25x8xf32>
    %17 = vector.shape_cast %16 : vector<1x1x25x8xf32> to vector<25x8xf32>
    %c0_31 = arith.constant 0 : index
    %c1_32 = arith.constant 1 : index
    %c5_33 = arith.constant 5 : index
    %c0_34 = arith.constant 0 : index
    %18 = vector.load %arg1[%c0_31, %c1_32, %c5_33, %c0_34] : memref<1x4x32x8xf32, #tpu.memory_space<vmem>>, vector<1x1x25x8xf32>
    %19 = vector.shape_cast %18 : vector<1x1x25x8xf32> to vector<25x8xf32>
    %c0_35 = arith.constant 0 : index
    %c0_36 = arith.constant 0 : index
    %c6 = arith.constant 6 : index
    %c0_37 = arith.constant 0 : index
    %20 = vector.load %arg1[%c0_35, %c0_36, %c6, %c0_37] : memref<1x4x32x8xf32, #tpu.memory_space<vmem>>, vector<1x1x25x8xf32>
    %21 = vector.shape_cast %20 : vector<1x1x25x8xf32> to vector<25x8xf32>
    %c0_38 = arith.constant 0 : index
    %c1_39 = arith.constant 1 : index
    %c6_40 = arith.constant 6 : index
    %c0_41 = arith.constant 0 : index
    %22 = vector.load %arg1[%c0_38, %c1_39, %c6_40, %c0_41] : memref<1x4x32x8xf32, #tpu.memory_space<vmem>>, vector<1x1x25x8xf32>
    %23 = vector.shape_cast %22 : vector<1x1x25x8xf32> to vector<25x8xf32>
    %c0_42 = arith.constant 0 : index
    %c2_43 = arith.constant 2 : index
    %c5_44 = arith.constant 5 : index
    %c0_45 = arith.constant 0 : index
    %24 = vector.load %arg1[%c0_42, %c2_43, %c5_44, %c0_45] : memref<1x4x32x8xf32, #tpu.memory_space<vmem>>, vector<1x1x25x8xf32>
    %25 = vector.shape_cast %24 : vector<1x1x25x8xf32> to vector<25x8xf32>
    %c0_46 = arith.constant 0 : index
    %c3_47 = arith.constant 3 : index
    %c5_48 = arith.constant 5 : index
    %c0_49 = arith.constant 0 : index
    %26 = vector.load %arg1[%c0_46, %c3_47, %c5_48, %c0_49] : memref<1x4x32x8xf32, #tpu.memory_space<vmem>>, vector<1x1x25x8xf32>
    %27 = vector.shape_cast %26 : vector<1x1x25x8xf32> to vector<25x8xf32>
    %c0_50 = arith.constant 0 : index
    %c2_51 = arith.constant 2 : index
    %c6_52 = arith.constant 6 : index
    %c0_53 = arith.constant 0 : index
    %28 = vector.load %arg1[%c0_50, %c2_51, %c6_52, %c0_53] : memref<1x4x32x8xf32, #tpu.memory_space<vmem>>, vector<1x1x25x8xf32>
    %29 = vector.shape_cast %28 : vector<1x1x25x8xf32> to vector<25x8xf32>
    %c0_54 = arith.constant 0 : index
    %c3_55 = arith.constant 3 : index
    %c6_56 = arith.constant 6 : index
    %c0_57 = arith.constant 0 : index
    %30 = vector.load %arg1[%c0_54, %c3_55, %c6_56, %c0_57] : memref<1x4x32x8xf32, #tpu.memory_space<vmem>>, vector<1x1x25x8xf32>
    %31 = vector.shape_cast %30 : vector<1x1x25x8xf32> to vector<25x8xf32>
    %32 = tpu.concatenate %1, %3, %5, %7, %9, %11, %13, %15, %17, %19, %21, %23, %25, %27, %29, %31 in 1 : vector<25x8xf32>, vector<25x8xf32>, vector<25x8xf32>, vector<25x8xf32>, vector<25x8xf32>, vector<25x8xf32>, vector<25x8xf32>, vector<25x8xf32>, vector<25x8xf32>, vector<25x8xf32>, vector<25x8xf32>, vector<25x8xf32>, vector<25x8xf32>, vector<25x8xf32>, vector<25x8xf32>, vector<25x8xf32> -> vector<25x128xf32>
    %33 = arith.truncf %32 : vector<25x128xf32> to vector<25x128xbf16>
    %c0_58 = arith.constant 0 : index
    %c0_59 = arith.constant 0 : index
    %34 = vector.load %arg2[%c0_58, %c0_59] : memref<128x16xbf16, #tpu.memory_space<vmem>>, vector<128x16xbf16>
    %cst = arith.constant dense<0.000000e+00> : vector<25x16xf32>
    %35 = tpu.matmul %33, %34, %cst {dimension_numbers = #tpu.dot_dimension_numbers<[1], [0], [0], [1], [0, 0, 1, 1], [], []>} : vector<25x128xbf16>, vector<128x16xbf16>, vector<25x16xf32> -> vector<25x16xf32>
    %c0_60 = arith.constant 0 : index
    %c0_61 = arith.constant 0 : index
    %36 = vector.load %arg3[%c0_60, %c0_61] : memref<1x16xf32, #tpu.memory_space<vmem>>, vector<1x16xf32>
    %37 = vector.broadcast %36 : vector<1x16xf32> to vector<25x16xf32>
    %38 = arith.addf %35, %37 : vector<25x16xf32>
    %cst_62 = arith.constant 0.000000e+00 : f32
    %39 = vector.broadcast %cst_62 : f32 to vector<25x16xf32>
    %40 = arith.maximumf %38, %39 : vector<25x16xf32>
    %c0_63 = arith.constant 0 : index
    %c0_64 = arith.constant 0 : index
    %41 = vector.load %arg5[%c0_63, %c0_64] : memref<25x16xf32, #tpu.memory_space<vmem>>, vector<25x16xf32>
    tpu.vector_store %arg5[%c0_63, %c0_64], %40 {strides = array<i32>} : memref<25x16xf32, #tpu.memory_space<vmem>>, vector<25x16xf32>,
    %c0_65 = arith.constant 0 : index
    %c0_66 = arith.constant 0 : index
    %42 = vector.load %arg5[%c0_65, %c0_66] : memref<25x16xf32, #tpu.memory_space<vmem>>, vector<4x16xf32>
    %c0_67 = arith.constant 0 : index
    %c0_68 = arith.constant 0 : index
    %c0_69 = arith.constant 0 : index
    %c0_70 = arith.constant 0 : index
    %43 = vector.load %arg4[%c0_67, %c0_68, %c0_69, %c0_70] : memref<1x4x4x16xf32, #tpu.memory_space<vmem>>, vector<1x1x4x16xf32>
    %44 = vector.shape_cast %43 : vector<1x1x4x16xf32> to vector<4x16xf32>
    %45 = vector.shape_cast %42 : vector<4x16xf32> to vector<1x1x4x16xf32>
    tpu.vector_store %arg4[%c0_67, %c0_68, %c0_69, %c0_70], %45 {strides = array<i32>} : memref<1x4x4x16xf32, #tpu.memory_space<vmem>>, vector<1x1x4x16xf32>,
    %c5_71 = arith.constant 5 : index
    %c0_72 = arith.constant 0 : index
    %46 = vector.load %arg5[%c5_71, %c0_72] : memref<25x16xf32, #tpu.memory_space<vmem>>, vector<4x16xf32>
    %c0_73 = arith.constant 0 : index
    %c1_74 = arith.constant 1 : index
    %c0_75 = arith.constant 0 : index
    %c0_76 = arith.constant 0 : index
    %47 = vector.load %arg4[%c0_73, %c1_74, %c0_75, %c0_76] : memref<1x4x4x16xf32, #tpu.memory_space<vmem>>, vector<1x1x4x16xf32>
    %48 = vector.shape_cast %47 : vector<1x1x4x16xf32> to vector<4x16xf32>
    %49 = vector.shape_cast %46 : vector<4x16xf32> to vector<1x1x4x16xf32>
    tpu.vector_store %arg4[%c0_73, %c1_74, %c0_75, %c0_76], %49 {strides = array<i32>} : memref<1x4x4x16xf32, #tpu.memory_space<vmem>>, vector<1x1x4x16xf32>,
    %c10 = arith.constant 10 : index
    %c0_77 = arith.constant 0 : index
    %50 = vector.load %arg5[%c10, %c0_77] : memref<25x16xf32, #tpu.memory_space<vmem>>, vector<4x16xf32>
    %c0_78 = arith.constant 0 : index
    %c2_79 = arith.constant 2 : index
    %c0_80 = arith.constant 0 : index
    %c0_81 = arith.constant 0 : index
    %51 = vector.load %arg4[%c0_78, %c2_79, %c0_80, %c0_81] : memref<1x4x4x16xf32, #tpu.memory_space<vmem>>, vector<1x1x4x16xf32>
    %52 = vector.shape_cast %51 : vector<1x1x4x16xf32> to vector<4x16xf32>
    %53 = vector.shape_cast %50 : vector<4x16xf32> to vector<1x1x4x16xf32>
    tpu.vector_store %arg4[%c0_78, %c2_79, %c0_80, %c0_81], %53 {strides = array<i32>} : memref<1x4x4x16xf32, #tpu.memory_space<vmem>>, vector<1x1x4x16xf32>,
    %c15 = arith.constant 15 : index
    %c0_82 = arith.constant 0 : index
    %54 = vector.load %arg5[%c15, %c0_82] : memref<25x16xf32, #tpu.memory_space<vmem>>, vector<4x16xf32>
    %c0_83 = arith.constant 0 : index
    %c3_84 = arith.constant 3 : index
    %c0_85 = arith.constant 0 : index
    %c0_86 = arith.constant 0 : index
    %55 = vector.load %arg4[%c0_83, %c3_84, %c0_85, %c0_86] : memref<1x4x4x16xf32, #tpu.memory_space<vmem>>, vector<1x1x4x16xf32>
    %56 = vector.shape_cast %55 : vector<1x1x4x16xf32> to vector<4x16xf32>
    %57 = vector.shape_cast %54 : vector<4x16xf32> to vector<1x1x4x16xf32>
    tpu.vector_store %arg4[%c0_83, %c3_84, %c0_85, %c0_86], %57 {strides = array<i32>} : memref<1x4x4x16xf32, #tpu.memory_space<vmem>>, vector<1x1x4x16xf32>,
    return
  }
  func.func @transform_0(%arg0: i32) -> (i32, i32, i32, i32) {
    %c0_i32 = arith.constant 0 : i32
    %c0_i32_0 = arith.constant 0 : i32
    %c0_i32_1 = arith.constant 0 : i32
    %c0_i32_2 = arith.constant 0 : i32
    return %arg0, %c0_i32, %c0_i32_0, %c0_i32_1 : i32, i32, i32, i32
  }
  func.func @transform_1(%arg0: i32) -> (i32, i32) {
    %c0_i32 = arith.constant 0 : i32
    %c0_i32_0 = arith.constant 0 : i32
    %c0_i32_1 = arith.constant 0 : i32
    return %c0_i32, %c0_i32_0 : i32, i32
  }
  func.func @transform_2(%arg0: i32) -> (i32, i32) {
    %c0_i32 = arith.constant 0 : i32
    %c0_i32_0 = arith.constant 0 : i32
    %c0_i32_1 = arith.constant 0 : i32
    return %c0_i32, %c0_i32_0 : i32, i32
  }
  func.func @transform_3(%arg0: i32) -> (i32, i32, i32, i32) {
    %c0_i32 = arith.constant 0 : i32
    %c0_i32_0 = arith.constant 0 : i32
    %c0_i32_1 = arith.constant 0 : i32
    %c0_i32_2 = arith.constant 0 : i32
    return %arg0, %c0_i32, %c0_i32_0, %c0_i32_1 : i32, i32, i32, i32
  }
}

module attributes {stable_mosaic.version = 11 : i64} {
  func.func @_stage_kernel(%arg0: i32, %arg1: memref<1x36x16xf32, #tpu.memory_space<vmem>>, %arg2: memref<36x1xf32, #tpu.memory_space<vmem>>, %arg3: memref<144x16xbf16, #tpu.memory_space<vmem>>, %arg4: memref<1x16xf32, #tpu.memory_space<vmem>>, %arg5: memref<2x144x8xbf16, #tpu.memory_space<vmem>>, %arg6: memref<2x1x8xf32, #tpu.memory_space<vmem>>, %arg7: memref<2x8x16xbf16, #tpu.memory_space<vmem>>, %arg8: memref<2x1x16xf32, #tpu.memory_space<vmem>>, %arg9: memref<1x4x4x16xf32, #tpu.memory_space<vmem>>, %arg10: memref<52x16xf32, #tpu.memory_space<vmem>>, %arg11: memref<36x16xf32, #tpu.memory_space<vmem>>) attributes {dimension_semantics = [#tpu.dimension_semantics<parallel>], iteration_bounds = array<i64: 2>, scalar_prefetch = 0 : i64, scratch_operands = 2 : i64, tpu.core_type = #tpu.core_type<tc>, window_params = [{transform_indices = @transform_0, window_bounds = array<i64: 1, 36, 16>}, {pipeline_mode = #tpu.pipeline_mode<synchronous>, transform_indices = @transform_1, window_bounds = array<i64: 36, 1>}, {pipeline_mode = #tpu.pipeline_mode<synchronous>, transform_indices = @transform_2, window_bounds = array<i64: 144, 16>}, {pipeline_mode = #tpu.pipeline_mode<synchronous>, transform_indices = @transform_3, window_bounds = array<i64: 1, 16>}, {pipeline_mode = #tpu.pipeline_mode<synchronous>, transform_indices = @transform_4, window_bounds = array<i64: 2, 144, 8>}, {pipeline_mode = #tpu.pipeline_mode<synchronous>, transform_indices = @transform_5, window_bounds = array<i64: 2, 1, 8>}, {pipeline_mode = #tpu.pipeline_mode<synchronous>, transform_indices = @transform_6, window_bounds = array<i64: 2, 8, 16>}, {pipeline_mode = #tpu.pipeline_mode<synchronous>, transform_indices = @transform_7, window_bounds = array<i64: 2, 1, 16>}, {transform_indices = @transform_8, window_bounds = array<i64: 1, 4, 4, 16>}]} {
    %c0 = arith.constant 0 : index
    %c0_0 = arith.constant 0 : index
    %0 = vector.load %arg2[%c0, %c0_0] : memref<36x1xf32, #tpu.memory_space<vmem>>, vector<36x1xf32>
    %cst = arith.constant 0.000000e+00 : f32
    %1 = vector.broadcast %cst : f32 to vector<8x16xf32>
    %c0_1 = arith.constant 0 : index
    %c0_2 = arith.constant 0 : index
    %2 = vector.load %arg10[%c0_1, %c0_2] : memref<52x16xf32, #tpu.memory_space<vmem>>, vector<8x16xf32>
    tpu.vector_store %arg10[%c0_1, %c0_2], %1 {strides = array<i32>} : memref<52x16xf32, #tpu.memory_space<vmem>>, vector<8x16xf32>,
    %cst_3 = arith.constant 0.000000e+00 : f32
    %3 = vector.broadcast %cst_3 : f32 to vector<12x16xf32>
    %c40 = arith.constant 40 : index
    %c0_4 = arith.constant 0 : index
    %4 = vector.load %arg10[%c40, %c0_4] : memref<52x16xf32, #tpu.memory_space<vmem>>, vector<12x16xf32>
    tpu.vector_store %arg10[%c40, %c0_4], %3 {strides = array<i32>} : memref<52x16xf32, #tpu.memory_space<vmem>>, vector<12x16xf32>,
    %c0_5 = arith.constant 0 : index
    %c0_6 = arith.constant 0 : index
    %c0_7 = arith.constant 0 : index
    %5 = vector.load %arg1[%c0_5, %c0_6, %c0_7] : memref<1x36x16xf32, #tpu.memory_space<vmem>>, vector<1x36x16xf32>
    %6 = vector.shape_cast %5 : vector<1x36x16xf32> to vector<36x16xf32>
    %c0_8 = arith.constant 0 : index
    %c0_9 = arith.constant 0 : index
    %7 = vector.load %arg3[%c0_8, %c0_9] : memref<144x16xbf16, #tpu.memory_space<vmem>>, vector<144x16xbf16>
    %c0_10 = arith.constant 0 : index
    %c0_11 = arith.constant 0 : index
    %8 = vector.load %arg4[%c0_10, %c0_11] : memref<1x16xf32, #tpu.memory_space<vmem>>, vector<1x16xf32>
    %9 = vector.broadcast %0 : vector<36x1xf32> to vector<36x16xf32>
    %10 = arith.mulf %6, %9 : vector<36x16xf32>
    %c8 = arith.constant 8 : index
    %c0_12 = arith.constant 0 : index
    %11 = vector.load %arg10[%c8, %c0_12] : memref<52x16xf32, #tpu.memory_space<vmem>>, vector<36x16xf32>
    tpu.vector_store %arg10[%c8, %c0_12], %10 {strides = array<i32>} : memref<52x16xf32, #tpu.memory_space<vmem>>, vector<36x16xf32>,
    %c1 = arith.constant 1 : index
    %c0_13 = arith.constant 0 : index
    %12 = vector.load %arg10[%c1, %c0_13] : memref<52x16xf32, #tpu.memory_space<vmem>>, vector<36x16xf32>
    %c2 = arith.constant 2 : index
    %c0_14 = arith.constant 0 : index
    %13 = vector.load %arg10[%c2, %c0_14] : memref<52x16xf32, #tpu.memory_space<vmem>>, vector<36x16xf32>
    %c3 = arith.constant 3 : index
    %c0_15 = arith.constant 0 : index
    %14 = vector.load %arg10[%c3, %c0_15] : memref<52x16xf32, #tpu.memory_space<vmem>>, vector<36x16xf32>
    %c7 = arith.constant 7 : index
    %c0_16 = arith.constant 0 : index
    %15 = vector.load %arg10[%c7, %c0_16] : memref<52x16xf32, #tpu.memory_space<vmem>>, vector<36x16xf32>
    %c8_17 = arith.constant 8 : index
    %c0_18 = arith.constant 0 : index
    %16 = vector.load %arg10[%c8_17, %c0_18] : memref<52x16xf32, #tpu.memory_space<vmem>>, vector<36x16xf32>
    %c9 = arith.constant 9 : index
    %c0_19 = arith.constant 0 : index
    %17 = vector.load %arg10[%c9, %c0_19] : memref<52x16xf32, #tpu.memory_space<vmem>>, vector<36x16xf32>
    %c13 = arith.constant 13 : index
    %c0_20 = arith.constant 0 : index
    %18 = vector.load %arg10[%c13, %c0_20] : memref<52x16xf32, #tpu.memory_space<vmem>>, vector<36x16xf32>
    %c14 = arith.constant 14 : index
    %c0_21 = arith.constant 0 : index
    %19 = vector.load %arg10[%c14, %c0_21] : memref<52x16xf32, #tpu.memory_space<vmem>>, vector<36x16xf32>
    %c15 = arith.constant 15 : index
    %c0_22 = arith.constant 0 : index
    %20 = vector.load %arg10[%c15, %c0_22] : memref<52x16xf32, #tpu.memory_space<vmem>>, vector<36x16xf32>
    %21 = tpu.concatenate %12, %13, %14, %15, %16, %17, %18, %19, %20 in 1 : vector<36x16xf32>, vector<36x16xf32>, vector<36x16xf32>, vector<36x16xf32>, vector<36x16xf32>, vector<36x16xf32>, vector<36x16xf32>, vector<36x16xf32>, vector<36x16xf32> -> vector<36x144xf32>
    %22 = arith.truncf %21 : vector<36x144xf32> to vector<36x144xbf16>
    %cst_23 = arith.constant dense<0.000000e+00> : vector<36x16xf32>
    %23 = tpu.matmul %22, %7, %cst_23 {dimension_numbers = #tpu.dot_dimension_numbers<[1], [0], [0], [1], [0, 0, 1, 1], [], []>} : vector<36x144xbf16>, vector<144x16xbf16>, vector<36x16xf32> -> vector<36x16xf32>
    %24 = vector.broadcast %8 : vector<1x16xf32> to vector<36x16xf32>
    %25 = arith.addf %23, %24 : vector<36x16xf32>
    %c0_24 = arith.constant 0 : index
    %c0_25 = arith.constant 0 : index
    %26 = vector.load %arg11[%c0_24, %c0_25] : memref<36x16xf32, #tpu.memory_space<vmem>>, vector<36x16xf32>
    tpu.vector_store %arg11[%c0_24, %c0_25], %25 {strides = array<i32>} : memref<36x16xf32, #tpu.memory_space<vmem>>, vector<36x16xf32>,
    %c0_26 = arith.constant 0 : index
    %c0_27 = arith.constant 0 : index
    %27 = vector.load %arg11[%c0_26, %c0_27] : memref<36x16xf32, #tpu.memory_space<vmem>>, vector<36x16xf32>
    %cst_28 = arith.constant 0.000000e+00 : f32
    %28 = vector.broadcast %cst_28 : f32 to vector<36x16xf32>
    %29 = arith.maximumf %27, %28 : vector<36x16xf32>
    %c0_29 = arith.constant 0 : index
    %c0_30 = arith.constant 0 : index
    %c0_31 = arith.constant 0 : index
    %30 = vector.load %arg5[%c0_29, %c0_30, %c0_31] : memref<2x144x8xbf16, #tpu.memory_space<vmem>>, vector<1x144x8xbf16>
    %31 = vector.shape_cast %30 : vector<1x144x8xbf16> to vector<144x8xbf16>
    %c0_32 = arith.constant 0 : index
    %c0_33 = arith.constant 0 : index
    %c0_34 = arith.constant 0 : index
    %32 = vector.load %arg6[%c0_32, %c0_33, %c0_34] : memref<2x1x8xf32, #tpu.memory_space<vmem>>, vector<1x1x8xf32>
    %33 = vector.shape_cast %32 : vector<1x1x8xf32> to vector<1x8xf32>
    %34 = vector.broadcast %0 : vector<36x1xf32> to vector<36x16xf32>
    %35 = arith.mulf %29, %34 : vector<36x16xf32>
    %c8_35 = arith.constant 8 : index
    %c0_36 = arith.constant 0 : index
    %36 = vector.load %arg10[%c8_35, %c0_36] : memref<52x16xf32, #tpu.memory_space<vmem>>, vector<36x16xf32>
    tpu.vector_store %arg10[%c8_35, %c0_36], %35 {strides = array<i32>} : memref<52x16xf32, #tpu.memory_space<vmem>>, vector<36x16xf32>,
    %c1_37 = arith.constant 1 : index
    %c0_38 = arith.constant 0 : index
    %37 = vector.load %arg10[%c1_37, %c0_38] : memref<52x16xf32, #tpu.memory_space<vmem>>, vector<36x16xf32>
    %c2_39 = arith.constant 2 : index
    %c0_40 = arith.constant 0 : index
    %38 = vector.load %arg10[%c2_39, %c0_40] : memref<52x16xf32, #tpu.memory_space<vmem>>, vector<36x16xf32>
    %c3_41 = arith.constant 3 : index
    %c0_42 = arith.constant 0 : index
    %39 = vector.load %arg10[%c3_41, %c0_42] : memref<52x16xf32, #tpu.memory_space<vmem>>, vector<36x16xf32>
    %c7_43 = arith.constant 7 : index
    %c0_44 = arith.constant 0 : index
    %40 = vector.load %arg10[%c7_43, %c0_44] : memref<52x16xf32, #tpu.memory_space<vmem>>, vector<36x16xf32>
    %c8_45 = arith.constant 8 : index
    %c0_46 = arith.constant 0 : index
    %41 = vector.load %arg10[%c8_45, %c0_46] : memref<52x16xf32, #tpu.memory_space<vmem>>, vector<36x16xf32>
    %c9_47 = arith.constant 9 : index
    %c0_48 = arith.constant 0 : index
    %42 = vector.load %arg10[%c9_47, %c0_48] : memref<52x16xf32, #tpu.memory_space<vmem>>, vector<36x16xf32>
    %c13_49 = arith.constant 13 : index
    %c0_50 = arith.constant 0 : index
    %43 = vector.load %arg10[%c13_49, %c0_50] : memref<52x16xf32, #tpu.memory_space<vmem>>, vector<36x16xf32>
    %c14_51 = arith.constant 14 : index
    %c0_52 = arith.constant 0 : index
    %44 = vector.load %arg10[%c14_51, %c0_52] : memref<52x16xf32, #tpu.memory_space<vmem>>, vector<36x16xf32>
    %c15_53 = arith.constant 15 : index
    %c0_54 = arith.constant 0 : index
    %45 = vector.load %arg10[%c15_53, %c0_54] : memref<52x16xf32, #tpu.memory_space<vmem>>, vector<36x16xf32>
    %46 = tpu.concatenate %37, %38, %39, %40, %41, %42, %43, %44, %45 in 1 : vector<36x16xf32>, vector<36x16xf32>, vector<36x16xf32>, vector<36x16xf32>, vector<36x16xf32>, vector<36x16xf32>, vector<36x16xf32>, vector<36x16xf32>, vector<36x16xf32> -> vector<36x144xf32>
    %47 = arith.truncf %46 : vector<36x144xf32> to vector<36x144xbf16>
    %cst_55 = arith.constant dense<0.000000e+00> : vector<36x8xf32>
    %48 = tpu.matmul %47, %31, %cst_55 {dimension_numbers = #tpu.dot_dimension_numbers<[1], [0], [0], [1], [0, 0, 1, 1], [], []>} : vector<36x144xbf16>, vector<144x8xbf16>, vector<36x8xf32> -> vector<36x8xf32>
    %49 = vector.broadcast %33 : vector<1x8xf32> to vector<36x8xf32>
    %50 = arith.addf %48, %49 : vector<36x8xf32>
    %cst_56 = arith.constant 0.000000e+00 : f32
    %51 = vector.broadcast %cst_56 : f32 to vector<36x8xf32>
    %52 = arith.maximumf %50, %51 : vector<36x8xf32>
    %53 = arith.truncf %52 : vector<36x8xf32> to vector<36x8xbf16>
    %c0_57 = arith.constant 0 : index
    %c0_58 = arith.constant 0 : index
    %c0_59 = arith.constant 0 : index
    %54 = vector.load %arg7[%c0_57, %c0_58, %c0_59] : memref<2x8x16xbf16, #tpu.memory_space<vmem>>, vector<1x8x16xbf16>
    %55 = vector.shape_cast %54 : vector<1x8x16xbf16> to vector<8x16xbf16>
    %cst_60 = arith.constant dense<0.000000e+00> : vector<36x16xf32>
    %56 = tpu.matmul %53, %55, %cst_60 {dimension_numbers = #tpu.dot_dimension_numbers<[1], [0], [0], [1], [0, 0, 1, 1], [], []>} : vector<36x8xbf16>, vector<8x16xbf16>, vector<36x16xf32> -> vector<36x16xf32>
    %c0_61 = arith.constant 0 : index
    %c0_62 = arith.constant 0 : index
    %c0_63 = arith.constant 0 : index
    %57 = vector.load %arg8[%c0_61, %c0_62, %c0_63] : memref<2x1x16xf32, #tpu.memory_space<vmem>>, vector<1x1x16xf32>
    %58 = vector.shape_cast %57 : vector<1x1x16xf32> to vector<1x16xf32>
    %59 = vector.broadcast %58 : vector<1x16xf32> to vector<36x16xf32>
    %60 = arith.addf %56, %59 : vector<36x16xf32>
    %61 = arith.addf %27, %60 : vector<36x16xf32>
    %c0_64 = arith.constant 0 : index
    %c0_65 = arith.constant 0 : index
    %62 = vector.load %arg11[%c0_64, %c0_65] : memref<36x16xf32, #tpu.memory_space<vmem>>, vector<36x16xf32>
    tpu.vector_store %arg11[%c0_64, %c0_65], %61 {strides = array<i32>} : memref<36x16xf32, #tpu.memory_space<vmem>>, vector<36x16xf32>,
    %c0_66 = arith.constant 0 : index
    %c0_67 = arith.constant 0 : index
    %63 = vector.load %arg11[%c0_66, %c0_67] : memref<36x16xf32, #tpu.memory_space<vmem>>, vector<36x16xf32>
    %cst_68 = arith.constant 0.000000e+00 : f32
    %64 = vector.broadcast %cst_68 : f32 to vector<36x16xf32>
    %65 = arith.maximumf %63, %64 : vector<36x16xf32>
    %c1_69 = arith.constant 1 : index
    %c0_70 = arith.constant 0 : index
    %c0_71 = arith.constant 0 : index
    %66 = vector.load %arg5[%c1_69, %c0_70, %c0_71] : memref<2x144x8xbf16, #tpu.memory_space<vmem>>, vector<1x144x8xbf16>
    %67 = vector.shape_cast %66 : vector<1x144x8xbf16> to vector<144x8xbf16>
    %c1_72 = arith.constant 1 : index
    %c0_73 = arith.constant 0 : index
    %c0_74 = arith.constant 0 : index
    %68 = vector.load %arg6[%c1_72, %c0_73, %c0_74] : memref<2x1x8xf32, #tpu.memory_space<vmem>>, vector<1x1x8xf32>
    %69 = vector.shape_cast %68 : vector<1x1x8xf32> to vector<1x8xf32>
    %70 = vector.broadcast %0 : vector<36x1xf32> to vector<36x16xf32>
    %71 = arith.mulf %65, %70 : vector<36x16xf32>
    %c8_75 = arith.constant 8 : index
    %c0_76 = arith.constant 0 : index
    %72 = vector.load %arg10[%c8_75, %c0_76] : memref<52x16xf32, #tpu.memory_space<vmem>>, vector<36x16xf32>
    tpu.vector_store %arg10[%c8_75, %c0_76], %71 {strides = array<i32>} : memref<52x16xf32, #tpu.memory_space<vmem>>, vector<36x16xf32>,
    %c1_77 = arith.constant 1 : index
    %c0_78 = arith.constant 0 : index
    %73 = vector.load %arg10[%c1_77, %c0_78] : memref<52x16xf32, #tpu.memory_space<vmem>>, vector<36x16xf32>
    %c2_79 = arith.constant 2 : index
    %c0_80 = arith.constant 0 : index
    %74 = vector.load %arg10[%c2_79, %c0_80] : memref<52x16xf32, #tpu.memory_space<vmem>>, vector<36x16xf32>
    %c3_81 = arith.constant 3 : index
    %c0_82 = arith.constant 0 : index
    %75 = vector.load %arg10[%c3_81, %c0_82] : memref<52x16xf32, #tpu.memory_space<vmem>>, vector<36x16xf32>
    %c7_83 = arith.constant 7 : index
    %c0_84 = arith.constant 0 : index
    %76 = vector.load %arg10[%c7_83, %c0_84] : memref<52x16xf32, #tpu.memory_space<vmem>>, vector<36x16xf32>
    %c8_85 = arith.constant 8 : index
    %c0_86 = arith.constant 0 : index
    %77 = vector.load %arg10[%c8_85, %c0_86] : memref<52x16xf32, #tpu.memory_space<vmem>>, vector<36x16xf32>
    %c9_87 = arith.constant 9 : index
    %c0_88 = arith.constant 0 : index
    %78 = vector.load %arg10[%c9_87, %c0_88] : memref<52x16xf32, #tpu.memory_space<vmem>>, vector<36x16xf32>
    %c13_89 = arith.constant 13 : index
    %c0_90 = arith.constant 0 : index
    %79 = vector.load %arg10[%c13_89, %c0_90] : memref<52x16xf32, #tpu.memory_space<vmem>>, vector<36x16xf32>
    %c14_91 = arith.constant 14 : index
    %c0_92 = arith.constant 0 : index
    %80 = vector.load %arg10[%c14_91, %c0_92] : memref<52x16xf32, #tpu.memory_space<vmem>>, vector<36x16xf32>
    %c15_93 = arith.constant 15 : index
    %c0_94 = arith.constant 0 : index
    %81 = vector.load %arg10[%c15_93, %c0_94] : memref<52x16xf32, #tpu.memory_space<vmem>>, vector<36x16xf32>
    %82 = tpu.concatenate %73, %74, %75, %76, %77, %78, %79, %80, %81 in 1 : vector<36x16xf32>, vector<36x16xf32>, vector<36x16xf32>, vector<36x16xf32>, vector<36x16xf32>, vector<36x16xf32>, vector<36x16xf32>, vector<36x16xf32>, vector<36x16xf32> -> vector<36x144xf32>
    %83 = arith.truncf %82 : vector<36x144xf32> to vector<36x144xbf16>
    %cst_95 = arith.constant dense<0.000000e+00> : vector<36x8xf32>
    %84 = tpu.matmul %83, %67, %cst_95 {dimension_numbers = #tpu.dot_dimension_numbers<[1], [0], [0], [1], [0, 0, 1, 1], [], []>} : vector<36x144xbf16>, vector<144x8xbf16>, vector<36x8xf32> -> vector<36x8xf32>
    %85 = vector.broadcast %69 : vector<1x8xf32> to vector<36x8xf32>
    %86 = arith.addf %84, %85 : vector<36x8xf32>
    %cst_96 = arith.constant 0.000000e+00 : f32
    %87 = vector.broadcast %cst_96 : f32 to vector<36x8xf32>
    %88 = arith.maximumf %86, %87 : vector<36x8xf32>
    %89 = arith.truncf %88 : vector<36x8xf32> to vector<36x8xbf16>
    %c1_97 = arith.constant 1 : index
    %c0_98 = arith.constant 0 : index
    %c0_99 = arith.constant 0 : index
    %90 = vector.load %arg7[%c1_97, %c0_98, %c0_99] : memref<2x8x16xbf16, #tpu.memory_space<vmem>>, vector<1x8x16xbf16>
    %91 = vector.shape_cast %90 : vector<1x8x16xbf16> to vector<8x16xbf16>
    %cst_100 = arith.constant dense<0.000000e+00> : vector<36x16xf32>
    %92 = tpu.matmul %89, %91, %cst_100 {dimension_numbers = #tpu.dot_dimension_numbers<[1], [0], [0], [1], [0, 0, 1, 1], [], []>} : vector<36x8xbf16>, vector<8x16xbf16>, vector<36x16xf32> -> vector<36x16xf32>
    %c1_101 = arith.constant 1 : index
    %c0_102 = arith.constant 0 : index
    %c0_103 = arith.constant 0 : index
    %93 = vector.load %arg8[%c1_101, %c0_102, %c0_103] : memref<2x1x16xf32, #tpu.memory_space<vmem>>, vector<1x1x16xf32>
    %94 = vector.shape_cast %93 : vector<1x1x16xf32> to vector<1x16xf32>
    %95 = vector.broadcast %94 : vector<1x16xf32> to vector<36x16xf32>
    %96 = arith.addf %92, %95 : vector<36x16xf32>
    %97 = arith.addf %63, %96 : vector<36x16xf32>
    %c0_104 = arith.constant 0 : index
    %c0_105 = arith.constant 0 : index
    %98 = vector.load %arg11[%c0_104, %c0_105] : memref<36x16xf32, #tpu.memory_space<vmem>>, vector<36x16xf32>
    tpu.vector_store %arg11[%c0_104, %c0_105], %97 {strides = array<i32>} : memref<36x16xf32, #tpu.memory_space<vmem>>, vector<36x16xf32>,
    %c7_106 = arith.constant 7 : index
    %c0_107 = arith.constant 0 : index
    %99 = vector.load %arg11[%c7_106, %c0_107] : memref<36x16xf32, #tpu.memory_space<vmem>>, vector<4x16xf32>
    %cst_108 = arith.constant 0.000000e+00 : f32
    %100 = vector.broadcast %cst_108 : f32 to vector<4x16xf32>
    %101 = arith.maximumf %99, %100 : vector<4x16xf32>
    %c0_109 = arith.constant 0 : index
    %c0_110 = arith.constant 0 : index
    %c0_111 = arith.constant 0 : index
    %c0_112 = arith.constant 0 : index
    %102 = vector.load %arg9[%c0_109, %c0_110, %c0_111, %c0_112] : memref<1x4x4x16xf32, #tpu.memory_space<vmem>>, vector<1x1x4x16xf32>
    %103 = vector.shape_cast %102 : vector<1x1x4x16xf32> to vector<4x16xf32>
    %104 = vector.shape_cast %101 : vector<4x16xf32> to vector<1x1x4x16xf32>
    tpu.vector_store %arg9[%c0_109, %c0_110, %c0_111, %c0_112], %104 {strides = array<i32>} : memref<1x4x4x16xf32, #tpu.memory_space<vmem>>, vector<1x1x4x16xf32>,
    %c13_113 = arith.constant 13 : index
    %c0_114 = arith.constant 0 : index
    %105 = vector.load %arg11[%c13_113, %c0_114] : memref<36x16xf32, #tpu.memory_space<vmem>>, vector<4x16xf32>
    %cst_115 = arith.constant 0.000000e+00 : f32
    %106 = vector.broadcast %cst_115 : f32 to vector<4x16xf32>
    %107 = arith.maximumf %105, %106 : vector<4x16xf32>
    %c0_116 = arith.constant 0 : index
    %c1_117 = arith.constant 1 : index
    %c0_118 = arith.constant 0 : index
    %c0_119 = arith.constant 0 : index
    %108 = vector.load %arg9[%c0_116, %c1_117, %c0_118, %c0_119] : memref<1x4x4x16xf32, #tpu.memory_space<vmem>>, vector<1x1x4x16xf32>
    %109 = vector.shape_cast %108 : vector<1x1x4x16xf32> to vector<4x16xf32>
    %110 = vector.shape_cast %107 : vector<4x16xf32> to vector<1x1x4x16xf32>
    tpu.vector_store %arg9[%c0_116, %c1_117, %c0_118, %c0_119], %110 {strides = array<i32>} : memref<1x4x4x16xf32, #tpu.memory_space<vmem>>, vector<1x1x4x16xf32>,
    %c19 = arith.constant 19 : index
    %c0_120 = arith.constant 0 : index
    %111 = vector.load %arg11[%c19, %c0_120] : memref<36x16xf32, #tpu.memory_space<vmem>>, vector<4x16xf32>
    %cst_121 = arith.constant 0.000000e+00 : f32
    %112 = vector.broadcast %cst_121 : f32 to vector<4x16xf32>
    %113 = arith.maximumf %111, %112 : vector<4x16xf32>
    %c0_122 = arith.constant 0 : index
    %c2_123 = arith.constant 2 : index
    %c0_124 = arith.constant 0 : index
    %c0_125 = arith.constant 0 : index
    %114 = vector.load %arg9[%c0_122, %c2_123, %c0_124, %c0_125] : memref<1x4x4x16xf32, #tpu.memory_space<vmem>>, vector<1x1x4x16xf32>
    %115 = vector.shape_cast %114 : vector<1x1x4x16xf32> to vector<4x16xf32>
    %116 = vector.shape_cast %113 : vector<4x16xf32> to vector<1x1x4x16xf32>
    tpu.vector_store %arg9[%c0_122, %c2_123, %c0_124, %c0_125], %116 {strides = array<i32>} : memref<1x4x4x16xf32, #tpu.memory_space<vmem>>, vector<1x1x4x16xf32>,
    %c25 = arith.constant 25 : index
    %c0_126 = arith.constant 0 : index
    %117 = vector.load %arg11[%c25, %c0_126] : memref<36x16xf32, #tpu.memory_space<vmem>>, vector<4x16xf32>
    %cst_127 = arith.constant 0.000000e+00 : f32
    %118 = vector.broadcast %cst_127 : f32 to vector<4x16xf32>
    %119 = arith.maximumf %117, %118 : vector<4x16xf32>
    %c0_128 = arith.constant 0 : index
    %c3_129 = arith.constant 3 : index
    %c0_130 = arith.constant 0 : index
    %c0_131 = arith.constant 0 : index
    %120 = vector.load %arg9[%c0_128, %c3_129, %c0_130, %c0_131] : memref<1x4x4x16xf32, #tpu.memory_space<vmem>>, vector<1x1x4x16xf32>
    %121 = vector.shape_cast %120 : vector<1x1x4x16xf32> to vector<4x16xf32>
    %122 = vector.shape_cast %119 : vector<4x16xf32> to vector<1x1x4x16xf32>
    tpu.vector_store %arg9[%c0_128, %c3_129, %c0_130, %c0_131], %122 {strides = array<i32>} : memref<1x4x4x16xf32, #tpu.memory_space<vmem>>, vector<1x1x4x16xf32>,
    return
  }
  func.func @transform_0(%arg0: i32) -> (i32, i32, i32) {
    %c0_i32 = arith.constant 0 : i32
    %c0_i32_0 = arith.constant 0 : i32
    %c0_i32_1 = arith.constant 0 : i32
    return %arg0, %c0_i32, %c0_i32_0 : i32, i32, i32
  }
  func.func @transform_1(%arg0: i32) -> (i32, i32) {
    %c0_i32 = arith.constant 0 : i32
    %c0_i32_0 = arith.constant 0 : i32
    %c0_i32_1 = arith.constant 0 : i32
    return %c0_i32, %c0_i32_0 : i32, i32
  }
  func.func @transform_2(%arg0: i32) -> (i32, i32) {
    %c0_i32 = arith.constant 0 : i32
    %c0_i32_0 = arith.constant 0 : i32
    %c0_i32_1 = arith.constant 0 : i32
    return %c0_i32, %c0_i32_0 : i32, i32
  }
  func.func @transform_3(%arg0: i32) -> (i32, i32) {
    %c0_i32 = arith.constant 0 : i32
    %c0_i32_0 = arith.constant 0 : i32
    %c0_i32_1 = arith.constant 0 : i32
    return %c0_i32, %c0_i32_0 : i32, i32
  }
  func.func @transform_4(%arg0: i32) -> (i32, i32, i32) {
    %c0_i32 = arith.constant 0 : i32
    %c0_i32_0 = arith.constant 0 : i32
    %c0_i32_1 = arith.constant 0 : i32
    %c0_i32_2 = arith.constant 0 : i32
    return %c0_i32, %c0_i32_0, %c0_i32_1 : i32, i32, i32
  }
  func.func @transform_5(%arg0: i32) -> (i32, i32, i32) {
    %c0_i32 = arith.constant 0 : i32
    %c0_i32_0 = arith.constant 0 : i32
    %c0_i32_1 = arith.constant 0 : i32
    %c0_i32_2 = arith.constant 0 : i32
    return %c0_i32, %c0_i32_0, %c0_i32_1 : i32, i32, i32
  }
  func.func @transform_6(%arg0: i32) -> (i32, i32, i32) {
    %c0_i32 = arith.constant 0 : i32
    %c0_i32_0 = arith.constant 0 : i32
    %c0_i32_1 = arith.constant 0 : i32
    %c0_i32_2 = arith.constant 0 : i32
    return %c0_i32, %c0_i32_0, %c0_i32_1 : i32, i32, i32
  }
  func.func @transform_7(%arg0: i32) -> (i32, i32, i32) {
    %c0_i32 = arith.constant 0 : i32
    %c0_i32_0 = arith.constant 0 : i32
    %c0_i32_1 = arith.constant 0 : i32
    %c0_i32_2 = arith.constant 0 : i32
    return %c0_i32, %c0_i32_0, %c0_i32_1 : i32, i32, i32
  }
  func.func @transform_8(%arg0: i32) -> (i32, i32, i32, i32) {
    %c0_i32 = arith.constant 0 : i32
    %c0_i32_0 = arith.constant 0 : i32
    %c0_i32_1 = arith.constant 0 : i32
    %c0_i32_2 = arith.constant 0 : i32
    return %arg0, %c0_i32, %c0_i32_0, %c0_i32_1 : i32, i32, i32, i32
  }
}

module attributes {stable_mosaic.version = 11 : i64} {
  func.func @_conv4x4s2_kernel(%arg0: i32, %arg1: memref<1x4x14x16xf32, #tpu.memory_space<vmem>>, %arg2: memref<256x8xbf16, #tpu.memory_space<vmem>>, %arg3: memref<1x8xf32, #tpu.memory_space<vmem>>, %arg4: memref<1x2x2x8xf32, #tpu.memory_space<vmem>>, %arg5: memref<9x8xf32, #tpu.memory_space<vmem>>) attributes {dimension_semantics = [#tpu.dimension_semantics<parallel>], iteration_bounds = array<i64: 2>, scalar_prefetch = 0 : i64, scratch_operands = 1 : i64, tpu.core_type = #tpu.core_type<tc>, window_params = [{transform_indices = @transform_0, window_bounds = array<i64: 1, 4, 14, 16>}, {pipeline_mode = #tpu.pipeline_mode<synchronous>, transform_indices = @transform_1, window_bounds = array<i64: 256, 8>}, {pipeline_mode = #tpu.pipeline_mode<synchronous>, transform_indices = @transform_2, window_bounds = array<i64: 1, 8>}, {transform_indices = @transform_3, window_bounds = array<i64: 1, 2, 2, 8>}]} {
    %c0 = arith.constant 0 : index
    %c0_0 = arith.constant 0 : index
    %c0_1 = arith.constant 0 : index
    %c0_2 = arith.constant 0 : index
    %0 = vector.load %arg1[%c0, %c0_0, %c0_1, %c0_2] : memref<1x4x14x16xf32, #tpu.memory_space<vmem>>, vector<1x1x9x16xf32>
    %1 = vector.shape_cast %0 : vector<1x1x9x16xf32> to vector<9x16xf32>
    %c0_3 = arith.constant 0 : index
    %c1 = arith.constant 1 : index
    %c0_4 = arith.constant 0 : index
    %c0_5 = arith.constant 0 : index
    %2 = vector.load %arg1[%c0_3, %c1, %c0_4, %c0_5] : memref<1x4x14x16xf32, #tpu.memory_space<vmem>>, vector<1x1x9x16xf32>
    %3 = vector.shape_cast %2 : vector<1x1x9x16xf32> to vector<9x16xf32>
    %c0_6 = arith.constant 0 : index
    %c0_7 = arith.constant 0 : index
    %c1_8 = arith.constant 1 : index
    %c0_9 = arith.constant 0 : index
    %4 = vector.load %arg1[%c0_6, %c0_7, %c1_8, %c0_9] : memref<1x4x14x16xf32, #tpu.memory_space<vmem>>, vector<1x1x9x16xf32>
    %5 = vector.shape_cast %4 : vector<1x1x9x16xf32> to vector<9x16xf32>
    %c0_10 = arith.constant 0 : index
    %c1_11 = arith.constant 1 : index
    %c1_12 = arith.constant 1 : index
    %c0_13 = arith.constant 0 : index
    %6 = vector.load %arg1[%c0_10, %c1_11, %c1_12, %c0_13] : memref<1x4x14x16xf32, #tpu.memory_space<vmem>>, vector<1x1x9x16xf32>
    %7 = vector.shape_cast %6 : vector<1x1x9x16xf32> to vector<9x16xf32>
    %c0_14 = arith.constant 0 : index
    %c2 = arith.constant 2 : index
    %c0_15 = arith.constant 0 : index
    %c0_16 = arith.constant 0 : index
    %8 = vector.load %arg1[%c0_14, %c2, %c0_15, %c0_16] : memref<1x4x14x16xf32, #tpu.memory_space<vmem>>, vector<1x1x9x16xf32>
    %9 = vector.shape_cast %8 : vector<1x1x9x16xf32> to vector<9x16xf32>
    %c0_17 = arith.constant 0 : index
    %c3 = arith.constant 3 : index
    %c0_18 = arith.constant 0 : index
    %c0_19 = arith.constant 0 : index
    %10 = vector.load %arg1[%c0_17, %c3, %c0_18, %c0_19] : memref<1x4x14x16xf32, #tpu.memory_space<vmem>>, vector<1x1x9x16xf32>
    %11 = vector.shape_cast %10 : vector<1x1x9x16xf32> to vector<9x16xf32>
    %c0_20 = arith.constant 0 : index
    %c2_21 = arith.constant 2 : index
    %c1_22 = arith.constant 1 : index
    %c0_23 = arith.constant 0 : index
    %12 = vector.load %arg1[%c0_20, %c2_21, %c1_22, %c0_23] : memref<1x4x14x16xf32, #tpu.memory_space<vmem>>, vector<1x1x9x16xf32>
    %13 = vector.shape_cast %12 : vector<1x1x9x16xf32> to vector<9x16xf32>
    %c0_24 = arith.constant 0 : index
    %c3_25 = arith.constant 3 : index
    %c1_26 = arith.constant 1 : index
    %c0_27 = arith.constant 0 : index
    %14 = vector.load %arg1[%c0_24, %c3_25, %c1_26, %c0_27] : memref<1x4x14x16xf32, #tpu.memory_space<vmem>>, vector<1x1x9x16xf32>
    %15 = vector.shape_cast %14 : vector<1x1x9x16xf32> to vector<9x16xf32>
    %c0_28 = arith.constant 0 : index
    %c0_29 = arith.constant 0 : index
    %c3_30 = arith.constant 3 : index
    %c0_31 = arith.constant 0 : index
    %16 = vector.load %arg1[%c0_28, %c0_29, %c3_30, %c0_31] : memref<1x4x14x16xf32, #tpu.memory_space<vmem>>, vector<1x1x9x16xf32>
    %17 = vector.shape_cast %16 : vector<1x1x9x16xf32> to vector<9x16xf32>
    %c0_32 = arith.constant 0 : index
    %c1_33 = arith.constant 1 : index
    %c3_34 = arith.constant 3 : index
    %c0_35 = arith.constant 0 : index
    %18 = vector.load %arg1[%c0_32, %c1_33, %c3_34, %c0_35] : memref<1x4x14x16xf32, #tpu.memory_space<vmem>>, vector<1x1x9x16xf32>
    %19 = vector.shape_cast %18 : vector<1x1x9x16xf32> to vector<9x16xf32>
    %c0_36 = arith.constant 0 : index
    %c0_37 = arith.constant 0 : index
    %c4 = arith.constant 4 : index
    %c0_38 = arith.constant 0 : index
    %20 = vector.load %arg1[%c0_36, %c0_37, %c4, %c0_38] : memref<1x4x14x16xf32, #tpu.memory_space<vmem>>, vector<1x1x9x16xf32>
    %21 = vector.shape_cast %20 : vector<1x1x9x16xf32> to vector<9x16xf32>
    %c0_39 = arith.constant 0 : index
    %c1_40 = arith.constant 1 : index
    %c4_41 = arith.constant 4 : index
    %c0_42 = arith.constant 0 : index
    %22 = vector.load %arg1[%c0_39, %c1_40, %c4_41, %c0_42] : memref<1x4x14x16xf32, #tpu.memory_space<vmem>>, vector<1x1x9x16xf32>
    %23 = vector.shape_cast %22 : vector<1x1x9x16xf32> to vector<9x16xf32>
    %c0_43 = arith.constant 0 : index
    %c2_44 = arith.constant 2 : index
    %c3_45 = arith.constant 3 : index
    %c0_46 = arith.constant 0 : index
    %24 = vector.load %arg1[%c0_43, %c2_44, %c3_45, %c0_46] : memref<1x4x14x16xf32, #tpu.memory_space<vmem>>, vector<1x1x9x16xf32>
    %25 = vector.shape_cast %24 : vector<1x1x9x16xf32> to vector<9x16xf32>
    %c0_47 = arith.constant 0 : index
    %c3_48 = arith.constant 3 : index
    %c3_49 = arith.constant 3 : index
    %c0_50 = arith.constant 0 : index
    %26 = vector.load %arg1[%c0_47, %c3_48, %c3_49, %c0_50] : memref<1x4x14x16xf32, #tpu.memory_space<vmem>>, vector<1x1x9x16xf32>
    %27 = vector.shape_cast %26 : vector<1x1x9x16xf32> to vector<9x16xf32>
    %c0_51 = arith.constant 0 : index
    %c2_52 = arith.constant 2 : index
    %c4_53 = arith.constant 4 : index
    %c0_54 = arith.constant 0 : index
    %28 = vector.load %arg1[%c0_51, %c2_52, %c4_53, %c0_54] : memref<1x4x14x16xf32, #tpu.memory_space<vmem>>, vector<1x1x9x16xf32>
    %29 = vector.shape_cast %28 : vector<1x1x9x16xf32> to vector<9x16xf32>
    %c0_55 = arith.constant 0 : index
    %c3_56 = arith.constant 3 : index
    %c4_57 = arith.constant 4 : index
    %c0_58 = arith.constant 0 : index
    %30 = vector.load %arg1[%c0_55, %c3_56, %c4_57, %c0_58] : memref<1x4x14x16xf32, #tpu.memory_space<vmem>>, vector<1x1x9x16xf32>
    %31 = vector.shape_cast %30 : vector<1x1x9x16xf32> to vector<9x16xf32>
    %32 = tpu.concatenate %1, %3, %5, %7, %9, %11, %13, %15, %17, %19, %21, %23, %25, %27, %29, %31 in 1 : vector<9x16xf32>, vector<9x16xf32>, vector<9x16xf32>, vector<9x16xf32>, vector<9x16xf32>, vector<9x16xf32>, vector<9x16xf32>, vector<9x16xf32>, vector<9x16xf32>, vector<9x16xf32>, vector<9x16xf32>, vector<9x16xf32>, vector<9x16xf32>, vector<9x16xf32>, vector<9x16xf32>, vector<9x16xf32> -> vector<9x256xf32>
    %33 = arith.truncf %32 : vector<9x256xf32> to vector<9x256xbf16>
    %c0_59 = arith.constant 0 : index
    %c0_60 = arith.constant 0 : index
    %34 = vector.load %arg2[%c0_59, %c0_60] : memref<256x8xbf16, #tpu.memory_space<vmem>>, vector<256x8xbf16>
    %cst = arith.constant dense<0.000000e+00> : vector<9x8xf32>
    %35 = tpu.matmul %33, %34, %cst {dimension_numbers = #tpu.dot_dimension_numbers<[1], [0], [0], [1], [0, 0, 1, 1], [], []>} : vector<9x256xbf16>, vector<256x8xbf16>, vector<9x8xf32> -> vector<9x8xf32>
    %c0_61 = arith.constant 0 : index
    %c0_62 = arith.constant 0 : index
    %36 = vector.load %arg3[%c0_61, %c0_62] : memref<1x8xf32, #tpu.memory_space<vmem>>, vector<1x8xf32>
    %37 = vector.broadcast %36 : vector<1x8xf32> to vector<9x8xf32>
    %38 = arith.addf %35, %37 : vector<9x8xf32>
    %cst_63 = arith.constant 0.000000e+00 : f32
    %39 = vector.broadcast %cst_63 : f32 to vector<9x8xf32>
    %40 = arith.maximumf %38, %39 : vector<9x8xf32>
    %c0_64 = arith.constant 0 : index
    %c0_65 = arith.constant 0 : index
    %41 = vector.load %arg5[%c0_64, %c0_65] : memref<9x8xf32, #tpu.memory_space<vmem>>, vector<9x8xf32>
    tpu.vector_store %arg5[%c0_64, %c0_65], %40 {strides = array<i32>} : memref<9x8xf32, #tpu.memory_space<vmem>>, vector<9x8xf32>,
    %c0_66 = arith.constant 0 : index
    %c0_67 = arith.constant 0 : index
    %42 = vector.load %arg5[%c0_66, %c0_67] : memref<9x8xf32, #tpu.memory_space<vmem>>, vector<2x8xf32>
    %c0_68 = arith.constant 0 : index
    %c0_69 = arith.constant 0 : index
    %c0_70 = arith.constant 0 : index
    %c0_71 = arith.constant 0 : index
    %43 = vector.load %arg4[%c0_68, %c0_69, %c0_70, %c0_71] : memref<1x2x2x8xf32, #tpu.memory_space<vmem>>, vector<1x1x2x8xf32>
    %44 = vector.shape_cast %43 : vector<1x1x2x8xf32> to vector<2x8xf32>
    %45 = vector.shape_cast %42 : vector<2x8xf32> to vector<1x1x2x8xf32>
    tpu.vector_store %arg4[%c0_68, %c0_69, %c0_70, %c0_71], %45 {strides = array<i32>} : memref<1x2x2x8xf32, #tpu.memory_space<vmem>>, vector<1x1x2x8xf32>,
    %c3_72 = arith.constant 3 : index
    %c0_73 = arith.constant 0 : index
    %46 = vector.load %arg5[%c3_72, %c0_73] : memref<9x8xf32, #tpu.memory_space<vmem>>, vector<2x8xf32>
    %c0_74 = arith.constant 0 : index
    %c1_75 = arith.constant 1 : index
    %c0_76 = arith.constant 0 : index
    %c0_77 = arith.constant 0 : index
    %47 = vector.load %arg4[%c0_74, %c1_75, %c0_76, %c0_77] : memref<1x2x2x8xf32, #tpu.memory_space<vmem>>, vector<1x1x2x8xf32>
    %48 = vector.shape_cast %47 : vector<1x1x2x8xf32> to vector<2x8xf32>
    %49 = vector.shape_cast %46 : vector<2x8xf32> to vector<1x1x2x8xf32>
    tpu.vector_store %arg4[%c0_74, %c1_75, %c0_76, %c0_77], %49 {strides = array<i32>} : memref<1x2x2x8xf32, #tpu.memory_space<vmem>>, vector<1x1x2x8xf32>,
    return
  }
  func.func @transform_0(%arg0: i32) -> (i32, i32, i32, i32) {
    %c0_i32 = arith.constant 0 : i32
    %c0_i32_0 = arith.constant 0 : i32
    %c0_i32_1 = arith.constant 0 : i32
    %c0_i32_2 = arith.constant 0 : i32
    return %arg0, %c0_i32, %c0_i32_0, %c0_i32_1 : i32, i32, i32, i32
  }
  func.func @transform_1(%arg0: i32) -> (i32, i32) {
    %c0_i32 = arith.constant 0 : i32
    %c0_i32_0 = arith.constant 0 : i32
    %c0_i32_1 = arith.constant 0 : i32
    return %c0_i32, %c0_i32_0 : i32, i32
  }
  func.func @transform_2(%arg0: i32) -> (i32, i32) {
    %c0_i32 = arith.constant 0 : i32
    %c0_i32_0 = arith.constant 0 : i32
    %c0_i32_1 = arith.constant 0 : i32
    return %c0_i32, %c0_i32_0 : i32, i32
  }
  func.func @transform_3(%arg0: i32) -> (i32, i32, i32, i32) {
    %c0_i32 = arith.constant 0 : i32
    %c0_i32_0 = arith.constant 0 : i32
    %c0_i32_1 = arith.constant 0 : i32
    %c0_i32_2 = arith.constant 0 : i32
    return %arg0, %c0_i32, %c0_i32_0, %c0_i32_1 : i32, i32, i32, i32
  }
}

module attributes {stable_mosaic.version = 11 : i64} {
  func.func @_stage_kernel(%arg0: i32, %arg1: memref<1x16x16xf32, #tpu.memory_space<vmem>>, %arg2: memref<16x1xf32, #tpu.memory_space<vmem>>, %arg3: memref<144x16xbf16, #tpu.memory_space<vmem>>, %arg4: memref<1x16xf32, #tpu.memory_space<vmem>>, %arg5: memref<2x144x8xbf16, #tpu.memory_space<vmem>>, %arg6: memref<2x1x8xf32, #tpu.memory_space<vmem>>, %arg7: memref<2x8x16xbf16, #tpu.memory_space<vmem>>, %arg8: memref<2x1x16xf32, #tpu.memory_space<vmem>>, %arg9: memref<1x2x2x16xf32, #tpu.memory_space<vmem>>, %arg10: memref<32x16xf32, #tpu.memory_space<vmem>>, %arg11: memref<16x16xf32, #tpu.memory_space<vmem>>) attributes {dimension_semantics = [#tpu.dimension_semantics<parallel>], iteration_bounds = array<i64: 2>, scalar_prefetch = 0 : i64, scratch_operands = 2 : i64, tpu.core_type = #tpu.core_type<tc>, window_params = [{transform_indices = @transform_0, window_bounds = array<i64: 1, 16, 16>}, {pipeline_mode = #tpu.pipeline_mode<synchronous>, transform_indices = @transform_1, window_bounds = array<i64: 16, 1>}, {pipeline_mode = #tpu.pipeline_mode<synchronous>, transform_indices = @transform_2, window_bounds = array<i64: 144, 16>}, {pipeline_mode = #tpu.pipeline_mode<synchronous>, transform_indices = @transform_3, window_bounds = array<i64: 1, 16>}, {pipeline_mode = #tpu.pipeline_mode<synchronous>, transform_indices = @transform_4, window_bounds = array<i64: 2, 144, 8>}, {pipeline_mode = #tpu.pipeline_mode<synchronous>, transform_indices = @transform_5, window_bounds = array<i64: 2, 1, 8>}, {pipeline_mode = #tpu.pipeline_mode<synchronous>, transform_indices = @transform_6, window_bounds = array<i64: 2, 8, 16>}, {pipeline_mode = #tpu.pipeline_mode<synchronous>, transform_indices = @transform_7, window_bounds = array<i64: 2, 1, 16>}, {transform_indices = @transform_8, window_bounds = array<i64: 1, 2, 2, 16>}]} {
    %c0 = arith.constant 0 : index
    %c0_0 = arith.constant 0 : index
    %0 = vector.load %arg2[%c0, %c0_0] : memref<16x1xf32, #tpu.memory_space<vmem>>, vector<16x1xf32>
    %cst = arith.constant 0.000000e+00 : f32
    %1 = vector.broadcast %cst : f32 to vector<8x16xf32>
    %c0_1 = arith.constant 0 : index
    %c0_2 = arith.constant 0 : index
    %2 = vector.load %arg10[%c0_1, %c0_2] : memref<32x16xf32, #tpu.memory_space<vmem>>, vector<8x16xf32>
    tpu.vector_store %arg10[%c0_1, %c0_2], %1 {strides = array<i32>} : memref<32x16xf32, #tpu.memory_space<vmem>>, vector<8x16xf32>,
    %cst_3 = arith.constant 0.000000e+00 : f32
    %3 = vector.broadcast %cst_3 : f32 to vector<8x16xf32>
    %c24 = arith.constant 24 : index
    %c0_4 = arith.constant 0 : index
    %4 = vector.load %arg10[%c24, %c0_4] : memref<32x16xf32, #tpu.memory_space<vmem>>, vector<8x16xf32>
    tpu.vector_store %arg10[%c24, %c0_4], %3 {strides = array<i32>} : memref<32x16xf32, #tpu.memory_space<vmem>>, vector<8x16xf32>,
    %c0_5 = arith.constant 0 : index
    %c0_6 = arith.constant 0 : index
    %c0_7 = arith.constant 0 : index
    %5 = vector.load %arg1[%c0_5, %c0_6, %c0_7] : memref<1x16x16xf32, #tpu.memory_space<vmem>>, vector<1x16x16xf32>
    %6 = vector.shape_cast %5 : vector<1x16x16xf32> to vector<16x16xf32>
    %c0_8 = arith.constant 0 : index
    %c0_9 = arith.constant 0 : index
    %7 = vector.load %arg3[%c0_8, %c0_9] : memref<144x16xbf16, #tpu.memory_space<vmem>>, vector<144x16xbf16>
    %c0_10 = arith.constant 0 : index
    %c0_11 = arith.constant 0 : index
    %8 = vector.load %arg4[%c0_10, %c0_11] : memref<1x16xf32, #tpu.memory_space<vmem>>, vector<1x16xf32>
    %9 = vector.broadcast %0 : vector<16x1xf32> to vector<16x16xf32>
    %10 = arith.mulf %6, %9 : vector<16x16xf32>
    %c8 = arith.constant 8 : index
    %c0_12 = arith.constant 0 : index
    %11 = vector.load %arg10[%c8, %c0_12] : memref<32x16xf32, #tpu.memory_space<vmem>>, vector<16x16xf32>
    tpu.vector_store %arg10[%c8, %c0_12], %10 {strides = array<i32>} : memref<32x16xf32, #tpu.memory_space<vmem>>, vector<16x16xf32>,
    %c3 = arith.constant 3 : index
    %c0_13 = arith.constant 0 : index
    %12 = vector.load %arg10[%c3, %c0_13] : memref<32x16xf32, #tpu.memory_space<vmem>>, vector<16x16xf32>
    %c4 = arith.constant 4 : index
    %c0_14 = arith.constant 0 : index
    %13 = vector.load %arg10[%c4, %c0_14] : memref<32x16xf32, #tpu.memory_space<vmem>>, vector<16x16xf32>
    %c5 = arith.constant 5 : index
    %c0_15 = arith.constant 0 : index
    %14 = vector.load %arg10[%c5, %c0_15] : memref<32x16xf32, #tpu.memory_space<vmem>>, vector<16x16xf32>
    %c7 = arith.constant 7 : index
    %c0_16 = arith.constant 0 : index
    %15 = vector.load %arg10[%c7, %c0_16] : memref<32x16xf32, #tpu.memory_space<vmem>>, vector<16x16xf32>
    %c8_17 = arith.constant 8 : index
    %c0_18 = arith.constant 0 : index
    %16 = vector.load %arg10[%c8_17, %c0_18] : memref<32x16xf32, #tpu.memory_space<vmem>>, vector<16x16xf32>
    %c9 = arith.constant 9 : index
    %c0_19 = arith.constant 0 : index
    %17 = vector.load %arg10[%c9, %c0_19] : memref<32x16xf32, #tpu.memory_space<vmem>>, vector<16x16xf32>
    %c11 = arith.constant 11 : index
    %c0_20 = arith.constant 0 : index
    %18 = vector.load %arg10[%c11, %c0_20] : memref<32x16xf32, #tpu.memory_space<vmem>>, vector<16x16xf32>
    %c12 = arith.constant 12 : index
    %c0_21 = arith.constant 0 : index
    %19 = vector.load %arg10[%c12, %c0_21] : memref<32x16xf32, #tpu.memory_space<vmem>>, vector<16x16xf32>
    %c13 = arith.constant 13 : index
    %c0_22 = arith.constant 0 : index
    %20 = vector.load %arg10[%c13, %c0_22] : memref<32x16xf32, #tpu.memory_space<vmem>>, vector<16x16xf32>
    %21 = tpu.concatenate %12, %13, %14, %15, %16, %17, %18, %19, %20 in 1 : vector<16x16xf32>, vector<16x16xf32>, vector<16x16xf32>, vector<16x16xf32>, vector<16x16xf32>, vector<16x16xf32>, vector<16x16xf32>, vector<16x16xf32>, vector<16x16xf32> -> vector<16x144xf32>
    %22 = arith.truncf %21 : vector<16x144xf32> to vector<16x144xbf16>
    %cst_23 = arith.constant dense<0.000000e+00> : vector<16x16xf32>
    %23 = tpu.matmul %22, %7, %cst_23 {dimension_numbers = #tpu.dot_dimension_numbers<[1], [0], [0], [1], [0, 0, 1, 1], [], []>} : vector<16x144xbf16>, vector<144x16xbf16>, vector<16x16xf32> -> vector<16x16xf32>
    %24 = vector.broadcast %8 : vector<1x16xf32> to vector<16x16xf32>
    %25 = arith.addf %23, %24 : vector<16x16xf32>
    %c0_24 = arith.constant 0 : index
    %c0_25 = arith.constant 0 : index
    %26 = vector.load %arg11[%c0_24, %c0_25] : memref<16x16xf32, #tpu.memory_space<vmem>>, vector<16x16xf32>
    tpu.vector_store %arg11[%c0_24, %c0_25], %25 {strides = array<i32>} : memref<16x16xf32, #tpu.memory_space<vmem>>, vector<16x16xf32>,
    %c0_26 = arith.constant 0 : index
    %c0_27 = arith.constant 0 : index
    %27 = vector.load %arg11[%c0_26, %c0_27] : memref<16x16xf32, #tpu.memory_space<vmem>>, vector<16x16xf32>
    %cst_28 = arith.constant 0.000000e+00 : f32
    %28 = vector.broadcast %cst_28 : f32 to vector<16x16xf32>
    %29 = arith.maximumf %27, %28 : vector<16x16xf32>
    %c0_29 = arith.constant 0 : index
    %c0_30 = arith.constant 0 : index
    %c0_31 = arith.constant 0 : index
    %30 = vector.load %arg5[%c0_29, %c0_30, %c0_31] : memref<2x144x8xbf16, #tpu.memory_space<vmem>>, vector<1x144x8xbf16>
    %31 = vector.shape_cast %30 : vector<1x144x8xbf16> to vector<144x8xbf16>
    %c0_32 = arith.constant 0 : index
    %c0_33 = arith.constant 0 : index
    %c0_34 = arith.constant 0 : index
    %32 = vector.load %arg6[%c0_32, %c0_33, %c0_34] : memref<2x1x8xf32, #tpu.memory_space<vmem>>, vector<1x1x8xf32>
    %33 = vector.shape_cast %32 : vector<1x1x8xf32> to vector<1x8xf32>
    %34 = vector.broadcast %0 : vector<16x1xf32> to vector<16x16xf32>
    %35 = arith.mulf %29, %34 : vector<16x16xf32>
    %c8_35 = arith.constant 8 : index
    %c0_36 = arith.constant 0 : index
    %36 = vector.load %arg10[%c8_35, %c0_36] : memref<32x16xf32, #tpu.memory_space<vmem>>, vector<16x16xf32>
    tpu.vector_store %arg10[%c8_35, %c0_36], %35 {strides = array<i32>} : memref<32x16xf32, #tpu.memory_space<vmem>>, vector<16x16xf32>,
    %c3_37 = arith.constant 3 : index
    %c0_38 = arith.constant 0 : index
    %37 = vector.load %arg10[%c3_37, %c0_38] : memref<32x16xf32, #tpu.memory_space<vmem>>, vector<16x16xf32>
    %c4_39 = arith.constant 4 : index
    %c0_40 = arith.constant 0 : index
    %38 = vector.load %arg10[%c4_39, %c0_40] : memref<32x16xf32, #tpu.memory_space<vmem>>, vector<16x16xf32>
    %c5_41 = arith.constant 5 : index
    %c0_42 = arith.constant 0 : index
    %39 = vector.load %arg10[%c5_41, %c0_42] : memref<32x16xf32, #tpu.memory_space<vmem>>, vector<16x16xf32>
    %c7_43 = arith.constant 7 : index
    %c0_44 = arith.constant 0 : index
    %40 = vector.load %arg10[%c7_43, %c0_44] : memref<32x16xf32, #tpu.memory_space<vmem>>, vector<16x16xf32>
    %c8_45 = arith.constant 8 : index
    %c0_46 = arith.constant 0 : index
    %41 = vector.load %arg10[%c8_45, %c0_46] : memref<32x16xf32, #tpu.memory_space<vmem>>, vector<16x16xf32>
    %c9_47 = arith.constant 9 : index
    %c0_48 = arith.constant 0 : index
    %42 = vector.load %arg10[%c9_47, %c0_48] : memref<32x16xf32, #tpu.memory_space<vmem>>, vector<16x16xf32>
    %c11_49 = arith.constant 11 : index
    %c0_50 = arith.constant 0 : index
    %43 = vector.load %arg10[%c11_49, %c0_50] : memref<32x16xf32, #tpu.memory_space<vmem>>, vector<16x16xf32>
    %c12_51 = arith.constant 12 : index
    %c0_52 = arith.constant 0 : index
    %44 = vector.load %arg10[%c12_51, %c0_52] : memref<32x16xf32, #tpu.memory_space<vmem>>, vector<16x16xf32>
    %c13_53 = arith.constant 13 : index
    %c0_54 = arith.constant 0 : index
    %45 = vector.load %arg10[%c13_53, %c0_54] : memref<32x16xf32, #tpu.memory_space<vmem>>, vector<16x16xf32>
    %46 = tpu.concatenate %37, %38, %39, %40, %41, %42, %43, %44, %45 in 1 : vector<16x16xf32>, vector<16x16xf32>, vector<16x16xf32>, vector<16x16xf32>, vector<16x16xf32>, vector<16x16xf32>, vector<16x16xf32>, vector<16x16xf32>, vector<16x16xf32> -> vector<16x144xf32>
    %47 = arith.truncf %46 : vector<16x144xf32> to vector<16x144xbf16>
    %cst_55 = arith.constant dense<0.000000e+00> : vector<16x8xf32>
    %48 = tpu.matmul %47, %31, %cst_55 {dimension_numbers = #tpu.dot_dimension_numbers<[1], [0], [0], [1], [0, 0, 1, 1], [], []>} : vector<16x144xbf16>, vector<144x8xbf16>, vector<16x8xf32> -> vector<16x8xf32>
    %49 = vector.broadcast %33 : vector<1x8xf32> to vector<16x8xf32>
    %50 = arith.addf %48, %49 : vector<16x8xf32>
    %cst_56 = arith.constant 0.000000e+00 : f32
    %51 = vector.broadcast %cst_56 : f32 to vector<16x8xf32>
    %52 = arith.maximumf %50, %51 : vector<16x8xf32>
    %53 = arith.truncf %52 : vector<16x8xf32> to vector<16x8xbf16>
    %c0_57 = arith.constant 0 : index
    %c0_58 = arith.constant 0 : index
    %c0_59 = arith.constant 0 : index
    %54 = vector.load %arg7[%c0_57, %c0_58, %c0_59] : memref<2x8x16xbf16, #tpu.memory_space<vmem>>, vector<1x8x16xbf16>
    %55 = vector.shape_cast %54 : vector<1x8x16xbf16> to vector<8x16xbf16>
    %cst_60 = arith.constant dense<0.000000e+00> : vector<16x16xf32>
    %56 = tpu.matmul %53, %55, %cst_60 {dimension_numbers = #tpu.dot_dimension_numbers<[1], [0], [0], [1], [0, 0, 1, 1], [], []>} : vector<16x8xbf16>, vector<8x16xbf16>, vector<16x16xf32> -> vector<16x16xf32>
    %c0_61 = arith.constant 0 : index
    %c0_62 = arith.constant 0 : index
    %c0_63 = arith.constant 0 : index
    %57 = vector.load %arg8[%c0_61, %c0_62, %c0_63] : memref<2x1x16xf32, #tpu.memory_space<vmem>>, vector<1x1x16xf32>
    %58 = vector.shape_cast %57 : vector<1x1x16xf32> to vector<1x16xf32>
    %59 = vector.broadcast %58 : vector<1x16xf32> to vector<16x16xf32>
    %60 = arith.addf %56, %59 : vector<16x16xf32>
    %61 = arith.addf %27, %60 : vector<16x16xf32>
    %c0_64 = arith.constant 0 : index
    %c0_65 = arith.constant 0 : index
    %62 = vector.load %arg11[%c0_64, %c0_65] : memref<16x16xf32, #tpu.memory_space<vmem>>, vector<16x16xf32>
    tpu.vector_store %arg11[%c0_64, %c0_65], %61 {strides = array<i32>} : memref<16x16xf32, #tpu.memory_space<vmem>>, vector<16x16xf32>,
    %c0_66 = arith.constant 0 : index
    %c0_67 = arith.constant 0 : index
    %63 = vector.load %arg11[%c0_66, %c0_67] : memref<16x16xf32, #tpu.memory_space<vmem>>, vector<16x16xf32>
    %cst_68 = arith.constant 0.000000e+00 : f32
    %64 = vector.broadcast %cst_68 : f32 to vector<16x16xf32>
    %65 = arith.maximumf %63, %64 : vector<16x16xf32>
    %c1 = arith.constant 1 : index
    %c0_69 = arith.constant 0 : index
    %c0_70 = arith.constant 0 : index
    %66 = vector.load %arg5[%c1, %c0_69, %c0_70] : memref<2x144x8xbf16, #tpu.memory_space<vmem>>, vector<1x144x8xbf16>
    %67 = vector.shape_cast %66 : vector<1x144x8xbf16> to vector<144x8xbf16>
    %c1_71 = arith.constant 1 : index
    %c0_72 = arith.constant 0 : index
    %c0_73 = arith.constant 0 : index
    %68 = vector.load %arg6[%c1_71, %c0_72, %c0_73] : memref<2x1x8xf32, #tpu.memory_space<vmem>>, vector<1x1x8xf32>
    %69 = vector.shape_cast %68 : vector<1x1x8xf32> to vector<1x8xf32>
    %70 = vector.broadcast %0 : vector<16x1xf32> to vector<16x16xf32>
    %71 = arith.mulf %65, %70 : vector<16x16xf32>
    %c8_74 = arith.constant 8 : index
    %c0_75 = arith.constant 0 : index
    %72 = vector.load %arg10[%c8_74, %c0_75] : memref<32x16xf32, #tpu.memory_space<vmem>>, vector<16x16xf32>
    tpu.vector_store %arg10[%c8_74, %c0_75], %71 {strides = array<i32>} : memref<32x16xf32, #tpu.memory_space<vmem>>, vector<16x16xf32>,
    %c3_76 = arith.constant 3 : index
    %c0_77 = arith.constant 0 : index
    %73 = vector.load %arg10[%c3_76, %c0_77] : memref<32x16xf32, #tpu.memory_space<vmem>>, vector<16x16xf32>
    %c4_78 = arith.constant 4 : index
    %c0_79 = arith.constant 0 : index
    %74 = vector.load %arg10[%c4_78, %c0_79] : memref<32x16xf32, #tpu.memory_space<vmem>>, vector<16x16xf32>
    %c5_80 = arith.constant 5 : index
    %c0_81 = arith.constant 0 : index
    %75 = vector.load %arg10[%c5_80, %c0_81] : memref<32x16xf32, #tpu.memory_space<vmem>>, vector<16x16xf32>
    %c7_82 = arith.constant 7 : index
    %c0_83 = arith.constant 0 : index
    %76 = vector.load %arg10[%c7_82, %c0_83] : memref<32x16xf32, #tpu.memory_space<vmem>>, vector<16x16xf32>
    %c8_84 = arith.constant 8 : index
    %c0_85 = arith.constant 0 : index
    %77 = vector.load %arg10[%c8_84, %c0_85] : memref<32x16xf32, #tpu.memory_space<vmem>>, vector<16x16xf32>
    %c9_86 = arith.constant 9 : index
    %c0_87 = arith.constant 0 : index
    %78 = vector.load %arg10[%c9_86, %c0_87] : memref<32x16xf32, #tpu.memory_space<vmem>>, vector<16x16xf32>
    %c11_88 = arith.constant 11 : index
    %c0_89 = arith.constant 0 : index
    %79 = vector.load %arg10[%c11_88, %c0_89] : memref<32x16xf32, #tpu.memory_space<vmem>>, vector<16x16xf32>
    %c12_90 = arith.constant 12 : index
    %c0_91 = arith.constant 0 : index
    %80 = vector.load %arg10[%c12_90, %c0_91] : memref<32x16xf32, #tpu.memory_space<vmem>>, vector<16x16xf32>
    %c13_92 = arith.constant 13 : index
    %c0_93 = arith.constant 0 : index
    %81 = vector.load %arg10[%c13_92, %c0_93] : memref<32x16xf32, #tpu.memory_space<vmem>>, vector<16x16xf32>
    %82 = tpu.concatenate %73, %74, %75, %76, %77, %78, %79, %80, %81 in 1 : vector<16x16xf32>, vector<16x16xf32>, vector<16x16xf32>, vector<16x16xf32>, vector<16x16xf32>, vector<16x16xf32>, vector<16x16xf32>, vector<16x16xf32>, vector<16x16xf32> -> vector<16x144xf32>
    %83 = arith.truncf %82 : vector<16x144xf32> to vector<16x144xbf16>
    %cst_94 = arith.constant dense<0.000000e+00> : vector<16x8xf32>
    %84 = tpu.matmul %83, %67, %cst_94 {dimension_numbers = #tpu.dot_dimension_numbers<[1], [0], [0], [1], [0, 0, 1, 1], [], []>} : vector<16x144xbf16>, vector<144x8xbf16>, vector<16x8xf32> -> vector<16x8xf32>
    %85 = vector.broadcast %69 : vector<1x8xf32> to vector<16x8xf32>
    %86 = arith.addf %84, %85 : vector<16x8xf32>
    %cst_95 = arith.constant 0.000000e+00 : f32
    %87 = vector.broadcast %cst_95 : f32 to vector<16x8xf32>
    %88 = arith.maximumf %86, %87 : vector<16x8xf32>
    %89 = arith.truncf %88 : vector<16x8xf32> to vector<16x8xbf16>
    %c1_96 = arith.constant 1 : index
    %c0_97 = arith.constant 0 : index
    %c0_98 = arith.constant 0 : index
    %90 = vector.load %arg7[%c1_96, %c0_97, %c0_98] : memref<2x8x16xbf16, #tpu.memory_space<vmem>>, vector<1x8x16xbf16>
    %91 = vector.shape_cast %90 : vector<1x8x16xbf16> to vector<8x16xbf16>
    %cst_99 = arith.constant dense<0.000000e+00> : vector<16x16xf32>
    %92 = tpu.matmul %89, %91, %cst_99 {dimension_numbers = #tpu.dot_dimension_numbers<[1], [0], [0], [1], [0, 0, 1, 1], [], []>} : vector<16x8xbf16>, vector<8x16xbf16>, vector<16x16xf32> -> vector<16x16xf32>
    %c1_100 = arith.constant 1 : index
    %c0_101 = arith.constant 0 : index
    %c0_102 = arith.constant 0 : index
    %93 = vector.load %arg8[%c1_100, %c0_101, %c0_102] : memref<2x1x16xf32, #tpu.memory_space<vmem>>, vector<1x1x16xf32>
    %94 = vector.shape_cast %93 : vector<1x1x16xf32> to vector<1x16xf32>
    %95 = vector.broadcast %94 : vector<1x16xf32> to vector<16x16xf32>
    %96 = arith.addf %92, %95 : vector<16x16xf32>
    %97 = arith.addf %63, %96 : vector<16x16xf32>
    %c0_103 = arith.constant 0 : index
    %c0_104 = arith.constant 0 : index
    %98 = vector.load %arg11[%c0_103, %c0_104] : memref<16x16xf32, #tpu.memory_space<vmem>>, vector<16x16xf32>
    tpu.vector_store %arg11[%c0_103, %c0_104], %97 {strides = array<i32>} : memref<16x16xf32, #tpu.memory_space<vmem>>, vector<16x16xf32>,
    %c5_105 = arith.constant 5 : index
    %c0_106 = arith.constant 0 : index
    %99 = vector.load %arg11[%c5_105, %c0_106] : memref<16x16xf32, #tpu.memory_space<vmem>>, vector<2x16xf32>
    %cst_107 = arith.constant 0.000000e+00 : f32
    %100 = vector.broadcast %cst_107 : f32 to vector<2x16xf32>
    %101 = arith.maximumf %99, %100 : vector<2x16xf32>
    %c0_108 = arith.constant 0 : index
    %c0_109 = arith.constant 0 : index
    %c0_110 = arith.constant 0 : index
    %c0_111 = arith.constant 0 : index
    %102 = vector.load %arg9[%c0_108, %c0_109, %c0_110, %c0_111] : memref<1x2x2x16xf32, #tpu.memory_space<vmem>>, vector<1x1x2x16xf32>
    %103 = vector.shape_cast %102 : vector<1x1x2x16xf32> to vector<2x16xf32>
    %104 = vector.shape_cast %101 : vector<2x16xf32> to vector<1x1x2x16xf32>
    tpu.vector_store %arg9[%c0_108, %c0_109, %c0_110, %c0_111], %104 {strides = array<i32>} : memref<1x2x2x16xf32, #tpu.memory_space<vmem>>, vector<1x1x2x16xf32>,
    %c9_112 = arith.constant 9 : index
    %c0_113 = arith.constant 0 : index
    %105 = vector.load %arg11[%c9_112, %c0_113] : memref<16x16xf32, #tpu.memory_space<vmem>>, vector<2x16xf32>
    %cst_114 = arith.constant 0.000000e+00 : f32
    %106 = vector.broadcast %cst_114 : f32 to vector<2x16xf32>
    %107 = arith.maximumf %105, %106 : vector<2x16xf32>
    %c0_115 = arith.constant 0 : index
    %c1_116 = arith.constant 1 : index
    %c0_117 = arith.constant 0 : index
    %c0_118 = arith.constant 0 : index
    %108 = vector.load %arg9[%c0_115, %c1_116, %c0_117, %c0_118] : memref<1x2x2x16xf32, #tpu.memory_space<vmem>>, vector<1x1x2x16xf32>
    %109 = vector.shape_cast %108 : vector<1x1x2x16xf32> to vector<2x16xf32>
    %110 = vector.shape_cast %107 : vector<2x16xf32> to vector<1x1x2x16xf32>
    tpu.vector_store %arg9[%c0_115, %c1_116, %c0_117, %c0_118], %110 {strides = array<i32>} : memref<1x2x2x16xf32, #tpu.memory_space<vmem>>, vector<1x1x2x16xf32>,
    return
  }
  func.func @transform_0(%arg0: i32) -> (i32, i32, i32) {
    %c0_i32 = arith.constant 0 : i32
    %c0_i32_0 = arith.constant 0 : i32
    %c0_i32_1 = arith.constant 0 : i32
    return %arg0, %c0_i32, %c0_i32_0 : i32, i32, i32
  }
  func.func @transform_1(%arg0: i32) -> (i32, i32) {
    %c0_i32 = arith.constant 0 : i32
    %c0_i32_0 = arith.constant 0 : i32
    %c0_i32_1 = arith.constant 0 : i32
    return %c0_i32, %c0_i32_0 : i32, i32
  }
  func.func @transform_2(%arg0: i32) -> (i32, i32) {
    %c0_i32 = arith.constant 0 : i32
    %c0_i32_0 = arith.constant 0 : i32
    %c0_i32_1 = arith.constant 0 : i32
    return %c0_i32, %c0_i32_0 : i32, i32
  }
  func.func @transform_3(%arg0: i32) -> (i32, i32) {
    %c0_i32 = arith.constant 0 : i32
    %c0_i32_0 = arith.constant 0 : i32
    %c0_i32_1 = arith.constant 0 : i32
    return %c0_i32, %c0_i32_0 : i32, i32
  }
  func.func @transform_4(%arg0: i32) -> (i32, i32, i32) {
    %c0_i32 = arith.constant 0 : i32
    %c0_i32_0 = arith.constant 0 : i32
    %c0_i32_1 = arith.constant 0 : i32
    %c0_i32_2 = arith.constant 0 : i32
    return %c0_i32, %c0_i32_0, %c0_i32_1 : i32, i32, i32
  }
  func.func @transform_5(%arg0: i32) -> (i32, i32, i32) {
    %c0_i32 = arith.constant 0 : i32
    %c0_i32_0 = arith.constant 0 : i32
    %c0_i32_1 = arith.constant 0 : i32
    %c0_i32_2 = arith.constant 0 : i32
    return %c0_i32, %c0_i32_0, %c0_i32_1 : i32, i32, i32
  }
  func.func @transform_6(%arg0: i32) -> (i32, i32, i32) {
    %c0_i32 = arith.constant 0 : i32
    %c0_i32_0 = arith.constant 0 : i32
    %c0_i32_1 = arith.constant 0 : i32
    %c0_i32_2 = arith.constant 0 : i32
    return %c0_i32, %c0_i32_0, %c0_i32_1 : i32, i32, i32
  }
  func.func @transform_7(%arg0: i32) -> (i32, i32, i32) {
    %c0_i32 = arith.constant 0 : i32
    %c0_i32_0 = arith.constant 0 : i32
    %c0_i32_1 = arith.constant 0 : i32
    %c0_i32_2 = arith.constant 0 : i32
    return %c0_i32, %c0_i32_0, %c0_i32_1 : i32, i32, i32
  }
  func.func @transform_8(%arg0: i32) -> (i32, i32, i32, i32) {
    %c0_i32 = arith.constant 0 : i32
    %c0_i32_0 = arith.constant 0 : i32
    %c0_i32_1 = arith.constant 0 : i32
    %c0_i32_2 = arith.constant 0 : i32
    return %arg0, %c0_i32, %c0_i32_0, %c0_i32_1 : i32, i32, i32, i32
  }
}

module attributes {stable_mosaic.version = 11 : i64} {
  func.func @_prevq_vq_kernel(%arg0: i32, %arg1: memref<8x16xf32, #tpu.memory_space<vmem>>, %arg2: memref<16x8xbf16, #tpu.memory_space<vmem>>, %arg3: memref<1x8xf32, #tpu.memory_space<vmem>>, %arg4: memref<32x8xf32, #tpu.memory_space<vmem>>, %arg5: memref<8x32xf32, #tpu.memory_space<vmem>>, %arg6: memref<1x32xf32, #tpu.memory_space<vmem>>, %arg7: memref<8x8xf32, #tpu.memory_space<vmem>>, %arg8: memref<8x8xf32, #tpu.memory_space<vmem>>, %arg9: memref<8x1xi32, #tpu.memory_space<vmem>>) attributes {dimension_semantics = [#tpu.dimension_semantics<parallel>], iteration_bounds = array<i64: 1>, scalar_prefetch = 0 : i64, scratch_operands = 0 : i64, tpu.core_type = #tpu.core_type<tc>, window_params = [{transform_indices = @transform_0, window_bounds = array<i64: 8, 16>}, {pipeline_mode = #tpu.pipeline_mode<synchronous>, transform_indices = @transform_1, window_bounds = array<i64: 16, 8>}, {pipeline_mode = #tpu.pipeline_mode<synchronous>, transform_indices = @transform_2, window_bounds = array<i64: 1, 8>}, {pipeline_mode = #tpu.pipeline_mode<synchronous>, transform_indices = @transform_3, window_bounds = array<i64: 32, 8>}, {pipeline_mode = #tpu.pipeline_mode<synchronous>, transform_indices = @transform_4, window_bounds = array<i64: 8, 32>}, {pipeline_mode = #tpu.pipeline_mode<synchronous>, transform_indices = @transform_5, window_bounds = array<i64: 1, 32>}, {transform_indices = @transform_6, window_bounds = array<i64: 8, 8>}, {transform_indices = @transform_7, window_bounds = array<i64: 8, 8>}, {transform_indices = @transform_8, window_bounds = array<i64: 8, 1>}]} {
    %c0 = arith.constant 0 : index
    %c0_0 = arith.constant 0 : index
    %0 = vector.load %arg1[%c0, %c0_0] : memref<8x16xf32, #tpu.memory_space<vmem>>, vector<8x16xf32>
    %1 = arith.truncf %0 : vector<8x16xf32> to vector<8x16xbf16>
    %c0_1 = arith.constant 0 : index
    %c0_2 = arith.constant 0 : index
    %2 = vector.load %arg2[%c0_1, %c0_2] : memref<16x8xbf16, #tpu.memory_space<vmem>>, vector<16x8xbf16>
    %cst = arith.constant dense<0.000000e+00> : vector<8x8xf32>
    %3 = tpu.matmul %1, %2, %cst {dimension_numbers = #tpu.dot_dimension_numbers<[1], [0], [0], [1], [0, 0, 1, 1], [], []>} : vector<8x16xbf16>, vector<16x8xbf16>, vector<8x8xf32> -> vector<8x8xf32>
    %c0_3 = arith.constant 0 : index
    %c0_4 = arith.constant 0 : index
    %4 = vector.load %arg3[%c0_3, %c0_4] : memref<1x8xf32, #tpu.memory_space<vmem>>, vector<1x8xf32>
    %5 = vector.broadcast %4 : vector<1x8xf32> to vector<8x8xf32>
    %6 = arith.addf %3, %5 : vector<8x8xf32>
    %c0_5 = arith.constant 0 : index
    %c0_6 = arith.constant 0 : index
    %7 = vector.load %arg7[%c0_5, %c0_6] : memref<8x8xf32, #tpu.memory_space<vmem>>, vector<8x8xf32>
    tpu.vector_store %arg7[%c0_5, %c0_6], %6 {strides = array<i32>} : memref<8x8xf32, #tpu.memory_space<vmem>>, vector<8x8xf32>,
    %c0_7 = arith.constant 0 : index
    %c0_8 = arith.constant 0 : index
    %8 = vector.load %arg6[%c0_7, %c0_8] : memref<1x32xf32, #tpu.memory_space<vmem>>, vector<1x32xf32>
    %c0_9 = arith.constant 0 : index
    %c0_10 = arith.constant 0 : index
    %9 = vector.load %arg5[%c0_9, %c0_10] : memref<8x32xf32, #tpu.memory_space<vmem>>, vector<8x32xf32>
    %cst_11 = arith.constant dense<0.000000e+00> : vector<8x32xf32>
    %10 = tpu.matmul %6, %9, %cst_11 {dimension_numbers = #tpu.dot_dimension_numbers<[1], [0], [0], [1], [0, 0, 1, 1], [], []>} : vector<8x8xf32>, vector<8x32xf32>, vector<8x32xf32> -> vector<8x32xf32>
    %cst_12 = arith.constant 2.000000e+00 : f32
    %11 = vector.broadcast %cst_12 : f32 to vector<8x32xf32>
    %12 = arith.mulf %11, %10 : vector<8x32xf32>
    %13 = vector.broadcast %8 : vector<1x32xf32> to vector<8x32xf32>
    %14 = arith.subf %13, %12 : vector<8x32xf32>
    %cst_13 = arith.constant dense<0x7F800000> : vector<8xf32>
    %15 = vector.multi_reduction <minimumf>, %14, %cst_13 [1] : vector<8x32xf32> to vector<8xf32>
    %16 = vector.shape_cast %15 : vector<8xf32> to vector<8x1xf32>
    %17 = tpu.iota {dimensions = array<i32: 1>} : vector<8x32xi32>
    %18 = vector.broadcast %16 : vector<8x1xf32> to vector<8x32xf32>
    %19 = arith.cmpf ole, %14, %18 : vector<8x32xf32>
    %c32_i32 = arith.constant 32 : i32
    %20 = vector.broadcast %c32_i32 : i32 to vector<8x32xi32>
    %21 = arith.select %19, %17, %20 : vector<8x32xi1>, vector<8x32xi32>
    %cst_14 = arith.constant dense<2147483647> : vector<8xi32>
    %22 = vector.multi_reduction <minsi>, %21, %cst_14 [1] : vector<8x32xi32> to vector<8xi32>
    %c31_i32 = arith.constant 31 : i32
    %23 = vector.broadcast %c31_i32 : i32 to vector<8xi32>
    %24 = arith.minsi %22, %23 : vector<8xi32>
    %25 = vector.shape_cast %24 : vector<8xi32> to vector<8x1xi32>
    %26 = vector.broadcast %25 : vector<8x1xi32> to vector<8x32xi32>
    %27 = arith.cmpi eq, %17, %26 : vector<8x32xi32>
    %28 = arith.extui %27 : vector<8x32xi1> to vector<8x32xi32>
    %29 = arith.sitofp %28 : vector<8x32xi32> to vector<8x32xf32>
    %c0_15 = arith.constant 0 : index
    %c0_16 = arith.constant 0 : index
    %30 = vector.load %arg4[%c0_15, %c0_16] : memref<32x8xf32, #tpu.memory_space<vmem>>, vector<32x8xf32>
    %cst_17 = arith.constant dense<0.000000e+00> : vector<8x8xf32>
    %31 = tpu.matmul %29, %30, %cst_17 {dimension_numbers = #tpu.dot_dimension_numbers<[1], [0], [0], [1], [0, 0, 1, 1], [], []>} : vector<8x32xf32>, vector<32x8xf32>, vector<8x8xf32> -> vector<8x8xf32>
    %c0_18 = arith.constant 0 : index
    %c0_19 = arith.constant 0 : index
    %32 = vector.load %arg8[%c0_18, %c0_19] : memref<8x8xf32, #tpu.memory_space<vmem>>, vector<8x8xf32>
    tpu.vector_store %arg8[%c0_18, %c0_19], %31 {strides = array<i32>} : memref<8x8xf32, #tpu.memory_space<vmem>>, vector<8x8xf32>,
    %33 = vector.shape_cast %24 : vector<8xi32> to vector<8x1xi32>
    %c0_20 = arith.constant 0 : index
    %c0_21 = arith.constant 0 : index
    %34 = vector.load %arg9[%c0_20, %c0_21] : memref<8x1xi32, #tpu.memory_space<vmem>>, vector<8x1xi32>
    tpu.vector_store %arg9[%c0_20, %c0_21], %33 {strides = array<i32>} : memref<8x1xi32, #tpu.memory_space<vmem>>, vector<8x1xi32>,
    return
  }
  func.func @transform_0(%arg0: i32) -> (i32, i32) {
    %c0_i32 = arith.constant 0 : i32
    %c0_i32_0 = arith.constant 0 : i32
    return %arg0, %c0_i32 : i32, i32
  }
  func.func @transform_1(%arg0: i32) -> (i32, i32) {
    %c0_i32 = arith.constant 0 : i32
    %c0_i32_0 = arith.constant 0 : i32
    %c0_i32_1 = arith.constant 0 : i32
    return %c0_i32, %c0_i32_0 : i32, i32
  }
  func.func @transform_2(%arg0: i32) -> (i32, i32) {
    %c0_i32 = arith.constant 0 : i32
    %c0_i32_0 = arith.constant 0 : i32
    %c0_i32_1 = arith.constant 0 : i32
    return %c0_i32, %c0_i32_0 : i32, i32
  }
  func.func @transform_3(%arg0: i32) -> (i32, i32) {
    %c0_i32 = arith.constant 0 : i32
    %c0_i32_0 = arith.constant 0 : i32
    %c0_i32_1 = arith.constant 0 : i32
    return %c0_i32, %c0_i32_0 : i32, i32
  }
  func.func @transform_4(%arg0: i32) -> (i32, i32) {
    %c0_i32 = arith.constant 0 : i32
    %c0_i32_0 = arith.constant 0 : i32
    %c0_i32_1 = arith.constant 0 : i32
    return %c0_i32, %c0_i32_0 : i32, i32
  }
  func.func @transform_5(%arg0: i32) -> (i32, i32) {
    %c0_i32 = arith.constant 0 : i32
    %c0_i32_0 = arith.constant 0 : i32
    %c0_i32_1 = arith.constant 0 : i32
    return %c0_i32, %c0_i32_0 : i32, i32
  }
  func.func @transform_6(%arg0: i32) -> (i32, i32) {
    %c0_i32 = arith.constant 0 : i32
    %c0_i32_0 = arith.constant 0 : i32
    return %arg0, %c0_i32 : i32, i32
  }
  func.func @transform_7(%arg0: i32) -> (i32, i32) {
    %c0_i32 = arith.constant 0 : i32
    %c0_i32_0 = arith.constant 0 : i32
    return %arg0, %c0_i32 : i32, i32
  }
  func.func @transform_8(%arg0: i32) -> (i32, i32) {
    %c0_i32 = arith.constant 0 : i32
    %c0_i32_0 = arith.constant 0 : i32
    return %arg0, %c0_i32 : i32, i32
  }
}

module attributes {stable_mosaic.version = 11 : i64} {
  func.func @_convt4x4s2_kernel(%arg0: i32, %arg1: memref<1x26x8xf32, #tpu.memory_space<vmem>>, %arg2: memref<72x32xbf16, #tpu.memory_space<vmem>>, %arg3: memref<1x32xf32, #tpu.memory_space<vmem>>, %arg4: memref<1x2x2x32xf32, #tpu.memory_space<vmem>>, %arg5: memref<16x32xf32, #tpu.memory_space<vmem>>) attributes {dimension_semantics = [#tpu.dimension_semantics<parallel>], iteration_bounds = array<i64: 2>, scalar_prefetch = 0 : i64, scratch_operands = 1 : i64, tpu.core_type = #tpu.core_type<tc>, window_params = [{transform_indices = @transform_0, window_bounds = array<i64: 1, 26, 8>}, {pipeline_mode = #tpu.pipeline_mode<synchronous>, transform_indices = @transform_1, window_bounds = array<i64: 72, 32>}, {pipeline_mode = #tpu.pipeline_mode<synchronous>, transform_indices = @transform_2, window_bounds = array<i64: 1, 32>}, {transform_indices = @transform_3, window_bounds = array<i64: 1, 2, 2, 32>}]} {
    %c0 = arith.constant 0 : index
    %c0_0 = arith.constant 0 : index
    %c0_1 = arith.constant 0 : index
    %0 = vector.load %arg1[%c0, %c0_0, %c0_1] : memref<1x26x8xf32, #tpu.memory_space<vmem>>, vector<1x16x8xf32>
    %1 = vector.shape_cast %0 : vector<1x16x8xf32> to vector<16x8xf32>
    %c0_2 = arith.constant 0 : index
    %c1 = arith.constant 1 : index
    %c0_3 = arith.constant 0 : index
    %2 = vector.load %arg1[%c0_2, %c1, %c0_3] : memref<1x26x8xf32, #tpu.memory_space<vmem>>, vector<1x16x8xf32>
    %3 = vector.shape_cast %2 : vector<1x16x8xf32> to vector<16x8xf32>
    %c0_4 = arith.constant 0 : index
    %c2 = arith.constant 2 : index
    %c0_5 = arith.constant 0 : index
    %4 = vector.load %arg1[%c0_4, %c2, %c0_5] : memref<1x26x8xf32, #tpu.memory_space<vmem>>, vector<1x16x8xf32>
    %5 = vector.shape_cast %4 : vector<1x16x8xf32> to vector<16x8xf32>
    %c0_6 = arith.constant 0 : index
    %c4 = arith.constant 4 : index
    %c0_7 = arith.constant 0 : index
    %6 = vector.load %arg1[%c0_6, %c4, %c0_7] : memref<1x26x8xf32, #tpu.memory_space<vmem>>, vector<1x16x8xf32>
    %7 = vector.shape_cast %6 : vector<1x16x8xf32> to vector<16x8xf32>
    %c0_8 = arith.constant 0 : index
    %c5 = arith.constant 5 : index
    %c0_9 = arith.constant 0 : index
    %8 = vector.load %arg1[%c0_8, %c5, %c0_9] : memref<1x26x8xf32, #tpu.memory_space<vmem>>, vector<1x16x8xf32>
    %9 = vector.shape_cast %8 : vector<1x16x8xf32> to vector<16x8xf32>
    %c0_10 = arith.constant 0 : index
    %c6 = arith.constant 6 : index
    %c0_11 = arith.constant 0 : index
    %10 = vector.load %arg1[%c0_10, %c6, %c0_11] : memref<1x26x8xf32, #tpu.memory_space<vmem>>, vector<1x16x8xf32>
    %11 = vector.shape_cast %10 : vector<1x16x8xf32> to vector<16x8xf32>
    %c0_12 = arith.constant 0 : index
    %c8 = arith.constant 8 : index
    %c0_13 = arith.constant 0 : index
    %12 = vector.load %arg1[%c0_12, %c8, %c0_13] : memref<1x26x8xf32, #tpu.memory_space<vmem>>, vector<1x16x8xf32>
    %13 = vector.shape_cast %12 : vector<1x16x8xf32> to vector<16x8xf32>
    %c0_14 = arith.constant 0 : index
    %c9 = arith.constant 9 : index
    %c0_15 = arith.constant 0 : index
    %14 = vector.load %arg1[%c0_14, %c9, %c0_15] : memref<1x26x8xf32, #tpu.memory_space<vmem>>, vector<1x16x8xf32>
    %15 = vector.shape_cast %14 : vector<1x16x8xf32> to vector<16x8xf32>
    %c0_16 = arith.constant 0 : index
    %c10 = arith.constant 10 : index
    %c0_17 = arith.constant 0 : index
    %16 = vector.load %arg1[%c0_16, %c10, %c0_17] : memref<1x26x8xf32, #tpu.memory_space<vmem>>, vector<1x16x8xf32>
    %17 = vector.shape_cast %16 : vector<1x16x8xf32> to vector<16x8xf32>
    %18 = tpu.concatenate %1, %3, %5, %7, %9, %11, %13, %15, %17 in 1 : vector<16x8xf32>, vector<16x8xf32>, vector<16x8xf32>, vector<16x8xf32>, vector<16x8xf32>, vector<16x8xf32>, vector<16x8xf32>, vector<16x8xf32>, vector<16x8xf32> -> vector<16x72xf32>
    %19 = arith.truncf %18 : vector<16x72xf32> to vector<16x72xbf16>
    %c0_18 = arith.constant 0 : index
    %c0_19 = arith.constant 0 : index
    %20 = vector.load %arg2[%c0_18, %c0_19] : memref<72x32xbf16, #tpu.memory_space<vmem>>, vector<72x32xbf16>
    %cst = arith.constant dense<0.000000e+00> : vector<16x32xf32>
    %21 = tpu.matmul %19, %20, %cst {dimension_numbers = #tpu.dot_dimension_numbers<[1], [0], [0], [1], [0, 0, 1, 1], [], []>} : vector<16x72xbf16>, vector<72x32xbf16>, vector<16x32xf32> -> vector<16x32xf32>
    %c0_20 = arith.constant 0 : index
    %c0_21 = arith.constant 0 : index
    %22 = vector.load %arg3[%c0_20, %c0_21] : memref<1x32xf32, #tpu.memory_space<vmem>>, vector<1x32xf32>
    %23 = vector.broadcast %22 : vector<1x32xf32> to vector<16x32xf32>
    %24 = arith.addf %21, %23 : vector<16x32xf32>
    %c0_22 = arith.constant 0 : index
    %c0_23 = arith.constant 0 : index
    %25 = vector.load %arg5[%c0_22, %c0_23] : memref<16x32xf32, #tpu.memory_space<vmem>>, vector<16x32xf32>
    tpu.vector_store %arg5[%c0_22, %c0_23], %24 {strides = array<i32>} : memref<16x32xf32, #tpu.memory_space<vmem>>, vector<16x32xf32>,
    %c5_24 = arith.constant 5 : index
    %c0_25 = arith.constant 0 : index
    %26 = vector.load %arg5[%c5_24, %c0_25] : memref<16x32xf32, #tpu.memory_space<vmem>>, vector<2x32xf32>
    %c0_26 = arith.constant 0 : index
    %c0_27 = arith.constant 0 : index
    %c0_28 = arith.constant 0 : index
    %c0_29 = arith.constant 0 : index
    %27 = vector.load %arg4[%c0_26, %c0_27, %c0_28, %c0_29] : memref<1x2x2x32xf32, #tpu.memory_space<vmem>>, vector<1x1x2x32xf32>
    %28 = vector.shape_cast %27 : vector<1x1x2x32xf32> to vector<2x32xf32>
    %29 = vector.shape_cast %26 : vector<2x32xf32> to vector<1x1x2x32xf32>
    tpu.vector_store %arg4[%c0_26, %c0_27, %c0_28, %c0_29], %29 {strides = array<i32>} : memref<1x2x2x32xf32, #tpu.memory_space<vmem>>, vector<1x1x2x32xf32>,
    %c9_30 = arith.constant 9 : index
    %c0_31 = arith.constant 0 : index
    %30 = vector.load %arg5[%c9_30, %c0_31] : memref<16x32xf32, #tpu.memory_space<vmem>>, vector<2x32xf32>
    %c0_32 = arith.constant 0 : index
    %c1_33 = arith.constant 1 : index
    %c0_34 = arith.constant 0 : index
    %c0_35 = arith.constant 0 : index
    %31 = vector.load %arg4[%c0_32, %c1_33, %c0_34, %c0_35] : memref<1x2x2x32xf32, #tpu.memory_space<vmem>>, vector<1x1x2x32xf32>
    %32 = vector.shape_cast %31 : vector<1x1x2x32xf32> to vector<2x32xf32>
    %33 = vector.shape_cast %30 : vector<2x32xf32> to vector<1x1x2x32xf32>
    tpu.vector_store %arg4[%c0_32, %c1_33, %c0_34, %c0_35], %33 {strides = array<i32>} : memref<1x2x2x32xf32, #tpu.memory_space<vmem>>, vector<1x1x2x32xf32>,
    return
  }
  func.func @transform_0(%arg0: i32) -> (i32, i32, i32) {
    %c0_i32 = arith.constant 0 : i32
    %c0_i32_0 = arith.constant 0 : i32
    %c0_i32_1 = arith.constant 0 : i32
    return %arg0, %c0_i32, %c0_i32_0 : i32, i32, i32
  }
  func.func @transform_1(%arg0: i32) -> (i32, i32) {
    %c0_i32 = arith.constant 0 : i32
    %c0_i32_0 = arith.constant 0 : i32
    %c0_i32_1 = arith.constant 0 : i32
    return %c0_i32, %c0_i32_0 : i32, i32
  }
  func.func @transform_2(%arg0: i32) -> (i32, i32) {
    %c0_i32 = arith.constant 0 : i32
    %c0_i32_0 = arith.constant 0 : i32
    %c0_i32_1 = arith.constant 0 : i32
    return %c0_i32, %c0_i32_0 : i32, i32
  }
  func.func @transform_3(%arg0: i32) -> (i32, i32, i32, i32) {
    %c0_i32 = arith.constant 0 : i32
    %c0_i32_0 = arith.constant 0 : i32
    %c0_i32_1 = arith.constant 0 : i32
    %c0_i32_2 = arith.constant 0 : i32
    return %arg0, %c0_i32, %c0_i32_0, %c0_i32_1 : i32, i32, i32, i32
  }
}

module attributes {stable_mosaic.version = 11 : i64} {
  func.func @_prevq_vq_kernel(%arg0: i32, %arg1: memref<32x24xf32, #tpu.memory_space<vmem>>, %arg2: memref<24x8xbf16, #tpu.memory_space<vmem>>, %arg3: memref<1x8xf32, #tpu.memory_space<vmem>>, %arg4: memref<32x8xf32, #tpu.memory_space<vmem>>, %arg5: memref<8x32xf32, #tpu.memory_space<vmem>>, %arg6: memref<1x32xf32, #tpu.memory_space<vmem>>, %arg7: memref<32x8xf32, #tpu.memory_space<vmem>>, %arg8: memref<32x8xf32, #tpu.memory_space<vmem>>, %arg9: memref<32x1xi32, #tpu.memory_space<vmem>>) attributes {dimension_semantics = [#tpu.dimension_semantics<parallel>], iteration_bounds = array<i64: 1>, scalar_prefetch = 0 : i64, scratch_operands = 0 : i64, tpu.core_type = #tpu.core_type<tc>, window_params = [{transform_indices = @transform_0, window_bounds = array<i64: 32, 24>}, {pipeline_mode = #tpu.pipeline_mode<synchronous>, transform_indices = @transform_1, window_bounds = array<i64: 24, 8>}, {pipeline_mode = #tpu.pipeline_mode<synchronous>, transform_indices = @transform_2, window_bounds = array<i64: 1, 8>}, {pipeline_mode = #tpu.pipeline_mode<synchronous>, transform_indices = @transform_3, window_bounds = array<i64: 32, 8>}, {pipeline_mode = #tpu.pipeline_mode<synchronous>, transform_indices = @transform_4, window_bounds = array<i64: 8, 32>}, {pipeline_mode = #tpu.pipeline_mode<synchronous>, transform_indices = @transform_5, window_bounds = array<i64: 1, 32>}, {transform_indices = @transform_6, window_bounds = array<i64: 32, 8>}, {transform_indices = @transform_7, window_bounds = array<i64: 32, 8>}, {transform_indices = @transform_8, window_bounds = array<i64: 32, 1>}]} {
    %c0 = arith.constant 0 : index
    %c0_0 = arith.constant 0 : index
    %0 = vector.load %arg1[%c0, %c0_0] : memref<32x24xf32, #tpu.memory_space<vmem>>, vector<32x24xf32>
    %1 = arith.truncf %0 : vector<32x24xf32> to vector<32x24xbf16>
    %c0_1 = arith.constant 0 : index
    %c0_2 = arith.constant 0 : index
    %2 = vector.load %arg2[%c0_1, %c0_2] : memref<24x8xbf16, #tpu.memory_space<vmem>>, vector<24x8xbf16>
    %cst = arith.constant dense<0.000000e+00> : vector<32x8xf32>
    %3 = tpu.matmul %1, %2, %cst {dimension_numbers = #tpu.dot_dimension_numbers<[1], [0], [0], [1], [0, 0, 1, 1], [], []>} : vector<32x24xbf16>, vector<24x8xbf16>, vector<32x8xf32> -> vector<32x8xf32>
    %c0_3 = arith.constant 0 : index
    %c0_4 = arith.constant 0 : index
    %4 = vector.load %arg3[%c0_3, %c0_4] : memref<1x8xf32, #tpu.memory_space<vmem>>, vector<1x8xf32>
    %5 = vector.broadcast %4 : vector<1x8xf32> to vector<32x8xf32>
    %6 = arith.addf %3, %5 : vector<32x8xf32>
    %c0_5 = arith.constant 0 : index
    %c0_6 = arith.constant 0 : index
    %7 = vector.load %arg7[%c0_5, %c0_6] : memref<32x8xf32, #tpu.memory_space<vmem>>, vector<32x8xf32>
    tpu.vector_store %arg7[%c0_5, %c0_6], %6 {strides = array<i32>} : memref<32x8xf32, #tpu.memory_space<vmem>>, vector<32x8xf32>,
    %c0_7 = arith.constant 0 : index
    %c0_8 = arith.constant 0 : index
    %8 = vector.load %arg6[%c0_7, %c0_8] : memref<1x32xf32, #tpu.memory_space<vmem>>, vector<1x32xf32>
    %c0_9 = arith.constant 0 : index
    %c0_10 = arith.constant 0 : index
    %9 = vector.load %arg5[%c0_9, %c0_10] : memref<8x32xf32, #tpu.memory_space<vmem>>, vector<8x32xf32>
    %cst_11 = arith.constant dense<0.000000e+00> : vector<32x32xf32>
    %10 = tpu.matmul %6, %9, %cst_11 {dimension_numbers = #tpu.dot_dimension_numbers<[1], [0], [0], [1], [0, 0, 1, 1], [], []>} : vector<32x8xf32>, vector<8x32xf32>, vector<32x32xf32> -> vector<32x32xf32>
    %cst_12 = arith.constant 2.000000e+00 : f32
    %11 = vector.broadcast %cst_12 : f32 to vector<32x32xf32>
    %12 = arith.mulf %11, %10 : vector<32x32xf32>
    %13 = vector.broadcast %8 : vector<1x32xf32> to vector<32x32xf32>
    %14 = arith.subf %13, %12 : vector<32x32xf32>
    %cst_13 = arith.constant dense<0x7F800000> : vector<32xf32>
    %15 = vector.multi_reduction <minimumf>, %14, %cst_13 [1] : vector<32x32xf32> to vector<32xf32>
    %16 = vector.shape_cast %15 : vector<32xf32> to vector<32x1xf32>
    %17 = tpu.iota {dimensions = array<i32: 1>} : vector<32x32xi32>
    %18 = vector.broadcast %16 : vector<32x1xf32> to vector<32x32xf32>
    %19 = arith.cmpf ole, %14, %18 : vector<32x32xf32>
    %c32_i32 = arith.constant 32 : i32
    %20 = vector.broadcast %c32_i32 : i32 to vector<32x32xi32>
    %21 = arith.select %19, %17, %20 : vector<32x32xi1>, vector<32x32xi32>
    %cst_14 = arith.constant dense<2147483647> : vector<32xi32>
    %22 = vector.multi_reduction <minsi>, %21, %cst_14 [1] : vector<32x32xi32> to vector<32xi32>
    %c31_i32 = arith.constant 31 : i32
    %23 = vector.broadcast %c31_i32 : i32 to vector<32xi32>
    %24 = arith.minsi %22, %23 : vector<32xi32>
    %25 = vector.shape_cast %24 : vector<32xi32> to vector<32x1xi32>
    %26 = vector.broadcast %25 : vector<32x1xi32> to vector<32x32xi32>
    %27 = arith.cmpi eq, %17, %26 : vector<32x32xi32>
    %28 = arith.extui %27 : vector<32x32xi1> to vector<32x32xi32>
    %29 = arith.sitofp %28 : vector<32x32xi32> to vector<32x32xf32>
    %c0_15 = arith.constant 0 : index
    %c0_16 = arith.constant 0 : index
    %30 = vector.load %arg4[%c0_15, %c0_16] : memref<32x8xf32, #tpu.memory_space<vmem>>, vector<32x8xf32>
    %cst_17 = arith.constant dense<0.000000e+00> : vector<32x8xf32>
    %31 = tpu.matmul %29, %30, %cst_17 {dimension_numbers = #tpu.dot_dimension_numbers<[1], [0], [0], [1], [0, 0, 1, 1], [], []>} : vector<32x32xf32>, vector<32x8xf32>, vector<32x8xf32> -> vector<32x8xf32>
    %c0_18 = arith.constant 0 : index
    %c0_19 = arith.constant 0 : index
    %32 = vector.load %arg8[%c0_18, %c0_19] : memref<32x8xf32, #tpu.memory_space<vmem>>, vector<32x8xf32>
    tpu.vector_store %arg8[%c0_18, %c0_19], %31 {strides = array<i32>} : memref<32x8xf32, #tpu.memory_space<vmem>>, vector<32x8xf32>,
    %33 = vector.shape_cast %24 : vector<32xi32> to vector<32x1xi32>
    %c0_20 = arith.constant 0 : index
    %c0_21 = arith.constant 0 : index
    %34 = vector.load %arg9[%c0_20, %c0_21] : memref<32x1xi32, #tpu.memory_space<vmem>>, vector<32x1xi32>
    tpu.vector_store %arg9[%c0_20, %c0_21], %33 {strides = array<i32>} : memref<32x1xi32, #tpu.memory_space<vmem>>, vector<32x1xi32>,
    return
  }
  func.func @transform_0(%arg0: i32) -> (i32, i32) {
    %c0_i32 = arith.constant 0 : i32
    %c0_i32_0 = arith.constant 0 : i32
    return %arg0, %c0_i32 : i32, i32
  }
  func.func @transform_1(%arg0: i32) -> (i32, i32) {
    %c0_i32 = arith.constant 0 : i32
    %c0_i32_0 = arith.constant 0 : i32
    %c0_i32_1 = arith.constant 0 : i32
    return %c0_i32, %c0_i32_0 : i32, i32
  }
  func.func @transform_2(%arg0: i32) -> (i32, i32) {
    %c0_i32 = arith.constant 0 : i32
    %c0_i32_0 = arith.constant 0 : i32
    %c0_i32_1 = arith.constant 0 : i32
    return %c0_i32, %c0_i32_0 : i32, i32
  }
  func.func @transform_3(%arg0: i32) -> (i32, i32) {
    %c0_i32 = arith.constant 0 : i32
    %c0_i32_0 = arith.constant 0 : i32
    %c0_i32_1 = arith.constant 0 : i32
    return %c0_i32, %c0_i32_0 : i32, i32
  }
  func.func @transform_4(%arg0: i32) -> (i32, i32) {
    %c0_i32 = arith.constant 0 : i32
    %c0_i32_0 = arith.constant 0 : i32
    %c0_i32_1 = arith.constant 0 : i32
    return %c0_i32, %c0_i32_0 : i32, i32
  }
  func.func @transform_5(%arg0: i32) -> (i32, i32) {
    %c0_i32 = arith.constant 0 : i32
    %c0_i32_0 = arith.constant 0 : i32
    %c0_i32_1 = arith.constant 0 : i32
    return %c0_i32, %c0_i32_0 : i32, i32
  }
  func.func @transform_6(%arg0: i32) -> (i32, i32) {
    %c0_i32 = arith.constant 0 : i32
    %c0_i32_0 = arith.constant 0 : i32
    return %arg0, %c0_i32 : i32, i32
  }
  func.func @transform_7(%arg0: i32) -> (i32, i32) {
    %c0_i32 = arith.constant 0 : i32
    %c0_i32_0 = arith.constant 0 : i32
    return %arg0, %c0_i32 : i32, i32
  }
  func.func @transform_8(%arg0: i32) -> (i32, i32) {
    %c0_i32 = arith.constant 0 : i32
    %c0_i32_0 = arith.constant 0 : i32
    return %arg0, %c0_i32 : i32, i32
  }
}

module attributes {stable_mosaic.version = 11 : i64} {
  func.func @_stage_kernel(%arg0: i32, %arg1: memref<1x16x8xf32, #tpu.memory_space<vmem>>, %arg2: memref<16x1xf32, #tpu.memory_space<vmem>>, %arg3: memref<72x8xbf16, #tpu.memory_space<vmem>>, %arg4: memref<1x8xf32, #tpu.memory_space<vmem>>, %arg5: memref<2x72x8xbf16, #tpu.memory_space<vmem>>, %arg6: memref<2x1x8xf32, #tpu.memory_space<vmem>>, %arg7: memref<2x8x8xbf16, #tpu.memory_space<vmem>>, %arg8: memref<2x1x8xf32, #tpu.memory_space<vmem>>, %arg9: memref<1x2x2x8xf32, #tpu.memory_space<vmem>>, %arg10: memref<32x8xf32, #tpu.memory_space<vmem>>, %arg11: memref<16x8xf32, #tpu.memory_space<vmem>>) attributes {dimension_semantics = [#tpu.dimension_semantics<parallel>], iteration_bounds = array<i64: 2>, scalar_prefetch = 0 : i64, scratch_operands = 2 : i64, tpu.core_type = #tpu.core_type<tc>, window_params = [{transform_indices = @transform_0, window_bounds = array<i64: 1, 16, 8>}, {pipeline_mode = #tpu.pipeline_mode<synchronous>, transform_indices = @transform_1, window_bounds = array<i64: 16, 1>}, {pipeline_mode = #tpu.pipeline_mode<synchronous>, transform_indices = @transform_2, window_bounds = array<i64: 72, 8>}, {pipeline_mode = #tpu.pipeline_mode<synchronous>, transform_indices = @transform_3, window_bounds = array<i64: 1, 8>}, {pipeline_mode = #tpu.pipeline_mode<synchronous>, transform_indices = @transform_4, window_bounds = array<i64: 2, 72, 8>}, {pipeline_mode = #tpu.pipeline_mode<synchronous>, transform_indices = @transform_5, window_bounds = array<i64: 2, 1, 8>}, {pipeline_mode = #tpu.pipeline_mode<synchronous>, transform_indices = @transform_6, window_bounds = array<i64: 2, 8, 8>}, {pipeline_mode = #tpu.pipeline_mode<synchronous>, transform_indices = @transform_7, window_bounds = array<i64: 2, 1, 8>}, {transform_indices = @transform_8, window_bounds = array<i64: 1, 2, 2, 8>}]} {
    %c0 = arith.constant 0 : index
    %c0_0 = arith.constant 0 : index
    %0 = vector.load %arg2[%c0, %c0_0] : memref<16x1xf32, #tpu.memory_space<vmem>>, vector<16x1xf32>
    %cst = arith.constant 0.000000e+00 : f32
    %1 = vector.broadcast %cst : f32 to vector<8x8xf32>
    %c0_1 = arith.constant 0 : index
    %c0_2 = arith.constant 0 : index
    %2 = vector.load %arg10[%c0_1, %c0_2] : memref<32x8xf32, #tpu.memory_space<vmem>>, vector<8x8xf32>
    tpu.vector_store %arg10[%c0_1, %c0_2], %1 {strides = array<i32>} : memref<32x8xf32, #tpu.memory_space<vmem>>, vector<8x8xf32>,
    %cst_3 = arith.constant 0.000000e+00 : f32
    %3 = vector.broadcast %cst_3 : f32 to vector<8x8xf32>
    %c24 = arith.constant 24 : index
    %c0_4 = arith.constant 0 : index
    %4 = vector.load %arg10[%c24, %c0_4] : memref<32x8xf32, #tpu.memory_space<vmem>>, vector<8x8xf32>
    tpu.vector_store %arg10[%c24, %c0_4], %3 {strides = array<i32>} : memref<32x8xf32, #tpu.memory_space<vmem>>, vector<8x8xf32>,
    %c0_5 = arith.constant 0 : index
    %c0_6 = arith.constant 0 : index
    %c0_7 = arith.constant 0 : index
    %5 = vector.load %arg1[%c0_5, %c0_6, %c0_7] : memref<1x16x8xf32, #tpu.memory_space<vmem>>, vector<1x16x8xf32>
    %6 = vector.shape_cast %5 : vector<1x16x8xf32> to vector<16x8xf32>
    %c0_8 = arith.constant 0 : index
    %c0_9 = arith.constant 0 : index
    %7 = vector.load %arg3[%c0_8, %c0_9] : memref<72x8xbf16, #tpu.memory_space<vmem>>, vector<72x8xbf16>
    %c0_10 = arith.constant 0 : index
    %c0_11 = arith.constant 0 : index
    %8 = vector.load %arg4[%c0_10, %c0_11] : memref<1x8xf32, #tpu.memory_space<vmem>>, vector<1x8xf32>
    %9 = vector.broadcast %0 : vector<16x1xf32> to vector<16x8xf32>
    %10 = arith.mulf %6, %9 : vector<16x8xf32>
    %c8 = arith.constant 8 : index
    %c0_12 = arith.constant 0 : index
    %11 = vector.load %arg10[%c8, %c0_12] : memref<32x8xf32, #tpu.memory_space<vmem>>, vector<16x8xf32>
    tpu.vector_store %arg10[%c8, %c0_12], %10 {strides = array<i32>} : memref<32x8xf32, #tpu.memory_space<vmem>>, vector<16x8xf32>,
    %c3 = arith.constant 3 : index
    %c0_13 = arith.constant 0 : index
    %12 = vector.load %arg10[%c3, %c0_13] : memref<32x8xf32, #tpu.memory_space<vmem>>, vector<16x8xf32>
    %c4 = arith.constant 4 : index
    %c0_14 = arith.constant 0 : index
    %13 = vector.load %arg10[%c4, %c0_14] : memref<32x8xf32, #tpu.memory_space<vmem>>, vector<16x8xf32>
    %c5 = arith.constant 5 : index
    %c0_15 = arith.constant 0 : index
    %14 = vector.load %arg10[%c5, %c0_15] : memref<32x8xf32, #tpu.memory_space<vmem>>, vector<16x8xf32>
    %c7 = arith.constant 7 : index
    %c0_16 = arith.constant 0 : index
    %15 = vector.load %arg10[%c7, %c0_16] : memref<32x8xf32, #tpu.memory_space<vmem>>, vector<16x8xf32>
    %c8_17 = arith.constant 8 : index
    %c0_18 = arith.constant 0 : index
    %16 = vector.load %arg10[%c8_17, %c0_18] : memref<32x8xf32, #tpu.memory_space<vmem>>, vector<16x8xf32>
    %c9 = arith.constant 9 : index
    %c0_19 = arith.constant 0 : index
    %17 = vector.load %arg10[%c9, %c0_19] : memref<32x8xf32, #tpu.memory_space<vmem>>, vector<16x8xf32>
    %c11 = arith.constant 11 : index
    %c0_20 = arith.constant 0 : index
    %18 = vector.load %arg10[%c11, %c0_20] : memref<32x8xf32, #tpu.memory_space<vmem>>, vector<16x8xf32>
    %c12 = arith.constant 12 : index
    %c0_21 = arith.constant 0 : index
    %19 = vector.load %arg10[%c12, %c0_21] : memref<32x8xf32, #tpu.memory_space<vmem>>, vector<16x8xf32>
    %c13 = arith.constant 13 : index
    %c0_22 = arith.constant 0 : index
    %20 = vector.load %arg10[%c13, %c0_22] : memref<32x8xf32, #tpu.memory_space<vmem>>, vector<16x8xf32>
    %21 = tpu.concatenate %12, %13, %14, %15, %16, %17, %18, %19, %20 in 1 : vector<16x8xf32>, vector<16x8xf32>, vector<16x8xf32>, vector<16x8xf32>, vector<16x8xf32>, vector<16x8xf32>, vector<16x8xf32>, vector<16x8xf32>, vector<16x8xf32> -> vector<16x72xf32>
    %22 = arith.truncf %21 : vector<16x72xf32> to vector<16x72xbf16>
    %cst_23 = arith.constant dense<0.000000e+00> : vector<16x8xf32>
    %23 = tpu.matmul %22, %7, %cst_23 {dimension_numbers = #tpu.dot_dimension_numbers<[1], [0], [0], [1], [0, 0, 1, 1], [], []>} : vector<16x72xbf16>, vector<72x8xbf16>, vector<16x8xf32> -> vector<16x8xf32>
    %24 = vector.broadcast %8 : vector<1x8xf32> to vector<16x8xf32>
    %25 = arith.addf %23, %24 : vector<16x8xf32>
    %c0_24 = arith.constant 0 : index
    %c0_25 = arith.constant 0 : index
    %26 = vector.load %arg11[%c0_24, %c0_25] : memref<16x8xf32, #tpu.memory_space<vmem>>, vector<16x8xf32>
    tpu.vector_store %arg11[%c0_24, %c0_25], %25 {strides = array<i32>} : memref<16x8xf32, #tpu.memory_space<vmem>>, vector<16x8xf32>,
    %c0_26 = arith.constant 0 : index
    %c0_27 = arith.constant 0 : index
    %27 = vector.load %arg11[%c0_26, %c0_27] : memref<16x8xf32, #tpu.memory_space<vmem>>, vector<16x8xf32>
    %cst_28 = arith.constant 0.000000e+00 : f32
    %28 = vector.broadcast %cst_28 : f32 to vector<16x8xf32>
    %29 = arith.maximumf %27, %28 : vector<16x8xf32>
    %c0_29 = arith.constant 0 : index
    %c0_30 = arith.constant 0 : index
    %c0_31 = arith.constant 0 : index
    %30 = vector.load %arg5[%c0_29, %c0_30, %c0_31] : memref<2x72x8xbf16, #tpu.memory_space<vmem>>, vector<1x72x8xbf16>
    %31 = vector.shape_cast %30 : vector<1x72x8xbf16> to vector<72x8xbf16>
    %c0_32 = arith.constant 0 : index
    %c0_33 = arith.constant 0 : index
    %c0_34 = arith.constant 0 : index
    %32 = vector.load %arg6[%c0_32, %c0_33, %c0_34] : memref<2x1x8xf32, #tpu.memory_space<vmem>>, vector<1x1x8xf32>
    %33 = vector.shape_cast %32 : vector<1x1x8xf32> to vector<1x8xf32>
    %34 = vector.broadcast %0 : vector<16x1xf32> to vector<16x8xf32>
    %35 = arith.mulf %29, %34 : vector<16x8xf32>
    %c8_35 = arith.constant 8 : index
    %c0_36 = arith.constant 0 : index
    %36 = vector.load %arg10[%c8_35, %c0_36] : memref<32x8xf32, #tpu.memory_space<vmem>>, vector<16x8xf32>
    tpu.vector_store %arg10[%c8_35, %c0_36], %35 {strides = array<i32>} : memref<32x8xf32, #tpu.memory_space<vmem>>, vector<16x8xf32>,
    %c3_37 = arith.constant 3 : index
    %c0_38 = arith.constant 0 : index
    %37 = vector.load %arg10[%c3_37, %c0_38] : memref<32x8xf32, #tpu.memory_space<vmem>>, vector<16x8xf32>
    %c4_39 = arith.constant 4 : index
    %c0_40 = arith.constant 0 : index
    %38 = vector.load %arg10[%c4_39, %c0_40] : memref<32x8xf32, #tpu.memory_space<vmem>>, vector<16x8xf32>
    %c5_41 = arith.constant 5 : index
    %c0_42 = arith.constant 0 : index
    %39 = vector.load %arg10[%c5_41, %c0_42] : memref<32x8xf32, #tpu.memory_space<vmem>>, vector<16x8xf32>
    %c7_43 = arith.constant 7 : index
    %c0_44 = arith.constant 0 : index
    %40 = vector.load %arg10[%c7_43, %c0_44] : memref<32x8xf32, #tpu.memory_space<vmem>>, vector<16x8xf32>
    %c8_45 = arith.constant 8 : index
    %c0_46 = arith.constant 0 : index
    %41 = vector.load %arg10[%c8_45, %c0_46] : memref<32x8xf32, #tpu.memory_space<vmem>>, vector<16x8xf32>
    %c9_47 = arith.constant 9 : index
    %c0_48 = arith.constant 0 : index
    %42 = vector.load %arg10[%c9_47, %c0_48] : memref<32x8xf32, #tpu.memory_space<vmem>>, vector<16x8xf32>
    %c11_49 = arith.constant 11 : index
    %c0_50 = arith.constant 0 : index
    %43 = vector.load %arg10[%c11_49, %c0_50] : memref<32x8xf32, #tpu.memory_space<vmem>>, vector<16x8xf32>
    %c12_51 = arith.constant 12 : index
    %c0_52 = arith.constant 0 : index
    %44 = vector.load %arg10[%c12_51, %c0_52] : memref<32x8xf32, #tpu.memory_space<vmem>>, vector<16x8xf32>
    %c13_53 = arith.constant 13 : index
    %c0_54 = arith.constant 0 : index
    %45 = vector.load %arg10[%c13_53, %c0_54] : memref<32x8xf32, #tpu.memory_space<vmem>>, vector<16x8xf32>
    %46 = tpu.concatenate %37, %38, %39, %40, %41, %42, %43, %44, %45 in 1 : vector<16x8xf32>, vector<16x8xf32>, vector<16x8xf32>, vector<16x8xf32>, vector<16x8xf32>, vector<16x8xf32>, vector<16x8xf32>, vector<16x8xf32>, vector<16x8xf32> -> vector<16x72xf32>
    %47 = arith.truncf %46 : vector<16x72xf32> to vector<16x72xbf16>
    %cst_55 = arith.constant dense<0.000000e+00> : vector<16x8xf32>
    %48 = tpu.matmul %47, %31, %cst_55 {dimension_numbers = #tpu.dot_dimension_numbers<[1], [0], [0], [1], [0, 0, 1, 1], [], []>} : vector<16x72xbf16>, vector<72x8xbf16>, vector<16x8xf32> -> vector<16x8xf32>
    %49 = vector.broadcast %33 : vector<1x8xf32> to vector<16x8xf32>
    %50 = arith.addf %48, %49 : vector<16x8xf32>
    %cst_56 = arith.constant 0.000000e+00 : f32
    %51 = vector.broadcast %cst_56 : f32 to vector<16x8xf32>
    %52 = arith.maximumf %50, %51 : vector<16x8xf32>
    %53 = arith.truncf %52 : vector<16x8xf32> to vector<16x8xbf16>
    %c0_57 = arith.constant 0 : index
    %c0_58 = arith.constant 0 : index
    %c0_59 = arith.constant 0 : index
    %54 = vector.load %arg7[%c0_57, %c0_58, %c0_59] : memref<2x8x8xbf16, #tpu.memory_space<vmem>>, vector<1x8x8xbf16>
    %55 = vector.shape_cast %54 : vector<1x8x8xbf16> to vector<8x8xbf16>
    %cst_60 = arith.constant dense<0.000000e+00> : vector<16x8xf32>
    %56 = tpu.matmul %53, %55, %cst_60 {dimension_numbers = #tpu.dot_dimension_numbers<[1], [0], [0], [1], [0, 0, 1, 1], [], []>} : vector<16x8xbf16>, vector<8x8xbf16>, vector<16x8xf32> -> vector<16x8xf32>
    %c0_61 = arith.constant 0 : index
    %c0_62 = arith.constant 0 : index
    %c0_63 = arith.constant 0 : index
    %57 = vector.load %arg8[%c0_61, %c0_62, %c0_63] : memref<2x1x8xf32, #tpu.memory_space<vmem>>, vector<1x1x8xf32>
    %58 = vector.shape_cast %57 : vector<1x1x8xf32> to vector<1x8xf32>
    %59 = vector.broadcast %58 : vector<1x8xf32> to vector<16x8xf32>
    %60 = arith.addf %56, %59 : vector<16x8xf32>
    %61 = arith.addf %27, %60 : vector<16x8xf32>
    %c0_64 = arith.constant 0 : index
    %c0_65 = arith.constant 0 : index
    %62 = vector.load %arg11[%c0_64, %c0_65] : memref<16x8xf32, #tpu.memory_space<vmem>>, vector<16x8xf32>
    tpu.vector_store %arg11[%c0_64, %c0_65], %61 {strides = array<i32>} : memref<16x8xf32, #tpu.memory_space<vmem>>, vector<16x8xf32>,
    %c0_66 = arith.constant 0 : index
    %c0_67 = arith.constant 0 : index
    %63 = vector.load %arg11[%c0_66, %c0_67] : memref<16x8xf32, #tpu.memory_space<vmem>>, vector<16x8xf32>
    %cst_68 = arith.constant 0.000000e+00 : f32
    %64 = vector.broadcast %cst_68 : f32 to vector<16x8xf32>
    %65 = arith.maximumf %63, %64 : vector<16x8xf32>
    %c1 = arith.constant 1 : index
    %c0_69 = arith.constant 0 : index
    %c0_70 = arith.constant 0 : index
    %66 = vector.load %arg5[%c1, %c0_69, %c0_70] : memref<2x72x8xbf16, #tpu.memory_space<vmem>>, vector<1x72x8xbf16>
    %67 = vector.shape_cast %66 : vector<1x72x8xbf16> to vector<72x8xbf16>
    %c1_71 = arith.constant 1 : index
    %c0_72 = arith.constant 0 : index
    %c0_73 = arith.constant 0 : index
    %68 = vector.load %arg6[%c1_71, %c0_72, %c0_73] : memref<2x1x8xf32, #tpu.memory_space<vmem>>, vector<1x1x8xf32>
    %69 = vector.shape_cast %68 : vector<1x1x8xf32> to vector<1x8xf32>
    %70 = vector.broadcast %0 : vector<16x1xf32> to vector<16x8xf32>
    %71 = arith.mulf %65, %70 : vector<16x8xf32>
    %c8_74 = arith.constant 8 : index
    %c0_75 = arith.constant 0 : index
    %72 = vector.load %arg10[%c8_74, %c0_75] : memref<32x8xf32, #tpu.memory_space<vmem>>, vector<16x8xf32>
    tpu.vector_store %arg10[%c8_74, %c0_75], %71 {strides = array<i32>} : memref<32x8xf32, #tpu.memory_space<vmem>>, vector<16x8xf32>,
    %c3_76 = arith.constant 3 : index
    %c0_77 = arith.constant 0 : index
    %73 = vector.load %arg10[%c3_76, %c0_77] : memref<32x8xf32, #tpu.memory_space<vmem>>, vector<16x8xf32>
    %c4_78 = arith.constant 4 : index
    %c0_79 = arith.constant 0 : index
    %74 = vector.load %arg10[%c4_78, %c0_79] : memref<32x8xf32, #tpu.memory_space<vmem>>, vector<16x8xf32>
    %c5_80 = arith.constant 5 : index
    %c0_81 = arith.constant 0 : index
    %75 = vector.load %arg10[%c5_80, %c0_81] : memref<32x8xf32, #tpu.memory_space<vmem>>, vector<16x8xf32>
    %c7_82 = arith.constant 7 : index
    %c0_83 = arith.constant 0 : index
    %76 = vector.load %arg10[%c7_82, %c0_83] : memref<32x8xf32, #tpu.memory_space<vmem>>, vector<16x8xf32>
    %c8_84 = arith.constant 8 : index
    %c0_85 = arith.constant 0 : index
    %77 = vector.load %arg10[%c8_84, %c0_85] : memref<32x8xf32, #tpu.memory_space<vmem>>, vector<16x8xf32>
    %c9_86 = arith.constant 9 : index
    %c0_87 = arith.constant 0 : index
    %78 = vector.load %arg10[%c9_86, %c0_87] : memref<32x8xf32, #tpu.memory_space<vmem>>, vector<16x8xf32>
    %c11_88 = arith.constant 11 : index
    %c0_89 = arith.constant 0 : index
    %79 = vector.load %arg10[%c11_88, %c0_89] : memref<32x8xf32, #tpu.memory_space<vmem>>, vector<16x8xf32>
    %c12_90 = arith.constant 12 : index
    %c0_91 = arith.constant 0 : index
    %80 = vector.load %arg10[%c12_90, %c0_91] : memref<32x8xf32, #tpu.memory_space<vmem>>, vector<16x8xf32>
    %c13_92 = arith.constant 13 : index
    %c0_93 = arith.constant 0 : index
    %81 = vector.load %arg10[%c13_92, %c0_93] : memref<32x8xf32, #tpu.memory_space<vmem>>, vector<16x8xf32>
    %82 = tpu.concatenate %73, %74, %75, %76, %77, %78, %79, %80, %81 in 1 : vector<16x8xf32>, vector<16x8xf32>, vector<16x8xf32>, vector<16x8xf32>, vector<16x8xf32>, vector<16x8xf32>, vector<16x8xf32>, vector<16x8xf32>, vector<16x8xf32> -> vector<16x72xf32>
    %83 = arith.truncf %82 : vector<16x72xf32> to vector<16x72xbf16>
    %cst_94 = arith.constant dense<0.000000e+00> : vector<16x8xf32>
    %84 = tpu.matmul %83, %67, %cst_94 {dimension_numbers = #tpu.dot_dimension_numbers<[1], [0], [0], [1], [0, 0, 1, 1], [], []>} : vector<16x72xbf16>, vector<72x8xbf16>, vector<16x8xf32> -> vector<16x8xf32>
    %85 = vector.broadcast %69 : vector<1x8xf32> to vector<16x8xf32>
    %86 = arith.addf %84, %85 : vector<16x8xf32>
    %cst_95 = arith.constant 0.000000e+00 : f32
    %87 = vector.broadcast %cst_95 : f32 to vector<16x8xf32>
    %88 = arith.maximumf %86, %87 : vector<16x8xf32>
    %89 = arith.truncf %88 : vector<16x8xf32> to vector<16x8xbf16>
    %c1_96 = arith.constant 1 : index
    %c0_97 = arith.constant 0 : index
    %c0_98 = arith.constant 0 : index
    %90 = vector.load %arg7[%c1_96, %c0_97, %c0_98] : memref<2x8x8xbf16, #tpu.memory_space<vmem>>, vector<1x8x8xbf16>
    %91 = vector.shape_cast %90 : vector<1x8x8xbf16> to vector<8x8xbf16>
    %cst_99 = arith.constant dense<0.000000e+00> : vector<16x8xf32>
    %92 = tpu.matmul %89, %91, %cst_99 {dimension_numbers = #tpu.dot_dimension_numbers<[1], [0], [0], [1], [0, 0, 1, 1], [], []>} : vector<16x8xbf16>, vector<8x8xbf16>, vector<16x8xf32> -> vector<16x8xf32>
    %c1_100 = arith.constant 1 : index
    %c0_101 = arith.constant 0 : index
    %c0_102 = arith.constant 0 : index
    %93 = vector.load %arg8[%c1_100, %c0_101, %c0_102] : memref<2x1x8xf32, #tpu.memory_space<vmem>>, vector<1x1x8xf32>
    %94 = vector.shape_cast %93 : vector<1x1x8xf32> to vector<1x8xf32>
    %95 = vector.broadcast %94 : vector<1x8xf32> to vector<16x8xf32>
    %96 = arith.addf %92, %95 : vector<16x8xf32>
    %97 = arith.addf %63, %96 : vector<16x8xf32>
    %c0_103 = arith.constant 0 : index
    %c0_104 = arith.constant 0 : index
    %98 = vector.load %arg11[%c0_103, %c0_104] : memref<16x8xf32, #tpu.memory_space<vmem>>, vector<16x8xf32>
    tpu.vector_store %arg11[%c0_103, %c0_104], %97 {strides = array<i32>} : memref<16x8xf32, #tpu.memory_space<vmem>>, vector<16x8xf32>,
    %c5_105 = arith.constant 5 : index
    %c0_106 = arith.constant 0 : index
    %99 = vector.load %arg11[%c5_105, %c0_106] : memref<16x8xf32, #tpu.memory_space<vmem>>, vector<2x8xf32>
    %cst_107 = arith.constant 0.000000e+00 : f32
    %100 = vector.broadcast %cst_107 : f32 to vector<2x8xf32>
    %101 = arith.maximumf %99, %100 : vector<2x8xf32>
    %c0_108 = arith.constant 0 : index
    %c0_109 = arith.constant 0 : index
    %c0_110 = arith.constant 0 : index
    %c0_111 = arith.constant 0 : index
    %102 = vector.load %arg9[%c0_108, %c0_109, %c0_110, %c0_111] : memref<1x2x2x8xf32, #tpu.memory_space<vmem>>, vector<1x1x2x8xf32>
    %103 = vector.shape_cast %102 : vector<1x1x2x8xf32> to vector<2x8xf32>
    %104 = vector.shape_cast %101 : vector<2x8xf32> to vector<1x1x2x8xf32>
    tpu.vector_store %arg9[%c0_108, %c0_109, %c0_110, %c0_111], %104 {strides = array<i32>} : memref<1x2x2x8xf32, #tpu.memory_space<vmem>>, vector<1x1x2x8xf32>,
    %c9_112 = arith.constant 9 : index
    %c0_113 = arith.constant 0 : index
    %105 = vector.load %arg11[%c9_112, %c0_113] : memref<16x8xf32, #tpu.memory_space<vmem>>, vector<2x8xf32>
    %cst_114 = arith.constant 0.000000e+00 : f32
    %106 = vector.broadcast %cst_114 : f32 to vector<2x8xf32>
    %107 = arith.maximumf %105, %106 : vector<2x8xf32>
    %c0_115 = arith.constant 0 : index
    %c1_116 = arith.constant 1 : index
    %c0_117 = arith.constant 0 : index
    %c0_118 = arith.constant 0 : index
    %108 = vector.load %arg9[%c0_115, %c1_116, %c0_117, %c0_118] : memref<1x2x2x8xf32, #tpu.memory_space<vmem>>, vector<1x1x2x8xf32>
    %109 = vector.shape_cast %108 : vector<1x1x2x8xf32> to vector<2x8xf32>
    %110 = vector.shape_cast %107 : vector<2x8xf32> to vector<1x1x2x8xf32>
    tpu.vector_store %arg9[%c0_115, %c1_116, %c0_117, %c0_118], %110 {strides = array<i32>} : memref<1x2x2x8xf32, #tpu.memory_space<vmem>>, vector<1x1x2x8xf32>,
    return
  }
  func.func @transform_0(%arg0: i32) -> (i32, i32, i32) {
    %c0_i32 = arith.constant 0 : i32
    %c0_i32_0 = arith.constant 0 : i32
    %c0_i32_1 = arith.constant 0 : i32
    return %arg0, %c0_i32, %c0_i32_0 : i32, i32, i32
  }
  func.func @transform_1(%arg0: i32) -> (i32, i32) {
    %c0_i32 = arith.constant 0 : i32
    %c0_i32_0 = arith.constant 0 : i32
    %c0_i32_1 = arith.constant 0 : i32
    return %c0_i32, %c0_i32_0 : i32, i32
  }
  func.func @transform_2(%arg0: i32) -> (i32, i32) {
    %c0_i32 = arith.constant 0 : i32
    %c0_i32_0 = arith.constant 0 : i32
    %c0_i32_1 = arith.constant 0 : i32
    return %c0_i32, %c0_i32_0 : i32, i32
  }
  func.func @transform_3(%arg0: i32) -> (i32, i32) {
    %c0_i32 = arith.constant 0 : i32
    %c0_i32_0 = arith.constant 0 : i32
    %c0_i32_1 = arith.constant 0 : i32
    return %c0_i32, %c0_i32_0 : i32, i32
  }
  func.func @transform_4(%arg0: i32) -> (i32, i32, i32) {
    %c0_i32 = arith.constant 0 : i32
    %c0_i32_0 = arith.constant 0 : i32
    %c0_i32_1 = arith.constant 0 : i32
    %c0_i32_2 = arith.constant 0 : i32
    return %c0_i32, %c0_i32_0, %c0_i32_1 : i32, i32, i32
  }
  func.func @transform_5(%arg0: i32) -> (i32, i32, i32) {
    %c0_i32 = arith.constant 0 : i32
    %c0_i32_0 = arith.constant 0 : i32
    %c0_i32_1 = arith.constant 0 : i32
    %c0_i32_2 = arith.constant 0 : i32
    return %c0_i32, %c0_i32_0, %c0_i32_1 : i32, i32, i32
  }
  func.func @transform_6(%arg0: i32) -> (i32, i32, i32) {
    %c0_i32 = arith.constant 0 : i32
    %c0_i32_0 = arith.constant 0 : i32
    %c0_i32_1 = arith.constant 0 : i32
    %c0_i32_2 = arith.constant 0 : i32
    return %c0_i32, %c0_i32_0, %c0_i32_1 : i32, i32, i32
  }
  func.func @transform_7(%arg0: i32) -> (i32, i32, i32) {
    %c0_i32 = arith.constant 0 : i32
    %c0_i32_0 = arith.constant 0 : i32
    %c0_i32_1 = arith.constant 0 : i32
    %c0_i32_2 = arith.constant 0 : i32
    return %c0_i32, %c0_i32_0, %c0_i32_1 : i32, i32, i32
  }
  func.func @transform_8(%arg0: i32) -> (i32, i32, i32, i32) {
    %c0_i32 = arith.constant 0 : i32
    %c0_i32_0 = arith.constant 0 : i32
    %c0_i32_1 = arith.constant 0 : i32
    %c0_i32_2 = arith.constant 0 : i32
    return %arg0, %c0_i32, %c0_i32_0, %c0_i32_1 : i32, i32, i32, i32
  }
}

module attributes {stable_mosaic.version = 11 : i64} {
  func.func @_convt4x4s2_kernel(%arg0: i32, %arg1: memref<1x50x16xf32, #tpu.memory_space<vmem>>, %arg2: memref<144x32xbf16, #tpu.memory_space<vmem>>, %arg3: memref<1x32xf32, #tpu.memory_space<vmem>>, %arg4: memref<1x4x4x32xf32, #tpu.memory_space<vmem>>, %arg5: memref<36x32xf32, #tpu.memory_space<vmem>>) attributes {dimension_semantics = [#tpu.dimension_semantics<parallel>], iteration_bounds = array<i64: 2>, scalar_prefetch = 0 : i64, scratch_operands = 1 : i64, tpu.core_type = #tpu.core_type<tc>, window_params = [{transform_indices = @transform_0, window_bounds = array<i64: 1, 50, 16>}, {pipeline_mode = #tpu.pipeline_mode<synchronous>, transform_indices = @transform_1, window_bounds = array<i64: 144, 32>}, {pipeline_mode = #tpu.pipeline_mode<synchronous>, transform_indices = @transform_2, window_bounds = array<i64: 1, 32>}, {transform_indices = @transform_3, window_bounds = array<i64: 1, 4, 4, 32>}]} {
    %c0 = arith.constant 0 : index
    %c0_0 = arith.constant 0 : index
    %c0_1 = arith.constant 0 : index
    %0 = vector.load %arg1[%c0, %c0_0, %c0_1] : memref<1x50x16xf32, #tpu.memory_space<vmem>>, vector<1x36x16xf32>
    %1 = vector.shape_cast %0 : vector<1x36x16xf32> to vector<36x16xf32>
    %c0_2 = arith.constant 0 : index
    %c1 = arith.constant 1 : index
    %c0_3 = arith.constant 0 : index
    %2 = vector.load %arg1[%c0_2, %c1, %c0_3] : memref<1x50x16xf32, #tpu.memory_space<vmem>>, vector<1x36x16xf32>
    %3 = vector.shape_cast %2 : vector<1x36x16xf32> to vector<36x16xf32>
    %c0_4 = arith.constant 0 : index
    %c2 = arith.constant 2 : index
    %c0_5 = arith.constant 0 : index
    %4 = vector.load %arg1[%c0_4, %c2, %c0_5] : memref<1x50x16xf32, #tpu.memory_space<vmem>>, vector<1x36x16xf32>
    %5 = vector.shape_cast %4 : vector<1x36x16xf32> to vector<36x16xf32>
    %c0_6 = arith.constant 0 : index
    %c6 = arith.constant 6 : index
    %c0_7 = arith.constant 0 : index
    %6 = vector.load %arg1[%c0_6, %c6, %c0_7] : memref<1x50x16xf32, #tpu.memory_space<vmem>>, vector<1x36x16xf32>
    %7 = vector.shape_cast %6 : vector<1x36x16xf32> to vector<36x16xf32>
    %c0_8 = arith.constant 0 : index
    %c7 = arith.constant 7 : index
    %c0_9 = arith.constant 0 : index
    %8 = vector.load %arg1[%c0_8, %c7, %c0_9] : memref<1x50x16xf32, #tpu.memory_space<vmem>>, vector<1x36x16xf32>
    %9 = vector.shape_cast %8 : vector<1x36x16xf32> to vector<36x16xf32>
    %c0_10 = arith.constant 0 : index
    %c8 = arith.constant 8 : index
    %c0_11 = arith.constant 0 : index
    %10 = vector.load %arg1[%c0_10, %c8, %c0_11] : memref<1x50x16xf32, #tpu.memory_space<vmem>>, vector<1x36x16xf32>
    %11 = vector.shape_cast %10 : vector<1x36x16xf32> to vector<36x16xf32>
    %c0_12 = arith.constant 0 : index
    %c12 = arith.constant 12 : index
    %c0_13 = arith.constant 0 : index
    %12 = vector.load %arg1[%c0_12, %c12, %c0_13] : memref<1x50x16xf32, #tpu.memory_space<vmem>>, vector<1x36x16xf32>
    %13 = vector.shape_cast %12 : vector<1x36x16xf32> to vector<36x16xf32>
    %c0_14 = arith.constant 0 : index
    %c13 = arith.constant 13 : index
    %c0_15 = arith.constant 0 : index
    %14 = vector.load %arg1[%c0_14, %c13, %c0_15] : memref<1x50x16xf32, #tpu.memory_space<vmem>>, vector<1x36x16xf32>
    %15 = vector.shape_cast %14 : vector<1x36x16xf32> to vector<36x16xf32>
    %c0_16 = arith.constant 0 : index
    %c14 = arith.constant 14 : index
    %c0_17 = arith.constant 0 : index
    %16 = vector.load %arg1[%c0_16, %c14, %c0_17] : memref<1x50x16xf32, #tpu.memory_space<vmem>>, vector<1x36x16xf32>
    %17 = vector.shape_cast %16 : vector<1x36x16xf32> to vector<36x16xf32>
    %18 = tpu.concatenate %1, %3, %5, %7, %9, %11, %13, %15, %17 in 1 : vector<36x16xf32>, vector<36x16xf32>, vector<36x16xf32>, vector<36x16xf32>, vector<36x16xf32>, vector<36x16xf32>, vector<36x16xf32>, vector<36x16xf32>, vector<36x16xf32> -> vector<36x144xf32>
    %19 = arith.truncf %18 : vector<36x144xf32> to vector<36x144xbf16>
    %c0_18 = arith.constant 0 : index
    %c0_19 = arith.constant 0 : index
    %20 = vector.load %arg2[%c0_18, %c0_19] : memref<144x32xbf16, #tpu.memory_space<vmem>>, vector<144x32xbf16>
    %cst = arith.constant dense<0.000000e+00> : vector<36x32xf32>
    %21 = tpu.matmul %19, %20, %cst {dimension_numbers = #tpu.dot_dimension_numbers<[1], [0], [0], [1], [0, 0, 1, 1], [], []>} : vector<36x144xbf16>, vector<144x32xbf16>, vector<36x32xf32> -> vector<36x32xf32>
    %c0_20 = arith.constant 0 : index
    %c0_21 = arith.constant 0 : index
    %22 = vector.load %arg3[%c0_20, %c0_21] : memref<1x32xf32, #tpu.memory_space<vmem>>, vector<1x32xf32>
    %23 = vector.broadcast %22 : vector<1x32xf32> to vector<36x32xf32>
    %24 = arith.addf %21, %23 : vector<36x32xf32>
    %cst_22 = arith.constant 0.000000e+00 : f32
    %25 = vector.broadcast %cst_22 : f32 to vector<36x32xf32>
    %26 = arith.maximumf %24, %25 : vector<36x32xf32>
    %c0_23 = arith.constant 0 : index
    %c0_24 = arith.constant 0 : index
    %27 = vector.load %arg5[%c0_23, %c0_24] : memref<36x32xf32, #tpu.memory_space<vmem>>, vector<36x32xf32>
    tpu.vector_store %arg5[%c0_23, %c0_24], %26 {strides = array<i32>} : memref<36x32xf32, #tpu.memory_space<vmem>>, vector<36x32xf32>,
    %c7_25 = arith.constant 7 : index
    %c0_26 = arith.constant 0 : index
    %28 = vector.load %arg5[%c7_25, %c0_26] : memref<36x32xf32, #tpu.memory_space<vmem>>, vector<4x32xf32>
    %c0_27 = arith.constant 0 : index
    %c0_28 = arith.constant 0 : index
    %c0_29 = arith.constant 0 : index
    %c0_30 = arith.constant 0 : index
    %29 = vector.load %arg4[%c0_27, %c0_28, %c0_29, %c0_30] : memref<1x4x4x32xf32, #tpu.memory_space<vmem>>, vector<1x1x4x32xf32>
    %30 = vector.shape_cast %29 : vector<1x1x4x32xf32> to vector<4x32xf32>
    %31 = vector.shape_cast %28 : vector<4x32xf32> to vector<1x1x4x32xf32>
    tpu.vector_store %arg4[%c0_27, %c0_28, %c0_29, %c0_30], %31 {strides = array<i32>} : memref<1x4x4x32xf32, #tpu.memory_space<vmem>>, vector<1x1x4x32xf32>,
    %c13_31 = arith.constant 13 : index
    %c0_32 = arith.constant 0 : index
    %32 = vector.load %arg5[%c13_31, %c0_32] : memref<36x32xf32, #tpu.memory_space<vmem>>, vector<4x32xf32>
    %c0_33 = arith.constant 0 : index
    %c1_34 = arith.constant 1 : index
    %c0_35 = arith.constant 0 : index
    %c0_36 = arith.constant 0 : index
    %33 = vector.load %arg4[%c0_33, %c1_34, %c0_35, %c0_36] : memref<1x4x4x32xf32, #tpu.memory_space<vmem>>, vector<1x1x4x32xf32>
    %34 = vector.shape_cast %33 : vector<1x1x4x32xf32> to vector<4x32xf32>
    %35 = vector.shape_cast %32 : vector<4x32xf32> to vector<1x1x4x32xf32>
    tpu.vector_store %arg4[%c0_33, %c1_34, %c0_35, %c0_36], %35 {strides = array<i32>} : memref<1x4x4x32xf32, #tpu.memory_space<vmem>>, vector<1x1x4x32xf32>,
    %c19 = arith.constant 19 : index
    %c0_37 = arith.constant 0 : index
    %36 = vector.load %arg5[%c19, %c0_37] : memref<36x32xf32, #tpu.memory_space<vmem>>, vector<4x32xf32>
    %c0_38 = arith.constant 0 : index
    %c2_39 = arith.constant 2 : index
    %c0_40 = arith.constant 0 : index
    %c0_41 = arith.constant 0 : index
    %37 = vector.load %arg4[%c0_38, %c2_39, %c0_40, %c0_41] : memref<1x4x4x32xf32, #tpu.memory_space<vmem>>, vector<1x1x4x32xf32>
    %38 = vector.shape_cast %37 : vector<1x1x4x32xf32> to vector<4x32xf32>
    %39 = vector.shape_cast %36 : vector<4x32xf32> to vector<1x1x4x32xf32>
    tpu.vector_store %arg4[%c0_38, %c2_39, %c0_40, %c0_41], %39 {strides = array<i32>} : memref<1x4x4x32xf32, #tpu.memory_space<vmem>>, vector<1x1x4x32xf32>,
    %c25 = arith.constant 25 : index
    %c0_42 = arith.constant 0 : index
    %40 = vector.load %arg5[%c25, %c0_42] : memref<36x32xf32, #tpu.memory_space<vmem>>, vector<4x32xf32>
    %c0_43 = arith.constant 0 : index
    %c3 = arith.constant 3 : index
    %c0_44 = arith.constant 0 : index
    %c0_45 = arith.constant 0 : index
    %41 = vector.load %arg4[%c0_43, %c3, %c0_44, %c0_45] : memref<1x4x4x32xf32, #tpu.memory_space<vmem>>, vector<1x1x4x32xf32>
    %42 = vector.shape_cast %41 : vector<1x1x4x32xf32> to vector<4x32xf32>
    %43 = vector.shape_cast %40 : vector<4x32xf32> to vector<1x1x4x32xf32>
    tpu.vector_store %arg4[%c0_43, %c3, %c0_44, %c0_45], %43 {strides = array<i32>} : memref<1x4x4x32xf32, #tpu.memory_space<vmem>>, vector<1x1x4x32xf32>,
    return
  }
  func.func @transform_0(%arg0: i32) -> (i32, i32, i32) {
    %c0_i32 = arith.constant 0 : i32
    %c0_i32_0 = arith.constant 0 : i32
    %c0_i32_1 = arith.constant 0 : i32
    return %arg0, %c0_i32, %c0_i32_0 : i32, i32, i32
  }
  func.func @transform_1(%arg0: i32) -> (i32, i32) {
    %c0_i32 = arith.constant 0 : i32
    %c0_i32_0 = arith.constant 0 : i32
    %c0_i32_1 = arith.constant 0 : i32
    return %c0_i32, %c0_i32_0 : i32, i32
  }
  func.func @transform_2(%arg0: i32) -> (i32, i32) {
    %c0_i32 = arith.constant 0 : i32
    %c0_i32_0 = arith.constant 0 : i32
    %c0_i32_1 = arith.constant 0 : i32
    return %c0_i32, %c0_i32_0 : i32, i32
  }
  func.func @transform_3(%arg0: i32) -> (i32, i32, i32, i32) {
    %c0_i32 = arith.constant 0 : i32
    %c0_i32_0 = arith.constant 0 : i32
    %c0_i32_1 = arith.constant 0 : i32
    %c0_i32_2 = arith.constant 0 : i32
    return %arg0, %c0_i32, %c0_i32_0, %c0_i32_1 : i32, i32, i32, i32
  }
}

module attributes {stable_mosaic.version = 11 : i64} {
  func.func @_convt4x4s2_kernel(%arg0: i32, %arg1: memref<1x122x8xf32, #tpu.memory_space<vmem>>, %arg2: memref<72x12xbf16, #tpu.memory_space<vmem>>, %arg3: memref<1x12xf32, #tpu.memory_space<vmem>>, %arg4: memref<1x8x8x12xf32, #tpu.memory_space<vmem>>, %arg5: memref<100x12xf32, #tpu.memory_space<vmem>>) attributes {dimension_semantics = [#tpu.dimension_semantics<parallel>], iteration_bounds = array<i64: 2>, scalar_prefetch = 0 : i64, scratch_operands = 1 : i64, tpu.core_type = #tpu.core_type<tc>, window_params = [{transform_indices = @transform_0, window_bounds = array<i64: 1, 122, 8>}, {pipeline_mode = #tpu.pipeline_mode<synchronous>, transform_indices = @transform_1, window_bounds = array<i64: 72, 12>}, {pipeline_mode = #tpu.pipeline_mode<synchronous>, transform_indices = @transform_2, window_bounds = array<i64: 1, 12>}, {transform_indices = @transform_3, window_bounds = array<i64: 1, 8, 8, 12>}]} {
    %c0 = arith.constant 0 : index
    %c0_0 = arith.constant 0 : index
    %c0_1 = arith.constant 0 : index
    %0 = vector.load %arg1[%c0, %c0_0, %c0_1] : memref<1x122x8xf32, #tpu.memory_space<vmem>>, vector<1x100x8xf32>
    %1 = vector.shape_cast %0 : vector<1x100x8xf32> to vector<100x8xf32>
    %c0_2 = arith.constant 0 : index
    %c1 = arith.constant 1 : index
    %c0_3 = arith.constant 0 : index
    %2 = vector.load %arg1[%c0_2, %c1, %c0_3] : memref<1x122x8xf32, #tpu.memory_space<vmem>>, vector<1x100x8xf32>
    %3 = vector.shape_cast %2 : vector<1x100x8xf32> to vector<100x8xf32>
    %c0_4 = arith.constant 0 : index
    %c2 = arith.constant 2 : index
    %c0_5 = arith.constant 0 : index
    %4 = vector.load %arg1[%c0_4, %c2, %c0_5] : memref<1x122x8xf32, #tpu.memory_space<vmem>>, vector<1x100x8xf32>
    %5 = vector.shape_cast %4 : vector<1x100x8xf32> to vector<100x8xf32>
    %c0_6 = arith.constant 0 : index
    %c10 = arith.constant 10 : index
    %c0_7 = arith.constant 0 : index
    %6 = vector.load %arg1[%c0_6, %c10, %c0_7] : memref<1x122x8xf32, #tpu.memory_space<vmem>>, vector<1x100x8xf32>
    %7 = vector.shape_cast %6 : vector<1x100x8xf32> to vector<100x8xf32>
    %c0_8 = arith.constant 0 : index
    %c11 = arith.constant 11 : index
    %c0_9 = arith.constant 0 : index
    %8 = vector.load %arg1[%c0_8, %c11, %c0_9] : memref<1x122x8xf32, #tpu.memory_space<vmem>>, vector<1x100x8xf32>
    %9 = vector.shape_cast %8 : vector<1x100x8xf32> to vector<100x8xf32>
    %c0_10 = arith.constant 0 : index
    %c12 = arith.constant 12 : index
    %c0_11 = arith.constant 0 : index
    %10 = vector.load %arg1[%c0_10, %c12, %c0_11] : memref<1x122x8xf32, #tpu.memory_space<vmem>>, vector<1x100x8xf32>
    %11 = vector.shape_cast %10 : vector<1x100x8xf32> to vector<100x8xf32>
    %c0_12 = arith.constant 0 : index
    %c20 = arith.constant 20 : index
    %c0_13 = arith.constant 0 : index
    %12 = vector.load %arg1[%c0_12, %c20, %c0_13] : memref<1x122x8xf32, #tpu.memory_space<vmem>>, vector<1x100x8xf32>
    %13 = vector.shape_cast %12 : vector<1x100x8xf32> to vector<100x8xf32>
    %c0_14 = arith.constant 0 : index
    %c21 = arith.constant 21 : index
    %c0_15 = arith.constant 0 : index
    %14 = vector.load %arg1[%c0_14, %c21, %c0_15] : memref<1x122x8xf32, #tpu.memory_space<vmem>>, vector<1x100x8xf32>
    %15 = vector.shape_cast %14 : vector<1x100x8xf32> to vector<100x8xf32>
    %c0_16 = arith.constant 0 : index
    %c22 = arith.constant 22 : index
    %c0_17 = arith.constant 0 : index
    %16 = vector.load %arg1[%c0_16, %c22, %c0_17] : memref<1x122x8xf32, #tpu.memory_space<vmem>>, vector<1x100x8xf32>
    %17 = vector.shape_cast %16 : vector<1x100x8xf32> to vector<100x8xf32>
    %18 = tpu.concatenate %1, %3, %5, %7, %9, %11, %13, %15, %17 in 1 : vector<100x8xf32>, vector<100x8xf32>, vector<100x8xf32>, vector<100x8xf32>, vector<100x8xf32>, vector<100x8xf32>, vector<100x8xf32>, vector<100x8xf32>, vector<100x8xf32> -> vector<100x72xf32>
    %19 = arith.truncf %18 : vector<100x72xf32> to vector<100x72xbf16>
    %c0_18 = arith.constant 0 : index
    %c0_19 = arith.constant 0 : index
    %20 = vector.load %arg2[%c0_18, %c0_19] : memref<72x12xbf16, #tpu.memory_space<vmem>>, vector<72x12xbf16>
    %cst = arith.constant dense<0.000000e+00> : vector<100x12xf32>
    %21 = tpu.matmul %19, %20, %cst {dimension_numbers = #tpu.dot_dimension_numbers<[1], [0], [0], [1], [0, 0, 1, 1], [], []>} : vector<100x72xbf16>, vector<72x12xbf16>, vector<100x12xf32> -> vector<100x12xf32>
    %c0_20 = arith.constant 0 : index
    %c0_21 = arith.constant 0 : index
    %22 = vector.load %arg3[%c0_20, %c0_21] : memref<1x12xf32, #tpu.memory_space<vmem>>, vector<1x12xf32>
    %23 = vector.broadcast %22 : vector<1x12xf32> to vector<100x12xf32>
    %24 = arith.addf %21, %23 : vector<100x12xf32>
    %c0_22 = arith.constant 0 : index
    %c0_23 = arith.constant 0 : index
    %25 = vector.load %arg5[%c0_22, %c0_23] : memref<100x12xf32, #tpu.memory_space<vmem>>, vector<100x12xf32>
    tpu.vector_store %arg5[%c0_22, %c0_23], %24 {strides = array<i32>} : memref<100x12xf32, #tpu.memory_space<vmem>>, vector<100x12xf32>,
    %c11_24 = arith.constant 11 : index
    %c0_25 = arith.constant 0 : index
    %26 = vector.load %arg5[%c11_24, %c0_25] : memref<100x12xf32, #tpu.memory_space<vmem>>, vector<8x12xf32>
    %c0_26 = arith.constant 0 : index
    %c0_27 = arith.constant 0 : index
    %c0_28 = arith.constant 0 : index
    %c0_29 = arith.constant 0 : index
    %27 = vector.load %arg4[%c0_26, %c0_27, %c0_28, %c0_29] : memref<1x8x8x12xf32, #tpu.memory_space<vmem>>, vector<1x1x8x12xf32>
    %28 = vector.shape_cast %27 : vector<1x1x8x12xf32> to vector<8x12xf32>
    %29 = vector.shape_cast %26 : vector<8x12xf32> to vector<1x1x8x12xf32>
    tpu.vector_store %arg4[%c0_26, %c0_27, %c0_28, %c0_29], %29 {strides = array<i32>} : memref<1x8x8x12xf32, #tpu.memory_space<vmem>>, vector<1x1x8x12xf32>,
    %c21_30 = arith.constant 21 : index
    %c0_31 = arith.constant 0 : index
    %30 = vector.load %arg5[%c21_30, %c0_31] : memref<100x12xf32, #tpu.memory_space<vmem>>, vector<8x12xf32>
    %c0_32 = arith.constant 0 : index
    %c1_33 = arith.constant 1 : index
    %c0_34 = arith.constant 0 : index
    %c0_35 = arith.constant 0 : index
    %31 = vector.load %arg4[%c0_32, %c1_33, %c0_34, %c0_35] : memref<1x8x8x12xf32, #tpu.memory_space<vmem>>, vector<1x1x8x12xf32>
    %32 = vector.shape_cast %31 : vector<1x1x8x12xf32> to vector<8x12xf32>
    %33 = vector.shape_cast %30 : vector<8x12xf32> to vector<1x1x8x12xf32>
    tpu.vector_store %arg4[%c0_32, %c1_33, %c0_34, %c0_35], %33 {strides = array<i32>} : memref<1x8x8x12xf32, #tpu.memory_space<vmem>>, vector<1x1x8x12xf32>,
    %c31 = arith.constant 31 : index
    %c0_36 = arith.constant 0 : index
    %34 = vector.load %arg5[%c31, %c0_36] : memref<100x12xf32, #tpu.memory_space<vmem>>, vector<8x12xf32>
    %c0_37 = arith.constant 0 : index
    %c2_38 = arith.constant 2 : index
    %c0_39 = arith.constant 0 : index
    %c0_40 = arith.constant 0 : index
    %35 = vector.load %arg4[%c0_37, %c2_38, %c0_39, %c0_40] : memref<1x8x8x12xf32, #tpu.memory_space<vmem>>, vector<1x1x8x12xf32>
    %36 = vector.shape_cast %35 : vector<1x1x8x12xf32> to vector<8x12xf32>
    %37 = vector.shape_cast %34 : vector<8x12xf32> to vector<1x1x8x12xf32>
    tpu.vector_store %arg4[%c0_37, %c2_38, %c0_39, %c0_40], %37 {strides = array<i32>} : memref<1x8x8x12xf32, #tpu.memory_space<vmem>>, vector<1x1x8x12xf32>,
    %c41 = arith.constant 41 : index
    %c0_41 = arith.constant 0 : index
    %38 = vector.load %arg5[%c41, %c0_41] : memref<100x12xf32, #tpu.memory_space<vmem>>, vector<8x12xf32>
    %c0_42 = arith.constant 0 : index
    %c3 = arith.constant 3 : index
    %c0_43 = arith.constant 0 : index
    %c0_44 = arith.constant 0 : index
    %39 = vector.load %arg4[%c0_42, %c3, %c0_43, %c0_44] : memref<1x8x8x12xf32, #tpu.memory_space<vmem>>, vector<1x1x8x12xf32>
    %40 = vector.shape_cast %39 : vector<1x1x8x12xf32> to vector<8x12xf32>
    %41 = vector.shape_cast %38 : vector<8x12xf32> to vector<1x1x8x12xf32>
    tpu.vector_store %arg4[%c0_42, %c3, %c0_43, %c0_44], %41 {strides = array<i32>} : memref<1x8x8x12xf32, #tpu.memory_space<vmem>>, vector<1x1x8x12xf32>,
    %c51 = arith.constant 51 : index
    %c0_45 = arith.constant 0 : index
    %42 = vector.load %arg5[%c51, %c0_45] : memref<100x12xf32, #tpu.memory_space<vmem>>, vector<8x12xf32>
    %c0_46 = arith.constant 0 : index
    %c4 = arith.constant 4 : index
    %c0_47 = arith.constant 0 : index
    %c0_48 = arith.constant 0 : index
    %43 = vector.load %arg4[%c0_46, %c4, %c0_47, %c0_48] : memref<1x8x8x12xf32, #tpu.memory_space<vmem>>, vector<1x1x8x12xf32>
    %44 = vector.shape_cast %43 : vector<1x1x8x12xf32> to vector<8x12xf32>
    %45 = vector.shape_cast %42 : vector<8x12xf32> to vector<1x1x8x12xf32>
    tpu.vector_store %arg4[%c0_46, %c4, %c0_47, %c0_48], %45 {strides = array<i32>} : memref<1x8x8x12xf32, #tpu.memory_space<vmem>>, vector<1x1x8x12xf32>,
    %c61 = arith.constant 61 : index
    %c0_49 = arith.constant 0 : index
    %46 = vector.load %arg5[%c61, %c0_49] : memref<100x12xf32, #tpu.memory_space<vmem>>, vector<8x12xf32>
    %c0_50 = arith.constant 0 : index
    %c5 = arith.constant 5 : index
    %c0_51 = arith.constant 0 : index
    %c0_52 = arith.constant 0 : index
    %47 = vector.load %arg4[%c0_50, %c5, %c0_51, %c0_52] : memref<1x8x8x12xf32, #tpu.memory_space<vmem>>, vector<1x1x8x12xf32>
    %48 = vector.shape_cast %47 : vector<1x1x8x12xf32> to vector<8x12xf32>
    %49 = vector.shape_cast %46 : vector<8x12xf32> to vector<1x1x8x12xf32>
    tpu.vector_store %arg4[%c0_50, %c5, %c0_51, %c0_52], %49 {strides = array<i32>} : memref<1x8x8x12xf32, #tpu.memory_space<vmem>>, vector<1x1x8x12xf32>,
    %c71 = arith.constant 71 : index
    %c0_53 = arith.constant 0 : index
    %50 = vector.load %arg5[%c71, %c0_53] : memref<100x12xf32, #tpu.memory_space<vmem>>, vector<8x12xf32>
    %c0_54 = arith.constant 0 : index
    %c6 = arith.constant 6 : index
    %c0_55 = arith.constant 0 : index
    %c0_56 = arith.constant 0 : index
    %51 = vector.load %arg4[%c0_54, %c6, %c0_55, %c0_56] : memref<1x8x8x12xf32, #tpu.memory_space<vmem>>, vector<1x1x8x12xf32>
    %52 = vector.shape_cast %51 : vector<1x1x8x12xf32> to vector<8x12xf32>
    %53 = vector.shape_cast %50 : vector<8x12xf32> to vector<1x1x8x12xf32>
    tpu.vector_store %arg4[%c0_54, %c6, %c0_55, %c0_56], %53 {strides = array<i32>} : memref<1x8x8x12xf32, #tpu.memory_space<vmem>>, vector<1x1x8x12xf32>,
    %c81 = arith.constant 81 : index
    %c0_57 = arith.constant 0 : index
    %54 = vector.load %arg5[%c81, %c0_57] : memref<100x12xf32, #tpu.memory_space<vmem>>, vector<8x12xf32>
    %c0_58 = arith.constant 0 : index
    %c7 = arith.constant 7 : index
    %c0_59 = arith.constant 0 : index
    %c0_60 = arith.constant 0 : index
    %55 = vector.load %arg4[%c0_58, %c7, %c0_59, %c0_60] : memref<1x8x8x12xf32, #tpu.memory_space<vmem>>, vector<1x1x8x12xf32>
    %56 = vector.shape_cast %55 : vector<1x1x8x12xf32> to vector<8x12xf32>
    %57 = vector.shape_cast %54 : vector<8x12xf32> to vector<1x1x8x12xf32>
    tpu.vector_store %arg4[%c0_58, %c7, %c0_59, %c0_60], %57 {strides = array<i32>} : memref<1x8x8x12xf32, #tpu.memory_space<vmem>>, vector<1x1x8x12xf32>,
    return
  }
  func.func @transform_0(%arg0: i32) -> (i32, i32, i32) {
    %c0_i32 = arith.constant 0 : i32
    %c0_i32_0 = arith.constant 0 : i32
    %c0_i32_1 = arith.constant 0 : i32
    return %arg0, %c0_i32, %c0_i32_0 : i32, i32, i32
  }
  func.func @transform_1(%arg0: i32) -> (i32, i32) {
    %c0_i32 = arith.constant 0 : i32
    %c0_i32_0 = arith.constant 0 : i32
    %c0_i32_1 = arith.constant 0 : i32
    return %c0_i32, %c0_i32_0 : i32, i32
  }
  func.func @transform_2(%arg0: i32) -> (i32, i32) {
    %c0_i32 = arith.constant 0 : i32
    %c0_i32_0 = arith.constant 0 : i32
    %c0_i32_1 = arith.constant 0 : i32
    return %c0_i32, %c0_i32_0 : i32, i32
  }
  func.func @transform_3(%arg0: i32) -> (i32, i32, i32, i32) {
    %c0_i32 = arith.constant 0 : i32
    %c0_i32_0 = arith.constant 0 : i32
    %c0_i32_1 = arith.constant 0 : i32
    %c0_i32_2 = arith.constant 0 : i32
    return %arg0, %c0_i32, %c0_i32_0, %c0_i32_1 : i32, i32, i32, i32
  }
}

</mosaic_0001>

<bundles_post_ra>
// kernel: vqvae2_forward.14
= control target key start
LH: loop header
LB: loop body
LE: loop exit
PB: predicated region body
PF: predicated region fallthrough
CT: control target
= control target key end

     0   :  { %s1079_s12 = smov 0   ;;  %s1320_s0 = inlined_call_operand.vmem [shape: f32[2,4,32,8], index: 0, kind: input, shape index: {}]   ;;  %s1321_s1 = inlined_call_operand.vmem [shape: bf16[128,16], index: 1, kind: input, shape index: {}]   ;;  %s1322_s2 = inlined_call_operand.vmem [shape: f32[1,16], index: 2, kind: input, shape index: {}]   ;;  %s1323_s3 = inlined_call_operand.vmem [shape: f32[2,4,4,16], index: 3, kind: output, shape index: {}]  }
   0x1 LB: > { %s752_s13 = sadd.s32 4294967295, %s1042_s12   ;;  %p756_p0 = scmp.ge.s32.totalorder %s1042_s12, 1  ;;  %s1042_s12 = sphi %s1079_s12, %s13_s12  }
   0x2   : > { %p137_p1 = scmp.lt.s32.totalorder %s1042_s12, 3 }
   0x4   : > { %p138_p2 = pnand %p756_p0, %p137_p1 }
   0x5   : > { %p161_p3 = scmp.lt.s32.totalorder (!%p138_p2), %s752_s13, 1  ;;  %s1044_s18 = smov (!%p138_p2), 16   ;;  %v1028_v40 = vld [vmem:[%s1321_s1] sm:$0xff] (!%p138_p2)   ;;  %v1029_v42 = vld [vmem:[%s1321_s1 + $0x8] sm:$0xff] (!%p138_p2)   ;;  %v1030_v49 = vld [vmem:[%s1321_s1 + $0x10] sm:$0xff] (!%p138_p2)   ;;  %vm479_vm0 = vcmask (!%p138_p2), 64512  }
   0x6   : > { %141 = sbr.rel (%p138_p2) target bundleno = 426 (0x1aa), region = 32  ;;  %s1045_s19 = smov (!%p138_p2), 8   ;;  %835 = vmatprep.subr.bf16.mxu0 (!%p138_p2), %v1028_v40  ;;  %v1031_v56 = vld [vmem:[%s1321_s1 + $0x18] sm:$0xff] (!%p138_p2)   ;;  %v1032_v63 = vld [vmem:[%s1321_s1 + $0x20] sm:$0xff] (!%p138_p2)   ;;  %vm484_vm1 = vcmask (!%p138_p2), 130048   ;;  %vm489_vm2 = vcmask (!%p138_p2), 195584  }
   0x7   : > { %s1046_s20 = smov (!%p138_p2), 24   ;;  %s1047_s21 = smov (!%p138_p2), 32   ;;  %836 = vmatpush3.bf16.msra.mxu0 (!%p138_p2), %v1028_v40  ;;  %vm494_vm3 = vcmask (!%p138_p2), 261120   ;;  %vm499_vm4 = vcmask (!%p138_p2), 326656   ;;  %vm504_vm5 = vcmask (!%p138_p2), 392192   ;;  %vm509_vm6 = vcmask (!%p138_p2), 457728  }
   0x8   : > { %s1048_s22 = smov (!%p138_p2), 40   ;;  %s1049_s25 = smov (!%p138_p2), 48   ;;  %837 = vmatprep.subr.bf16.mxu0 (!%p138_p2), %v1029_v42  ;;  %vm514_vm7 = vcmask (!%p138_p2), 523264   ;;  %vm519_vm8 = vcmask (!%p138_p2), 588800   ;;  %vm524_vm9 = vcmask (!%p138_p2), 654336   ;;  %vm529_vm10 = vcmask (!%p138_p2), 719872  }
   0x9   : > { %s1050_s28 = smov (!%p138_p2), 56   ;;  %s1051_s4 = smov (!%p138_p2), 64   ;;  %vm534_vm11 = vcmask (!%p138_p2), 785408   ;;  %vm539_vm12 = vcmask (!%p138_p2), 850944   ;;  %vm544_vm13 = vcmask (!%p138_p2), 916480   ;;  %vm549_vm14 = vcmask (!%p138_p2), 982016  }
   0xa   : > { %s1052_s7 = smov (!%p138_p2), 72   ;;  %s1053_s10 = smov (!%p138_p2), 80   ;;  %vm686_vm15 = vcmask (!%p138_p2), 125952  }
   0xb   : > { %838 = vmatpush3.bf16.msra.mxu0 (!%p138_p2), %v1029_v42  ;;  %s1054_s15 = smov (!%p138_p2), 88   ;;  %s1057_s23 = smov (!%p138_p2), 112  }
   0xc   : > { %839 = vmatprep.subr.bf16.mxu0 (!%p138_p2), %v1030_v49  ;;  %s1058_s24 = smov (!%p138_p2), 120  }
   0xd   : > { %s1325_s13 = smov (!%p161_p3, %s752_s13), 1 }
   0xe   : > { %s823_s14 = sshll.u32 %s1325_s13, 7  ;;  %s824_s26 = sshll.u32 %s1325_s13, 4 }
   0xf   : > { %s1093_s17 = scalar_lea.vmem %s1320_s0, %s823_s14  ;;  %840 = vmatpush3.bf16.msra.mxu0 %v1030_v49  ;;  %s170_s29 = scalar_lea.vmem %s1323_s3, %s824_s26 }
  0x10   : > { %v181_v0 = vld [vmem:[%s1093_s17 + $0x1] sm:$0xff]  ;;  %v182_v1 = vld [vmem:[%s1093_s17 + $0x9] sm:$0xff]  ;;  %v183_v5 = vld [vmem:[%s1093_s17 + $0x11] sm:$0xff]  ;;  %841 = vmatprep.subr.bf16.mxu0 %v1031_v56 }
  0x11   : > { %v761_v2 = vld [vmem:[%s1093_s17 + $0x20] sm:$0xff]  ;;  %v888_v3 = vpack.i.bf16 %v182_v1, %v181_v0  ;;  %v762_v4 = vld [vmem:[%s1093_s17 + $0x28] sm:$0xff]  ;;  %v184_v6 = vld [vmem:[%s1093_s17 + $0x19] sm:$0x1] }
  0x12   : > { %v878_v7 = vpack.i.bf16 %v762_v4, %v761_v2  ;;  %v763_v8 = vld [vmem:[%s1093_s17 + $0x30] sm:$0xff]  ;;  %v764_v9 = vld [vmem:[%s1093_s17 + $0x38] sm:$0x1]  ;;  %v893_v10 = vpack.i.bf16 %v184_v6, %v183_v5  ;;  %v768_v13 = vld [vmem:[%s1093_s17 + $0x39] sm:$0x1] }
  0x13   : > { %889 = vrot.lane.b32.xlu1 %v888_v3, %s1044_s18  ;;  %v883_v11 = vpack.i.bf16 %v764_v9, %v763_v8  ;;  %v767_v12 = vld [vmem:[%s1093_s17 + $0x31] sm:$0xff]  ;;  %v765_v14 = vld [vmem:[%s1093_s17 + $0x21] sm:$0xff]  ;;  %v766_v15 = vld [vmem:[%s1093_s17 + $0x29] sm:$0xff]  ;;  %842 = vmatpush3.bf16.msra.mxu0 %v1031_v56 }
  0x14   : > { %879 = vrot.lane.b32.xlu0 %v878_v7, %s1045_s19  ;;  %v903_v16 = vpack.i.bf16 %v768_v13, %v767_v12  ;;  %v898_v17 = vpack.i.bf16 %v766_v15, %v765_v14  ;;  %v771_v18 = vld [vmem:[%s1093_s17 + $0x50] sm:$0xff]  ;;  %v772_v19 = vld [vmem:[%s1093_s17 + $0x58] sm:$0x1]  ;;  %v769_v20 = vld [vmem:[%s1093_s17 + $0x40] sm:$0xff]  ;;  %843 = vmatprep.subr.bf16.mxu0 %v1032_v63 }
  0x15   : > { %v770_v21 = vld [vmem:[%s1093_s17 + $0x48] sm:$0xff]  ;;  %v913_v22 = vpack.i.bf16 %v772_v19, %v771_v18  ;;  %v775_v24 = vld [vmem:[%s1093_s17 + $0x70] sm:$0xff]  ;;  %v776_v25 = vld [vmem:[%s1093_s17 + $0x78] sm:$0x1] }
  0x16   : > { %v908_v23 = vpack.i.bf16 %v770_v21, %v769_v20  ;;  %v773_v26 = vld [vmem:[%s1093_s17 + $0x60] sm:$0xff]  ;;  %v774_v27 = vld [vmem:[%s1093_s17 + $0x68] sm:$0xff]  ;;  %v923_v28 = vpack.i.bf16 %v776_v25, %v775_v24  ;;  %v779_v30 = vld [vmem:[%s1093_s17 + $0x51] sm:$0xff] }
  0x17   : > { %894 = vrot.lane.b32.xlu1 %v893_v10, %s1044_s18  ;;  %v918_v29 = vpack.i.bf16 %v774_v27, %v773_v26  ;;  %v780_v31 = vld [vmem:[%s1093_s17 + $0x59] sm:$0x1]  ;;  %v777_v32 = vld [vmem:[%s1093_s17 + $0x41] sm:$0xff]  ;;  %v778_v33 = vld [vmem:[%s1093_s17 + $0x49] sm:$0xff]  ;;  %844 = vmatpush3.bf16.msra.mxu0 %v1032_v63 }
  0x18   : > { %884 = vrot.lane.b32.xlu0 %v883_v11, %s1045_s19  ;;  %v933_v34 = vpack.i.bf16 %v780_v31, %v779_v30  ;;  %v928_v35 = vpack.i.bf16 %v778_v33, %v777_v32  ;;  %v783_v36 = vld [vmem:[%s1093_s17 + $0x71] sm:$0xff]  ;;  %v784_v37 = vld [vmem:[%s1093_s17 + $0x79] sm:$0x1]  ;;  %v781_v38 = vld [vmem:[%s1093_s17 + $0x61] sm:$0xff]  ;;  %s1055_s19 = smov 96  }
  0x19   : > { %v782_v39 = vld [vmem:[%s1093_s17 + $0x69] sm:$0xff]  ;;  %v943_v41 = vpack.i.bf16 %v784_v37, %v783_v36  ;;  %v209_v44 = vld [vmem:[%s1093_s17 + $0x15] sm:$0xff]  ;;  %v210_v45 = vld [vmem:[%s1093_s17 + $0x1d] sm:$0x1] }
  0x1a   : > { %v938_v43 = vpack.i.bf16 %v782_v39, %v781_v38  ;;  %v207_v46 = vld [vmem:[%s1093_s17 + $0x5] sm:$0xff]  ;;  %v208_v47 = vld [vmem:[%s1093_s17 + $0xd] sm:$0xff]  ;;  %v953_v48 = vpack.i.bf16 %v210_v45, %v209_v44  ;;  %v787_v51 = vld [vmem:[%s1093_s17 + $0x35] sm:$0xff] }
  0x1b   : > { %904 = vrot.lane.b32.xlu1 %v903_v16, %s1046_s20  ;;  %v948_v50 = vpack.i.bf16 %v208_v47, %v207_v46  ;;  %v788_v52 = vld [vmem:[%s1093_s17 + $0x3d] sm:$0x1]  ;;  %v785_v53 = vld [vmem:[%s1093_s17 + $0x25] sm:$0xff]  ;;  %v786_v54 = vld [vmem:[%s1093_s17 + $0x2d] sm:$0xff] }
  0x1c   : > { %899 = vrot.lane.b32.xlu0 %v898_v17, %s1046_s20  ;;  %v963_v55 = vpack.i.bf16 %v788_v52, %v787_v51  ;;  %v958_v57 = vpack.i.bf16 %v786_v54, %v785_v53  ;;  %v217_v58 = vld [vmem:[%s1093_s17 + $0x16] sm:$0xff]  ;;  %v218_v59 = vld [vmem:[%s1093_s17 + $0x1e] sm:$0x1]  ;;  %v215_v60 = vld [vmem:[%s1093_s17 + $0x6] sm:$0xff] }
  0x1d   : > { %v216_v61 = vld [vmem:[%s1093_s17 + $0xe] sm:$0xff]  ;;  %v973_v62 = vpack.i.bf16 %v218_v59, %v217_v58  ;;  %v791_v1 = vld [vmem:[%s1093_s17 + $0x36] sm:$0xff]  ;;  %v792_v2 = vld [vmem:[%s1093_s17 + $0x3e] sm:$0x1] }
  0x1e   : > { %v968_v0 = vpack.i.bf16 %v216_v61, %v215_v60  ;;  %v789_v3 = vld [vmem:[%s1093_s17 + $0x26] sm:$0xff]  ;;  %v790_v4 = vld [vmem:[%s1093_s17 + $0x2e] sm:$0xff]  ;;  %v983_v5 = vpack.i.bf16 %v792_v2, %v791_v1  ;;  %v796_v9 = vld [vmem:[%s1093_s17 + $0x5d] sm:$0x1] }
  0x1f   : > { %914 = vrot.lane.b32.xlu1 %v913_v22, %s1047_s21  ;;  %v1033_v6 = vld [vmem:[%s1321_s1 + $0x28] sm:$0xff]   ;;  %v978_v7 = vpack.i.bf16 %v790_v4, %v789_v3  ;;  %v795_v8 = vld [vmem:[%s1093_s17 + $0x55] sm:$0xff]  ;;  %v800_v16 = vld [vmem:[%s1093_s17 + $0x7d] sm:$0x1] }
  0x20   : > { %909 = vrot.lane.b32.xlu0 %v908_v23, %s1047_s21  ;;  %v793_v10 = vld [vmem:[%s1093_s17 + $0x45] sm:$0xff]  ;;  %v794_v11 = vld [vmem:[%s1093_s17 + $0x4d] sm:$0xff]  ;;  %845 = vmatprep.subr.bf16.mxu0 %v1033_v6  ;;  %v993_v12 = vpack.i.bf16 %v796_v9, %v795_v8  ;;  %v799_v15 = vld [vmem:[%s1093_s17 + $0x75] sm:$0xff] }
  0x21   : > { %v1034_v13 = vld [vmem:[%s1321_s1 + $0x30] sm:$0xff]   ;;  %v988_v14 = vpack.i.bf16 %v794_v11, %v793_v10  ;;  %846 = vmatpush3.bf16.msra.mxu0 %v1033_v6  ;;  %v797_v17 = vld [vmem:[%s1093_s17 + $0x65] sm:$0xff]  ;;  %v1003_v19 = vpack.i.bf16 %v800_v16, %v799_v15  ;;  %v1035_v20 = vld [vmem:[%s1321_s1 + $0x38] sm:$0xff]  }
  0x22   : > { %v798_v18 = vld [vmem:[%s1093_s17 + $0x6d] sm:$0xff]  ;;  %847 = vmatprep.subr.bf16.mxu0 %v1034_v13  ;;  %v803_v22 = vld [vmem:[%s1093_s17 + $0x56] sm:$0xff]  ;;  %v804_v23 = vld [vmem:[%s1093_s17 + $0x5e] sm:$0x1] }
  0x23   : > { %924 = vrot.lane.b32.xlu1 %v923_v28, %s1048_s22  ;;  %v998_v21 = vpack.i.bf16 %v798_v18, %v797_v17  ;;  %v801_v24 = vld [vmem:[%s1093_s17 + $0x46] sm:$0xff]  ;;  %v802_v25 = vld [vmem:[%s1093_s17 + $0x4e] sm:$0xff]  ;;  %v1013_v26 = vpack.i.bf16 %v804_v23, %v803_v22  ;;  %v807_v28 = vld [vmem:[%s1093_s17 + $0x76] sm:$0xff] }
  0x24   : > { %919 = vrot.lane.b32.xlu0 %v918_v29, %s1048_s22  ;;  %s1056_s22 = smov 104   ;;  %v1008_v27 = vpack.i.bf16 %v802_v25, %v801_v24  ;;  %v808_v29 = vld [vmem:[%s1093_s17 + $0x7e] sm:$0x1]  ;;  %v805_v30 = vld [vmem:[%s1093_s17 + $0x66] sm:$0xff]  ;;  %v806_v31 = vld [vmem:[%s1093_s17 + $0x6e] sm:$0xff] }
  0x25   : > { %848 = vmatpush3.bf16.msra.mxu0 %v1034_v13  ;;  %v1023_v32 = vpack.i.bf16 %v808_v29, %v807_v28  ;;  %v1018_v33 = vpack.i.bf16 %v806_v31, %v805_v30  ;;  %v173_v51 = vld [vmem:[%s1093_s17 + $0x8] sm:$0xff]  ;;  %v175_v56 = vld [vmem:[%s1093_s17 + $0x18] sm:$0x1] }
  0x26   : > { %849 = vmatprep.subr.bf16.mxu0 %v1035_v20 }
  0x27   : > { %934 = vrot.lane.b32.xlu1 %v933_v34, %s1049_s25 }
  0x28   : > { %929 = vrot.lane.b32.xlu0 %v928_v35, %s1049_s25 }
  0x29   : > { %850 = vmatpush3.bf16.msra.mxu0 %v1035_v20 }
  0x2b   : > { %944 = vrot.lane.b32.xlu1 %v943_v41, %s1050_s28 }
  0x2c   : > { %939 = vrot.lane.b32.xlu0 %v938_v43, %s1050_s28 }
  0x2f   : > { %954 = vrot.lane.b32.xlu1 %v953_v48, %s1051_s4 }
  0x30   : > { %949 = vrot.lane.b32.xlu0 %v948_v50, %s1051_s4  ;;  %v172_v50 = vld [vmem:[%s1093_s17] sm:$0xff] }
  0x33   : > { %964 = vrot.lane.b32.xlu1 %v963_v55, %s1052_s7  ;;  %v174_v55 = vld [vmem:[%s1093_s17 + $0x10] sm:$0xff] }
  0x34   : > { %959 = vrot.lane.b32.xlu0 %v958_v57, %s1052_s7 }
  0x37   : > { %974 = vrot.lane.b32.xlu1 %v973_v62, %s1053_s10 }
  0x38   : > { %969 = vrot.lane.b32.xlu0 %v968_v0, %s1053_s10 }
  0x3b   : > { %984 = vrot.lane.b32.xlu1 %v983_v5, %s1054_s15 }
  0x3c   : > { %979 = vrot.lane.b32.xlu0 %v978_v7, %s1054_s15 }
  0x3f   : > { %994 = vrot.lane.b32.xlu1 %v993_v12, %s1055_s19 }
  0x40   : > { %989 = vrot.lane.b32.xlu0 %v988_v14, %s1055_s19 }
  0x43   : > { %1004 = vrot.lane.b32.xlu1 %v1003_v19, %s1056_s22 }
  0x44   : > { %999 = vrot.lane.b32.xlu0 %v998_v21, %s1056_s22 }
  0x47   : > { %1014 = vrot.lane.b32.xlu1 %v1013_v26, %s1057_s23 }
  0x48   : > { %1009 = vrot.lane.b32.xlu0 %v1008_v27, %s1057_s23 }
  0x4b   : > { %1024 = vrot.lane.b32.xlu1 %v1023_v32, %s1058_s24 }
  0x4c   : > { %1019 = vrot.lane.b32.xlu0 %v1018_v33, %s1058_s24 }
  0x85   : > { %v890_v34 = vpop.permute.xlu1 %889 }
  0x86   : > { %v880_v35 = vpop.permute.xlu0 %879  ;;  %v892_v58 = vunpack.i.h.bf16 %v890_v34  ;;  %v891_v59 = vunpack.i.l.bf16 %v890_v34 }
  0x87   : > { %v882_v48 = vunpack.i.h.bf16 %v880_v35  ;;  %v881_v49 = vunpack.i.l.bf16 %v880_v35 }
  0x89   : > { %v895_v36 = vpop.permute.xlu1 %894  ;;  %v480_v60 = vsel %vm479_vm0, %v172_v50, %v881_v49  ;;  %v481_v61 = vsel %vm479_vm0, %v173_v51, %v882_v48 }
  0x8a   : > { %v885_v37 = vpop.permute.xlu0 %884  ;;  %v897_v62 = vunpack.i.h.bf16 %v895_v36  ;;  %v896_v63 = vunpack.i.l.bf16 %v895_v36  ;;  %v485_v8 = vsel %vm484_vm1, %v480_v60, %v891_v59  ;;  %v486_v9 = vsel %vm484_vm1, %v481_v61, %v892_v58 }
  0x8b   : > { %v887_v52 = vunpack.i.h.bf16 %v885_v37  ;;  %v886_v53 = vunpack.i.l.bf16 %v885_v37 }
  0x8d   : > { %v905_v38 = vpop.permute.xlu1 %904  ;;  %v482_v0 = vsel %vm479_vm0, %v174_v55, %v886_v53  ;;  %v483_v1 = vsel %vm479_vm0, %v175_v56, %v887_v52 }
  0x8e   : > { %v900_v39 = vpop.permute.xlu0 %899  ;;  %v907_v3 = vunpack.i.h.bf16 %v905_v38  ;;  %v906_v4 = vunpack.i.l.bf16 %v905_v38  ;;  %v487_v10 = vsel %vm484_vm1, %v482_v0, %v896_v63  ;;  %v488_v11 = vsel %vm484_vm1, %v483_v1, %v897_v62 }
  0x8f   : > { %v902_v6 = vunpack.i.h.bf16 %v900_v39  ;;  %v901_v7 = vunpack.i.l.bf16 %v900_v39 }
  0x90   : > { %v492_v19 = vsel %vm489_vm2, %v487_v10, %v906_v4  ;;  %v493_v20 = vsel %vm489_vm2, %v488_v11, %v907_v3 }
  0x91   : > { %v1179_v40 = vpop.permute.xlu1 %914  ;;  %v490_v24 = vsel %vm489_vm2, %v485_v8, %v901_v7  ;;  %v491_v25 = vsel %vm489_vm2, %v486_v9, %v902_v6 }
  0x92   : > { %v1181_v41 = vpop.permute.xlu0 %909  ;;  %v917_v12 = vunpack.i.h.bf16 %v1179_v40  ;;  %v916_v13 = vunpack.i.l.bf16 %v1179_v40 }
  0x93   : > { %v912_v14 = vunpack.i.h.bf16 %v1181_v41  ;;  %v911_v15 = vunpack.i.l.bf16 %v1181_v41 }
  0x94   : > { %v497_v28 = vsel %vm494_vm3, %v492_v19, %v916_v13  ;;  %v498_v29 = vsel %vm494_vm3, %v493_v20, %v917_v12 }
  0x95   : > { %v1183_v42 = vpop.permute.xlu1 %924  ;;  %v495_v32 = vsel %vm494_vm3, %v490_v24, %v911_v15  ;;  %v496_v33 = vsel %vm494_vm3, %v491_v25, %v912_v14 }
  0x96   : > { %v1185_v43 = vpop.permute.xlu0 %919  ;;  %v927_v16 = vunpack.i.h.bf16 %v1183_v42  ;;  %v926_v17 = vunpack.i.l.bf16 %v1183_v42 }
  0x97   : > { %v922_v21 = vunpack.i.h.bf16 %v1185_v43  ;;  %v921_v22 = vunpack.i.l.bf16 %v1185_v43 }
  0x98   : > { %v502_v34 = vsel %vm499_vm4, %v497_v28, %v926_v17  ;;  %v503_v35 = vsel %vm499_vm4, %v498_v29, %v927_v16 }
  0x99   : > { %v1187_v44 = vpop.permute.xlu1 %934  ;;  %v500_v37 = vsel %vm499_vm4, %v495_v32, %v921_v22  ;;  %v501_v38 = vsel %vm499_vm4, %v496_v33, %v922_v21 }
  0x9a   : > { %v1189_v45 = vpop.permute.xlu0 %929  ;;  %v937_v26 = vunpack.i.h.bf16 %v1187_v44  ;;  %v936_v27 = vunpack.i.l.bf16 %v1187_v44 }
  0x9b   : > { %v932_v30 = vunpack.i.h.bf16 %v1189_v45  ;;  %v931_v31 = vunpack.i.l.bf16 %v1189_v45 }
  0x9c   : > { %v507_v42 = vsel %vm504_vm5, %v502_v34, %v936_v27  ;;  %v508_v43 = vsel %vm504_vm5, %v503_v35, %v937_v26 }
  0x9d   : > { %v1191_v46 = vpop.permute.xlu1 %944  ;;  %v505_v48 = vsel %vm504_vm5, %v500_v37, %v931_v31  ;;  %v506_v49 = vsel %vm504_vm5, %v501_v38, %v932_v30 }
  0x9e   : > { %v1193_v47 = vpop.permute.xlu0 %939  ;;  %v947_v39 = vunpack.i.h.bf16 %v1191_v46  ;;  %v946_v40 = vunpack.i.l.bf16 %v1191_v46 }
  0x9f   : > { %v942_v44 = vunpack.i.h.bf16 %v1193_v47  ;;  %v941_v45 = vunpack.i.l.bf16 %v1193_v47 }
  0xa0   : > { %v512_v47 = vsel %vm509_vm6, %v507_v42, %v946_v40  ;;  %v513_v58 = vsel %vm509_vm6, %v508_v43, %v947_v39 }
  0xa1   : > { %v1197_v54 = vpop.permute.xlu1 %954 }
  0xa2   : > { %v1201_v57 = vpop.permute.xlu0 %949  ;;  %v957_v50 = vunpack.i.h.bf16 %v1197_v54  ;;  %v956_v51 = vunpack.i.l.bf16 %v1197_v54  ;;  %v510_v54 = vsel %vm509_vm6, %v505_v48, %v941_v45 }
  0xa3   : > { %v952_v46 = vunpack.i.h.bf16 %v1201_v57  ;;  %v951_v52 = vunpack.i.l.bf16 %v1201_v57  ;;  %v511_v57 = vsel %vm509_vm6, %v506_v49, %v942_v44 }
  0xa4   : > { %v517_v0 = vsel %vm514_vm7, %v512_v47, %v956_v51  ;;  %v518_v1 = vsel %vm514_vm7, %v513_v58, %v957_v50 }
  0xa5   : > { %v1207_v2 = vpop.permute.xlu1 %964  ;;  %v515_v4 = vsel %vm514_vm7, %v510_v54, %v951_v52 }
  0xa6   : > { %v1209_v5 = vpop.permute.xlu0 %959  ;;  %v967_v53 = vunpack.i.h.bf16 %v1207_v2  ;;  %v966_v55 = vunpack.i.l.bf16 %v1207_v2 }
  0xa7   : > { %v962_v59 = vunpack.i.h.bf16 %v1209_v5  ;;  %v961_v60 = vunpack.i.l.bf16 %v1209_v5  ;;  %v516_v5 = vsel %vm514_vm7, %v511_v57, %v952_v46 }
  0xa8   : > { %v522_v6 = vsel %vm519_vm8, %v517_v0, %v966_v55  ;;  %v523_v7 = vsel %vm519_vm8, %v518_v1, %v967_v53 }
  0xa9   : > { %v1221_v18 = vpop.permute.xlu1 %974  ;;  %v520_v9 = vsel %vm519_vm8, %v515_v4, %v961_v60  ;;  %v521_v10 = vsel %vm519_vm8, %v516_v5, %v962_v59 }
  0xaa   : > { %v1227_v23 = vpop.permute.xlu0 %969  ;;  %v977_v62 = vunpack.i.h.bf16 %v1221_v18  ;;  %v976_v63 = vunpack.i.l.bf16 %v1221_v18 }
  0xab   : > { %v972_v2 = vunpack.i.h.bf16 %v1227_v23  ;;  %v971_v3 = vunpack.i.l.bf16 %v1227_v23 }
  0xac   : > { %v527_v14 = vsel %vm524_vm9, %v522_v6, %v976_v63  ;;  %v528_v15 = vsel %vm524_vm9, %v523_v7, %v977_v62  ;;  %v809_v62 = vld [vmem:[%s1322_s2] ss:$0 sm:$0xff] }
  0xad   : > { %v1241_v36 = vpop.permute.xlu1 %984  ;;  %v525_v18 = vsel %vm524_vm9, %v520_v9, %v971_v3  ;;  %v526_v19 = vsel %vm524_vm9, %v521_v10, %v972_v2 }
  0xae   : > { %v1247_v41 = vpop.permute.xlu0 %979  ;;  %v987_v11 = vunpack.i.h.bf16 %v1241_v36  ;;  %v986_v12 = vunpack.i.l.bf16 %v1241_v36 }
  0xaf   : > { %v982_v16 = vunpack.i.h.bf16 %v1247_v41  ;;  %v981_v17 = vunpack.i.l.bf16 %v1247_v41 }
  0xb0   : > { %v532_v27 = vsel %vm529_vm10, %v527_v14, %v986_v12  ;;  %v533_v28 = vsel %vm529_vm10, %v528_v15, %v987_v11 }
  0xb1   : > { %v995_v56 = vpop.permute.xlu1 %994  ;;  %v530_v32 = vsel %vm529_vm10, %v525_v18, %v981_v17  ;;  %v531_v33 = vsel %vm529_vm10, %v526_v19, %v982_v16 }
  0xb2   : > { %v990_v61 = vpop.permute.xlu0 %989  ;;  %v997_v20 = vunpack.i.h.bf16 %v995_v56  ;;  %v996_v21 = vunpack.i.l.bf16 %v995_v56 }
  0xb3   : > { %v992_v22 = vunpack.i.h.bf16 %v990_v61  ;;  %v991_v23 = vunpack.i.l.bf16 %v990_v61 }
  0xb4   : > { %v537_v36 = vsel %vm534_vm11, %v532_v27, %v996_v21  ;;  %v538_v37 = vsel %vm534_vm11, %v533_v28, %v997_v20 }
  0xb5   : > { %v1005_v8 = vpop.permute.xlu1 %1004  ;;  %v535_v40 = vsel %vm534_vm11, %v530_v32, %v991_v23  ;;  %v536_v41 = vsel %vm534_vm11, %v531_v33, %v992_v22 }
  0xb6   : > { %v1000_v13 = vpop.permute.xlu0 %999  ;;  %v1007_v24 = vunpack.i.h.bf16 %v1005_v8  ;;  %v1006_v25 = vunpack.i.l.bf16 %v1005_v8 }
  0xb7   : > { %v1002_v29 = vunpack.i.h.bf16 %v1000_v13  ;;  %v1001_v30 = vunpack.i.l.bf16 %v1000_v13 }
  0xb8   : > { %v542_v42 = vsel %vm539_vm12, %v537_v36, %v1006_v25  ;;  %v543_v43 = vsel %vm539_vm12, %v538_v37, %v1007_v24 }
  0xb9   : > { %v1015_v26 = vpop.permute.xlu1 %1014  ;;  %v540_v50 = vsel %vm539_vm12, %v535_v40, %v1001_v30  ;;  %v541_v51 = vsel %vm539_vm12, %v536_v41, %v1002_v29 }
  0xba   : > { %v1010_v31 = vpop.permute.xlu0 %1009  ;;  %v1017_v34 = vunpack.i.h.bf16 %v1015_v26  ;;  %v1016_v35 = vunpack.i.l.bf16 %v1015_v26 }
  0xbb   : > { %v1012_v38 = vunpack.i.h.bf16 %v1010_v31  ;;  %v1011_v39 = vunpack.i.l.bf16 %v1010_v31 }
  0xbc   : > { %v547_v46 = vsel %vm544_vm13, %v542_v42, %v1016_v35  ;;  %v548_v52 = vsel %vm544_vm13, %v543_v43, %v1017_v34 }
  0xbd   : > { %v1025_v44 = vpop.permute.xlu1 %1024  ;;  %v545_v56 = vsel %vm544_vm13, %v540_v50, %v1011_v39  ;;  %v546_v47 = vsel %vm544_vm13, %v541_v51, %v1012_v38 }
  0xbe   : > { %v1027_v45 = vunpack.i.h.bf16 %v1025_v44  ;;  %v1026_v48 = vunpack.i.l.bf16 %v1025_v44  ;;  %v1020_v49 = vpop.permute.xlu0 %1019 }
  0xbf   : > { %v1022_v53 = vunpack.i.h.bf16 %v1020_v49  ;;  %v1021_v55 = vunpack.i.l.bf16 %v1020_v49 }
  0xc0   : > { %v552_v58 = vsel %vm549_vm14, %v547_v46, %v1026_v48  ;;  %v553_v59 = vsel %vm549_vm14, %v548_v52, %v1027_v45 }
  0xc1   : > { %v550_v60 = vsel %vm549_vm14, %v545_v56, %v1021_v55  ;;  %v551_v61 = vsel %vm549_vm14, %v546_v47, %v1022_v53  ;;  %v555_v54 = vpack.c.bf16 %v553_v59, %v552_v58 }
  0xc2   : > { %v554_v57 = vpack.c.bf16 %v551_v61, %v550_v60 }
  0xc4   : > { %851 = vmatprep.mubr.bf16.mxu0 %v554_v57 }
  0xc5   : > { %852 = vmatmul.mubr.bf16.vlgmr.msra.gmra.mrb[0].mxu0 %v555_v54 }
 0x198   : > { %v853_v63 = vpop.f32.mrb[0].mxu0 }
 0x199   : > { %v670_v0 = vadd.f32 %v853_v63, %v809_v62  ;;  %v661_v1 = vpop.f32.mrb[1].mxu0 }
 0x19a   : > { %v662_v2 = vadd.f32 %v809_v62, %v661_v1  ;;  %v854_v3 = vpop.f32.mrb[2].mxu0 }
 0x19b   : > { %v678_v4 = vmax.f32 %v670_v0, 0.0  ;;  %v664_v5 = vpop.f32.mrb[3].mxu0 }
 0x19c   : > { %v676_v6 = vmax.f32 %v662_v2, 0.0  ;;  %v665_v7 = vadd.f32 %v809_v62, %v664_v5 }
 0x19d   : > { %682 = vst.msk [vmem:[#allocation2 + $0x10] sm:$0xff] %vm484_vm1, %v678_v4 }
 0x19e   : > { %680 = vst.msk [vmem:[#allocation2] sm:$0xff] %vm484_vm1, %v676_v6  ;;  %v677_v8 = vmax.f32 %v665_v7, 0.0 }
 0x1a0   : > { %681 = vst.msk [vmem:[#allocation2 + $0x8] sm:$0xff] %vm484_vm1, %v677_v8 }
 0x1a5   : > { %v685_v9 = vld [vmem:[#allocation2] sm:$0xf] }
 0x1a6   : > { %687 = vst.msk [vmem:[%s170_s29] sm:$0xf] %vm686_vm15, %v685_v9 }
 0x1a7   : > { %v688_v10 = vld [vmem:[#allocation2 + $0x5] sm:$0xf]  ;;  %v691_v11 = vld [vmem:[#allocation2 + $0xa] sm:$0xf]  ;;  %v694_v12 = vld [vmem:[#allocation2 + $0xf] sm:$0xf] }
 0x1a8   : > { %818 = vst.msk [vmem:[%s170_s29 + $0x4] sm:$0xf] %vm686_vm15, %v688_v10  ;;  %819 = vst.msk [vmem:[%s170_s29 + $0x8] sm:$0xf] %vm686_vm15, %v691_v11 }
 0x1a9   : > { %820 = vst.msk [vmem:[%s170_s29 + $0xc] sm:$0xf] %vm686_vm15, %v694_v12 }
 0x1aa PF: > { %s13_s12 = sadd.s32 1, %s1042_s12  }
 0x1ab   : > { %p10_p4 = scmp.ge.s32.totalorder %s13_s12, 4  }
 0x1ad   :  { %12 = sbr.rel (!%p10_p4) target bundleno = 1 (0x1), region = 68 }

// kernel: vqvae2_forward.13
= control target key start
LH: loop header
LB: loop body
LE: loop exit
PB: predicated region body
PF: predicated region fallthrough
CT: control target
= control target key end

     0   :  { %s2017_s12 = smov 0   ;;  %s2799_s0 = inlined_call_operand.vmem [shape: f32[2,4,92,8], index: 0, kind: input, shape index: {}]   ;;  %s2800_s1 = inlined_call_operand.vmem [shape: bf16[128,8], index: 1, kind: input, shape index: {}]   ;;  %s2801_s2 = inlined_call_operand.vmem [shape: f32[1,8], index: 2, kind: input, shape index: {}]   ;;  %s2802_s3 = inlined_call_operand.vmem [shape: f32[2,8,8,8], index: 3, kind: output, shape index: {}]  }
   0x1 LB: > { %s1377_s13 = sadd.s32 4294967295, %s1980_s12   ;;  %p1381_p0 = scmp.ge.s32.totalorder %s1980_s12, 1  ;;  %s1980_s12 = sphi %s2017_s12, %s13_s12  }
   0x2   : > { %p137_p1 = scmp.lt.s32.totalorder %s1980_s12, 3 }
   0x4   : > { %p138_p2 = pnand %p1381_p0, %p137_p1 }
   0x5   : > { %p161_p3 = scmp.lt.s32.totalorder (!%p138_p2), %s1377_s13, 1  ;;  %s1982_s18 = smov (!%p138_p2), 8   ;;  %vm939_vm0 = vcmask (!%p138_p2), 64512   ;;  %vm951_vm1 = vcmask (!%p138_p2), 130048   ;;  %vm963_vm2 = vcmask (!%p138_p2), 195584   ;;  %vm975_vm3 = vcmask (!%p138_p2), 261120  }
   0x6   : > { %141 = sbr.rel (%p138_p2) target bundleno = 544 (0x220), region = 32  ;;  %s1983_s19 = smov (!%p138_p2), 16   ;;  %vm987_vm4 = vcmask (!%p138_p2), 326656   ;;  %vm999_vm5 = vcmask (!%p138_p2), 392192   ;;  %vm1011_vm6 = vcmask (!%p138_p2), 457728   ;;  %vm1023_vm7 = vcmask (!%p138_p2), 523264  }
   0x7   : > { %s1984_s20 = smov (!%p138_p2), 24   ;;  %s1985_s21 = smov (!%p138_p2), 32   ;;  %vm1035_vm8 = vcmask (!%p138_p2), 588800   ;;  %vm1047_vm9 = vcmask (!%p138_p2), 654336   ;;  %vm1059_vm10 = vcmask (!%p138_p2), 719872   ;;  %vm1071_vm11 = vcmask (!%p138_p2), 785408  }
   0x8   : > { %s1986_s22 = smov (!%p138_p2), 40   ;;  %s1987_s23 = smov (!%p138_p2), 48   ;;  %vm1083_vm12 = vcmask (!%p138_p2), 850944   ;;  %vm1095_vm13 = vcmask (!%p138_p2), 916480   ;;  %vm1107_vm14 = vcmask (!%p138_p2), 982016  }
   0x9   : > { %s1988_s24 = smov (!%p138_p2), 56   ;;  %s1989_s25 = smov (!%p138_p2), 64  }
   0xa   : > { %s1990_s26 = smov (!%p138_p2), 72   ;;  %s1991_s27 = smov (!%p138_p2), 80  }
   0xb   : > { %s1992_s28 = smov (!%p138_p2), 88   ;;  %s1993_s29 = smov (!%p138_p2), 96  }
   0xc   : > { %s1994_s9 = smov (!%p138_p2), 104   ;;  %s1996_s30 = smov (!%p138_p2), 120  }
   0xd   : > { %s2804_s13 = smov (!%p161_p3, %s1377_s13), 1 }
   0xe   : > { %s1567_s14 = smul.u32 384, %s2804_s13 }
  0x10   : > { %s2031_s17 = scalar_lea.vmem %s2799_s0, %s1567_s14 }
  0x11   : > { %v1389_v0 = vld [vmem:[%s2031_s17 + $0x80] sm:$0xff]  ;;  %v1390_v1 = vld [vmem:[%s2031_s17 + $0x88] sm:$0xff]  ;;  %v1391_v5 = vld [vmem:[%s2031_s17 + $0x90] sm:$0xff] }
  0x12   : > { %v1385_v2 = vld [vmem:[%s2031_s17 + $0x60] sm:$0xff]  ;;  %v1601_v3 = vpack.i.bf16 %v1390_v1, %v1389_v0  ;;  %v1386_v4 = vld [vmem:[%s2031_s17 + $0x68] sm:$0xff]  ;;  %v1392_v6 = vld [vmem:[%s2031_s17 + $0x98] sm:$0xff] }
  0x13   : > { %v1591_v7 = vpack.i.bf16 %v1386_v4, %v1385_v2  ;;  %v1387_v8 = vld [vmem:[%s2031_s17 + $0x70] sm:$0xff]  ;;  %v1388_v9 = vld [vmem:[%s2031_s17 + $0x78] sm:$0xff]  ;;  %v1606_v10 = vpack.i.bf16 %v1392_v6, %v1391_v5  ;;  %v1393_v12 = vld [vmem:[%s2031_s17 + $0xa0] sm:$0xff] }
  0x14   : > { %1602 = vrot.lane.b32.xlu1 %v1601_v3, %s1982_s18  ;;  %v1596_v11 = vpack.i.bf16 %v1388_v9, %v1387_v8  ;;  %v1394_v13 = vld [vmem:[%s2031_s17 + $0xa8] sm:$0xff]  ;;  %v1395_v14 = vld [vmem:[%s2031_s17 + $0xb0] sm:$0x1]  ;;  %v2045_v16 = vld [vmem:[%s2031_s17 + $0x31] sm:$0xff] }
  0x15   : > { %1592 = vrot.lane.b32.xlu0 %v1591_v7, %s1982_s18  ;;  %v1611_v15 = vpack.i.bf16 %v1394_v13, %v1393_v12  ;;  %v2048_v17 = vld [vmem:[%s2031_s17 + $0x39] sm:$0xff]  ;;  %v2051_v18 = vld [vmem:[%s2031_s17 + $0x21] sm:$0xff]  ;;  %v2054_v19 = vld [vmem:[%s2031_s17 + $0x29] sm:$0xff] }
  0x16   : > { %v1621_v20 = vpack.i.bf16 %v2048_v17, %v2045_v16  ;;  %v1616_v21 = vpack.i.bf16 %v2054_v19, %v2051_v18  ;;  %v2061_v22 = vld [vmem:[%s2031_s17 + $0x91] sm:$0xff]  ;;  %v2064_v23 = vld [vmem:[%s2031_s17 + $0x99] sm:$0xff]  ;;  %v2067_v24 = vld [vmem:[%s2031_s17 + $0x81] sm:$0xff]  ;;  %v1681_v4 = vpack.i.bf16 %v2045_v16, %v2054_v19 }
  0x17   : > { %v2070_v25 = vld [vmem:[%s2031_s17 + $0x89] sm:$0xff]  ;;  %v2073_v26 = vld [vmem:[%s2031_s17 + $0x19] sm:$0xff]  ;;  %v2079_v28 = vld [vmem:[%s2031_s17 + $0x71] sm:$0xff]  ;;  %v1631_v31 = vpack.i.bf16 %v2064_v23, %v2061_v22 }
  0x18   : > { %1607 = vrot.lane.b32.xlu1 %v1606_v10, %s1982_s18  ;;  %v2076_v27 = vld [vmem:[%s2031_s17 + $0x69] sm:$0xff]  ;;  %v2082_v29 = vld [vmem:[%s2031_s17 + $0x79] sm:$0xff]  ;;  %v1836_v30 = vpack.i.bf16 %v2051_v18, %v2073_v26  ;;  %v1626_v34 = vpack.i.bf16 %v2070_v25, %v2067_v24  ;;  %v2108_v46 = vld [vmem:[%s2031_s17 + $0xe1] sm:$0xff] }
  0x19   : > { %1597 = vrot.lane.b32.xlu0 %v1596_v11, %s1982_s18  ;;  %v1841_v32 = vpack.i.bf16 %v2079_v28, %v2076_v27  ;;  %v1861_v33 = vpack.i.bf16 %v2067_v24, %v2082_v29  ;;  %v1413_v35 = vld [vmem:[%s2031_s17 + $0xf0] sm:$0xff]  ;;  %v1414_v36 = vld [vmem:[%s2031_s17 + $0xf8] sm:$0xff]  ;;  %v1411_v37 = vld [vmem:[%s2031_s17 + $0xe0] sm:$0xff]  ;;  %v1711_v16 = vpack.i.bf16 %v2082_v29, %v2079_v28 }
  0x1a   : > { %v1412_v38 = vld [vmem:[%s2031_s17 + $0xe8] sm:$0xff]  ;;  %v1641_v39 = vpack.i.bf16 %v1414_v36, %v1413_v35  ;;  %v1424_v41 = vld [vmem:[%s2031_s17 + $0x150] sm:$0xff]  ;;  %v1425_v42 = vld [vmem:[%s2031_s17 + $0x158] sm:$0xff] }
  0x1b   : > { %v1636_v40 = vpack.i.bf16 %v1412_v38, %v1411_v37  ;;  %v1422_v43 = vld [vmem:[%s2031_s17 + $0x140] sm:$0xff]  ;;  %v1423_v44 = vld [vmem:[%s2031_s17 + $0x148] sm:$0xff]  ;;  %v1651_v45 = vpack.i.bf16 %v1425_v42, %v1424_v41  ;;  %v2115_v49 = vld [vmem:[%s2031_s17 + $0xf1] sm:$0xff] }
  0x1c   : > { %346 = vrot.lane.b32.xlu1 %v1395_v14, %s1982_s18  ;;  %v2111_v47 = vld [vmem:[%s2031_s17 + $0xd9] sm:$0xff]  ;;  %v1646_v48 = vpack.i.bf16 %v1423_v44, %v1422_v43  ;;  %v2123_v52 = vld [vmem:[%s2031_s17 + $0xe9] sm:$0xff]  ;;  %v195_v55 = vld [vmem:[%s2031_s17 + $0x1] sm:$0xff]  ;;  %v1701_v14 = vpack.i.bf16 %v2061_v22, %v2070_v25 }
  0x1d   : > { %1612 = vrot.lane.b32.xlu0 %v1611_v15, %s1982_s18  ;;  %v2118_v50 = vld [vmem:[%s2031_s17 + $0xf9] sm:$0xff]  ;;  %v1911_v51 = vpack.i.bf16 %v2108_v46, %v2111_v47  ;;  %v1656_v54 = vpack.i.bf16 %v2123_v52, %v2108_v46  ;;  %v2133_v56 = vld [vmem:[%s2031_s17 + $0x9] sm:$0xff]  ;;  %v2136_v57 = vld [vmem:[%s2031_s17 + $0x141] sm:$0xff] }
  0x1e   : > { %v1661_v53 = vpack.i.bf16 %v2118_v50, %v2115_v49  ;;  %v2139_v58 = vld [vmem:[%s2031_s17 + $0x149] sm:$0xff]  ;;  %v2142_v59 = vld [vmem:[%s2031_s17 + $0x139] sm:$0xff]  ;;  %v1671_v61 = vpack.i.bf16 %v2133_v56, %v195_v55  ;;  %v2152_v63 = vld [vmem:[%s2031_s17 + $0x151] sm:$0xff] }
  0x1f   : > { %v1926_v60 = vpack.i.bf16 %v2136_v57, %v2142_v59  ;;  %v1666_v62 = vpack.i.bf16 %v2139_v58, %v2136_v57  ;;  %v2155_v0 = vld [vmem:[%s2031_s17 + $0x159] sm:$0xff]  ;;  %v2158_v1 = vld [vmem:[%s2031_s17 + $0x49] sm:$0xff]  ;;  %v2161_v2 = vld [vmem:[%s2031_s17 + $0x51] sm:$0xff] }
  0x20   : > { %1622 = vrot.lane.b32.xlu1 %v1621_v20, %s1983_s19  ;;  %v1856_v3 = vpack.i.bf16 %v2161_v2, %v2158_v1  ;;  %v2169_v5 = vld [vmem:[%s2031_s17 + $0xa9] sm:$0xff]  ;;  %v2172_v6 = vld [vmem:[%s2031_s17 + $0xb1] sm:$0xff]  ;;  %v1676_v7 = vpack.i.bf16 %v2155_v0, %v2152_v63  ;;  %v1396_v8 = vld [vmem:[%s2031_s17 + $0x61] sm:$0xff] }
  0x21   : > { %1617 = vrot.lane.b32.xlu0 %v1616_v21, %s1983_s19  ;;  %v1876_v9 = vpack.i.bf16 %v2172_v6, %v2169_v5  ;;  %v2181_v10 = vld [vmem:[%s2031_s17 + $0x11] sm:$0xff]  ;;  %v1691_v11 = vpack.i.bf16 %v2076_v27, %v1396_v8  ;;  %v203_v13 = vld [vmem:[%s2031_s17 + $0x41] sm:$0xff] }
  0x22   : > { %v1686_v12 = vpack.i.bf16 %v2073_v26, %v2181_v10  ;;  %v1696_v15 = vpack.i.bf16 %v203_v13, %v2048_v17  ;;  %v1706_v19 = vpack.i.bf16 %v2158_v1, %v203_v13  ;;  %v1404_v20 = vld [vmem:[%s2031_s17 + $0xa1] sm:$0xff]  ;;  %v205_v35 = vld [vmem:[%s2031_s17 + $0x51] sm:$0x1]  ;;  %v1410_v38 = vld [vmem:[%s2031_s17 + $0xd8] sm:$0xff] }
  0x23   : > { %v1407_v21 = vld [vmem:[%s2031_s17 + $0xc0] sm:$0xff]  ;;  %v1408_v22 = vld [vmem:[%s2031_s17 + $0xc8] sm:$0xff]  ;;  %v1721_v17 = vpack.i.bf16 %v1404_v20, %v2064_v23  ;;  %v1409_v37 = vld [vmem:[%s2031_s17 + $0xd0] sm:$0xff] }
  0x24   : > { %1632 = vrot.lane.b32.xlu1 %v1631_v31, %s1984_s20  ;;  %v1716_v25 = vpack.i.bf16 %v1408_v22, %v1407_v21  ;;  %v271_v31 = vld [vmem:[%s2031_s17 + $0x2a] sm:$0xff]  ;;  %v1736_v23 = vpack.i.bf16 %v1410_v38, %v1409_v37  ;;  %v274_v41 = vld [vmem:[%s2031_s17 + $0x42] sm:$0xff]  ;;  %v1776_v21 = vpack.i.bf16 %v2115_v49, %v2123_v52 }
  0x25   : > { %1627 = vrot.lane.b32.xlu0 %v1626_v34, %s1984_s20  ;;  %v272_v34 = vld [vmem:[%s2031_s17 + $0x32] sm:$0xff]  ;;  %v1418_v42 = vld [vmem:[%s2031_s17 + $0x120] sm:$0xff]  ;;  %v1419_v43 = vld [vmem:[%s2031_s17 + $0x128] sm:$0xff] }
  0x26   : > { %v1726_v36 = vpack.i.bf16 %v272_v34, %v271_v31  ;;  %v1460_v13 = vld [vmem:[%s2031_s17 + $0xa2] sm:$0xff]  ;;  %v2247_v22 = vld [vmem:[%s2031_s17 + $0xd1] sm:$0xff] }
  0x27   : > { %v1786_v31 = vpack.i.bf16 %v2111_v47, %v2247_v22  ;;  %v2258_v37 = vld [vmem:[%s2031_s17 + $0x129] sm:$0xff]  ;;  %v1966_v49 = vld [vmem:[%s2800_s1] sm:$0xff]   ;;  %v1450_v18 = vld [vmem:[%s2031_s17 + $0x171] sm:$0x1] }
  0x28   : > { %1642 = vrot.lane.b32.xlu1 %v1641_v39, %s1985_s21  ;;  %v1731_v39 = vpack.i.bf16 %v2169_v5, %v1404_v20  ;;  %v1417_v20 = vld [vmem:[%s2031_s17 + $0x110] sm:$0x1]  ;;  %1551 = vmatprep.subr.bf16.mxu1 %v1966_v49 }
  0x29   : > { %1637 = vrot.lane.b32.xlu0 %v1636_v40, %s1985_s21  ;;  %v273_v40 = vld [vmem:[%s2031_s17 + $0x3a] sm:$0xff]  ;;  %1559 = vmatpush3.bf16.msra.mxu1 %v1966_v49  ;;  %v1453_v2 = vld [vmem:[%s2031_s17 + $0x6a] sm:$0xff] }
  0x2a   : > { %v1746_v44 = vpack.i.bf16 %v274_v41, %v273_v40  ;;  %1523 = vmatprep.subr.bf16.mxu0 %v1966_v49  ;;  %v2276_v40 = vld [vmem:[%s2031_s17 + $0x131] sm:$0xff]  ;;  %v2279_v41 = vld [vmem:[%s2031_s17 + $0x109] sm:$0xff] }
  0x2b   : > { %1524 = vmatpush3.bf16.msra.mxu0 %v1966_v49  ;;  %v1486_v49 = vld [vmem:[%s2031_s17 + $0x162] sm:$0xff] }
  0x2c   : > { %1652 = vrot.lane.b32.xlu1 %v1651_v45, %s1986_s22  ;;  %v1741_v45 = vpack.i.bf16 %v1419_v43, %v1418_v42  ;;  %v1968_v42 = vld [vmem:[%s2800_s1 + $0x10] sm:$0xff]   ;;  %v1811_v43 = vpack.i.bf16 %v2142_v59, %v2276_v40 }
  0x2d   : > { %1647 = vrot.lane.b32.xlu0 %v1646_v48, %s1986_s22  ;;  %v1457_v48 = vld [vmem:[%s2031_s17 + $0x8a] sm:$0xff] }
  0x30   : > { %1662 = vrot.lane.b32.xlu1 %v1661_v53, %s1987_s23  ;;  %v1458_v53 = vld [vmem:[%s2031_s17 + $0x92] sm:$0xff] }
  0x31   : > { %1657 = vrot.lane.b32.xlu0 %v1656_v54, %s1987_s23  ;;  %v1406_v54 = vld [vmem:[%s2031_s17 + $0xb1] sm:$0x1]  ;;  %v1751_v55 = vpack.i.bf16 %v1458_v53, %v1457_v48  ;;  %v1816_v48 = vpack.i.bf16 %v2181_v10, %v2133_v56  ;;  %v2307_v56 = vld [vmem:[%s2031_s17 + $0x169] sm:$0xff] }
  0x32   : > { %v1472_v53 = vld [vmem:[%s2031_s17 + $0xea] sm:$0xff] }
  0x33   : > { %v1971_v10 = vld [vmem:[%s2800_s1 + $0x28] sm:$0xff]  }
  0x34   : > { %1672 = vrot.lane.b32.xlu1 %v1671_v61, %s1983_s19  ;;  %v1420_v61 = vld [vmem:[%s2031_s17 + $0x130] sm:$0xff] }
  0x35   : > { %1667 = vrot.lane.b32.xlu0 %v1666_v62, %s1988_s24  ;;  %v1421_v62 = vld [vmem:[%s2031_s17 + $0x138] sm:$0xff] }
  0x36   : > { %v1761_v8 = vpack.i.bf16 %v1421_v62, %v1420_v61 }
  0x38   : > { %1682 = vrot.lane.b32.xlu1 %v1681_v4, %s1989_s25  ;;  %v1415_v4 = vld [vmem:[%s2031_s17 + $0x100] sm:$0xff] }
  0x39   : > { %1677 = vrot.lane.b32.xlu0 %v1676_v7, %s1988_s24  ;;  %v1416_v7 = vld [vmem:[%s2031_s17 + $0x108] sm:$0xff] }
  0x3c   : > { %1692 = vrot.lane.b32.xlu1 %v1691_v11, %s1984_s20  ;;  %v1756_v11 = vpack.i.bf16 %v1416_v7, %v1415_v4  ;;  %v1474_v4 = vld [vmem:[%s2031_s17 + $0xfa] sm:$0xff]  ;;  %v1475_v7 = vld [vmem:[%s2031_s17 + $0x102] sm:$0xff] }
  0x3d   : > { %1687 = vrot.lane.b32.xlu0 %v1686_v12, %s1983_s19  ;;  %v1459_v12 = vld [vmem:[%s2031_s17 + $0x9a] sm:$0xff] }
  0x40   : > { %1702 = vrot.lane.b32.xlu1 %v1701_v14, %s1990_s26  ;;  %v1429_v14 = vld [vmem:[%s2031_s17 + $0xc1] sm:$0xff] }
  0x41   : > { %1697 = vrot.lane.b32.xlu0 %v1696_v15, %s1989_s25  ;;  %v2236_v15 = vld [vmem:[%s2031_s17 + $0xc9] sm:$0xff] }
  0x44   : > { %1712 = vrot.lane.b32.xlu1 %v1711_v16, %s1984_s20  ;;  %v1771_v16 = vpack.i.bf16 %v1460_v13, %v1459_v12  ;;  %v1483_v12 = vld [vmem:[%s2031_s17 + $0x14a] sm:$0xff]  ;;  %v1484_v13 = vld [vmem:[%s2031_s17 + $0x152] sm:$0xff] }
  0x45   : > { %1707 = vrot.lane.b32.xlu0 %v1706_v19, %s1983_s19  ;;  %v1766_v19 = vpack.i.bf16 %v2236_v15, %v1429_v14  ;;  %v1973_v14 = vld [vmem:[%s2800_s1 + $0x38] sm:$0xff]   ;;  %v1851_v26 = vpack.i.bf16 %v1484_v13, %v1483_v12 }
  0x48   : > { %1722 = vrot.lane.b32.xlu1 %v1721_v17, %s1990_s26  ;;  %v1426_v17 = vld [vmem:[%s2031_s17 + $0x160] sm:$0xff] }
  0x49   : > { %1717 = vrot.lane.b32.xlu0 %v1716_v25, %s1985_s21  ;;  %v1427_v25 = vld [vmem:[%s2031_s17 + $0x168] sm:$0xff] }
  0x4a   : > { %v1781_v34 = vpack.i.bf16 %v1427_v25, %v1426_v17  ;;  %v172_v25 = vld [vmem:[%s2031_s17] sm:$0xff] }
  0x4c   : > { %390 = vrot.lane.b32.xlu1 %v205_v35, %s1983_s19  ;;  %v1437_v35 = vld [vmem:[%s2031_s17 + $0x101] sm:$0xff]  ;;  %s1995_s19 = smov 112  }
  0x4d   : > { %1727 = vrot.lane.b32.xlu0 %v1726_v36, %s1991_s27  ;;  %v1440_v36 = vld [vmem:[%s2031_s17 + $0x121] sm:$0xff]  ;;  %v1796_v52 = vpack.i.bf16 %v1437_v35, %v2118_v50  ;;  %v1801_v50 = vpack.i.bf16 %v2152_v63, %v2139_v58  ;;  %v1806_v58 = vpack.i.bf16 %v2279_v41, %v1437_v35  ;;  %v178_v35 = vld [vmem:[%s2031_s17 + $0x30] sm:$0xff] }
  0x4e   : > { %v1791_v38 = vpack.i.bf16 %v2258_v37, %v1440_v36  ;;  %v1448_v63 = vld [vmem:[%s2031_s17 + $0x161] sm:$0xff] }
  0x4f   : > { %v1831_v62 = vpack.i.bf16 %v2307_v56, %v1448_v63  ;;  %v1485_v36 = vld [vmem:[%s2031_s17 + $0x15a] sm:$0xff] }
  0x50   : > { %1737 = vrot.lane.b32.xlu1 %v1736_v23, %s1985_s21  ;;  %v1967_v23 = vld [vmem:[%s2800_s1 + $0x8] sm:$0xff]  }
  0x51   : > { %1732 = vrot.lane.b32.xlu0 %v1731_v39, %s1984_s20  ;;  %v1428_v39 = vld [vmem:[%s2031_s17 + $0x170] sm:$0x1]  ;;  %1552 = vmatprep.subr.bf16.mxu1 %v1967_v23 }
  0x52   : > { %1560 = vmatpush3.bf16.msra.mxu1 %v1967_v23  ;;  %1525 = vmatprep.subr.bf16.mxu0 %v1967_v23 }
  0x53   : > { %1526 = vmatpush3.bf16.msra.mxu0 %v1967_v23  ;;  %1553 = vmatprep.subr.bf16.mxu1 %v1968_v42 }
  0x54   : > { %1747 = vrot.lane.b32.xlu1 %v1746_v44, %s1991_s27  ;;  %1527 = vmatprep.subr.bf16.mxu0 %v1968_v42  ;;  %v1969_v44 = vld [vmem:[%s2800_s1 + $0x18] sm:$0xff]  }
  0x55   : > { %1742 = vrot.lane.b32.xlu0 %v1741_v45, %s1986_s22  ;;  %v1821_v45 = vpack.i.bf16 %v1448_v63, %v2155_v0  ;;  %v1439_v0 = vld [vmem:[%s2031_s17 + $0x111] sm:$0x1] }
  0x56   : > { %1561 = vmatpush3.bf16.msra.mxu1 %v1968_v42 }
  0x57   : > { %1528 = vmatpush3.bf16.msra.mxu0 %v1968_v42  ;;  %1554 = vmatprep.subr.bf16.mxu1 %v1969_v44  ;;  %v268_v42 = vld [vmem:[%s2031_s17 + $0x12] sm:$0xff] }
  0x58   : > { %434 = vrot.lane.b32.xlu1 %v1406_v54, %s1984_s20  ;;  %v1473_v54 = vld [vmem:[%s2031_s17 + $0xf2] sm:$0xff]  ;;  %1529 = vmatprep.subr.bf16.mxu0 %v1969_v44 }
  0x59   : > { %1752 = vrot.lane.b32.xlu0 %v1751_v55, %s1992_s28  ;;  %v1970_v55 = vld [vmem:[%s2800_s1 + $0x20] sm:$0xff]   ;;  %v1826_v61 = vpack.i.bf16 %v1473_v54, %v1472_v53  ;;  %v182_v54 = vld [vmem:[%s2031_s17 + $0x50] sm:$0x1] }
  0x5a   : > { %1562 = vmatpush3.bf16.msra.mxu1 %v1969_v44 }
  0x5b   : > { %1530 = vmatpush3.bf16.msra.mxu0 %v1969_v44  ;;  %1555 = vmatprep.subr.bf16.mxu1 %v1970_v55  ;;  %v174_v44 = vld [vmem:[%s2031_s17 + $0x10] sm:$0xff] }
  0x5c   : > { %1762 = vrot.lane.b32.xlu1 %v1761_v8, %s1986_s22  ;;  %1531 = vmatprep.subr.bf16.mxu0 %v1970_v55  ;;  %v1972_v8 = vld [vmem:[%s2800_s1 + $0x30] sm:$0xff]  }
  0x5d   : > { %1757 = vrot.lane.b32.xlu0 %v1756_v11, %s1985_s21  ;;  %v1846_v11 = vpack.i.bf16 %v1475_v7, %v1474_v4  ;;  %v180_v7 = vld [vmem:[%s2031_s17 + $0x40] sm:$0xff] }
  0x5e   : > { %1563 = vmatpush3.bf16.msra.mxu1 %v1970_v55 }
  0x5f   : > { %1532 = vmatpush3.bf16.msra.mxu0 %v1970_v55  ;;  %1556 = vmatprep.subr.bf16.mxu1 %v1971_v10  ;;  %v1871_v55 = vpack.i.bf16 %v1486_v49, %v1485_v36  ;;  %v276_v36 = vld [vmem:[%s2031_s17 + $0x52] sm:$0xff] }
  0x60   : > { %1772 = vrot.lane.b32.xlu1 %v1771_v16, %s1992_s28  ;;  %1533 = vmatprep.subr.bf16.mxu0 %v1971_v10  ;;  %v176_v16 = vld [vmem:[%s2031_s17 + $0x20] sm:$0xff] }
  0x61   : > { %1767 = vrot.lane.b32.xlu0 %v1766_v19, %s1987_s23  ;;  %v177_v19 = vld [vmem:[%s2031_s17 + $0x28] sm:$0xff] }
  0x62   : > { %1564 = vmatpush3.bf16.msra.mxu1 %v1971_v10 }
  0x63   : > { %1534 = vmatpush3.bf16.msra.mxu0 %v1971_v10  ;;  %1557 = vmatprep.subr.bf16.mxu1 %v1972_v8 }
  0x64   : > { %478 = vrot.lane.b32.xlu1 %v1417_v20, %s1985_s21  ;;  %1535 = vmatprep.subr.bf16.mxu0 %v1972_v8 }
  0x65   : > { %1777 = vrot.lane.b32.xlu0 %v1776_v21, %s1993_s29 }
  0x66   : > { %1565 = vmatpush3.bf16.msra.mxu1 %v1972_v8 }
  0x67   : > { %1536 = vmatpush3.bf16.msra.mxu0 %v1972_v8  ;;  %1558 = vmatprep.subr.bf16.mxu1 %v1973_v14  ;;  %v181_v8 = vld [vmem:[%s2031_s17 + $0x48] sm:$0xff] }
  0x68   : > { %1787 = vrot.lane.b32.xlu1 %v1786_v31, %s1987_s23  ;;  %1537 = vmatprep.subr.bf16.mxu0 %v1973_v14  ;;  %v173_v31 = vld [vmem:[%s2031_s17 + $0x8] sm:$0xff] }
  0x69   : > { %1782 = vrot.lane.b32.xlu0 %v1781_v34, %s1986_s22 }
  0x6a   : > { %1566 = vmatpush3.bf16.msra.mxu1 %v1973_v14 }
  0x6b   : > { %1538 = vmatpush3.bf16.msra.mxu0 %v1973_v14 }
  0x6c   : > { %1797 = vrot.lane.b32.xlu1 %v1796_v52, %s1993_s29 }
  0x6d   : > { %1792 = vrot.lane.b32.xlu0 %v1791_v38, %s1988_s24 }
  0x70   : > { %522 = vrot.lane.b32.xlu1 %v1428_v39, %s1986_s22  ;;  %v179_v39 = vld [vmem:[%s2031_s17 + $0x38] sm:$0xff] }
  0x71   : > { %1802 = vrot.lane.b32.xlu0 %v1801_v50, %s1994_s9  ;;  %v267_v50 = vld [vmem:[%s2031_s17 + $0xa] sm:$0xff] }
  0x72   : > { %v1866_v10 = vpack.i.bf16 %v268_v42, %v267_v50 }
  0x74   : > { %1812 = vrot.lane.b32.xlu1 %v1811_v43, %s1988_s24 }
  0x75   : > { %1807 = vrot.lane.b32.xlu0 %v1806_v58, %s1987_s23 }
  0x78   : > { %1822 = vrot.lane.b32.xlu1 %v1821_v45, %s1994_s9  ;;  %v175_v45 = vld [vmem:[%s2031_s17 + $0x18] sm:$0xff] }
  0x79   : > { %1817 = vrot.lane.b32.xlu0 %v1816_v48, %s1989_s25 }
  0x7c   : > { %566 = vrot.lane.b32.xlu1 %v1439_v0, %s1987_s23 }
  0x7d   : > { %1827 = vrot.lane.b32.xlu0 %v1826_v61, %s1995_s19 }
  0x80   : > { %1837 = vrot.lane.b32.xlu1 %v1836_v30, %s1989_s25 }
  0x81   : > { %1832 = vrot.lane.b32.xlu0 %v1831_v62, %s1988_s24 }
  0x84   : > { %1847 = vrot.lane.b32.xlu1 %v1846_v11, %s1995_s19 }
  0x85   : > { %1842 = vrot.lane.b32.xlu0 %v1841_v32, %s1990_s26 }
  0x86   : > { %v1603_v30 = vpop.permute.xlu1 %1602 }
  0x87   : > { %v1605_v20 = vunpack.i.h.bf16 %v1603_v30  ;;  %v1604_v21 = vunpack.i.l.bf16 %v1603_v30  ;;  %v1593_v17 = vpop.permute.xlu0 %1592  ;;  %v270_v30 = vld [vmem:[%s2031_s17 + $0x22] sm:$0xff] }
  0x88   : > { %v1595_v27 = vunpack.i.h.bf16 %v1593_v17  ;;  %v1594_v28 = vunpack.i.l.bf16 %v1593_v17  ;;  %610 = vrot.lane.b32.xlu1 %v1450_v18, %s1988_s24  ;;  %v264_v18 = vld [vmem:[%s2031_s17 + $0x59] sm:$0x1] }
  0x89   : > { %v944_v32 = vsel %vm939_vm0, %v176_v16, %v1604_v21  ;;  %v945_v34 = vsel %vm939_vm0, %v177_v19, %v1605_v20  ;;  %1852 = vrot.lane.b32.xlu0 %v1851_v26, %s1996_s30  ;;  %v269_v26 = vld [vmem:[%s2031_s17 + $0x1a] sm:$0xff] }
  0x8a   : > { %v2348_v52 = vsel %vm939_vm0, %v172_v25, %v1594_v28  ;;  %v2351_v38 = vsel %vm939_vm0, %v173_v31, %v1595_v27  ;;  %v1608_v23 = vpop.permute.xlu1 %1607  ;;  %v1881_v28 = vpack.i.bf16 %v270_v30, %v269_v26 }
  0x8b   : > { %v1610_v43 = vunpack.i.h.bf16 %v1608_v23  ;;  %v1609_v58 = vunpack.i.l.bf16 %v1608_v23  ;;  %v1598_v63 = vpop.permute.xlu0 %1597 }
  0x8c   : > { %v1600_v48 = vunpack.i.h.bf16 %v1598_v63  ;;  %v1599_v53 = vunpack.i.l.bf16 %v1598_v63  ;;  %1862 = vrot.lane.b32.xlu1 %v1861_v33, %s1990_s26 }
  0x8d   : > { %v946_v0 = vsel %vm939_vm0, %v178_v35, %v1609_v58  ;;  %v947_v61 = vsel %vm939_vm0, %v179_v39, %v1610_v43  ;;  %1857 = vrot.lane.b32.xlu0 %v1856_v3, %s1989_s25  ;;  %v1454_v3 = vld [vmem:[%s2031_s17 + $0x72] sm:$0xff]  ;;  %v275_v35 = vld [vmem:[%s2031_s17 + $0x4a] sm:$0xff] }
  0x8e   : > { %v2370_v62 = vsel %vm939_vm0, %v174_v44, %v1599_v53  ;;  %v2373_v24 = vsel %vm939_vm0, %v175_v45, %v1600_v48  ;;  %v347_v29 = vpop.permute.xlu1 %346  ;;  %v1886_v25 = vpack.i.bf16 %v1454_v3, %v1453_v2  ;;  %v1891_v43 = vpack.i.bf16 %v276_v36, %v275_v35  ;;  %v1452_v45 = vld [vmem:[%s2031_s17 + $0xb9] sm:$0x1]  ;;  %v1455_v48 = vld [vmem:[%s2031_s17 + $0x7a] sm:$0xff]  ;;  %v1456_v53 = vld [vmem:[%s2031_s17 + $0x82] sm:$0xff] }
  0x8f   : > { %v2376_v33 = vsel %vm939_vm0, %v182_v54, %v347_v29  ;;  %v1613_v4 = vpop.permute.xlu0 %1612  ;;  %v1901_v29 = vpack.i.bf16 %v2247_v22, %v2236_v15 }
  0x90   : > { %v1615_v11 = vunpack.i.h.bf16 %v1613_v4  ;;  %v1614_v1 = vunpack.i.l.bf16 %v1613_v4  ;;  %1872 = vrot.lane.b32.xlu1 %v1871_v55, %s1996_s30 }
  0x91   : > { %1867 = vrot.lane.b32.xlu0 %v1866_v10, %s1991_s27 }
  0x92   : > { %v2385_v12 = vsel %vm939_vm0, %v180_v7, %v1614_v1  ;;  %v2388_v13 = vsel %vm939_vm0, %v181_v8, %v1615_v11  ;;  %v1623_v14 = vpop.permute.xlu1 %1622  ;;  %v1896_v8 = vpack.i.bf16 %v1456_v53, %v1455_v48  ;;  %v1461_v11 = vld [vmem:[%s2031_s17 + $0xaa] sm:$0xff]  ;;  %v1462_v1 = vld [vmem:[%s2031_s17 + $0xb2] sm:$0xff] }
  0x93   : > { %v1625_v16 = vunpack.i.h.bf16 %v1623_v14  ;;  %v1624_v19 = vunpack.i.l.bf16 %v1623_v14  ;;  %v1618_v20 = vpop.permute.xlu0 %1617  ;;  %v1469_v48 = vld [vmem:[%s2031_s17 + $0xd2] sm:$0xff] }
  0x94   : > { %v1620_v21 = vunpack.i.h.bf16 %v1618_v20  ;;  %v1619_v17 = vunpack.i.l.bf16 %v1618_v20  ;;  %1877 = vrot.lane.b32.xlu1 %v1876_v9, %s1990_s26 }
  0x95   : > { %v958_v31 = vsel %vm951_vm1, %v946_v0, %v1624_v19  ;;  %v959_v27 = vsel %vm951_vm1, %v947_v61, %v1625_v16  ;;  %645 = vrot.lane.b32.xlu0 %v264_v18, %s1989_s25  ;;  %v1906_v16 = vpack.i.bf16 %v1462_v1, %v1461_v11  ;;  %s1508_s25 = sshll.u32 %s2804_s13, 6 }
  0x96   : > { %v956_v49 = vsel %vm951_vm1, %v944_v32, %v1619_v17  ;;  %v957_v23 = vsel %vm951_vm1, %v945_v34, %v1620_v21  ;;  %v1633_v39 = vpop.permute.xlu1 %1632 }
  0x97   : > { %v1635_v5 = vunpack.i.h.bf16 %v1633_v39  ;;  %v1634_v6 = vunpack.i.l.bf16 %v1633_v39  ;;  %v1628_v9 = vpop.permute.xlu0 %1627 }
  0x98   : > { %v1630_v50 = vunpack.i.h.bf16 %v1628_v9  ;;  %v1629_v42 = vunpack.i.l.bf16 %v1628_v9  ;;  %1887 = vrot.lane.b32.xlu1 %v1886_v25, %s1992_s28 }
  0x99   : > { %v970_v58 = vsel %vm963_vm2, %v958_v31, %v1634_v6  ;;  %v971_v63 = vsel %vm963_vm2, %v959_v27, %v1635_v5  ;;  %1882 = vrot.lane.b32.xlu0 %v1881_v28, %s1991_s27  ;;  %v277_v31 = vld [vmem:[%s2031_s17 + $0x5a] sm:$0x1]  ;;  %v1464_v6 = vld [vmem:[%s2031_s17 + $0x111] sm:$0xff] }
  0x9a   : > { %v968_v32 = vsel %vm963_vm2, %v956_v49, %v1629_v42  ;;  %v969_v34 = vsel %vm963_vm2, %v957_v23, %v1630_v50  ;;  %v1643_v44 = vpop.permute.xlu1 %1642  ;;  %v1916_v23 = vpack.i.bf16 %v2276_v40, %v2258_v37 }
  0x9b   : > { %v1645_v54 = vunpack.i.h.bf16 %v1643_v44  ;;  %v1644_v55 = vunpack.i.l.bf16 %v1643_v44  ;;  %v1638_v0 = vpop.permute.xlu0 %1637 }
  0x9c   : > { %v1640_v61 = vunpack.i.h.bf16 %v1638_v0  ;;  %v1639_v10 = vunpack.i.l.bf16 %v1638_v0  ;;  %1892 = vrot.lane.b32.xlu1 %v1891_v43, %s1991_s27 }
  0x9d   : > { %v982_v4 = vsel %vm975_vm3, %v970_v58, %v1644_v55  ;;  %v983_v7 = vsel %vm975_vm3, %v971_v63, %v1645_v54  ;;  %680 = vrot.lane.b32.xlu0 %v1452_v45, %s1990_s26  ;;  %v1468_v45 = vld [vmem:[%s2031_s17 + $0xca] sm:$0xff]  ;;  %v1463_v55 = vld [vmem:[%s2031_s17 + $0xba] sm:$0x1] }
  0x9e   : > { %v980_v2 = vsel %vm975_vm3, %v968_v32, %v1639_v10  ;;  %v981_v3 = vsel %vm975_vm3, %v969_v34, %v1640_v61  ;;  %v1653_v14 = vpop.permute.xlu1 %1652  ;;  %v1921_v32 = vpack.i.bf16 %v1464_v6, %v2279_v41 }
  0x9f   : > { %v1655_v18 = vunpack.i.h.bf16 %v1653_v14  ;;  %v1654_v26 = vunpack.i.l.bf16 %v1653_v14  ;;  %v1648_v30 = vpop.permute.xlu0 %1647 }
  0xa0   : > { %v1650_v15 = vunpack.i.h.bf16 %v1648_v30  ;;  %v1649_v22 = vunpack.i.l.bf16 %v1648_v30  ;;  %1902 = vrot.lane.b32.xlu1 %v1901_v29, %s1993_s29  ;;  %v1931_v29 = vpack.i.bf16 %v1469_v48, %v1468_v45  ;;  %v1482_v45 = vld [vmem:[%s2031_s17 + $0x142] sm:$0xff] }
  0xa1   : > { %v994_v19 = vsel %vm987_vm4, %v982_v4, %v1654_v26  ;;  %v995_v20 = vsel %vm987_vm4, %v983_v7, %v1655_v18  ;;  %1897 = vrot.lane.b32.xlu0 %v1896_v8, %s1992_s28 }
  0xa2   : > { %v992_v21 = vsel %vm987_vm4, %v980_v2, %v1649_v22  ;;  %v993_v17 = vsel %vm987_vm4, %v981_v3, %v1650_v15  ;;  %v1663_v25 = vpop.permute.xlu1 %1662  ;;  %v1479_v15 = vld [vmem:[%s2031_s17 + $0x12a] sm:$0xff]  ;;  %v1480_v22 = vld [vmem:[%s2031_s17 + $0x132] sm:$0xff] }
  0xa3   : > { %v1665_v27 = vunpack.i.h.bf16 %v1663_v25  ;;  %v1664_v28 = vunpack.i.l.bf16 %v1663_v25  ;;  %v1658_v35 = vpop.permute.xlu0 %1657 }
  0xa4   : > { %v1660_v36 = vunpack.i.h.bf16 %v1658_v35  ;;  %v1659_v49 = vunpack.i.l.bf16 %v1658_v35  ;;  %1907 = vrot.lane.b32.xlu1 %v1906_v16, %s1992_s28  ;;  %v1476_v35 = vld [vmem:[%s2031_s17 + $0x10a] sm:$0xff] }
  0xa5   : > { %v1006_v39 = vsel %vm999_vm5, %v994_v19, %v1664_v28  ;;  %v1007_v5 = vsel %vm999_vm5, %v995_v20, %v1665_v27  ;;  %724 = vrot.lane.b32.xlu0 %v277_v31, %s1991_s27  ;;  %v1465_v20 = vld [vmem:[%s2031_s17 + $0x119] sm:$0x1] }
  0xa6   : > { %v1004_v9 = vsel %vm999_vm5, %v992_v21, %v1659_v49  ;;  %v1005_v50 = vsel %vm999_vm5, %v993_v17, %v1660_v36  ;;  %v1673_v42 = vpop.permute.xlu1 %1672  ;;  %v1470_v21 = vld [vmem:[%s2031_s17 + $0xda] sm:$0xff]  ;;  %v1471_v17 = vld [vmem:[%s2031_s17 + $0xe2] sm:$0xff]  ;;  %v1477_v36 = vld [vmem:[%s2031_s17 + $0x112] sm:$0xff] }
  0xa7   : > { %v1675_v43 = vunpack.i.h.bf16 %v1673_v42  ;;  %v1674_v58 = vunpack.i.l.bf16 %v1673_v42  ;;  %v1668_v63 = vpop.permute.xlu0 %1667  ;;  %v1941_v28 = vpack.i.bf16 %v1471_v17, %v1470_v21 }
  0xa8   : > { %v1670_v37 = vunpack.i.h.bf16 %v1668_v63  ;;  %v1669_v40 = vunpack.i.l.bf16 %v1668_v63  ;;  %1917 = vrot.lane.b32.xlu1 %v1916_v23, %s1994_s9 }
  0xa9   : > { %v952_v34 = vsel %vm951_vm1, %v2348_v52, %v1674_v58  ;;  %v953_v44 = vsel %vm951_vm1, %v2351_v38, %v1675_v43  ;;  %1912 = vrot.lane.b32.xlu0 %v1911_v51, %s1993_s29  ;;  %v1466_v51 = vld [vmem:[%s2031_s17 + $0x171] sm:$0xff]  ;;  %v1951_v43 = vpack.i.bf16 %v1477_v36, %v1476_v35 }
  0xaa   : > { %v1016_v53 = vsel %vm1011_vm6, %v1004_v9, %v1669_v40  ;;  %v1017_v54 = vsel %vm1011_vm6, %v1005_v50, %v1670_v37  ;;  %v1683_v41 = vpop.permute.xlu1 %1682  ;;  %v1936_v18 = vpack.i.bf16 %v1466_v51, %v2307_v56 }
  0xab   : > { %v1685_v0 = vunpack.i.h.bf16 %v1683_v41  ;;  %v1684_v52 = vunpack.i.l.bf16 %v1683_v41  ;;  %v1678_v61 = vpop.permute.xlu0 %1677 }
  0xac   : > { %v1680_v10 = vunpack.i.h.bf16 %v1678_v61  ;;  %v1679_v38 = vunpack.i.l.bf16 %v1678_v61  ;;  %1922 = vrot.lane.b32.xlu1 %v1921_v32, %s1993_s29 }
  0xad   : > { %v1028_v46 = vsel %vm1023_vm7, %v1016_v53, %v1684_v52  ;;  %v1029_v47 = vsel %vm1023_vm7, %v1017_v54, %v1685_v0  ;;  %768 = vrot.lane.b32.xlu0 %v1463_v55, %s1992_s28  ;;  %s2773_s28 = scalar_lea.vmem %s2802_s3, %s1508_s25 }
  0xae   : > { %v1018_v4 = vsel %vm1011_vm6, %v1006_v39, %v1679_v38  ;;  %v1019_v7 = vsel %vm1011_vm6, %v1007_v5, %v1680_v10  ;;  %v1693_v8 = vpop.permute.xlu1 %1692 }
  0xaf   : > { %v1695_v11 = vunpack.i.h.bf16 %v1693_v8  ;;  %v1694_v1 = vunpack.i.l.bf16 %v1693_v8  ;;  %v1688_v2 = vpop.permute.xlu0 %1687 }
  0xb0   : > { %v1690_v3 = vunpack.i.h.bf16 %v1688_v2  ;;  %v1689_v14 = vunpack.i.l.bf16 %v1688_v2  ;;  %1932 = vrot.lane.b32.xlu1 %v1931_v29, %s1995_s19  ;;  %v1487_v29 = vld [vmem:[%s2031_s17 + $0x16a] sm:$0xff] }
  0xb1   : > { %v964_v26 = vsel %vm963_vm2, %v952_v34, %v1694_v1  ;;  %v965_v30 = vsel %vm963_vm2, %v953_v44, %v1695_v11  ;;  %1927 = vrot.lane.b32.xlu0 %v1926_v60, %s1994_s9  ;;  %v1946_v60 = vpack.i.bf16 %v1480_v22, %v1479_v15  ;;  %v1467_v34 = vld [vmem:[%s2031_s17 + $0x179] sm:$0x1]  ;;  %v1481_v44 = vld [vmem:[%s2031_s17 + $0x13a] sm:$0xff] }
  0xb2   : > { %v954_v16 = vsel %vm951_vm1, %v2370_v62, %v1689_v14  ;;  %v955_v19 = vsel %vm951_vm1, %v2373_v24, %v1690_v3  ;;  %v1703_v56 = vpop.permute.xlu1 %1702  ;;  %v1956_v52 = vpack.i.bf16 %v1482_v45, %v1481_v44 }
  0xb3   : > { %v1705_v25 = vunpack.i.h.bf16 %v1703_v56  ;;  %v1704_v31 = vunpack.i.l.bf16 %v1703_v56  ;;  %v1698_v27 = vpop.permute.xlu0 %1697 }
  0xb4   : > { %v1700_v57 = vunpack.i.h.bf16 %v1698_v27  ;;  %v1699_v59 = vunpack.i.l.bf16 %v1698_v27  ;;  %1937 = vrot.lane.b32.xlu1 %v1936_v18, %s1994_s9 }
  0xb5   : > { %v2480_v62 = vsel %vm1035_vm8, %v1028_v46, %v1704_v31  ;;  %v2483_v24 = vsel %vm1035_vm8, %v1029_v47, %v1705_v25  ;;  %803 = vrot.lane.b32.xlu0 %v1465_v20, %s1993_s29  ;;  %v1488_v46 = vld [vmem:[%s2031_s17 + $0x172] sm:$0xff] }
  0xb6   : > { %v1030_v49 = vsel %vm1023_vm7, %v1018_v4, %v1699_v59  ;;  %v1031_v23 = vsel %vm1023_vm7, %v1019_v7, %v1700_v57  ;;  %v1713_v39 = vpop.permute.xlu1 %1712  ;;  %v1489_v4 = vld [vmem:[%s2031_s17 + $0x17a] sm:$0x1]  ;;  %v1961_v7 = vpack.i.bf16 %v1488_v46, %v1487_v29 }
  0xb7   : > { %v1715_v5 = vunpack.i.h.bf16 %v1713_v39  ;;  %v1714_v6 = vunpack.i.l.bf16 %v1713_v39  ;;  %v1708_v9 = vpop.permute.xlu0 %1707 }
  0xb8   : > { %v1710_v50 = vunpack.i.h.bf16 %v1708_v9  ;;  %v1709_v42 = vunpack.i.l.bf16 %v1708_v9  ;;  %1947 = vrot.lane.b32.xlu1 %v1946_v60, %s1996_s30 }
  0xb9   : > { %v966_v58 = vsel %vm963_vm2, %v954_v16, %v1714_v6  ;;  %v967_v63 = vsel %vm963_vm2, %v955_v19, %v1715_v5  ;;  %1942 = vrot.lane.b32.xlu0 %v1941_v28, %s1995_s19 }
  0xba   : > { %v960_v37 = vsel %vm951_vm1, %v2385_v12, %v1709_v42  ;;  %v961_v40 = vsel %vm951_vm1, %v2388_v13, %v1710_v50  ;;  %v1723_v32 = vpop.permute.xlu1 %1722  ;;  %v1478_v13 = vld [vmem:[%s2031_s17 + $0x11a] sm:$0x1] }
  0xbb   : > { %v1725_v48 = vunpack.i.h.bf16 %v1723_v32  ;;  %v1724_v53 = vunpack.i.l.bf16 %v1723_v32  ;;  %v1718_v54 = vpop.permute.xlu0 %1717 }
  0xbc   : > { %v1720_v41 = vunpack.i.h.bf16 %v1718_v54  ;;  %v1719_v55 = vunpack.i.l.bf16 %v1718_v54  ;;  %1952 = vrot.lane.b32.xlu1 %v1951_v43, %s1995_s19 }
  0xbd   : > { %v2503_v0 = vsel %vm1035_vm8, %v1030_v49, %v1724_v53  ;;  %v2506_v12 = vsel %vm1035_vm8, %v1031_v23, %v1725_v48  ;;  %838 = vrot.lane.b32.xlu0 %v1467_v34, %s1994_s9 }
  0xbe   : > { %v976_v61 = vsel %vm975_vm3, %v964_v26, %v1719_v55  ;;  %v977_v10 = vsel %vm975_vm3, %v965_v30, %v1720_v41  ;;  %v391_v38 = vpop.permute.xlu1 %390 }
  0xbf   : > { %v962_v47 = vsel %vm951_vm1, %v2376_v33, %v391_v38  ;;  %v2516_v51 = vpop.permute.xlu0 %1727 }
  0xc0   : > { %882 = vrot.lane.b32.xlu1 %v1478_v13, %s1995_s19 }
  0xc1   : > { %1957 = vrot.lane.b32.xlu0 %v1956_v52, %s1996_s30 }
  0xc2   : > { %v1738_v8 = vpop.permute.xlu1 %1737 }
  0xc3   : > { %v1740_v11 = vunpack.i.h.bf16 %v1738_v8  ;;  %v1739_v1 = vunpack.i.l.bf16 %v1738_v8  ;;  %v1733_v2 = vpop.permute.xlu0 %1732 }
  0xc4   : > { %v1735_v3 = vunpack.i.h.bf16 %v1733_v2  ;;  %v1734_v14 = vunpack.i.l.bf16 %v1733_v2  ;;  %926 = vrot.lane.b32.xlu1 %v1489_v4, %s1996_s30 }
  0xc5   : > { %v978_v18 = vsel %vm975_vm3, %v966_v58, %v1739_v1  ;;  %v979_v33 = vsel %vm975_vm3, %v967_v63, %v1740_v11  ;;  %1962 = vrot.lane.b32.xlu0 %v1961_v7, %s1996_s30 }
  0xc6   : > { %v972_v26 = vsel %vm963_vm2, %v960_v37, %v1734_v14  ;;  %v973_v30 = vsel %vm963_vm2, %v961_v40, %v1735_v3  ;;  %v2527_v15 = vpop.permute.xlu1 %1747 }
  0xc7   : > { %v1743_v22 = vpop.permute.xlu0 %1742 }
  0xc8   : > { %v1745_v16 = vunpack.i.h.bf16 %v1743_v22  ;;  %v1744_v19 = vunpack.i.l.bf16 %v1743_v22 }
  0xca   : > { %v988_v56 = vsel %vm987_vm4, %v976_v61, %v1744_v19  ;;  %v989_v20 = vsel %vm987_vm4, %v977_v10, %v1745_v16  ;;  %v435_v21 = vpop.permute.xlu1 %434 }
  0xcb   : > { %v974_v17 = vsel %vm963_vm2, %v962_v47, %v435_v21  ;;  %v2532_v25 = vpop.permute.xlu0 %1752  ;;  %v1730_v21 = vunpack.i.h.bf16 %v2516_v51 }
  0xce   : > { %v1763_v31 = vpop.permute.xlu1 %1762 }
  0xcf   : > { %v1765_v27 = vunpack.i.h.bf16 %v1763_v31  ;;  %v1764_v57 = vunpack.i.l.bf16 %v1763_v31  ;;  %v1758_v59 = vpop.permute.xlu0 %1757  ;;  %v1755_v31 = vunpack.i.h.bf16 %v2532_v25 }
  0xd0   : > { %v1760_v60 = vunpack.i.h.bf16 %v1758_v59  ;;  %v1759_v28 = vunpack.i.l.bf16 %v1758_v59 }
  0xd1   : > { %v990_v35 = vsel %vm987_vm4, %v978_v18, %v1764_v57  ;;  %v991_v36 = vsel %vm987_vm4, %v979_v33, %v1765_v27  ;;  %v1754_v27 = vunpack.i.l.bf16 %v2532_v25 }
  0xd2   : > { %v984_v49 = vsel %vm975_vm3, %v972_v26, %v1759_v28  ;;  %v985_v23 = vsel %vm975_vm3, %v973_v30, %v1760_v60  ;;  %v2538_v39 = vpop.permute.xlu1 %1772 }
  0xd3   : > { %v1768_v5 = vpop.permute.xlu0 %1767 }
  0xd4   : > { %v1770_v6 = vunpack.i.h.bf16 %v1768_v5  ;;  %v1769_v9 = vunpack.i.l.bf16 %v1768_v5 }
  0xd6   : > { %v1000_v50 = vsel %vm999_vm5, %v988_v56, %v1769_v9  ;;  %v1001_v42 = vsel %vm999_vm5, %v989_v20, %v1770_v6  ;;  %v479_v43 = vpop.permute.xlu1 %478 }
  0xd7   : > { %v986_v58 = vsel %vm975_vm3, %v974_v17, %v479_v43  ;;  %v2543_v63 = vpop.permute.xlu0 %1777  ;;  %v1729_v17 = vunpack.i.l.bf16 %v2516_v51 }
  0xd8   : > { %v1780_v59 = vunpack.i.h.bf16 %v2543_v63  ;;  %v1779_v60 = vunpack.i.l.bf16 %v2543_v63 }
  0xd9   : > { %v1052_v51 = vsel %vm1047_vm9, %v2480_v62, %v1729_v17 }
  0xda   : > { %v1788_v37 = vpop.permute.xlu1 %1787  ;;  %v1064_v5 = vsel %vm1059_vm10, %v1052_v51, %v1754_v27 }
  0xdb   : > { %v1790_v40 = vunpack.i.h.bf16 %v1788_v37  ;;  %v1789_v32 = vunpack.i.l.bf16 %v1788_v37  ;;  %v1783_v34 = vpop.permute.xlu0 %1782  ;;  %v1076_v43 = vsel %vm1071_vm11, %v1064_v5, %v1779_v60 }
  0xdc   : > { %v1785_v44 = vunpack.i.h.bf16 %v1783_v34  ;;  %v1784_v45 = vunpack.i.l.bf16 %v1783_v34  ;;  %v1774_v34 = vunpack.i.l.bf16 %v2538_v39 }
  0xdd   : > { %v1002_v48 = vsel %vm999_vm5, %v990_v35, %v1789_v32  ;;  %v1003_v53 = vsel %vm999_vm5, %v991_v36, %v1790_v40  ;;  %v1775_v32 = vunpack.i.h.bf16 %v2538_v39 }
  0xde   : > { %v996_v54 = vsel %vm987_vm4, %v984_v49, %v1784_v45  ;;  %v997_v41 = vsel %vm987_vm4, %v985_v23, %v1785_v44  ;;  %v2549_v55 = vpop.permute.xlu1 %1797  ;;  %v1053_v49 = vsel %vm1047_vm9, %v2483_v24, %v1730_v21 }
  0xdf   : > { %v1793_v13 = vpop.permute.xlu0 %1792  ;;  %v1065_v6 = vsel %vm1059_vm10, %v1053_v49, %v1755_v31 }
  0xe0   : > { %v1795_v52 = vunpack.i.h.bf16 %v1793_v13  ;;  %v1794_v61 = vunpack.i.l.bf16 %v1793_v13  ;;  %v1077_v62 = vsel %vm1071_vm11, %v1065_v6, %v1780_v59 }
  0xe2   : > { %v2552_v10 = vsel %vm1011_vm6, %v1000_v50, %v1794_v61  ;;  %v2555_v38 = vsel %vm1011_vm6, %v1001_v42, %v1795_v52  ;;  %v523_v29 = vpop.permute.xlu1 %522  ;;  %v1750_v50 = vunpack.i.h.bf16 %v2527_v15  ;;  %v1749_v42 = vunpack.i.l.bf16 %v2527_v15 }
  0xe3   : > { %v998_v46 = vsel %vm987_vm4, %v986_v58, %v523_v29  ;;  %v1803_v47 = vpop.permute.xlu0 %1802  ;;  %v1800_v15 = vunpack.i.h.bf16 %v2549_v55 }
  0xe4   : > { %v1805_v35 = vunpack.i.h.bf16 %v1803_v47  ;;  %v1804_v36 = vunpack.i.l.bf16 %v1803_v47  ;;  %v1054_v29 = vsel %vm1047_vm9, %v2503_v0, %v1749_v42 }
  0xe6   : > { %v1813_v4 = vpop.permute.xlu1 %1812  ;;  %v1088_v37 = vsel %vm1083_vm12, %v1076_v43, %v1804_v36  ;;  %v1089_v40 = vsel %vm1083_vm12, %v1077_v62, %v1805_v35 }
  0xe7   : > { %v1815_v7 = vunpack.i.h.bf16 %v1813_v4  ;;  %v1814_v8 = vunpack.i.l.bf16 %v1813_v4  ;;  %v1808_v11 = vpop.permute.xlu0 %1807  ;;  %v1066_v4 = vsel %vm1059_vm10, %v1054_v29, %v1774_v34 }
  0xe8   : > { %v1810_v1 = vunpack.i.h.bf16 %v1808_v11  ;;  %v1809_v2 = vunpack.i.l.bf16 %v1808_v11 }
  0xe9   : > { %v2559_v3 = vsel %vm1011_vm6, %v1002_v48, %v1814_v8  ;;  %v2562_v14 = vsel %vm1011_vm6, %v1003_v53, %v1815_v7  ;;  %v1799_v48 = vunpack.i.l.bf16 %v2549_v55 }
  0xea   : > { %v2565_v18 = vsel %vm999_vm5, %v996_v54, %v1809_v2  ;;  %v2568_v33 = vsel %vm999_vm5, %v997_v41, %v1810_v1  ;;  %v2570_v26 = vpop.permute.xlu1 %1822 }
  0xeb   : > { %v2572_v30 = vpop.permute.xlu0 %1817  ;;  %v1825_v13 = vunpack.i.h.bf16 %v2570_v26  ;;  %v1824_v52 = vunpack.i.l.bf16 %v2570_v26  ;;  %v1078_v8 = vsel %vm1071_vm11, %v1066_v4, %v1799_v48 }
  0xec   : > { %v1819_v42 = vunpack.i.l.bf16 %v2572_v30  ;;  %v1820_v43 = vunpack.i.h.bf16 %v2572_v30 }
  0xed   : > { %v1090_v2 = vsel %vm1083_vm12, %v1078_v8, %v1824_v52 }
  0xee   : > { %v567_v22 = vpop.permute.xlu1 %566 }
  0xef   : > { %v2575_v16 = vsel %vm999_vm5, %v998_v46, %v567_v22  ;;  %v1828_v19 = vpop.permute.xlu0 %1827  ;;  %v1055_v46 = vsel %vm1047_vm9, %v2506_v12, %v1750_v50 }
  0xf0   : > { %v1830_v23 = vunpack.i.h.bf16 %v1828_v19  ;;  %v1829_v25 = vunpack.i.l.bf16 %v1828_v19  ;;  %v1067_v7 = vsel %vm1059_vm10, %v1055_v46, %v1775_v32 }
  0xf1   : > { %v1079_v11 = vsel %vm1071_vm11, %v1067_v7, %v1800_v15 }
  0xf2   : > { %v2577_v56 = vpop.permute.xlu1 %1837  ;;  %v1100_v44 = vsel %vm1095_vm13, %v1088_v37, %v1829_v25  ;;  %v1101_v45 = vsel %vm1095_vm13, %v1089_v40, %v1830_v23  ;;  %v1091_v26 = vsel %vm1083_vm12, %v1079_v11, %v1825_v13 }
  0xf3   : > { %v2579_v20 = vpop.permute.xlu0 %1832  ;;  %v1839_v62 = vunpack.i.l.bf16 %v2577_v56 }
  0xf4   : > { %v1835_v37 = vunpack.i.h.bf16 %v2579_v20 }
  0xf6   : > { %v1848_v57 = vpop.permute.xlu1 %1847 }
  0xf7   : > { %v2587_v28 = vpop.permute.xlu0 %1842  ;;  %v1850_v55 = vunpack.i.h.bf16 %v1848_v57  ;;  %v1849_v47 = vunpack.i.l.bf16 %v1848_v57 }
  0xf8   : > { %v1845_v40 = vunpack.i.h.bf16 %v2587_v28  ;;  %v1844_v32 = vunpack.i.l.bf16 %v2587_v28 }
  0xf9   : > { %v1102_v12 = vsel %vm1095_vm13, %v1090_v2, %v1849_v47  ;;  %v1103_v21 = vsel %vm1095_vm13, %v1091_v26, %v1850_v55 }
  0xfa   : > { %v2595_v9 = vpop.permute.xlu1 %610 }
  0xfb   : > { %v1853_v58 = vpop.permute.xlu0 %1852 }
  0xfc   : > { %v1855_v24 = vunpack.i.h.bf16 %v1853_v58  ;;  %v1854_v63 = vunpack.i.l.bf16 %v1853_v58  ;;  %v1840_v58 = vunpack.i.h.bf16 %v2577_v56  ;;  %v1025_v56 = vsel %vm1023_vm7, %v2555_v38, %v1820_v43 }
  0xfd   : > { %v1021_v38 = vsel %vm1011_vm6, %v2568_v33, %v1835_v37 }
  0xfe   : > { %v2609_v53 = vpop.permute.xlu1 %1862  ;;  %v1112_v54 = vsel %vm1107_vm14, %v1100_v44, %v1854_v63  ;;  %v1113_v41 = vsel %vm1107_vm14, %v1101_v45, %v1855_v24  ;;  %v1834_v24 = vunpack.i.l.bf16 %v2579_v20  ;;  %v1024_v44 = vsel %vm1023_vm7, %v2552_v10, %v1819_v42 }
  0xff   : > { %v2615_v61 = vpop.permute.xlu0 %1857  ;;  %v1121_v39 = vpack.c.bf16 %v1113_v41, %v1112_v54  ;;  %v1864_v30 = vunpack.i.l.bf16 %v2609_v53  ;;  %v1026_v45 = vsel %vm1023_vm7, %v2559_v3, %v1839_v62  ;;  %v1865_v15 = vunpack.i.h.bf16 %v2609_v53 }
 0x100   : > { %v1859_v20 = vunpack.i.l.bf16 %v2615_v61  ;;  %v1027_v28 = vsel %vm1023_vm7, %v2562_v14, %v1840_v58  ;;  %v1020_v48 = vsel %vm1011_vm6, %v2565_v18, %v1834_v24  ;;  %v1860_v10 = vunpack.i.h.bf16 %v2615_v61 }
 0x101   : > { %1543 = vmatprep.mubr.bf16.mxu1 %v1121_v39  ;;  %v1036_v13 = vsel %vm1035_vm8, %v1024_v44, %v1844_v32  ;;  %v1037_v3 = vsel %vm1035_vm8, %v1025_v56, %v1845_v40  ;;  %v1022_v14 = vsel %vm1011_vm6, %v2575_v16, %v2595_v9  ;;  %v1038_v18 = vsel %vm1035_vm8, %v1026_v45, %v1864_v30 }
 0x102   : > { %v1873_v1 = vpop.permute.xlu1 %1872  ;;  %v1039_v29 = vsel %vm1035_vm8, %v1027_v28, %v1865_v15  ;;  %v1032_v46 = vsel %vm1023_vm7, %v1020_v48, %v1859_v20  ;;  %v1033_v47 = vsel %vm1023_vm7, %v1021_v38, %v1860_v10 }
 0x103   : > { %v1875_v0 = vunpack.i.h.bf16 %v1873_v1  ;;  %v1874_v22 = vunpack.i.l.bf16 %v1873_v1  ;;  %v1868_v19 = vpop.permute.xlu0 %1867 }
 0x104   : > { %v1869_v54 = vunpack.i.l.bf16 %v1868_v19  ;;  %v1870_v53 = vunpack.i.h.bf16 %v1868_v19 }
 0x105   : > { %v1114_v17 = vsel %vm1107_vm14, %v1102_v12, %v1874_v22  ;;  %v1115_v31 = vsel %vm1107_vm14, %v1103_v21, %v1875_v0 }
 0x106   : > { %v1878_v27 = vpop.permute.xlu1 %1877  ;;  %v1122_v57 = vpack.c.bf16 %v1115_v31, %v1114_v17  ;;  %v1048_v4 = vsel %vm1047_vm9, %v1036_v13, %v1869_v54  ;;  %v1049_v16 = vsel %vm1047_vm9, %v1037_v3, %v1870_v53 }
 0x107   : > { %v646_v59 = vpop.permute.xlu0 %645  ;;  %v1880_v39 = vunpack.i.h.bf16 %v1878_v27  ;;  %v1879_v61 = vunpack.i.l.bf16 %v1878_v27 }
 0x108   : > { %1544 = vmatmul.mubr.bf16.vlgmr.msra.gmra.mrb[0].mxu1 %v1122_v57  ;;  %v1034_v9 = vsel %vm1023_vm7, %v1022_v14, %v646_v59 }
 0x109   : > { %v1044_v0 = vsel %vm1035_vm8, %v1032_v46, %v1879_v61  ;;  %v1045_v22 = vsel %vm1035_vm8, %v1033_v47, %v1880_v39 }
 0x10a   : > { %v1888_v60 = vpop.permute.xlu1 %1887 }
 0x10b   : > { %v2631_v35 = vpop.permute.xlu0 %1882  ;;  %v1890_v33 = vunpack.i.h.bf16 %v1888_v60  ;;  %v1889_v55 = vunpack.i.l.bf16 %v1888_v60 }
 0x10c   : > { %v1885_v31 = vunpack.i.h.bf16 %v2631_v35  ;;  %v1884_v27 = vunpack.i.l.bf16 %v2631_v35 }
 0x10d   : > { %v1060_v21 = vsel %vm1059_vm10, %v1048_v4, %v1889_v55  ;;  %v1061_v17 = vsel %vm1059_vm10, %v1049_v16, %v1890_v33 }
 0x10e   : > { %v2633_v36 = vpop.permute.xlu1 %1892  ;;  %v1050_v32 = vsel %vm1047_vm9, %v1038_v18, %v1884_v27  ;;  %v1051_v48 = vsel %vm1047_vm9, %v1039_v29, %v1885_v31 }
 0x10f   : > { %v2635_v51 = vpop.permute.xlu0 %680  ;;  %v1895_v57 = vunpack.i.h.bf16 %v2633_v36  ;;  %v1894_v59 = vunpack.i.l.bf16 %v2633_v36 }
 0x110   : > { %v1046_v54 = vsel %vm1035_vm8, %v1034_v9, %v2635_v51 }
 0x111   : > { %v1056_v10 = vsel %vm1047_vm9, %v1044_v0, %v1894_v59  ;;  %v1057_v13 = vsel %vm1047_vm9, %v1045_v22, %v1895_v57 }
 0x112   : > { %v2637_v49 = vpop.permute.xlu1 %1902 }
 0x113   : > { %v2639_v23 = vpop.permute.xlu0 %1897  ;;  %v1905_v7 = vunpack.i.h.bf16 %v2637_v49  ;;  %v1904_v8 = vunpack.i.l.bf16 %v2637_v49 }
 0x114   : > { %v1900_v37 = vunpack.i.h.bf16 %v2639_v23  ;;  %v1899_v35 = vunpack.i.l.bf16 %v2639_v23 }
 0x115   : > { %v1072_v60 = vsel %vm1071_vm11, %v1060_v21, %v1904_v8  ;;  %v1073_v49 = vsel %vm1071_vm11, %v1061_v17, %v1905_v7 }
 0x116   : > { %v2641_v25 = vpop.permute.xlu1 %1907  ;;  %v1063_v3 = vsel %vm1059_vm10, %v1051_v48, %v1900_v37 }
 0x117   : > { %v2643_v5 = vpop.permute.xlu0 %724  ;;  %v1909_v44 = vunpack.i.l.bf16 %v2641_v25  ;;  %v1910_v45 = vunpack.i.h.bf16 %v2641_v25  ;;  %v1062_v25 = vsel %vm1059_vm10, %v1050_v32, %v1899_v35  ;;  %v1490_v35 = vld [vmem:[%s2801_s2] ss:$0 sm:$0xff] }
 0x118   : > { %v1058_v14 = vsel %vm1047_vm9, %v1046_v54, %v2643_v5 }
 0x119   : > { %v1068_v53 = vsel %vm1059_vm10, %v1056_v10, %v1909_v44  ;;  %v1069_v51 = vsel %vm1059_vm10, %v1057_v13, %v1910_v45 }
 0x11a   : > { %v2645_v6 = vpop.permute.xlu1 %1917 }
 0x11b   : > { %v2647_v50 = vpop.permute.xlu0 %1912  ;;  %v1920_v1 = vunpack.i.h.bf16 %v2645_v6  ;;  %v1919_v2 = vunpack.i.l.bf16 %v2645_v6 }
 0x11c   : > { %v1915_v15 = vunpack.i.h.bf16 %v2647_v50  ;;  %v1914_v20 = vunpack.i.l.bf16 %v2647_v50 }
 0x11d   : > { %v1084_v58 = vsel %vm1083_vm12, %v1072_v60, %v1919_v2  ;;  %v1085_v24 = vsel %vm1083_vm12, %v1073_v49, %v1920_v1 }
 0x11e   : > { %v2654_v63 = vpop.permute.xlu1 %1922  ;;  %v1074_v61 = vsel %vm1071_vm11, %v1062_v25, %v1914_v20  ;;  %v1075_v29 = vsel %vm1071_vm11, %v1063_v3, %v1915_v15 }
 0x11f   : > { %v2659_v34 = vpop.permute.xlu0 %768  ;;  %v1924_v46 = vunpack.i.l.bf16 %v2654_v63  ;;  %v1925_v55 = vunpack.i.h.bf16 %v2654_v63 }
 0x121   : > { %v1080_v22 = vsel %vm1071_vm11, %v1068_v53, %v1924_v46 }
 0x122   : > { %v1933_v41 = vpop.permute.xlu1 %1932 }
 0x123   : > { %v2679_v52 = vpop.permute.xlu0 %1927  ;;  %v1935_v19 = vunpack.i.h.bf16 %v1933_v41  ;;  %v1934_v12 = vunpack.i.l.bf16 %v1933_v41 }
 0x124   : > { %v1929_v41 = vunpack.i.l.bf16 %v2679_v52  ;;  %v1930_v50 = vunpack.i.h.bf16 %v2679_v52  ;;  %v1070_v52 = vsel %vm1059_vm10, %v1058_v14, %v2659_v34 }
 0x125   : > { %v1096_v40 = vsel %vm1095_vm13, %v1084_v58, %v1934_v12  ;;  %v1097_v36 = vsel %vm1095_vm13, %v1085_v24, %v1935_v19 }
 0x126   : > { %v2691_v11 = vpop.permute.xlu1 %1937  ;;  %v1086_v47 = vsel %vm1083_vm12, %v1074_v61, %v1929_v41  ;;  %v1087_v7 = vsel %vm1083_vm12, %v1075_v29, %v1930_v50 }
 0x127   : > { %v2697_v26 = vpop.permute.xlu0 %803  ;;  %v1939_v5 = vunpack.i.l.bf16 %v2691_v11  ;;  %v1940_v8 = vunpack.i.h.bf16 %v2691_v11  ;;  %v1081_v11 = vsel %vm1071_vm11, %v1069_v51, %v1925_v55 }
 0x128   : > { %v1082_v34 = vsel %vm1071_vm11, %v1070_v52, %v2697_v26 }
 0x129   : > { %v1092_v17 = vsel %vm1083_vm12, %v1080_v22, %v1939_v5  ;;  %v1093_v59 = vsel %vm1083_vm12, %v1081_v11, %v1940_v8 }
 0x12a   : > { %v1948_v6 = vpop.permute.xlu1 %1947 }
 0x12b   : > { %v1950_v42 = vunpack.i.h.bf16 %v1948_v6  ;;  %v1949_v43 = vunpack.i.l.bf16 %v1948_v6  ;;  %v1943_v62 = vpop.permute.xlu0 %1942 }
 0x12c   : > { %v1945_v18 = vunpack.i.h.bf16 %v1943_v62  ;;  %v1944_v39 = vunpack.i.l.bf16 %v1943_v62 }
 0x12d   : > { %v1108_v30 = vsel %vm1107_vm14, %v1096_v40, %v1949_v43  ;;  %v1109_v56 = vsel %vm1107_vm14, %v1097_v36, %v1950_v42 }
 0x12e   : > { %v1953_v28 = vpop.permute.xlu1 %1952  ;;  %v1119_v23 = vpack.c.bf16 %v1109_v56, %v1108_v30  ;;  %v1098_v1 = vsel %vm1095_vm13, %v1086_v47, %v1944_v39  ;;  %v1099_v2 = vsel %vm1095_vm13, %v1087_v7, %v1945_v18 }
 0x12f   : > { %v839_v38 = vpop.permute.xlu0 %838  ;;  %v1955_v0 = vunpack.i.h.bf16 %v1953_v28  ;;  %v1954_v63 = vunpack.i.l.bf16 %v1953_v28 }
 0x130   : > { %1539 = vmatprep.mubr.bf16.mxu0 %v1119_v23  ;;  %v1094_v31 = vsel %vm1083_vm12, %v1082_v34, %v839_v38 }
 0x131   : > { %v1104_v26 = vsel %vm1095_vm13, %v1092_v17, %v1954_v63  ;;  %v1105_v42 = vsel %vm1095_vm13, %v1093_v59, %v1955_v0 }
 0x132   : > { %v883_v33 = vpop.permute.xlu1 %882 }
 0x133   : > { %v1958_v4 = vpop.permute.xlu0 %1957  ;;  %v1106_v60 = vsel %vm1095_vm13, %v1094_v31, %v883_v33 }
 0x134   : > { %v1960_v16 = vunpack.i.h.bf16 %v1958_v4  ;;  %v1959_v9 = vunpack.i.l.bf16 %v1958_v4 }
 0x136   : > { %v927_v19 = vpop.permute.xlu1 %926  ;;  %v1110_v12 = vsel %vm1107_vm14, %v1098_v1, %v1959_v9  ;;  %v1111_v21 = vsel %vm1107_vm14, %v1099_v2, %v1960_v16 }
 0x137   : > { %v1963_v27 = vpop.permute.xlu0 %1962  ;;  %v1120_v57 = vpack.c.bf16 %v1111_v21, %v1110_v12  ;;  %v1118_v43 = vsel %vm1107_vm14, %v1106_v60, %v927_v19 }
 0x138   : > { %v1965_v49 = vunpack.i.h.bf16 %v1963_v27  ;;  %v1964_v6 = vunpack.i.l.bf16 %v1963_v27  ;;  %v1124_v37 = vpack.c.bf16 %v1118_v43, %v1118_v43 }
 0x139   : > { %1540 = vmatmul.mubr.bf16.vlgmr.msra.gmra.mrb[0].mxu0 %v1120_v57 }
 0x13a   : > { %v1116_v62 = vsel %vm1107_vm14, %v1104_v26, %v1964_v6  ;;  %v1117_v58 = vsel %vm1107_vm14, %v1105_v42, %v1965_v49 }
 0x13b   : > { %v1123_v24 = vpack.c.bf16 %v1117_v58, %v1116_v62 }
 0x13d   : > { %1547 = vmatprep.mubr.bf16.mxu1 %v1123_v24 }
 0x13e   : > { %1548 = vmatmul.mubr.bf16.gmra.mrb[4].mxu1 %v1124_v37 }
 0x1db   : > { %v1545_v40 = vpop.f32.mrb[0].mxu1 }
 0x1dc   : > { %v1255_v36 = vadd.f32 %v1545_v40, %v1490_v35  ;;  %v1246_v32 = vpop.f32.mrb[1].mxu1 }
 0x1dd   : > { %v1247_v44 = vadd.f32 %v1490_v35, %v1246_v32  ;;  %v1546_v30 = vpop.f32.mrb[2].mxu1 }
 0x1de   : > { %v1282_v56 = vmax.f32 %v1255_v36, 0.0  ;;  %v1258_v45 = vadd.f32 %v1546_v30, %v1490_v35  ;;  %v1249_v15 = vpop.f32.mrb[3].mxu1 }
 0x1df   : > { %v1280_v20 = vmax.f32 %v1247_v44, 0.0  ;;  %v1250_v28 = vadd.f32 %v1490_v35, %v1249_v15 }
 0x1e0   : > { %1293 = vst.msk [vmem:[#allocation2 + $0x30] sm:$0xff] %vm939_vm0, %v1282_v56  ;;  %v1283_v23 = vmax.f32 %v1258_v45, 0.0 }
 0x1e1   : > { %1291 = vst.msk [vmem:[#allocation2 + $0x20] sm:$0xff] %vm939_vm0, %v1280_v20  ;;  %v1281_v48 = vmax.f32 %v1250_v28, 0.0 }
 0x1e2   : > { %1294 = vst.msk [vmem:[#allocation2 + $0x38] sm:$0xff] %vm939_vm0, %v1283_v23 }
 0x1e3   : > { %1292 = vst.msk [vmem:[#allocation2 + $0x28] sm:$0xff] %vm939_vm0, %v1281_v48 }
 0x1e9   : > { %v1316_v10 = vld [vmem:[#allocation2 + $0x36] sm:$0xff] }
 0x1ea   : > { %1504 = vst.msk [vmem:[%s2773_s28 + $0x30] sm:$0xff] %vm939_vm0, %v1316_v10  ;;  %v1310_v54 = vld [vmem:[#allocation2 + $0x24] sm:$0xff]  ;;  %v1313_v41 = vld [vmem:[#allocation2 + $0x2d] sm:$0xff] }
 0x1eb   : > { %1502 = vst.msk [vmem:[%s2773_s28 + $0x20] sm:$0xff] %vm939_vm0, %v1310_v54  ;;  %1503 = vst.msk [vmem:[%s2773_s28 + $0x28] sm:$0xff] %vm939_vm0, %v1313_v41 }
 0x20c   : > { %v1541_v38 = vpop.f32.mrb[0].mxu0 }
 0x20d   : > { %v1239_v13 = vadd.f32 %v1541_v38, %v1490_v35  ;;  %v1230_v25 = vpop.f32.mrb[1].mxu0 }
 0x20e   : > { %v1231_v3 = vadd.f32 %v1490_v35, %v1230_v25  ;;  %v1542_v50 = vpop.f32.mrb[2].mxu0 }
 0x20f   : > { %v1278_v53 = vmax.f32 %v1239_v13, 0.0  ;;  %v1242_v14 = vadd.f32 %v1542_v50, %v1490_v35  ;;  %v1233_v18 = vpop.f32.mrb[3].mxu0 }
 0x210   : > { %v1276_v39 = vmax.f32 %v1231_v3, 0.0  ;;  %v1234_v51 = vadd.f32 %v1490_v35, %v1233_v18 }
 0x211   : > { %1289 = vst.msk [vmem:[#allocation2 + $0x10] sm:$0xff] %vm939_vm0, %v1278_v53  ;;  %v1279_v61 = vmax.f32 %v1242_v14, 0.0  ;;  %v1549_v29 = vpop.f32.mrb[4].mxu1 }
 0x212   : > { %1287 = vst.msk [vmem:[#allocation2] sm:$0xff] %vm939_vm0, %v1276_v39  ;;  %v1277_v46 = vmax.f32 %v1234_v51, 0.0  ;;  %v1262_v33 = vpop.f32.mrb[5].mxu1 }
 0x213   : > { %1290 = vst.msk [vmem:[#allocation2 + $0x18] sm:$0xff] %vm939_vm0, %v1279_v61  ;;  %v1263_v55 = vadd.f32 %v1490_v35, %v1262_v33  ;;  %v1550_v52 = vpop.f32.mrb[6].mxu1 }
 0x214   : > { %1288 = vst.msk [vmem:[#allocation2 + $0x8] sm:$0xff] %vm939_vm0, %v1277_v46  ;;  %v1265_v47 = vpop.f32.mrb[7].mxu1 }
 0x215   : > { %v1284_v5 = vmax.f32 %v1263_v55, 0.0 }
 0x217   : > { %1295 = vst.msk [vmem:[#allocation2 + $0x40] sm:$0xff] %vm939_vm0, %v1284_v5 }
 0x219   : > { %v1299_v4 = vld [vmem:[#allocation2] sm:$0xff] }
 0x21a   : > { %1300 = vst.msk [vmem:[%s2773_s28] sm:$0xff] %vm939_vm0, %v1299_v4  ;;  %v1304_v7 = vld [vmem:[#allocation2 + $0x12] sm:$0xff]  ;;  %v1307_v8 = vld [vmem:[#allocation2 + $0x1b] sm:$0xff] }
 0x21b   : > { %1500 = vst.msk [vmem:[%s2773_s28 + $0x10] sm:$0xff] %vm939_vm0, %v1304_v7  ;;  %1501 = vst.msk [vmem:[%s2773_s28 + $0x18] sm:$0xff] %vm939_vm0, %v1307_v8  ;;  %v1301_v16 = vld [vmem:[#allocation2 + $0x9] sm:$0xff] }
 0x21c   : > { %1499 = vst.msk [vmem:[%s2773_s28 + $0x8] sm:$0xff] %vm939_vm0, %v1301_v16 }
 0x21e   : > { %v1319_v9 = vld [vmem:[#allocation2 + $0x3f] sm:$0xff] }
 0x21f   : > { %1505 = vst.msk [vmem:[%s2773_s28 + $0x38] sm:$0xff] %vm939_vm0, %v1319_v9 }
 0x220 PF: > { %s13_s12 = sadd.s32 1, %s1980_s12  }
 0x221   : > { %p10_p4 = scmp.ge.s32.totalorder %s13_s12, 4  }
 0x223   :  { %12 = sbr.rel (!%p10_p4) target bundleno = 1 (0x1), region = 72 }

// kernel: vqvae2_forward.15
= control target key start
LH: loop header
LB: loop body
LE: loop exit
PB: predicated region body
PF: predicated region fallthrough
CT: control target
= control target key end

     0   :  { %s2203_s27 = smov 0   ;;  %s2726_s0 = inlined_call_operand.vmem [shape: f32[2,36,16], index: 0, kind: input, shape index: {}]   ;;  %s2727_s1 = inlined_call_operand.vmem [shape: f32[36,1], index: 1, kind: input, shape index: {}]   ;;  %s2728_s2 = inlined_call_operand.vmem [shape: bf16[144,16], index: 2, kind: input, shape index: {}]   ;;  %s2729_s3 = inlined_call_operand.vmem [shape: f32[1,16], index: 3, kind: input, shape index: {}]   ;;  %s2730_s4 = inlined_call_operand.vmem [shape: bf16[2,144,8], index: 4, kind: input, shape index: {}]   ;;  %s2731_s5 = inlined_call_operand.vmem [shape: f32[2,1,8], index: 5, kind: input, shape index: {}]   ;;  %s2732_s6 = inlined_call_operand.vmem [shape: bf16[2,8,16], index: 6, kind: input, shape index: {}]   ;;  %s2733_s7 = inlined_call_operand.vmem [shape: f32[2,1,16], index: 7, kind: input, shape index: {}]   ;;  %s2734_s8 = inlined_call_operand.vmem [shape: f32[2,4,4,16], index: 8, kind: output, shape index: {}]  }
   0x1 LB: > { %s1764_s28 = sadd.s32 4294967295, %s2146_s27   ;;  %p1768_p0 = scmp.ge.s32.totalorder %s2146_s27, 1  ;;  %s2146_s27 = sphi %s2203_s27, %s18_s27  }
   0x2   : > { %p262_p1 = scmp.lt.s32.totalorder %s2146_s27, 3 }
   0x4   : > { %p263_p2 = pnand %p1768_p0, %p262_p1 }
   0x5   : > { %v309_v0 = vld [vmem:[%s2727_s1 + $0x10] sm:$0xff] (!%p263_p2)  ;;  %v307_v1 = vld [vmem:[%s2727_s1] sm:$0xff] (!%p263_p2)  ;;  %v2148_v2 = vmov (!%p263_p2), 0   ;;  %vm312_vm0 = vcmask (!%p263_p2), 130048   ;;  %v310_v3 = vld [vmem:[%s2727_s1 + $0x18] sm:$0xff] (!%p263_p2)  ;;  %v2149_v5 = vmov (!%p263_p2), 0.0  }
   0x6   : > { %266 = sbr.rel (%p263_p2) target bundleno = 1724 (0x6bc), region = 52  ;;  %1902 = vset.pattern.permute.xlu1 (!%p263_p2), %v2148_v2  ;;  %1901 = vset.pattern.permute.xlu0 (!%p263_p2), %v2148_v2  ;;  %v308_v4 = vld [vmem:[%s2727_s1 + $0x8] sm:$0xff] (!%p263_p2)  ;;  %314 = vst.msk [vmem:[#allocation2 + $0x28] sm:$0xff] (!%p263_p2), %vm312_vm0, %v2149_v5  ;;  %313 = vst.msk [vmem:[#allocation2] sm:$0xff] (!%p263_p2), %vm312_vm0, %v2149_v5  ;;  %v311_v6 = vld [vmem:[%s2727_s1 + $0x20] sm:$0xf] (!%p263_p2) }
   0x7   : > { %353 = vperm.xlu1 (!%p263_p2), %1902, %v309_v0   ;;  %343 = vperm.xlu0 (!%p263_p2), %1901, %v307_v1   ;;  %vm315_vm1 = vcmask (!%p263_p2), 125952   ;;  %v2113_v7 = vld [vmem:[%s2728_s2] sm:$0xff] (!%p263_p2)   ;;  %v2114_v8 = vld [vmem:[%s2728_s2 + $0x8] sm:$0xff] (!%p263_p2)   ;;  %v2115_v9 = vld [vmem:[%s2728_s2 + $0x10] sm:$0xff] (!%p263_p2)   ;;  %p296_p3 = scmp.lt.s32.totalorder (!%p263_p2), %s1764_s28, 1  ;;  %s2150_s15 = smov (!%p263_p2), 32  }
   0x8   : > { %671 = vmatprep.subr.bf16.mxu0 (!%p263_p2), %v2148_v2  ;;  %1060 = vmatprep.subr.bf16.mxu1 (!%p263_p2), %v2148_v2  ;;  %316 = vst.msk [vmem:[#allocation2 + $0x30] sm:$0xf] (!%p263_p2), %vm315_vm1, %v2149_v5  ;;  %v2116_v10 = vld [vmem:[%s2728_s2 + $0x18] sm:$0xff] (!%p263_p2)   ;;  %v2117_v11 = vld [vmem:[%s2728_s2 + $0x20] sm:$0xff] (!%p263_p2)   ;;  %v2118_v25 = vld [vmem:[%s2728_s2 + $0x28] sm:$0xff] (!%p263_p2)   ;;  %s2151_s16 = smov (!%p263_p2), 16  }
   0x9   : > { %672 = vmatpush1.bf16.msra.mxu0 (!%p263_p2), %v2113_v7  ;;  %v2119_v28 = vld [vmem:[%s2728_s2 + $0x30] sm:$0xff] (!%p263_p2)   ;;  %s2152_s17 = smov (!%p263_p2), 64   ;;  %s2153_s18 = smov (!%p263_p2), 48   ;;  %v2120_v48 = vld [vmem:[%s2728_s2 + $0x38] sm:$0xff] (!%p263_p2)   ;;  %v2121_v54 = vld [vmem:[%s2728_s2 + $0x40] sm:$0xff] (!%p263_p2)   ;;  %vm560_vm2 = vcmask (!%p263_p2), 261120  }
   0xa   : > { %673 = vmatprep.subr.bf16.mxu0 (!%p263_p2), %v2148_v2  ;;  %s2154_s21 = smov (!%p263_p2), 96   ;;  %s2155_s24 = smov (!%p263_p2), 80   ;;  %vm566_vm3 = vcmask (!%p263_p2), 392192   ;;  %vm572_vm4 = vcmask (!%p263_p2), 523264   ;;  %vm578_vm5 = vcmask (!%p263_p2), 654336   ;;  %vm584_vm6 = vcmask (!%p263_p2), 785408  }
   0xb   : > { %358 = vperm.xlu1 (!%p263_p2), %1902, %v310_v3   ;;  %348 = vperm.xlu0 (!%p263_p2), %1901, %v308_v4   ;;  %s2156_s25 = smov (!%p263_p2), 112   ;;  %vm590_vm7 = vcmask (!%p263_p2), 916480   ;;  %vm1142_vm8 = vcmask (!%p263_p2), 1043456   ;;  %vm2157_vm9 = vmmov (!%p263_p2), 0   ;;  %vm1132_vm10 = vcmask (!%p263_p2), 64512  }
   0xd   : > { %674 = vmatpush1.bf16.msra.mxu0 %v2114_v8  ;;  %s2736_s28 = smov (!%p296_p3, %s1764_s28), 1 }
   0xe   : > { %675 = vmatprep.subr.bf16.mxu0 %v2148_v2  ;;  %s1882_s29 = smul.u32 40, %s2736_s28 }
   0xf   : > { %363 = vperm.xlu0 %1901, %v311_v6  }
  0x10   : > { %s300_s10 = scalar_lea.vmem %s2726_s0, %s1882_s29 }
  0x11   : > { %676 = vmatpush1.bf16.msra.mxu0 %v2115_v9  ;;  %v319_v12 = vld [vmem:[%s300_s10 + $0x10] sm:$0xff]  ;;  %v317_v13 = vld [vmem:[%s300_s10] sm:$0xff]  ;;  %v320_v18 = vld [vmem:[%s300_s10 + $0x18] sm:$0xff] }
  0x12   : > { %677 = vmatprep.subr.bf16.mxu0 %v2148_v2  ;;  %v318_v19 = vld [vmem:[%s300_s10 + $0x8] sm:$0xff]  ;;  %v321_v24 = vld [vmem:[%s300_s10 + $0x20] sm:$0xf] }
  0x15   : > { %678 = vmatpush1.bf16.msra.mxu0 %v2116_v10 }
  0x16   : > { %679 = vmatprep.subr.bf16.mxu0 %v2148_v2 }
  0x19   : > { %680 = vmatpush1.bf16.msra.mxu0 %v2117_v11 }
  0x1a   : > { %681 = vmatprep.subr.bf16.mxu0 %v2148_v2 }
  0x1d   : > { %682 = vmatpush1.bf16.msra.mxu0 %v2118_v25 }
  0x1e   : > { %683 = vmatprep.subr.bf16.mxu0 %v2148_v2 }
  0x21   : > { %684 = vmatpush1.bf16.msra.mxu0 %v2119_v28 }
  0x22   : > { %685 = vmatprep.subr.bf16.mxu0 %v2148_v2 }
  0x25   : > { %686 = vmatpush1.bf16.msra.mxu0 %v2120_v48 }
  0x26   : > { %687 = vmatprep.subr.bf16.mxu0 %v2148_v2 }
  0x29   : > { %688 = vmatpush1.bf16.msra.mxu0 %v2121_v54 }
  0x2a   : > { %1854 = vmatprep.subr.bf16.mxu0 %v2149_v5 }
  0x86   : > { %v2266_v14 = vpop.permute.xlu1 %353  ;;  %v2268_v15 = vpop.permute.xlu0 %343 }
  0x87   : > { %v368_v16 = vmul.f32 %v2266_v14, %v319_v12  ;;  %v366_v17 = vmul.f32 %v2268_v15, %v317_v13 }
  0x89   : > { %373 = vst.msk [vmem:[#allocation2 + $0x18] sm:$0xff] %vm312_vm0, %v368_v16  ;;  %371 = vst.msk [vmem:[#allocation2 + $0x8] sm:$0xff] %vm312_vm0, %v366_v17 }
  0x8a   : > { %v2274_v20 = vpop.permute.xlu1 %358  ;;  %v2276_v21 = vpop.permute.xlu0 %348 }
  0x8b   : > { %v369_v22 = vmul.f32 %v2274_v20, %v320_v18  ;;  %v367_v23 = vmul.f32 %v2276_v21, %v318_v19  ;;  %v407_v18 = vld [vmem:[#allocation2 + $0x2d] sm:$0xf] }
  0x8d   : > { %374 = vst.msk [vmem:[#allocation2 + $0x20] sm:$0xff] %vm312_vm0, %v369_v22  ;;  %372 = vst.msk [vmem:[#allocation2 + $0x10] sm:$0xff] %vm312_vm0, %v367_v23  ;;  %v412_v22 = vld [vmem:[#allocation2 + $0x2e] sm:$0xf] }
  0x8e   : > { %v2285_v26 = vpop.permute.xlu0 %363 }
  0x8f   : > { %v370_v27 = vmul.f32 %v2285_v26, %v321_v24 }
  0x90   : > { %v386_v29 = vld [vmem:[#allocation2 + $0x3] sm:$0xff]  ;;  %v398_v0 = vld [vmem:[#allocation2 + $0x18] sm:$0xff] }
  0x91   : > { %375 = vst.msk [vmem:[#allocation2 + $0x28] sm:$0xf] %vm315_vm1, %v370_v27  ;;  %v381_v35 = vld [vmem:[#allocation2 + $0x2] sm:$0xff] }
  0x92   : > { %v396_v39 = vld [vmem:[#allocation2 + $0x8] sm:$0xff] }
  0x93   : > { %v391_v41 = vld [vmem:[#allocation2 + $0x7] sm:$0xff] }
  0x94   : > { %v392_v30 = vld [vmem:[#allocation2 + $0xf] sm:$0xff]  ;;  %v393_v31 = vld [vmem:[#allocation2 + $0x17] sm:$0xff]  ;;  %v2314_v57 = vld [vmem:[#allocation2 + $0x1f] sm:$0xff] }
  0x95   : > { %v387_v32 = vld [vmem:[#allocation2 + $0xb] sm:$0xff]  ;;  %v597_v33 = vpack.c.bf16 %v393_v31, %v392_v30  ;;  %v1913_v42 = vpack.i.bf16 %v392_v30, %v391_v41  ;;  %v404_v44 = vld [vmem:[#allocation2 + $0x15] sm:$0xff]  ;;  %v1948_v60 = vpack.i.bf16 %v2314_v57, %v393_v31  ;;  %v399_v1 = vld [vmem:[#allocation2 + $0x20] sm:$0xff] }
  0x96   : > { %v1908_v34 = vpack.i.bf16 %v387_v32, %v386_v29  ;;  %v382_v36 = vld [vmem:[#allocation2 + $0xa] sm:$0xff]  ;;  %v383_v50 = vld [vmem:[#allocation2 + $0x12] sm:$0xff]  ;;  %v384_v51 = vld [vmem:[#allocation2 + $0x1a] sm:$0xff]  ;;  %v1953_v4 = vpack.i.bf16 %v399_v1, %v398_v0 }
  0x97   : > { %v1903_v37 = vpack.i.bf16 %v382_v36, %v381_v35  ;;  %v397_v38 = vld [vmem:[#allocation2 + $0x10] sm:$0xff]  ;;  %1782 = vmatprep.mubr.msk.bf16.mxu0 %vm312_vm0, %v597_v33  ;;  %v1938_v55 = vpack.i.bf16 %v384_v51, %v383_v50  ;;  %v389_v59 = vld [vmem:[#allocation2 + $0x1b] sm:$0xff]  ;;  %v390_v12 = vld [vmem:[#allocation2 + $0x23] sm:$0xf] }
  0x98   : > { %1909 = vrot.lane.b32.xlu0 %v1908_v34, %s2150_s15  ;;  %v1918_v40 = vpack.i.bf16 %v397_v38, %v396_v39  ;;  %v403_v43 = vld [vmem:[#allocation2 + $0xd] sm:$0xff]  ;;  %v409_v53 = vld [vmem:[#allocation2 + $0x16] sm:$0xff]  ;;  %v401_v63 = vld [vmem:[#allocation2 + $0x21] sm:$0xff] }
  0x99   : > { %1904 = vrot.lane.b32.xlu1 %v1903_v37, %s2151_s16  ;;  %v2298_v45 = vld [vmem:[#allocation2 + $0x9] sm:$0xff]  ;;  %v2300_v46 = vld [vmem:[#allocation2 + $0x11] sm:$0xff]  ;;  %v1928_v47 = vpack.i.bf16 %v404_v44, %v403_v43  ;;  %v2320_v62 = vld [vmem:[#allocation2 + $0x19] sm:$0xff] }
  0x9a   : > { %v1923_v49 = vpack.i.bf16 %v2300_v46, %v2298_v45  ;;  %v408_v52 = vld [vmem:[#allocation2 + $0xe] sm:$0xff]  ;;  %v1958_v3 = vpack.i.bf16 %v401_v63, %v2320_v62  ;;  %v410_v6 = vld [vmem:[#allocation2 + $0x1e] sm:$0xff]  ;;  %v411_v7 = vld [vmem:[#allocation2 + $0x26] sm:$0xff] }
  0x9b   : > { %v1933_v56 = vpack.i.bf16 %v409_v53, %v408_v52  ;;  %v388_v58 = vld [vmem:[#allocation2 + $0x13] sm:$0xff]  ;;  %v405_v8 = vld [vmem:[#allocation2 + $0x1d] sm:$0xff]  ;;  %v406_v9 = vld [vmem:[#allocation2 + $0x25] sm:$0xff]  ;;  %v1968_v10 = vpack.i.bf16 %v411_v7, %v410_v6 }
  0x9c   : > { %1919 = vrot.lane.b32.xlu0 %v1918_v40, %s2152_s17  ;;  %v1943_v61 = vpack.i.bf16 %v389_v59, %v388_v58  ;;  %v1963_v11 = vpack.i.bf16 %v406_v9, %v405_v8  ;;  %v385_v13 = vld [vmem:[#allocation2 + $0x22] sm:$0xf]  ;;  %v400_v16 = vld [vmem:[#allocation2 + $0x28] sm:$0xf] }
  0x9d   : > { %1914 = vrot.lane.b32.xlu1 %v1913_v42, %s2153_s18  ;;  %v395_v17 = vld [vmem:[#allocation2 + $0x27] sm:$0xf] }
  0x9e   : > { %v402_v19 = vld [vmem:[#allocation2 + $0x29] sm:$0xf]  ;;  %v376_v30 = vld [vmem:[#allocation2 + $0x1] sm:$0xff] }
  0x9f   : > { %v413_v0 = vld [vmem:[#allocation2 + $0x27] sm:$0xff] }
  0xa0   : > { %1929 = vrot.lane.b32.xlu0 %v1928_v47, %s2154_s21 }
  0xa1   : > { %1924 = vrot.lane.b32.xlu1 %v1923_v49, %s2155_s24 }
  0xa4   : > { %1939 = vrot.lane.b32.xlu0 %v1938_v55, %s2151_s16 }
  0xa5   : > { %1934 = vrot.lane.b32.xlu1 %v1933_v56, %s2156_s25 }
  0xa8   : > { %1949 = vrot.lane.b32.xlu0 %v1948_v60, %s2153_s18 }
  0xa9   : > { %1944 = vrot.lane.b32.xlu1 %v1943_v61, %s2150_s15 }
  0xac   : > { %1959 = vrot.lane.b32.xlu0 %v1958_v3, %s2155_s24 }
  0xad   : > { %1954 = vrot.lane.b32.xlu1 %v1953_v4, %s2152_s17 }
  0xb0   : > { %1969 = vrot.lane.b32.xlu0 %v1968_v10, %s2156_s25  ;;  %v599_v10 = vpack.c.bf16 %v413_v0, %v2314_v57  ;;  %v2123_v0 = vld [vmem:[%s2730_s4 + $0x8] sm:$0xff]  }
  0xb1   : > { %1964 = vrot.lane.b32.xlu1 %v1963_v11, %s2154_s21 }
  0xb4   : > { %448 = vrot.lane.b32.xlu0 %v390_v12, %s2150_s15 }
  0xb5   : > { %428 = vrot.lane.b32.xlu1 %v385_v13, %s2151_s16 }
  0xb8   : > { %488 = vrot.lane.b32.xlu0 %v400_v16, %s2152_s17 }
  0xb9   : > { %468 = vrot.lane.b32.xlu1 %v395_v17, %s2153_s18 }
  0xbc   : > { %528 = vrot.lane.b32.xlu0 %v407_v18, %s2154_s21 }
  0xbd   : > { %508 = vrot.lane.b32.xlu1 %v402_v19, %s2155_s24 }
  0xc1   : > { %548 = vrot.lane.b32.xlu1 %v412_v22, %s2156_s25 }
 0x10a   : > { %v1910_v23 = vpop.permute.xlu0 %1909 }
 0x10b   : > { %v1905_v24 = vpop.permute.xlu1 %1904  ;;  %v1912_v28 = vunpack.i.h.bf16 %v1910_v23  ;;  %v1911_v29 = vunpack.i.l.bf16 %v1910_v23 }
 0x10c   : > { %v1907_v25 = vunpack.i.h.bf16 %v1905_v24  ;;  %v1906_v27 = vunpack.i.l.bf16 %v1905_v24 }
 0x10e   : > { %v555_v31 = vsel %vm312_vm0, %v376_v30, %v1906_v27  ;;  %v556_v32 = vsel %vm312_vm0, %v2298_v45, %v1907_v25  ;;  %v1920_v33 = vpop.permute.xlu0 %1919 }
 0x10f   : > { %v1915_v34 = vpop.permute.xlu1 %1914  ;;  %v1922_v37 = vunpack.i.h.bf16 %v1920_v33  ;;  %v1921_v38 = vunpack.i.l.bf16 %v1920_v33  ;;  %v561_v39 = vsel %vm560_vm2, %v555_v31, %v1911_v29  ;;  %v562_v40 = vsel %vm560_vm2, %v556_v32, %v1912_v28 }
 0x110   : > { %v1917_v35 = vunpack.i.h.bf16 %v1915_v34  ;;  %v1916_v36 = vunpack.i.l.bf16 %v1915_v34 }
 0x112   : > { %v567_v41 = vsel %vm566_vm3, %v561_v39, %v1916_v36  ;;  %v568_v42 = vsel %vm566_vm3, %v562_v40, %v1917_v35  ;;  %v1930_v43 = vpop.permute.xlu0 %1929  ;;  %v414_v35 = vld [vmem:[#allocation2 + $0x2f] sm:$0xf] }
 0x113   : > { %v1925_v44 = vpop.permute.xlu1 %1924  ;;  %v1932_v48 = vunpack.i.h.bf16 %v1930_v43  ;;  %v1931_v49 = vunpack.i.l.bf16 %v1930_v43  ;;  %v573_v50 = vsel %vm572_vm4, %v567_v41, %v1921_v38  ;;  %v574_v51 = vsel %vm572_vm4, %v568_v42, %v1922_v37  ;;  %v380_v41 = vld [vmem:[#allocation2 + $0x21] sm:$0xf] }
 0x114   : > { %v1927_v45 = vunpack.i.h.bf16 %v1925_v44  ;;  %v1926_v47 = vunpack.i.l.bf16 %v1925_v44 }
 0x116   : > { %v579_v52 = vsel %vm578_vm5, %v573_v50, %v1926_v47  ;;  %v580_v53 = vsel %vm578_vm5, %v574_v51, %v1927_v45  ;;  %v1940_v54 = vpop.permute.xlu0 %1939  ;;  %v601_v45 = vpack.c.bf16 %v414_v35, %v414_v35 }
 0x117   : > { %v1935_v55 = vpop.permute.xlu1 %1934  ;;  %v1942_v59 = vunpack.i.h.bf16 %v1940_v54  ;;  %v1941_v60 = vunpack.i.l.bf16 %v1940_v54  ;;  %v585_v61 = vsel %vm584_vm6, %v579_v52, %v1931_v49  ;;  %v586_v63 = vsel %vm584_vm6, %v580_v53, %v1932_v48 }
 0x118   : > { %v1937_v56 = vunpack.i.h.bf16 %v1935_v55  ;;  %v1936_v58 = vunpack.i.l.bf16 %v1935_v55 }
 0x119   : > { %v558_v11 = vsel %vm312_vm0, %v2320_v62, %v1942_v59  ;;  %v557_v12 = vsel %vm312_vm0, %v2300_v46, %v1941_v60 }
 0x11a   : > { %v1950_v1 = vpop.permute.xlu0 %1949  ;;  %v591_v3 = vsel %vm590_vm7, %v585_v61, %v1936_v58  ;;  %v592_v4 = vsel %vm590_vm7, %v586_v63, %v1937_v56  ;;  %v2122_v63 = vld [vmem:[%s2730_s4] sm:$0xff]  }
 0x11b   : > { %v1945_v6 = vpop.permute.xlu1 %1944  ;;  %v596_v7 = vpack.c.bf16 %v592_v4, %v591_v3  ;;  %v1952_v13 = vunpack.i.h.bf16 %v1950_v1  ;;  %v1951_v16 = vunpack.i.l.bf16 %v1950_v1  ;;  %1061 = vmatpush1.bf16.msra.mxu1 %v2122_v63  ;;  %v2124_v1 = vld [vmem:[%s2730_s4 + $0x10] sm:$0xff]   ;;  %v2125_v3 = vld [vmem:[%s2730_s4 + $0x18] sm:$0xff]   ;;  %v1772_v4 = vld [vmem:[%s2729_s3] ss:$0 sm:$0xff] }
 0x11c   : > { %v1947_v8 = vunpack.i.h.bf16 %v1945_v6  ;;  %v1946_v9 = vunpack.i.l.bf16 %v1945_v6  ;;  %1062 = vmatprep.subr.bf16.mxu1 %v2148_v2 }
 0x11d   : > { %704 = vmatmul.mubr.bf16.vlgmr.msra.gmra.mrb[0].mxu0 %v596_v7 }
 0x11e   : > { %v564_v17 = vsel %vm560_vm2, %v558_v11, %v1947_v8  ;;  %v563_v18 = vsel %vm560_vm2, %v557_v12, %v1946_v9  ;;  %1783 = vmatprep.mubr.msk.bf16.mxu0 %vm312_vm0, %v599_v10  ;;  %v1960_v19 = vpop.permute.xlu0 %1959 }
 0x11f   : > { %v1955_v22 = vpop.permute.xlu1 %1954  ;;  %v1962_v57 = vunpack.i.h.bf16 %v1960_v19  ;;  %v1961_v25 = vunpack.i.l.bf16 %v1960_v19  ;;  %v569_v62 = vsel %vm566_vm3, %v563_v18, %v1951_v16  ;;  %v570_v27 = vsel %vm566_vm3, %v564_v17, %v1952_v13  ;;  %1063 = vmatpush1.bf16.msra.mxu1 %v2123_v0 }
 0x120   : > { %v1957_v23 = vunpack.i.h.bf16 %v1955_v22  ;;  %v1956_v24 = vunpack.i.l.bf16 %v1955_v22  ;;  %1064 = vmatprep.subr.bf16.mxu1 %v2148_v2 }
 0x122   : > { %v575_v46 = vsel %vm572_vm4, %v569_v62, %v1956_v24  ;;  %v576_v28 = vsel %vm572_vm4, %v570_v27, %v1957_v23  ;;  %v1970_v29 = vpop.permute.xlu0 %1969  ;;  %v2126_v27 = vld [vmem:[%s2730_s4 + $0x20] sm:$0xff]  }
 0x123   : > { %v1972_v30 = vunpack.i.h.bf16 %v1970_v29  ;;  %v1971_v31 = vunpack.i.l.bf16 %v1970_v29  ;;  %v1965_v32 = vpop.permute.xlu1 %1964  ;;  %v581_v36 = vsel %vm578_vm5, %v575_v46, %v1961_v25  ;;  %v582_v37 = vsel %vm578_vm5, %v576_v28, %v1962_v57  ;;  %1065 = vmatpush1.bf16.msra.mxu1 %v2124_v1  ;;  %v2127_v46 = vld [vmem:[%s2730_s4 + $0x28] sm:$0xff]   ;;  %v2128_v28 = vld [vmem:[%s2730_s4 + $0x30] sm:$0xff]  }
 0x124   : > { %v1967_v33 = vunpack.i.h.bf16 %v1965_v32  ;;  %v1966_v34 = vunpack.i.l.bf16 %v1965_v32  ;;  %1066 = vmatprep.subr.bf16.mxu1 %v2148_v2 }
 0x126   : > { %v587_v38 = vsel %vm584_vm6, %v581_v36, %v1966_v34  ;;  %v588_v39 = vsel %vm584_vm6, %v582_v37, %v1967_v33  ;;  %v449_v40 = vpop.permute.xlu0 %448 }
 0x127   : > { %v429_v42 = vpop.permute.xlu1 %428  ;;  %v593_v43 = vsel %vm590_vm7, %v587_v38, %v1971_v31  ;;  %v594_v44 = vsel %vm590_vm7, %v588_v39, %v1972_v30  ;;  %1067 = vmatpush1.bf16.msra.mxu1 %v2125_v3 }
 0x128   : > { %v559_v47 = vsel %vm312_vm0, %v380_v41, %v429_v42  ;;  %v598_v48 = vpack.c.bf16 %v594_v44, %v593_v43  ;;  %1068 = vmatprep.subr.bf16.mxu1 %v2148_v2 }
 0x129   : > { %v565_v50 = vsel %vm560_vm2, %v559_v47, %v449_v40 }
 0x12a   : > { %712 = vmatmul.mubr.bf16.gmra.mrb[4].mxu0 %v598_v48  ;;  %v489_v49 = vpop.permute.xlu0 %488 }
 0x12b   : > { %v469_v51 = vpop.permute.xlu1 %468  ;;  %1784 = vmatprep.mubr.msk.bf16.mxu0 %vm312_vm0, %v601_v45  ;;  %1069 = vmatpush1.bf16.msra.mxu1 %v2126_v27 }
 0x12c   : > { %v571_v52 = vsel %vm566_vm3, %v565_v50, %v469_v51  ;;  %1070 = vmatprep.subr.bf16.mxu1 %v2148_v2  ;;  %v2129_v50 = vld [vmem:[%s2730_s4 + $0x38] sm:$0xff]  }
 0x12d   : > { %v577_v53 = vsel %vm572_vm4, %v571_v52, %v489_v49 }
 0x12e   : > { %v529_v56 = vpop.permute.xlu0 %528 }
 0x12f   : > { %v509_v54 = vpop.permute.xlu1 %508  ;;  %1071 = vmatpush1.bf16.msra.mxu1 %v2127_v46 }
 0x130   : > { %v583_v55 = vsel %vm578_vm5, %v577_v53, %v509_v54  ;;  %1072 = vmatprep.subr.bf16.mxu1 %v2148_v2  ;;  %v2130_v54 = vld [vmem:[%s2730_s4 + $0x40] sm:$0xff]  }
 0x131   : > { %v589_v58 = vsel %vm584_vm6, %v583_v55, %v529_v56 }
 0x133   : > { %v549_v59 = vpop.permute.xlu1 %548  ;;  %1073 = vmatpush1.bf16.msra.mxu1 %v2128_v28 }
 0x134   : > { %v595_v60 = vsel %vm590_vm7, %v589_v58, %v549_v59  ;;  %1074 = vmatprep.subr.bf16.mxu1 %v2148_v2 }
 0x135   : > { %v600_v61 = vpack.c.bf16 %v595_v60, %v595_v60 }
 0x137   : > { %720 = vmatmul.mubr.bf16.gmra.mrb[8].mxu0 %v600_v61  ;;  %1075 = vmatpush1.bf16.msra.mxu1 %v2129_v50 }
 0x138   : > { %1076 = vmatprep.subr.bf16.mxu1 %v2148_v2  ;;  %1856 = vmatprep.mubr.msk.bf16.mxu0 %vm2157_vm9, %v2149_v5 }
 0x13b   : > { %1077 = vmatpush1.bf16.msra.mxu1 %v2130_v54 }
 0x13c   : > { %1542 = vmatprep.subr.bf16.mxu1 %v2148_v2 }
 0x1f0   : > { %v705_v6 = vpop.f32.mrb[0].mxu0 }
 0x1f1   : > { %v706_v7 = vadd.f32 %v1772_v4, %v705_v6  ;;  %v707_v8 = vpop.f32.mrb[1].mxu0 }
 0x1f2   : > { %v708_v9 = vpop.f32.mrb[2].mxu0 }
 0x1f3   : > { %727 = vst.msk [vmem:[#allocation3] sm:$0xff] %vm312_vm0, %v706_v7  ;;  %v709_v10 = vadd.f32 %v1772_v4, %v708_v9  ;;  %v710_v11 = vpop.f32.mrb[3].mxu0 }
 0x1f5   : > { %728 = vst.msk [vmem:[#allocation3 + $0x8] sm:$0xff] %vm312_vm0, %v709_v10 }
 0x1fa   : > { %v2398_v12 = vld [vmem:[#allocation3] sm:$0xff] }
 0x1fb   : > { %v737_v13 = vmax.f32 %v2398_v12, 0.0 }
 0x1fc   : > { %v2401_v16 = vld [vmem:[#allocation3 + $0x8] sm:$0xff] }
 0x1fd   : > { %v761_v17 = vmul.f32 %v737_v13, %v2268_v15  ;;  %v738_v18 = vmax.f32 %v2401_v16, 0.0  ;;  %v713_v19 = vpop.f32.mrb[4].mxu0 }
 0x1fe   : > { %v714_v22 = vadd.f32 %v1772_v4, %v713_v19  ;;  %v715_v23 = vpop.f32.mrb[5].mxu0 }
 0x1ff   : > { %766 = vst.msk [vmem:[#allocation2 + $0x8] sm:$0xff] %vm312_vm0, %v761_v17  ;;  %v762_v24 = vmul.f32 %v738_v18, %v2276_v21  ;;  %v716_v57 = vpop.f32.mrb[6].mxu0 }
 0x200   : > { %729 = vst.msk [vmem:[#allocation3 + $0x10] sm:$0xff] %vm312_vm0, %v714_v22  ;;  %v717_v25 = vadd.f32 %v1772_v4, %v716_v57  ;;  %v718_v62 = vpop.f32.mrb[7].mxu0 }
 0x201   : > { %767 = vst.msk [vmem:[#allocation2 + $0x10] sm:$0xff] %vm312_vm0, %v762_v24 }
 0x202   : > { %730 = vst.msk [vmem:[#allocation3 + $0x18] sm:$0xff] %vm312_vm0, %v717_v25 }
 0x206   : > { %v781_v30 = vld [vmem:[#allocation2 + $0x3] sm:$0xff] }
 0x207   : > { %v2420_v29 = vld [vmem:[#allocation3 + $0x10] sm:$0xff] }
 0x208   : > { %v739_v31 = vmax.f32 %v2420_v29, 0.0  ;;  %v782_v32 = vld [vmem:[#allocation2 + $0xb] sm:$0xff]  ;;  %v776_v33 = vld [vmem:[#allocation2 + $0x2] sm:$0xff] }
 0x209   : > { %v777_v34 = vld [vmem:[#allocation2 + $0xa] sm:$0xff]  ;;  %v1978_v36 = vpack.i.bf16 %v782_v32, %v781_v30 }
 0x20a   : > { %v2424_v35 = vld [vmem:[#allocation3 + $0x18] sm:$0xff]  ;;  %v1973_v37 = vpack.i.bf16 %v777_v34, %v776_v33  ;;  %v763_v38 = vmul.f32 %v739_v31, %v2266_v14  ;;  %v721_v40 = vpop.f32.mrb[8].mxu0  ;;  %v791_v48 = vld [vmem:[#allocation2 + $0x8] sm:$0xff] }
 0x20b   : > { %v740_v39 = vmax.f32 %v2424_v35, 0.0  ;;  %v792_v41 = vld [vmem:[#allocation2 + $0x10] sm:$0xff]  ;;  %v722_v43 = vadd.f32 %v1772_v4, %v721_v40  ;;  %v723_v44 = vpop.f32.mrb[9].mxu0  ;;  %1979 = vrot.lane.b32.xlu1 %v1978_v36, %s2150_s15  ;;  %v786_v49 = vld [vmem:[#allocation2 + $0x7] sm:$0xff] }
 0x20c   : > { %v787_v42 = vld [vmem:[#allocation2 + $0xf] sm:$0xff]  ;;  %1974 = vrot.lane.b32.xlu0 %v1973_v37, %s2151_s16  ;;  %768 = vst.msk [vmem:[#allocation2 + $0x18] sm:$0xff] %vm312_vm0, %v763_v38  ;;  %v724_v47 = vpop.f32.mrb[10].mxu0  ;;  %v1988_v52 = vpack.i.bf16 %v792_v41, %v791_v48  ;;  %v1124_v37 = vld [vmem:[%s2732_s6] sm:$0xf] }
 0x20d   : > { %v764_v45 = vmul.f32 %v740_v39, %v2274_v20  ;;  %731 = vst.msk [vmem:[#allocation3 + $0x20] sm:$0xf] %vm315_vm1, %v722_v43  ;;  %v725_v51 = vpop.f32.mrb[11].mxu0  ;;  %v1983_v53 = vpack.i.bf16 %v787_v42, %v786_v49  ;;  %v798_v55 = vld [vmem:[#allocation2 + $0xd] sm:$0xff]  ;;  %v1144_v40 = vsel %vm1142_vm8, %v1124_v37, 0 }
 0x20e   : > { %v2444_v56 = vld [vmem:[#allocation2 + $0x9] sm:$0xff]  ;;  %1855 = vmatpush3.bf16.msra.mxu0 %v1144_v40 }
 0x20f   : > { %769 = vst.msk [vmem:[#allocation2 + $0x20] sm:$0xff] %vm312_vm0, %v764_v45  ;;  %1989 = vrot.lane.b32.xlu1 %v1988_v52, %s2152_s17  ;;  %v803_v10 = vld [vmem:[#allocation2 + $0xe] sm:$0xff]  ;;  %1868 = vmatprep.subr.bf16.mxu0 %v2149_v5  ;;  %v771_v52 = vld [vmem:[#allocation2 + $0x1] sm:$0xff] }
 0x210   : > { %1984 = vrot.lane.b32.xlu0 %v1983_v53, %s2153_s18  ;;  %v802_v41 = vld [vmem:[#allocation2 + $0x2d] sm:$0xf] }
 0x211   : > { %v807_v43 = vld [vmem:[#allocation2 + $0x2e] sm:$0xf] }
 0x213   : > { %v788_v58 = vld [vmem:[#allocation2 + $0x17] sm:$0xff] }
 0x214   : > { %v799_v59 = vld [vmem:[#allocation2 + $0x15] sm:$0xff]  ;;  %v986_v63 = vpack.c.bf16 %v788_v58, %v787_v42 }
 0x215   : > { %v2446_v60 = vld [vmem:[#allocation2 + $0x11] sm:$0xff]  ;;  %v1998_v0 = vpack.i.bf16 %v799_v59, %v798_v55 }
 0x216   : > { %v2449_v61 = vld [vmem:[#allocation3 + $0x20] sm:$0xf]  ;;  %v1993_v1 = vpack.i.bf16 %v2446_v60, %v2444_v56  ;;  %1795 = vmatprep.mubr.msk.bf16.mxu1 %vm312_vm0, %v986_v63  ;;  %v2459_v13 = vld [vmem:[#allocation2 + $0x1f] sm:$0xff] }
 0x217   : > { %v741_v3 = vmax.f32 %v2449_v61, 0.0  ;;  %v779_v4 = vld [vmem:[#allocation2 + $0x1a] sm:$0xff]  ;;  %1999 = vrot.lane.b32.xlu1 %v1998_v0, %s2154_s21  ;;  %v778_v8 = vld [vmem:[#allocation2 + $0x12] sm:$0xff]  ;;  %v2018_v18 = vpack.i.bf16 %v2459_v13, %v788_v58  ;;  %v780_v31 = vld [vmem:[#allocation2 + $0x22] sm:$0xf] }
 0x218   : > { %v804_v6 = vld [vmem:[#allocation2 + $0x16] sm:$0xff]  ;;  %1994 = vrot.lane.b32.xlu0 %v1993_v1, %s2155_s24  ;;  %v2008_v9 = vpack.i.bf16 %v779_v4, %v778_v8  ;;  %v794_v23 = vld [vmem:[#allocation2 + $0x20] sm:$0xff] }
 0x219   : > { %v765_v7 = vmul.f32 %v741_v3, %v2285_v26  ;;  %v2003_v11 = vpack.i.bf16 %v804_v6, %v803_v10  ;;  %v784_v17 = vld [vmem:[#allocation2 + $0x1b] sm:$0xff]  ;;  %v783_v19 = vld [vmem:[#allocation2 + $0x13] sm:$0xff]  ;;  %v785_v36 = vld [vmem:[#allocation2 + $0x23] sm:$0xf] }
 0x21a   : > { %v2013_v22 = vpack.i.bf16 %v784_v17, %v783_v19  ;;  %v793_v24 = vld [vmem:[#allocation2 + $0x18] sm:$0xff] }
 0x21b   : > { %770 = vst.msk [vmem:[#allocation2 + $0x28] sm:$0xf] %vm315_vm1, %v765_v7  ;;  %2009 = vrot.lane.b32.xlu1 %v2008_v9, %s2151_s16  ;;  %v2466_v57 = vld [vmem:[#allocation2 + $0x19] sm:$0xff]  ;;  %v2023_v62 = vpack.i.bf16 %v794_v23, %v793_v24 }
 0x21c   : > { %2004 = vrot.lane.b32.xlu0 %v2003_v11, %s2156_s25  ;;  %v805_v28 = vld [vmem:[#allocation2 + $0x1e] sm:$0xff] }
 0x21d   : > { %v800_v33 = vld [vmem:[#allocation2 + $0x1d] sm:$0xff] }
 0x21f   : > { %2019 = vrot.lane.b32.xlu1 %v2018_v18, %s2153_s18 }
 0x220   : > { %2014 = vrot.lane.b32.xlu0 %v2013_v22, %s2150_s15 }
 0x222   : > { %v796_v25 = vld [vmem:[#allocation2 + $0x21] sm:$0xff]  ;;  %v797_v42 = vld [vmem:[#allocation2 + $0x29] sm:$0xf] }
 0x223   : > { %v2028_v27 = vpack.i.bf16 %v796_v25, %v2466_v57  ;;  %v806_v46 = vld [vmem:[#allocation2 + $0x26] sm:$0xff] }
 0x224   : > { %2024 = vrot.lane.b32.xlu0 %v2023_v62, %s2152_s17  ;;  %v2038_v30 = vpack.i.bf16 %v806_v46, %v805_v28  ;;  %v801_v32 = vld [vmem:[#allocation2 + $0x25] sm:$0xff] }
 0x225   : > { %2029 = vrot.lane.b32.xlu1 %v2028_v27, %s2155_s24  ;;  %v2033_v34 = vpack.i.bf16 %v801_v32, %v800_v33  ;;  %v790_v38 = vld [vmem:[#allocation2 + $0x27] sm:$0xf] }
 0x226   : > { %v795_v39 = vld [vmem:[#allocation2 + $0x28] sm:$0xf] }
 0x227   : > { %v808_v28 = vld [vmem:[#allocation2 + $0x27] sm:$0xff] }
 0x228   : > { %823 = vrot.lane.b32.xlu0 %v780_v31, %s2151_s16 }
 0x229   : > { %2039 = vrot.lane.b32.xlu1 %v2038_v30, %s2156_s25 }
 0x22c   : > { %2034 = vrot.lane.b32.xlu0 %v2033_v34, %s2154_s21 }
 0x22d   : > { %843 = vrot.lane.b32.xlu1 %v785_v36, %s2150_s15  ;;  %v988_v36 = vpack.c.bf16 %v808_v28, %v2459_v13 }
 0x230   : > { %863 = vrot.lane.b32.xlu0 %v790_v38, %s2153_s18 }
 0x231   : > { %883 = vrot.lane.b32.xlu1 %v795_v39, %s2152_s17 }
 0x234   : > { %903 = vrot.lane.b32.xlu0 %v797_v42, %s2155_s24 }
 0x235   : > { %923 = vrot.lane.b32.xlu1 %v802_v41, %s2154_s21 }
 0x238   : > { %943 = vrot.lane.b32.xlu0 %v807_v43, %s2156_s25 }
 0x27d   : > { %v1980_v45 = vpop.permute.xlu1 %1979 }
 0x27e   : > { %v1975_v44 = vpop.permute.xlu0 %1974  ;;  %v1982_v50 = vunpack.i.h.bf16 %v1980_v45  ;;  %v1981_v51 = vunpack.i.l.bf16 %v1980_v45 }
 0x27f   : > { %v1977_v47 = vunpack.i.h.bf16 %v1975_v44  ;;  %v1976_v48 = vunpack.i.l.bf16 %v1975_v44 }
 0x281   : > { %v950_v53 = vsel %vm312_vm0, %v771_v52, %v1976_v48  ;;  %v951_v54 = vsel %vm312_vm0, %v2444_v56, %v1977_v47  ;;  %v1990_v55 = vpop.permute.xlu1 %1989 }
 0x282   : > { %v1985_v49 = vpop.permute.xlu0 %1984  ;;  %v1992_v63 = vunpack.i.h.bf16 %v1990_v55  ;;  %v1991_v0 = vunpack.i.l.bf16 %v1990_v55  ;;  %v955_v1 = vsel %vm560_vm2, %v950_v53, %v1981_v51  ;;  %v956_v3 = vsel %vm560_vm2, %v951_v54, %v1982_v50 }
 0x283   : > { %v1987_v58 = vunpack.i.h.bf16 %v1985_v49  ;;  %v1986_v59 = vunpack.i.l.bf16 %v1985_v49 }
 0x285   : > { %v960_v4 = vsel %vm566_vm3, %v955_v1, %v1986_v59  ;;  %v961_v6 = vsel %vm566_vm3, %v956_v3, %v1987_v58  ;;  %v809_v3 = vld [vmem:[#allocation2 + $0x2f] sm:$0xf] }
 0x286   : > { %v965_v56 = vsel %vm572_vm4, %v960_v4, %v1991_v0  ;;  %v966_v18 = vsel %vm572_vm4, %v961_v6, %v1992_v63 }
 0x289   : > { %v2000_v7 = vpop.permute.xlu1 %1999 }
 0x28a   : > { %v1995_v8 = vpop.permute.xlu0 %1994  ;;  %v2002_v11 = vunpack.i.h.bf16 %v2000_v7  ;;  %v2001_v17 = vunpack.i.l.bf16 %v2000_v7  ;;  %v775_v7 = vld [vmem:[#allocation2 + $0x21] sm:$0xf] }
 0x28b   : > { %v1997_v9 = vunpack.i.h.bf16 %v1995_v8  ;;  %v1996_v10 = vunpack.i.l.bf16 %v1995_v8 }
 0x28d   : > { %v970_v19 = vsel %vm578_vm5, %v965_v56, %v1996_v10  ;;  %v971_v22 = vsel %vm578_vm5, %v966_v18, %v1997_v9  ;;  %v2010_v23 = vpop.permute.xlu1 %2009 }
 0x28e   : > { %v2005_v24 = vpop.permute.xlu0 %2004  ;;  %v975_v27 = vsel %vm584_vm6, %v970_v19, %v2001_v17  ;;  %v976_v46 = vsel %vm584_vm6, %v971_v22, %v2002_v11  ;;  %v2012_v37 = vunpack.i.h.bf16 %v2010_v23  ;;  %v2011_v38 = vunpack.i.l.bf16 %v2010_v23 }
 0x28f   : > { %v2007_v25 = vunpack.i.h.bf16 %v2005_v24  ;;  %v2006_v62 = vunpack.i.l.bf16 %v2005_v24  ;;  %v990_v24 = vpack.c.bf16 %v809_v3, %v809_v3  ;;  %v2132_v3 = vld [vmem:[%s2730_s4 + $0x50] sm:$0xff]  }
 0x290   : > { %v953_v43 = vsel %vm312_vm0, %v2466_v57, %v2012_v37  ;;  %v952_v44 = vsel %vm312_vm0, %v2446_v60, %v2011_v38 }
 0x291   : > { %v2020_v30 = vpop.permute.xlu1 %2019  ;;  %v980_v31 = vsel %vm590_vm7, %v975_v27, %v2006_v62  ;;  %v981_v32 = vsel %vm590_vm7, %v976_v46, %v2007_v25 }
 0x292   : > { %v2015_v33 = vpop.permute.xlu0 %2014  ;;  %v985_v34 = vpack.c.bf16 %v981_v32, %v980_v31  ;;  %v2022_v45 = vunpack.i.h.bf16 %v2020_v30  ;;  %v2021_v47 = vunpack.i.l.bf16 %v2020_v30 }
 0x293   : > { %v2017_v39 = vunpack.i.h.bf16 %v2015_v33  ;;  %v2016_v40 = vunpack.i.l.bf16 %v2015_v33 }
 0x294   : > { %1093 = vmatmul.mubr.bf16.vlgmr.msra.gmra.mrb[0].mxu1 %v985_v34 }
 0x295   : > { %1796 = vmatprep.mubr.msk.bf16.mxu1 %vm312_vm0, %v988_v36  ;;  %v958_v48 = vsel %vm560_vm2, %v953_v43, %v2017_v39  ;;  %v957_v13 = vsel %vm560_vm2, %v952_v44, %v2016_v40  ;;  %v1785_v36 = vld [vmem:[%s2731_s5] ss:$0 sm:$0xff] }
 0x296   : > { %v2025_v41 = vpop.permute.xlu0 %2024  ;;  %v962_v53 = vsel %vm566_vm3, %v957_v13, %v2021_v47  ;;  %v963_v54 = vsel %vm566_vm3, %v958_v48, %v2022_v45 }
 0x297   : > { %v2030_v42 = vpop.permute.xlu1 %2029  ;;  %v2027_v49 = vunpack.i.h.bf16 %v2025_v41  ;;  %v2026_v50 = vunpack.i.l.bf16 %v2025_v41 }
 0x298   : > { %v2032_v55 = vunpack.i.h.bf16 %v2030_v42  ;;  %v2031_v58 = vunpack.i.l.bf16 %v2030_v42 }
 0x299   : > { %v967_v57 = vsel %vm572_vm4, %v962_v53, %v2026_v50  ;;  %v968_v60 = vsel %vm572_vm4, %v963_v54, %v2027_v49 }
 0x29a   : > { %v824_v51 = vpop.permute.xlu0 %823  ;;  %v972_v4 = vsel %vm578_vm5, %v967_v57, %v2031_v58  ;;  %v973_v6 = vsel %vm578_vm5, %v968_v60, %v2032_v55 }
 0x29b   : > { %v2040_v52 = vpop.permute.xlu1 %2039  ;;  %v954_v10 = vsel %vm312_vm0, %v775_v7, %v824_v51 }
 0x29c   : > { %v2042_v8 = vunpack.i.h.bf16 %v2040_v52  ;;  %v2041_v9 = vunpack.i.l.bf16 %v2040_v52 }
 0x29e   : > { %v2035_v59 = vpop.permute.xlu0 %2034 }
 0x29f   : > { %v844_v63 = vpop.permute.xlu1 %843  ;;  %v2037_v0 = vunpack.i.h.bf16 %v2035_v59  ;;  %v2036_v1 = vunpack.i.l.bf16 %v2035_v59 }
 0x2a0   : > { %v959_v56 = vsel %vm560_vm2, %v954_v10, %v844_v63 }
 0x2a1   : > { %v977_v11 = vsel %vm584_vm6, %v972_v4, %v2036_v1  ;;  %v978_v17 = vsel %vm584_vm6, %v973_v6, %v2037_v0  ;;  %v2131_v1 = vld [vmem:[%s2730_s4 + $0x48] sm:$0xff]   ;;  %v2133_v4 = vld [vmem:[%s2730_s4 + $0x58] sm:$0xff]   ;;  %v1798_v6 = vld [vmem:[%s2733_s7] ss:$0 sm:$0xff] }
 0x2a2   : > { %v864_v18 = vpop.permute.xlu0 %863  ;;  %v982_v22 = vsel %vm590_vm7, %v977_v11, %v2041_v9  ;;  %v983_v23 = vsel %vm590_vm7, %v978_v17, %v2042_v8  ;;  %1543 = vmatpush1.bf16.msra.mxu1 %v2131_v1 }
 0x2a3   : > { %v884_v19 = vpop.permute.xlu1 %883  ;;  %v964_v25 = vsel %vm566_vm3, %v959_v56, %v864_v18  ;;  %v987_v62 = vpack.c.bf16 %v983_v23, %v982_v22  ;;  %1544 = vmatprep.subr.bf16.mxu1 %v2148_v2 }
 0x2a4   : > { %v969_v27 = vsel %vm572_vm4, %v964_v25, %v884_v19 }
 0x2a5   : > { %1101 = vmatmul.mubr.bf16.gmra.mrb[4].mxu1 %v987_v62 }
 0x2a6   : > { %v904_v46 = vpop.permute.xlu0 %903  ;;  %1797 = vmatprep.mubr.msk.bf16.mxu1 %vm312_vm0, %v990_v24  ;;  %1545 = vmatpush1.bf16.msra.mxu1 %v2132_v3 }
 0x2a7   : > { %v974_v28 = vsel %vm578_vm5, %v969_v27, %v904_v46  ;;  %v924_v30 = vpop.permute.xlu1 %923  ;;  %1546 = vmatprep.subr.bf16.mxu1 %v2148_v2 }
 0x2a8   : > { %v979_v31 = vsel %vm584_vm6, %v974_v28, %v924_v30 }
 0x2aa   : > { %v944_v32 = vpop.permute.xlu0 %943  ;;  %1547 = vmatpush1.bf16.msra.mxu1 %v2133_v4 }
 0x2ab   : > { %v984_v33 = vsel %vm590_vm7, %v979_v31, %v944_v32  ;;  %1548 = vmatprep.subr.bf16.mxu1 %v2148_v2  ;;  %v2135_v32 = vld [vmem:[%s2730_s4 + $0x68] sm:$0xff]  }
 0x2ac   : > { %v989_v34 = vpack.c.bf16 %v984_v33, %v984_v33 }
 0x2ae   : > { %1109 = vmatmul.mubr.bf16.gmra.mrb[8].mxu1 %v989_v34 }
 0x367   : > { %v1094_v37 = vpop.f32.mrb[0].mxu1 }
 0x368   : > { %v1095_v38 = vadd.f32 %v1785_v36, %v1094_v37  ;;  %v1096_v39 = vpop.f32.mrb[1].mxu1 }
 0x369   : > { %v1097_v40 = vpop.f32.mrb[2].mxu1 }
 0x36a   : > { %v1098_v41 = vadd.f32 %v1785_v36, %v1097_v40  ;;  %v1099_v42 = vpop.f32.mrb[3].mxu1  ;;  %v1116_v43 = vmax.f32 %v1095_v38, 0.0 }
 0x36c   : > { %v1117_v44 = vmax.f32 %v1098_v41, 0.0 }
 0x36e   : > { %v1121_v45 = vpack.c.bf16 %v1117_v44, %v1116_v43 }
 0x370   : > { %1857 = vmatmul.mubr.msk.bf16.vlgmr.msra.gmra.mrb[12].mxu0 %vm1132_vm10, %v1121_v45 }
 0x371   : > { %1860 = vmatprep.mubr.msk.bf16.mxu0 %vm2157_vm9, %v2149_v5 }
 0x378   : > { %v1102_v47 = vpop.f32.mrb[4].mxu1 }
 0x379   : > { %v1103_v48 = vadd.f32 %v1785_v36, %v1102_v47  ;;  %v1104_v13 = vpop.f32.mrb[5].mxu1 }
 0x37a   : > { %v1105_v49 = vpop.f32.mrb[6].mxu1 }
 0x37b   : > { %v1106_v50 = vadd.f32 %v1785_v36, %v1105_v49  ;;  %v1107_v51 = vpop.f32.mrb[7].mxu1  ;;  %v1118_v52 = vmax.f32 %v1103_v48, 0.0  ;;  %v2137_v48 = vld [vmem:[%s2730_s4 + $0x78] sm:$0xff]  }
 0x37d   : > { %v1119_v53 = vmax.f32 %v1106_v50, 0.0 }
 0x37f   : > { %v1122_v54 = vpack.c.bf16 %v1119_v53, %v1118_v52 }
 0x381   : > { %v1110_v55 = vpop.f32.mrb[8].mxu1  ;;  %1861 = vmatmul.mubr.msk.bf16.gmra.mrb[16].mxu0 %vm1132_vm10, %v1122_v54 }
 0x382   : > { %v1111_v58 = vadd.f32 %v1785_v36, %v1110_v55  ;;  %v1112_v57 = vpop.f32.mrb[9].mxu1  ;;  %1864 = vmatprep.mubr.msk.bf16.mxu0 %vm2157_vm9, %v2149_v5 }
 0x383   : > { %v1113_v60 = vpop.f32.mrb[10].mxu1  ;;  %v2138_v57 = vld [vmem:[%s2730_s4 + $0x80] sm:$0xff]  }
 0x384   : > { %v1120_v59 = vmax.f32 %v1111_v58, 0.0  ;;  %v1114_v63 = vpop.f32.mrb[11].mxu1 }
 0x386   : > { %v1123_v0 = vpack.c.bf16 %v1120_v59, %v1120_v59  ;;  %v2139_v59 = vld [vmem:[%s2730_s4 + $0x88] sm:$0xff]  }
 0x389   : > { %1865 = vmatmul.mubr.msk.bf16.gmra.mrb[20].mxu0 %vm1132_vm10, %v1123_v0 }
 0x38a   : > { %1870 = vmatprep.mubr.msk.bf16.mxu0 %vm2157_vm9, %v2149_v5 }
 0x443   : > { %v1180_v7 = vpop.f32.mrb[12].mxu0 }
 0x444   : > { %v1181_v8 = vadd.f32 %v1798_v6, %v1180_v7  ;;  %v1858_v9 = vpop.f32.mrb[13].mxu0 }
 0x445   : > { %v1183_v10 = vpop.f32.mrb[14].mxu0 }
 0x446   : > { %v1202_v11 = vadd.f32 %v1181_v8, %v2398_v12  ;;  %v1184_v17 = vadd.f32 %v1798_v6, %v1183_v10  ;;  %v1859_v56 = vpop.f32.mrb[15].mxu0 }
 0x448   : > { %1207 = vst.msk [vmem:[#allocation3] sm:$0xff] %vm312_vm0, %v1202_v11  ;;  %v1203_v18 = vadd.f32 %v1184_v17, %v2401_v16  ;;  %v2134_v16 = vld [vmem:[%s2730_s4 + $0x60] sm:$0xff]  }
 0x449   : > { %1549 = vmatpush1.bf16.msra.mxu1 %v2134_v16 }
 0x44a   : > { %1208 = vst.msk [vmem:[#allocation3 + $0x8] sm:$0xff] %vm312_vm0, %v1203_v18  ;;  %1550 = vmatprep.subr.bf16.mxu1 %v2148_v2 }
 0x44d   : > { %1551 = vmatpush1.bf16.msra.mxu1 %v2135_v32 }
 0x44e   : > { %1552 = vmatprep.subr.bf16.mxu1 %v2148_v2 }
 0x44f   : > { %v2559_v19 = vld [vmem:[#allocation3] sm:$0xff] }
 0x450   : > { %v1217_v22 = vmax.f32 %v2559_v19, 0.0 }
 0x451   : > { %v2562_v23 = vld [vmem:[#allocation3 + $0x8] sm:$0xff] }
 0x452   : > { %v1243_v24 = vmul.f32 %v1217_v22, %v2268_v15  ;;  %v1218_v25 = vmax.f32 %v2562_v23, 0.0 }
 0x454   : > { %1248 = vst.msk [vmem:[#allocation2 + $0x8] sm:$0xff] %vm312_vm0, %v1243_v24  ;;  %v1244_v12 = vmul.f32 %v1218_v25, %v2276_v21  ;;  %v1188_v62 = vpop.f32.mrb[16].mxu0 }
 0x455   : > { %v1189_v27 = vadd.f32 %v1798_v6, %v1188_v62  ;;  %v1862_v46 = vpop.f32.mrb[17].mxu0 }
 0x456   : > { %1249 = vst.msk [vmem:[#allocation2 + $0x10] sm:$0xff] %vm312_vm0, %v1244_v12  ;;  %v1191_v28 = vpop.f32.mrb[18].mxu0 }
 0x457   : > { %v1204_v30 = vadd.f32 %v1189_v27, %v2420_v29  ;;  %v1192_v31 = vadd.f32 %v1798_v6, %v1191_v28  ;;  %v1863_v15 = vpop.f32.mrb[19].mxu0  ;;  %v2136_v29 = vld [vmem:[%s2730_s4 + $0x70] sm:$0xff]  }
 0x458   : > { %1553 = vmatpush1.bf16.msra.mxu1 %v2136_v29 }
 0x459   : > { %1209 = vst.msk [vmem:[#allocation3 + $0x10] sm:$0xff] %vm312_vm0, %v1204_v30  ;;  %v1205_v21 = vadd.f32 %v1192_v31, %v2424_v35  ;;  %1554 = vmatprep.subr.bf16.mxu1 %v2148_v2 }
 0x45b   : > { %1210 = vst.msk [vmem:[#allocation3 + $0x18] sm:$0xff] %vm312_vm0, %v1205_v21  ;;  %v1263_v34 = vld [vmem:[#allocation2 + $0x3] sm:$0xff] }
 0x45c   : > { %v1196_v33 = vpop.f32.mrb[20].mxu0  ;;  %v1258_v39 = vld [vmem:[#allocation2 + $0x2] sm:$0xff]  ;;  %1555 = vmatpush1.bf16.msra.mxu1 %v2137_v48 }
 0x45d   : > { %v1197_v36 = vadd.f32 %v1798_v6, %v1196_v33  ;;  %v1866_v37 = vpop.f32.mrb[21].mxu0  ;;  %v1264_v38 = vld [vmem:[#allocation2 + $0xb] sm:$0xff]  ;;  %1556 = vmatprep.subr.bf16.mxu1 %v2148_v2 }
 0x45e   : > { %v1259_v35 = vld [vmem:[#allocation2 + $0xa] sm:$0xff]  ;;  %v1199_v40 = vpop.f32.mrb[22].mxu0  ;;  %v2048_v41 = vpack.i.bf16 %v1264_v38, %v1263_v34  ;;  %v1834_v37 = vld [vmem:[%s2732_s6 + $0x4] sm:$0xf] }
 0x45f   : > { %v2043_v42 = vpack.i.bf16 %v1259_v35, %v1258_v39  ;;  %v1206_v43 = vadd.f32 %v1197_v36, %v2449_v61  ;;  %v1867_v44 = vpop.f32.mrb[23].mxu0  ;;  %v1274_v45 = vld [vmem:[#allocation2 + $0x10] sm:$0xff]  ;;  %v1273_v50 = vld [vmem:[#allocation2 + $0x8] sm:$0xff]  ;;  %v1626_v39 = vsel %vm1142_vm8, %v1834_v37, 0 }
 0x460   : > { %v1269_v47 = vld [vmem:[#allocation2 + $0xf] sm:$0xff]  ;;  %2049 = vrot.lane.b32.xlu0 %v2048_v41, %s2150_s15  ;;  %v1268_v61 = vld [vmem:[#allocation2 + $0x7] sm:$0xff]  ;;  %v2058_v52 = vpack.i.bf16 %v1274_v45, %v1273_v50  ;;  %1557 = vmatpush1.bf16.msra.mxu1 %v2138_v57 }
 0x461   : > { %v2588_v13 = vld [vmem:[#allocation3 + $0x10] sm:$0xff]  ;;  %2044 = vrot.lane.b32.xlu1 %v2043_v42, %s2151_s16  ;;  %1211 = vst.msk [vmem:[#allocation3 + $0x20] sm:$0xf] %vm315_vm1, %v1206_v43  ;;  %v2053_v53 = vpack.i.bf16 %v1269_v47, %v1268_v61  ;;  %1558 = vmatprep.subr.bf16.mxu1 %v2148_v2 }
 0x462   : > { %v1219_v49 = vmax.f32 %v2588_v13, 0.0  ;;  %v2595_v51 = vld [vmem:[#allocation3 + $0x18] sm:$0xff]  ;;  %1869 = vmatpush3.bf16.msra.mxu0 %v1626_v39  ;;  %v1253_v50 = vld [vmem:[#allocation2 + $0x1] sm:$0xff] }
 0x463   : > { %v1220_v55 = vmax.f32 %v2595_v51, 0.0  ;;  %v1280_v63 = vld [vmem:[#allocation2 + $0xd] sm:$0xff] }
 0x464   : > { %v1245_v54 = vmul.f32 %v1219_v49, %v2266_v14  ;;  %2059 = vrot.lane.b32.xlu0 %v2058_v52, %s2152_s17  ;;  %v2616_v0 = vld [vmem:[#allocation2 + $0x9] sm:$0xff]  ;;  %1559 = vmatpush1.bf16.msra.mxu1 %v2139_v59 }
 0x465   : > { %2054 = vrot.lane.b32.xlu1 %v2053_v53, %s2153_s18  ;;  %v1246_v58 = vmul.f32 %v1220_v55, %v2274_v20  ;;  %v1285_v10 = vld [vmem:[#allocation2 + $0xe] sm:$0xff] }
 0x466   : > { %1250 = vst.msk [vmem:[#allocation2 + $0x18] sm:$0xff] %vm312_vm0, %v1245_v54  ;;  %v1284_v35 = vld [vmem:[#allocation2 + $0x2d] sm:$0xf] }
 0x467   : > { %1251 = vst.msk [vmem:[#allocation2 + $0x20] sm:$0xff] %vm312_vm0, %v1246_v58  ;;  %v1289_v41 = vld [vmem:[#allocation2 + $0x2e] sm:$0xf] }
 0x468   : > { %v2608_v14 = vld [vmem:[#allocation3 + $0x20] sm:$0xf] }
 0x469   : > { %v1221_v60 = vmax.f32 %v2608_v14, 0.0 }
 0x46b   : > { %v1247_v20 = vmul.f32 %v1221_v60, %v2285_v26 }
 0x46d   : > { %v1270_v1 = vld [vmem:[#allocation2 + $0x17] sm:$0xff]  ;;  %1252 = vst.msk [vmem:[#allocation2 + $0x28] sm:$0xf] %vm315_vm1, %v1247_v20 }
 0x46e   : > { %v1281_v3 = vld [vmem:[#allocation2 + $0x15] sm:$0xff]  ;;  %v1468_v6 = vpack.c.bf16 %v1270_v1, %v1269_v47  ;;  %v2626_v56 = vld [vmem:[#allocation2 + $0x1f] sm:$0xff] }
 0x46f   : > { %v2618_v4 = vld [vmem:[#allocation2 + $0x11] sm:$0xff]  ;;  %v2068_v2 = vpack.i.bf16 %v1281_v3, %v1280_v63  ;;  %v1261_v8 = vld [vmem:[#allocation2 + $0x1a] sm:$0xff]  ;;  %v2088_v24 = vpack.i.bf16 %v2626_v56, %v1270_v1  ;;  %v1267_v33 = vld [vmem:[#allocation2 + $0x23] sm:$0xf] }
 0x470   : > { %v2063_v7 = vpack.i.bf16 %v2618_v4, %v2616_v0  ;;  %1831 = vmatprep.mubr.msk.bf16.mxu1 %vm312_vm0, %v1468_v6  ;;  %v1286_v26 = vld [vmem:[#allocation2 + $0x16] sm:$0xff]  ;;  %v1276_v62 = vld [vmem:[#allocation2 + $0x20] sm:$0xff] }
 0x471   : > { %2069 = vrot.lane.b32.xlu0 %v2068_v2, %s2154_s21  ;;  %v1260_v9 = vld [vmem:[#allocation2 + $0x12] sm:$0xff]  ;;  %v2073_v17 = vpack.i.bf16 %v1286_v26, %v1285_v10  ;;  %v1266_v18 = vld [vmem:[#allocation2 + $0x1b] sm:$0xff] }
 0x472   : > { %2064 = vrot.lane.b32.xlu1 %v2063_v7, %s2155_s24  ;;  %v2078_v11 = vpack.i.bf16 %v1261_v8, %v1260_v9  ;;  %v1265_v22 = vld [vmem:[#allocation2 + $0x13] sm:$0xff]  ;;  %v1287_v15 = vld [vmem:[#allocation2 + $0x1e] sm:$0xff] }
 0x473   : > { %v2083_v25 = vpack.i.bf16 %v1266_v18, %v1265_v22  ;;  %v2633_v27 = vld [vmem:[#allocation2 + $0x19] sm:$0xff]  ;;  %v1262_v34 = vld [vmem:[#allocation2 + $0x22] sm:$0xf] }
 0x474   : > { %v1278_v12 = vld [vmem:[#allocation2 + $0x21] sm:$0xff]  ;;  %v1275_v46 = vld [vmem:[#allocation2 + $0x18] sm:$0xff]  ;;  %v1279_v40 = vld [vmem:[#allocation2 + $0x29] sm:$0xf] }
 0x475   : > { %2079 = vrot.lane.b32.xlu0 %v2078_v11, %s2151_s16  ;;  %v2098_v16 = vpack.i.bf16 %v1278_v12, %v2633_v27  ;;  %v2093_v28 = vpack.i.bf16 %v1276_v62, %v1275_v46  ;;  %v1288_v30 = vld [vmem:[#allocation2 + $0x26] sm:$0xff]  ;;  %v1282_v21 = vld [vmem:[#allocation2 + $0x1d] sm:$0xff] }
 0x476   : > { %2074 = vrot.lane.b32.xlu1 %v2073_v17, %s2156_s25  ;;  %v1283_v31 = vld [vmem:[#allocation2 + $0x25] sm:$0xff]  ;;  %v2108_v32 = vpack.i.bf16 %v1288_v30, %v1287_v15 }
 0x477   : > { %v2103_v29 = vpack.i.bf16 %v1283_v31, %v1282_v21  ;;  %v1277_v36 = vld [vmem:[#allocation2 + $0x28] sm:$0xf] }
 0x478   : > { %v1272_v38 = vld [vmem:[#allocation2 + $0x27] sm:$0xf] }
 0x479   : > { %2089 = vrot.lane.b32.xlu0 %v2088_v24, %s2153_s18  ;;  %v1290_v24 = vld [vmem:[#allocation2 + $0x27] sm:$0xff] }
 0x47a   : > { %2084 = vrot.lane.b32.xlu1 %v2083_v25, %s2150_s15  ;;  %v1470_v21 = vpack.c.bf16 %v1290_v24, %v2626_v56 }
 0x47d   : > { %2099 = vrot.lane.b32.xlu0 %v2098_v16, %s2155_s24 }
 0x47e   : > { %2094 = vrot.lane.b32.xlu1 %v2093_v28, %s2152_s17 }
 0x481   : > { %2109 = vrot.lane.b32.xlu0 %v2108_v32, %s2156_s25 }
 0x482   : > { %2104 = vrot.lane.b32.xlu1 %v2103_v29, %s2154_s21 }
 0x485   : > { %1325 = vrot.lane.b32.xlu0 %v1267_v33, %s2150_s15 }
 0x486   : > { %1305 = vrot.lane.b32.xlu1 %v1262_v34, %s2151_s16 }
 0x489   : > { %1365 = vrot.lane.b32.xlu0 %v1277_v36, %s2152_s17 }
 0x48a   : > { %1345 = vrot.lane.b32.xlu1 %v1272_v38, %s2153_s18 }
 0x48d   : > { %1405 = vrot.lane.b32.xlu0 %v1284_v35, %s2154_s21  ;;  %s1845_s21 = sshll.u32 %s2736_s28, 4 }
 0x48e   : > { %1385 = vrot.lane.b32.xlu1 %v1279_v40, %s2155_s24  ;;  %s305_s13 = scalar_lea.vmem %s2734_s8, %s1845_s21 }
 0x492   : > { %1425 = vrot.lane.b32.xlu1 %v1289_v41, %s2156_s25 }
 0x4d2   : > { %v2050_v43 = vpop.permute.xlu0 %2049 }
 0x4d3   : > { %v2045_v42 = vpop.permute.xlu1 %2044  ;;  %v2052_v48 = vunpack.i.h.bf16 %v2050_v43  ;;  %v2051_v49 = vunpack.i.l.bf16 %v2050_v43 }
 0x4d4   : > { %v2047_v44 = vunpack.i.h.bf16 %v2045_v42  ;;  %v2046_v45 = vunpack.i.l.bf16 %v2045_v42 }
 0x4d6   : > { %v1432_v61 = vsel %vm312_vm0, %v1253_v50, %v2046_v45  ;;  %v1433_v52 = vsel %vm312_vm0, %v2616_v0, %v2047_v44  ;;  %v2060_v53 = vpop.permute.xlu0 %2059 }
 0x4d7   : > { %v2055_v47 = vpop.permute.xlu1 %2054  ;;  %v2062_v58 = vunpack.i.h.bf16 %v2060_v53  ;;  %v2061_v57 = vunpack.i.l.bf16 %v2060_v53  ;;  %v1437_v60 = vsel %vm560_vm2, %v1432_v61, %v2051_v49  ;;  %v1438_v59 = vsel %vm560_vm2, %v1433_v52, %v2052_v48  ;;  %v1291_v53 = vld [vmem:[#allocation2 + $0x2f] sm:$0xf] }
 0x4d8   : > { %v2057_v54 = vunpack.i.h.bf16 %v2055_v47  ;;  %v2056_v55 = vunpack.i.l.bf16 %v2055_v47 }
 0x4da   : > { %v1442_v20 = vsel %vm566_vm3, %v1437_v60, %v2056_v55  ;;  %v1443_v63 = vsel %vm566_vm3, %v1438_v59, %v2057_v54  ;;  %v1257_v59 = vld [vmem:[#allocation2 + $0x21] sm:$0xf] }
 0x4db   : > { %v1447_v0 = vsel %vm572_vm4, %v1442_v20, %v2061_v57  ;;  %v1448_v26 = vsel %vm572_vm4, %v1443_v63, %v2062_v58 }
 0x4e3   : > { %v2070_v1 = vpop.permute.xlu0 %2069 }
 0x4e4   : > { %v2065_v3 = vpop.permute.xlu1 %2064  ;;  %v2072_v7 = vunpack.i.h.bf16 %v2070_v1  ;;  %v2071_v8 = vunpack.i.l.bf16 %v2070_v1 }
 0x4e5   : > { %v2067_v6 = vunpack.i.h.bf16 %v2065_v3  ;;  %v2066_v2 = vunpack.i.l.bf16 %v2065_v3  ;;  %v1472_v3 = vpack.c.bf16 %v1291_v53, %v1291_v53 }
 0x4e7   : > { %v1453_v9 = vsel %vm578_vm5, %v1448_v26, %v2067_v6  ;;  %v1452_v10 = vsel %vm578_vm5, %v1447_v0, %v2066_v2  ;;  %v2080_v11 = vpop.permute.xlu0 %2079 }
 0x4e8   : > { %v2075_v17 = vpop.permute.xlu1 %2074  ;;  %v1457_v25 = vsel %vm584_vm6, %v1452_v10, %v2071_v8  ;;  %v1458_v12 = vsel %vm584_vm6, %v1453_v9, %v2072_v7  ;;  %v2082_v62 = vunpack.i.h.bf16 %v2080_v11  ;;  %v2081_v46 = vunpack.i.l.bf16 %v2080_v11 }
 0x4e9   : > { %v2077_v18 = vunpack.i.h.bf16 %v2075_v17  ;;  %v2076_v22 = vunpack.i.l.bf16 %v2075_v17 }
 0x4ea   : > { %v1434_v33 = vsel %vm312_vm0, %v2618_v4, %v2081_v46  ;;  %v1435_v34 = vsel %vm312_vm0, %v2633_v27, %v2082_v62 }
 0x4eb   : > { %v1462_v16 = vsel %vm590_vm7, %v1457_v25, %v2076_v22  ;;  %v1463_v28 = vsel %vm590_vm7, %v1458_v12, %v2077_v18  ;;  %v2090_v30 = vpop.permute.xlu0 %2089  ;;  %v1821_v12 = vld [vmem:[%s2731_s5 + $0x1] ss:$0 sm:$0xff] }
 0x4ec   : > { %v1467_v31 = vpack.c.bf16 %v1463_v28, %v1462_v16  ;;  %v2085_v15 = vpop.permute.xlu1 %2084  ;;  %v2092_v36 = vunpack.i.h.bf16 %v2090_v30  ;;  %v2091_v37 = vunpack.i.l.bf16 %v2090_v30 }
 0x4ed   : > { %v2087_v32 = vunpack.i.h.bf16 %v2085_v15  ;;  %v2086_v29 = vunpack.i.l.bf16 %v2085_v15 }
 0x4ee   : > { %1575 = vmatmul.mubr.bf16.vlgmr.msra.gmra.mrb[12].mxu1 %v1467_v31 }
 0x4ef   : > { %v1439_v38 = vsel %vm560_vm2, %v1434_v33, %v2086_v29  ;;  %v1440_v39 = vsel %vm560_vm2, %v1435_v34, %v2087_v32  ;;  %1832 = vmatprep.mubr.msk.bf16.mxu1 %vm312_vm0, %v1470_v21  ;;  %v2100_v35 = vpop.permute.xlu0 %2099 }
 0x4f0   : > { %v2095_v40 = vpop.permute.xlu1 %2094  ;;  %v1444_v42 = vsel %vm566_vm3, %v1439_v38, %v2091_v37  ;;  %v1445_v4 = vsel %vm566_vm3, %v1440_v39, %v2092_v36  ;;  %v2102_v43 = vunpack.i.h.bf16 %v2100_v35  ;;  %v2101_v44 = vunpack.i.l.bf16 %v2100_v35 }
 0x4f1   : > { %v2097_v56 = vunpack.i.h.bf16 %v2095_v40  ;;  %v2096_v41 = vunpack.i.l.bf16 %v2095_v40 }
 0x4f3   : > { %v1449_v27 = vsel %vm572_vm4, %v1444_v42, %v2096_v41  ;;  %v1450_v45 = vsel %vm572_vm4, %v1445_v4, %v2097_v56  ;;  %v2110_v47 = vpop.permute.xlu0 %2109 }
 0x4f4   : > { %v2105_v48 = vpop.permute.xlu1 %2104  ;;  %v2112_v49 = vunpack.i.h.bf16 %v2110_v47  ;;  %v2111_v50 = vunpack.i.l.bf16 %v2110_v47  ;;  %v1455_v54 = vsel %vm578_vm5, %v1450_v45, %v2102_v43  ;;  %v1454_v55 = vsel %vm578_vm5, %v1449_v27, %v2101_v44  ;;  %v1836_v45 = vld [vmem:[%s2733_s7 + $0x1] ss:$0 sm:$0xff] }
 0x4f5   : > { %v2107_v61 = vunpack.i.h.bf16 %v2105_v48  ;;  %v2106_v52 = vunpack.i.l.bf16 %v2105_v48 }
 0x4f7   : > { %v1459_v58 = vsel %vm584_vm6, %v1454_v55, %v2106_v52  ;;  %v1460_v57 = vsel %vm584_vm6, %v1455_v54, %v2107_v61  ;;  %v1326_v60 = vpop.permute.xlu0 %1325 }
 0x4f8   : > { %v1306_v20 = vpop.permute.xlu1 %1305  ;;  %v1464_v63 = vsel %vm590_vm7, %v1459_v58, %v2111_v50  ;;  %v1465_v1 = vsel %vm590_vm7, %v1460_v57, %v2112_v49 }
 0x4f9   : > { %v1436_v6 = vsel %vm312_vm0, %v1257_v59, %v1306_v20  ;;  %v1469_v2 = vpack.c.bf16 %v1465_v1, %v1464_v63 }
 0x4fa   : > { %v1441_v8 = vsel %vm560_vm2, %v1436_v6, %v1326_v60 }
 0x4fb   : > { %1583 = vmatmul.mubr.bf16.gmra.mrb[16].mxu1 %v1469_v2  ;;  %v1366_v7 = vpop.permute.xlu0 %1365 }
 0x4fc   : > { %v1346_v0 = vpop.permute.xlu1 %1345  ;;  %1833 = vmatprep.mubr.msk.bf16.mxu1 %vm312_vm0, %v1472_v3 }
 0x4fd   : > { %v1446_v26 = vsel %vm566_vm3, %v1441_v8, %v1346_v0 }
 0x4fe   : > { %v1451_v9 = vsel %vm572_vm4, %v1446_v26, %v1366_v7 }
 0x4ff   : > { %v1406_v17 = vpop.permute.xlu0 %1405 }
 0x500   : > { %v1386_v10 = vpop.permute.xlu1 %1385 }
 0x501   : > { %v1456_v11 = vsel %vm578_vm5, %v1451_v9, %v1386_v10 }
 0x502   : > { %v1461_v18 = vsel %vm584_vm6, %v1456_v11, %v1406_v17 }
 0x504   : > { %v1426_v22 = vpop.permute.xlu1 %1425 }
 0x505   : > { %v1466_v24 = vsel %vm590_vm7, %v1461_v18, %v1426_v22 }
 0x506   : > { %v1471_v25 = vpack.c.bf16 %v1466_v24, %v1466_v24 }
 0x508   : > { %1591 = vmatmul.mubr.bf16.gmra.mrb[20].mxu1 %v1471_v25 }
 0x5c1   : > { %v1576_v62 = vpop.f32.mrb[12].mxu1 }
 0x5c2   : > { %v1577_v46 = vadd.f32 %v1821_v12, %v1576_v62  ;;  %v1578_v16 = vpop.f32.mrb[13].mxu1 }
 0x5c3   : > { %v1579_v28 = vpop.f32.mrb[14].mxu1 }
 0x5c4   : > { %v1580_v30 = vadd.f32 %v1821_v12, %v1579_v28  ;;  %v1581_v31 = vpop.f32.mrb[15].mxu1  ;;  %v1598_v15 = vmax.f32 %v1577_v46, 0.0 }
 0x5c6   : > { %v1599_v21 = vmax.f32 %v1580_v30, 0.0 }
 0x5c8   : > { %v1603_v32 = vpack.c.bf16 %v1599_v21, %v1598_v15 }
 0x5ca   : > { %1871 = vmatmul.mubr.msk.bf16.vlgmr.msra.gmra.mrb[24].mxu0 %vm1132_vm10, %v1603_v32 }
 0x5cb   : > { %1874 = vmatprep.mubr.msk.bf16.mxu0 %vm2157_vm9, %v2149_v5 }
 0x5ce   : > { %v1584_v29 = vpop.f32.mrb[16].mxu1 }
 0x5cf   : > { %v1585_v33 = vadd.f32 %v1821_v12, %v1584_v29  ;;  %v1586_v34 = vpop.f32.mrb[17].mxu1 }
 0x5d0   : > { %v1587_v36 = vpop.f32.mrb[18].mxu1 }
 0x5d1   : > { %v1588_v37 = vadd.f32 %v1821_v12, %v1587_v36  ;;  %v1589_v38 = vpop.f32.mrb[19].mxu1  ;;  %v1600_v39 = vmax.f32 %v1585_v33, 0.0 }
 0x5d3   : > { %v1601_v35 = vmax.f32 %v1588_v37, 0.0 }
 0x5d5   : > { %v1604_v40 = vpack.c.bf16 %v1601_v35, %v1600_v39 }
 0x5d7   : > { %1875 = vmatmul.mubr.msk.bf16.gmra.mrb[28].mxu0 %vm1132_vm10, %v1604_v40 }
 0x5d8   : > { %1878 = vmatprep.mubr.msk.bf16.mxu0 %vm2157_vm9, %v2149_v5 }
 0x5db   : > { %v1592_v56 = vpop.f32.mrb[20].mxu1 }
 0x5dc   : > { %v1593_v41 = vadd.f32 %v1821_v12, %v1592_v56  ;;  %v1594_v42 = vpop.f32.mrb[21].mxu1 }
 0x5dd   : > { %v1595_v4 = vpop.f32.mrb[22].mxu1 }
 0x5de   : > { %v1602_v43 = vmax.f32 %v1593_v41, 0.0  ;;  %v1596_v44 = vpop.f32.mrb[23].mxu1 }
 0x5e0   : > { %v1605_v27 = vpack.c.bf16 %v1602_v43, %v1602_v43 }
 0x5e2   : > { %1879 = vmatmul.mubr.msk.bf16.gmra.mrb[32].mxu0 %vm1132_vm10, %v1605_v27 }
 0x69d   : > { %v1662_v47 = vpop.f32.mrb[24].mxu0 }
 0x69e   : > { %v1663_v48 = vadd.f32 %v1836_v45, %v1662_v47  ;;  %v1872_v49 = vpop.f32.mrb[25].mxu0 }
 0x69f   : > { %v1665_v50 = vpop.f32.mrb[26].mxu0 }
 0x6a0   : > { %v1684_v5 = vadd.f32 %v1663_v48, %v2559_v19  ;;  %v1666_v61 = vadd.f32 %v1836_v45, %v1665_v50  ;;  %v1873_v52 = vpop.f32.mrb[27].mxu0 }
 0x6a2   : > { %1689 = vst.msk [vmem:[#allocation3] sm:$0xff] %vm312_vm0, %v1684_v5  ;;  %v1685_v53 = vadd.f32 %v1666_v61, %v2562_v23 }
 0x6a4   : > { %1690 = vst.msk [vmem:[#allocation3 + $0x8] sm:$0xff] %vm312_vm0, %v1685_v53 }
 0x6aa   : > { %v1670_v54 = vpop.f32.mrb[28].mxu0 }
 0x6ab   : > { %v1694_v55 = vld [vmem:[#allocation3 + $0x7] sm:$0xf]  ;;  %v1671_v58 = vadd.f32 %v1836_v45, %v1670_v54  ;;  %v1876_v57 = vpop.f32.mrb[29].mxu0 }
 0x6ac   : > { %v1695_v60 = vmax.f32 %v1694_v55, 0.0  ;;  %v1673_v59 = vpop.f32.mrb[30].mxu0 }
 0x6ad   : > { %v1686_v19 = vadd.f32 %v1671_v58, %v2588_v13  ;;  %v1674_v20 = vadd.f32 %v1836_v45, %v1673_v59  ;;  %v1877_v63 = vpop.f32.mrb[31].mxu0 }
 0x6ae   : > { %1696 = vst.msk [vmem:[%s305_s13] sm:$0xf] %vm315_vm1, %v1695_v60 }
 0x6af   : > { %1691 = vst.msk [vmem:[#allocation3 + $0x10] sm:$0xff] %vm312_vm0, %v1686_v19  ;;  %v1687_v23 = vadd.f32 %v1674_v20, %v2595_v51 }
 0x6b1   : > { %1692 = vst.msk [vmem:[#allocation3 + $0x18] sm:$0xff] %vm312_vm0, %v1687_v23 }
 0x6b5   : > { %v1678_v1 = vpop.f32.mrb[32].mxu0 }
 0x6b6   : > { %v1697_v3 = vld [vmem:[#allocation3 + $0xd] sm:$0xf]  ;;  %v1701_v6 = vld [vmem:[#allocation3 + $0x13] sm:$0xf]  ;;  %v1679_v2 = vadd.f32 %v1836_v45, %v1678_v1  ;;  %v1880_v7 = vpop.f32.mrb[33].mxu0 }
 0x6b7   : > { %v1698_v8 = vmax.f32 %v1697_v3, 0.0  ;;  %v1702_v0 = vmax.f32 %v1701_v6, 0.0  ;;  %v1681_v26 = vpop.f32.mrb[34].mxu0 }
 0x6b8   : > { %v1705_v9 = vld [vmem:[#allocation3 + $0x19] sm:$0xf]  ;;  %v1688_v13 = vadd.f32 %v1679_v2, %v2608_v14  ;;  %v1881_v10 = vpop.f32.mrb[35].mxu0 }
 0x6b9   : > { %1840 = vst.msk [vmem:[%s305_s13 + $0x4] sm:$0xf] %vm315_vm1, %v1698_v8  ;;  %1841 = vst.msk [vmem:[%s305_s13 + $0x8] sm:$0xf] %vm315_vm1, %v1702_v0  ;;  %v1706_v11 = vmax.f32 %v1705_v9, 0.0 }
 0x6ba   : > { %1693 = vst.msk [vmem:[#allocation3 + $0x20] sm:$0xf] %vm315_vm1, %v1688_v13 }
 0x6bb   : > { %1842 = vst.msk [vmem:[%s305_s13 + $0xc] sm:$0xf] %vm315_vm1, %v1706_v11 }
 0x6bc PF: > { %s18_s27 = sadd.s32 1, %s2146_s27  }
 0x6bd   : > { %p15_p4 = scmp.ge.s32.totalorder %s18_s27, 4  }
 0x6bf   :  { %17 = sbr.rel (!%p15_p4) target bundleno = 1 (0x1), region = 89 }

// kernel: vqvae2_forward.16
= control target key start
LH: loop header
LB: loop body
LE: loop exit
PB: predicated region body
PF: predicated region fallthrough
CT: control target
= control target key end

     0   :  { %s812_s12 = smov 0   ;;  %s946_s0 = inlined_call_operand.vmem [shape: f32[2,4,14,16], index: 0, kind: input, shape index: {}]   ;;  %s947_s1 = inlined_call_operand.vmem [shape: bf16[256,8], index: 1, kind: input, shape index: {}]   ;;  %s948_s2 = inlined_call_operand.vmem [shape: f32[1,8], index: 2, kind: input, shape index: {}]   ;;  %s949_s3 = inlined_call_operand.vmem [shape: f32[2,2,2,8], index: 3, kind: output, shape index: {}]  }
   0x1 LB: > { %s599_s13 = sadd.s32 4294967295, %s783_s12   ;;  %p603_p0 = scmp.ge.s32.totalorder %s783_s12, 1  ;;  %s783_s12 = sphi %s812_s12, %s13_s12  }
   0x2   : > { %p137_p1 = scmp.lt.s32.totalorder %s783_s12, 3 }
   0x4   : > { %p138_p2 = pnand %p603_p0, %p137_p1 }
   0x5   : > { %p161_p3 = scmp.lt.s32.totalorder (!%p138_p2), %s599_s13, 1  ;;  %v761_v0 = vld [vmem:[%s947_s1 + $0x40] sm:$0xff] (!%p138_p2)   ;;  %v763_v2 = vld [vmem:[%s947_s1 + $0x48] sm:$0xff] (!%p138_p2)   ;;  %v765_v4 = vld [vmem:[%s947_s1 + $0x50] sm:$0xff] (!%p138_p2)   ;;  %s785_s28 = smov (!%p138_p2), 32   ;;  %vm319_vm0 = vcmask (!%p138_p2), 130048  }
   0x6   : > { %141 = sbr.rel (%p138_p2) target bundleno = 393 (0x189), region = 32  ;;  %v762_v1 = vld [vmem:[%s947_s1] sm:$0xff] (!%p138_p2)   ;;  %654 = vmatprep.subr.bf16.mxu0 (!%p138_p2), %v761_v0  ;;  %v764_v3 = vld [vmem:[%s947_s1 + $0x8] sm:$0xff] (!%p138_p2)   ;;  %s786_s29 = smov (!%p138_p2), 16   ;;  %v766_v32 = vld [vmem:[%s947_s1 + $0x10] sm:$0xff] (!%p138_p2)   ;;  %vm322_vm1 = vcmask (!%p138_p2), 261120  }
   0x7   : > { %655 = vmatpush3.bf16.msra.mxu0 (!%p138_p2), %v762_v1  ;;  %s787_s30 = smov (!%p138_p2), 48   ;;  %v767_v34 = vld [vmem:[%s947_s1 + $0x58] sm:$0xff] (!%p138_p2)   ;;  %v769_v38 = vld [vmem:[%s947_s1 + $0x60] sm:$0xff] (!%p138_p2)   ;;  %s788_s14 = smov (!%p138_p2), 64   ;;  %v771_v45 = vld [vmem:[%s947_s1 + $0x68] sm:$0xff] (!%p138_p2)   ;;  %vm325_vm2 = vcmask (!%p138_p2), 392192  }
   0x8   : > { %656 = vmatprep.subr.bf16.mxu0 (!%p138_p2), %v763_v2  ;;  %v768_v35 = vld [vmem:[%s947_s1 + $0x18] sm:$0xff] (!%p138_p2)   ;;  %v770_v43 = vld [vmem:[%s947_s1 + $0x20] sm:$0xff] (!%p138_p2)   ;;  %s789_s19 = smov (!%p138_p2), 80   ;;  %v772_v51 = vld [vmem:[%s947_s1 + $0x28] sm:$0xff] (!%p138_p2)   ;;  %s790_s24 = smov (!%p138_p2), 96   ;;  %vm328_vm3 = vcmask (!%p138_p2), 523264  }
   0x9   : > { %v773_v52 = vld [vmem:[%s947_s1 + $0x70] sm:$0xff] (!%p138_p2)   ;;  %v775_v56 = vld [vmem:[%s947_s1 + $0x78] sm:$0xff] (!%p138_p2)   ;;  %vm331_vm4 = vcmask (!%p138_p2), 654336   ;;  %vm334_vm5 = vcmask (!%p138_p2), 785408   ;;  %vm337_vm6 = vcmask (!%p138_p2), 916480   ;;  %vm534_vm7 = vcmask (!%p138_p2), 64512  }
   0xa   : > { %v774_v55 = vld [vmem:[%s947_s1 + $0x30] sm:$0xff] (!%p138_p2)   ;;  %v776_v57 = vld [vmem:[%s947_s1 + $0x38] sm:$0xff] (!%p138_p2)   ;;  %vm539_vm8 = vcmask (!%p138_p2), 58368  }
   0xb   : > { %657 = vmatpush3.bf16.msra.mxu0 (!%p138_p2), %v764_v3 }
   0xc   : > { %658 = vmatprep.subr.bf16.mxu0 (!%p138_p2), %v765_v4 }
   0xd   : > { %s951_s13 = smov (!%p161_p3, %s599_s13), 1 }
   0xe   : > { %s652_s20 = sshll.u32 %s951_s13, 6  ;;  %s653_s7 = sshll.u32 %s951_s13, 2 }
   0xf   : > { %s838_s25 = scalar_lea.vmem %s946_s0, %s652_s20  ;;  %659 = vmatpush3.bf16.msra.mxu0 %v766_v32  ;;  %s170_s10 = scalar_lea.vmem %s949_s3, %s653_s7 }
  0x10   : > { %v195_v5 = vld [vmem:[%s838_s25 + $0x4] sm:$0xff]  ;;  %v196_v6 = vld [vmem:[%s838_s25 + $0xc] sm:$0x1]  ;;  %v620_v7 = vld [vmem:[%s838_s25 + $0x13] sm:$0xff]  ;;  %660 = vmatprep.subr.bf16.mxu0 %v767_v34 }
  0x11   : > { %v701_v8 = vpack.i.bf16 %v196_v6, %v195_v5  ;;  %v621_v9 = vld [vmem:[%s838_s25 + $0x1b] sm:$0x1]  ;;  %v177_v10 = vld [vmem:[%s838_s25 + $0x1] sm:$0xff]  ;;  %v178_v11 = vld [vmem:[%s838_s25 + $0x9] sm:$0x1] }
  0x12   : > { %v691_v12 = vpack.i.bf16 %v621_v9, %v620_v7  ;;  %v608_v13 = vld [vmem:[%s838_s25 + $0x10] sm:$0xff]  ;;  %v609_v14 = vld [vmem:[%s838_s25 + $0x18] sm:$0x1]  ;;  %v706_v15 = vpack.i.bf16 %v178_v11, %v177_v10  ;;  %v611_v18 = vld [vmem:[%s838_s25 + $0x19] sm:$0x1] }
  0x13   : > { %702 = vrot.lane.b32.xlu1 %v701_v8, %s785_s28  ;;  %v696_v16 = vpack.i.bf16 %v609_v14, %v608_v13  ;;  %v610_v17 = vld [vmem:[%s838_s25 + $0x11] sm:$0xff]  ;;  %v623_v20 = vld [vmem:[%s838_s25 + $0x1c] sm:$0x1]  ;;  %v612_v23 = vld [vmem:[%s838_s25 + $0x20] sm:$0xff]  ;;  %661 = vmatpush3.bf16.msra.mxu0 %v768_v35 }
  0x14   : > { %692 = vrot.lane.b32.xlu0 %v691_v12, %s786_s29  ;;  %v622_v19 = vld [vmem:[%s838_s25 + $0x14] sm:$0xff]  ;;  %v716_v21 = vpack.i.bf16 %v611_v18, %v610_v17  ;;  %v613_v24 = vld [vmem:[%s838_s25 + $0x28] sm:$0x1]  ;;  %v625_v26 = vld [vmem:[%s838_s25 + $0x2b] sm:$0x1]  ;;  %662 = vmatprep.subr.bf16.mxu0 %v769_v38 }
  0x15   : > { %v711_v22 = vpack.i.bf16 %v623_v20, %v622_v19  ;;  %v624_v25 = vld [vmem:[%s838_s25 + $0x23] sm:$0xff]  ;;  %v614_v27 = vld [vmem:[%s838_s25 + $0x30] sm:$0xff]  ;;  %v615_v28 = vld [vmem:[%s838_s25 + $0x38] sm:$0x1]  ;;  %v726_v29 = vpack.i.bf16 %v613_v24, %v612_v23 }
  0x16   : > { %v626_v30 = vld [vmem:[%s838_s25 + $0x33] sm:$0xff]  ;;  %v627_v31 = vld [vmem:[%s838_s25 + $0x3b] sm:$0x1]  ;;  %v721_v33 = vpack.i.bf16 %v625_v26, %v624_v25  ;;  %v616_v36 = vld [vmem:[%s838_s25 + $0x21] sm:$0xff]  ;;  %v736_v39 = vpack.i.bf16 %v615_v28, %v614_v27 }
  0x17   : > { %707 = vrot.lane.b32.xlu1 %v706_v15, %s785_s28  ;;  %v617_v37 = vld [vmem:[%s838_s25 + $0x29] sm:$0x1]  ;;  %v731_v41 = vpack.i.bf16 %v627_v31, %v626_v30  ;;  %v629_v42 = vld [vmem:[%s838_s25 + $0x2c] sm:$0x1]  ;;  %v618_v44 = vld [vmem:[%s838_s25 + $0x31] sm:$0xff]  ;;  %663 = vmatpush3.bf16.msra.mxu0 %v770_v43 }
  0x18   : > { %697 = vrot.lane.b32.xlu0 %v696_v16, %s786_s29  ;;  %v628_v40 = vld [vmem:[%s838_s25 + $0x24] sm:$0xff]  ;;  %v746_v46 = vpack.i.bf16 %v617_v37, %v616_v36  ;;  %v619_v47 = vld [vmem:[%s838_s25 + $0x39] sm:$0x1]  ;;  %v631_v50 = vld [vmem:[%s838_s25 + $0x3c] sm:$0x1]  ;;  %664 = vmatprep.subr.bf16.mxu0 %v771_v45 }
  0x19   : > { %v741_v48 = vpack.i.bf16 %v629_v42, %v628_v40  ;;  %v630_v49 = vld [vmem:[%s838_s25 + $0x34] sm:$0xff]  ;;  %v756_v53 = vpack.i.bf16 %v619_v47, %v618_v44  ;;  %v191_v2 = vld [vmem:[%s838_s25 + $0x3] sm:$0xff]  ;;  %v192_v3 = vld [vmem:[%s838_s25 + $0xb] sm:$0x1] }
  0x1a   : > { %v751_v54 = vpack.i.bf16 %v631_v50, %v630_v49  ;;  %v172_v7 = vld [vmem:[%s838_s25] sm:$0xff]  ;;  %v173_v8 = vld [vmem:[%s838_s25 + $0x8] sm:$0x1] }
  0x1b   : > { %717 = vrot.lane.b32.xlu1 %v716_v21, %s787_s30  ;;  %665 = vmatpush3.bf16.msra.mxu0 %v772_v51 }
  0x1c   : > { %712 = vrot.lane.b32.xlu0 %v711_v22, %s787_s30  ;;  %666 = vmatprep.subr.bf16.mxu0 %v773_v52  ;;  %s791_s30 = smov 112  }
  0x1f   : > { %727 = vrot.lane.b32.xlu1 %v726_v29, %s788_s14  ;;  %667 = vmatpush3.bf16.msra.mxu0 %v774_v55 }
  0x20   : > { %722 = vrot.lane.b32.xlu0 %v721_v33, %s788_s14  ;;  %668 = vmatprep.subr.bf16.mxu0 %v775_v56 }
  0x23   : > { %737 = vrot.lane.b32.xlu1 %v736_v39, %s789_s19  ;;  %669 = vmatpush3.bf16.msra.mxu0 %v776_v57 }
  0x24   : > { %732 = vrot.lane.b32.xlu0 %v731_v41, %s789_s19 }
  0x27   : > { %747 = vrot.lane.b32.xlu1 %v746_v46, %s790_s24 }
  0x28   : > { %742 = vrot.lane.b32.xlu0 %v741_v48, %s790_s24 }
  0x2b   : > { %757 = vrot.lane.b32.xlu1 %v756_v53, %s791_s30 }
  0x2c   : > { %752 = vrot.lane.b32.xlu0 %v751_v54, %s791_s30 }
  0x85   : > { %v703_v58 = vpop.permute.xlu1 %702 }
  0x86   : > { %v693_v59 = vpop.permute.xlu0 %692  ;;  %v705_v10 = vunpack.i.h.bf16 %v703_v58  ;;  %v704_v11 = vunpack.i.l.bf16 %v703_v58 }
  0x87   : > { %v695_v0 = vunpack.i.h.bf16 %v693_v59  ;;  %v694_v1 = vunpack.i.l.bf16 %v693_v59 }
  0x89   : > { %v708_v60 = vpop.permute.xlu1 %707  ;;  %v340_v12 = vsel %vm319_vm0, %v191_v2, %v694_v1  ;;  %v341_v13 = vsel %vm319_vm0, %v192_v3, %v695_v0 }
  0x8a   : > { %v698_v61 = vpop.permute.xlu0 %697  ;;  %v710_v14 = vunpack.i.h.bf16 %v708_v60  ;;  %v709_v15 = vunpack.i.l.bf16 %v708_v60  ;;  %v342_v22 = vsel %vm322_vm1, %v340_v12, %v704_v11  ;;  %v343_v23 = vsel %vm322_vm1, %v341_v13, %v705_v10 }
  0x8b   : > { %v700_v4 = vunpack.i.h.bf16 %v698_v61  ;;  %v699_v5 = vunpack.i.l.bf16 %v698_v61 }
  0x8d   : > { %v718_v62 = vpop.permute.xlu1 %717  ;;  %v320_v16 = vsel %vm319_vm0, %v172_v7, %v699_v5  ;;  %v321_v17 = vsel %vm319_vm0, %v173_v8, %v700_v4  ;;  %v632_v7 = vld [vmem:[%s948_s2] ss:$0 sm:$0xff] }
  0x8e   : > { %v713_v63 = vpop.permute.xlu0 %712  ;;  %v720_v19 = vunpack.i.h.bf16 %v718_v62  ;;  %v719_v20 = vunpack.i.l.bf16 %v718_v62  ;;  %v323_v26 = vsel %vm322_vm1, %v320_v16, %v709_v15  ;;  %v324_v27 = vsel %vm322_vm1, %v321_v17, %v710_v14 }
  0x8f   : > { %v715_v24 = vunpack.i.h.bf16 %v713_v63  ;;  %v714_v25 = vunpack.i.l.bf16 %v713_v63 }
  0x90   : > { %v326_v35 = vsel %vm325_vm2, %v323_v26, %v719_v20  ;;  %v327_v36 = vsel %vm325_vm2, %v324_v27, %v720_v19 }
  0x91   : > { %v728_v6 = vpop.permute.xlu1 %727  ;;  %v345_v40 = vsel %vm325_vm2, %v343_v23, %v715_v24  ;;  %v344_v41 = vsel %vm325_vm2, %v342_v22, %v714_v25 }
  0x92   : > { %v723_v9 = vpop.permute.xlu0 %722  ;;  %v730_v28 = vunpack.i.h.bf16 %v728_v6  ;;  %v729_v29 = vunpack.i.l.bf16 %v728_v6 }
  0x93   : > { %v725_v30 = vunpack.i.h.bf16 %v723_v9  ;;  %v724_v31 = vunpack.i.l.bf16 %v723_v9 }
  0x94   : > { %v329_v44 = vsel %vm328_vm3, %v326_v35, %v729_v29  ;;  %v330_v45 = vsel %vm328_vm3, %v327_v36, %v730_v28 }
  0x95   : > { %v738_v18 = vpop.permute.xlu1 %737  ;;  %v346_v48 = vsel %vm328_vm3, %v344_v41, %v724_v31  ;;  %v347_v49 = vsel %vm328_vm3, %v345_v40, %v725_v30 }
  0x96   : > { %v733_v21 = vpop.permute.xlu0 %732  ;;  %v740_v32 = vunpack.i.h.bf16 %v738_v18  ;;  %v739_v33 = vunpack.i.l.bf16 %v738_v18 }
  0x97   : > { %v735_v37 = vunpack.i.h.bf16 %v733_v21  ;;  %v734_v38 = vunpack.i.l.bf16 %v733_v21 }
  0x98   : > { %v332_v50 = vsel %vm331_vm4, %v329_v44, %v739_v33  ;;  %v333_v51 = vsel %vm331_vm4, %v330_v45, %v740_v32 }
  0x99   : > { %v748_v34 = vpop.permute.xlu1 %747  ;;  %v348_v56 = vsel %vm331_vm4, %v346_v48, %v734_v38  ;;  %v349_v57 = vsel %vm331_vm4, %v347_v49, %v735_v37 }
  0x9a   : > { %v743_v39 = vpop.permute.xlu0 %742  ;;  %v750_v42 = vunpack.i.h.bf16 %v748_v34  ;;  %v749_v43 = vunpack.i.l.bf16 %v748_v34 }
  0x9b   : > { %v745_v46 = vunpack.i.h.bf16 %v743_v39  ;;  %v744_v47 = vunpack.i.l.bf16 %v743_v39 }
  0x9c   : > { %v335_v58 = vsel %vm334_vm5, %v332_v50, %v749_v43  ;;  %v336_v59 = vsel %vm334_vm5, %v333_v51, %v750_v42 }
  0x9d   : > { %v758_v52 = vpop.permute.xlu1 %757  ;;  %v350_v62 = vsel %vm334_vm5, %v348_v56, %v744_v47  ;;  %v351_v63 = vsel %vm334_vm5, %v349_v57, %v745_v46 }
  0x9e   : > { %v760_v53 = vunpack.i.h.bf16 %v758_v52  ;;  %v759_v54 = vunpack.i.l.bf16 %v758_v52  ;;  %v753_v55 = vpop.permute.xlu0 %752 }
  0x9f   : > { %v755_v60 = vunpack.i.h.bf16 %v753_v55  ;;  %v754_v61 = vunpack.i.l.bf16 %v753_v55 }
  0xa0   : > { %v338_v0 = vsel %vm337_vm6, %v335_v58, %v759_v54  ;;  %v339_v1 = vsel %vm337_vm6, %v336_v59, %v760_v53 }
  0xa1   : > { %v352_v2 = vsel %vm337_vm6, %v350_v62, %v754_v61  ;;  %v353_v3 = vsel %vm337_vm6, %v351_v63, %v755_v60  ;;  %v354_v4 = vpack.c.bf16 %v339_v1, %v338_v0 }
  0xa2   : > { %v355_v5 = vpack.c.bf16 %v353_v3, %v352_v2 }
  0xa4   : > { %523 = vmatprep.mubr.bf16.mxu0 %v355_v5 }
  0xa5   : > { %524 = vmatmul.mubr.bf16.vlgmr.msra.gmra.mrb[0].mxu0 %v354_v4 }
 0x178   : > { %v670_v6 = vpop.f32.mrb[0].mxu0 }
 0x179   : > { %v671_v8 = vpop.f32.mrb[1].mxu0 }
 0x17a   : > { %v672_v9 = vadd.f32 %v671_v8, %v670_v6  ;;  %v673_v10 = vpop.f32.mrb[2].mxu0 }
 0x17b   : > { %v674_v11 = vpop.f32.mrb[3].mxu0 }
 0x17c   : > { %v526_v12 = vadd.f32 %v672_v9, %v632_v7 }
 0x17e   : > { %v532_v13 = vmax.f32 %v526_v12, 0.0 }
 0x180   : > { %535 = vst.msk [vmem:[#allocation2] sm:$0xff] %vm534_vm7, %v532_v13 }
 0x187   : > { %v538_v14 = vld [vmem:[#allocation2] sm:$0x3]  ;;  %v541_v15 = vld [vmem:[#allocation2 + $0x3] sm:$0x3] }
 0x188   : > { %540 = vst.msk [vmem:[%s170_s10] sm:$0x3] %vm539_vm8, %v538_v14  ;;  %649 = vst.msk [vmem:[%s170_s10 + $0x2] sm:$0x3] %vm539_vm8, %v541_v15 }
 0x189 PF: > { %s13_s12 = sadd.s32 1, %s783_s12  }
 0x18a   : > { %p10_p4 = scmp.ge.s32.totalorder %s13_s12, 4  }
 0x18c   :  { %12 = sbr.rel (!%p10_p4) target bundleno = 1 (0x1), region = 66 }

// kernel: vqvae2_forward.18
= control target key start
LH: loop header
LB: loop body
LE: loop exit
PB: predicated region body
PF: predicated region fallthrough
CT: control target
= control target key end

     0   :  { %v341_v0 = vmov 0.0   ;;  %vm342_vm0 = vmmov 0   ;;  %vm44_vm1 = vcmask 130048   ;;  %vm88_vm2 = vcmask 64512   ;;  %s440_s1 = inlined_call_operand.vmem [shape: bf16[16,8], index: 1, kind: input, shape index: {}]   ;;  %s441_s0 = inlined_call_operand.vmem [shape: f32[8,16], index: 0, kind: input, shape index: {}]   ;;  %s442_s4 = inlined_call_operand.vmem [shape: f32[8,32], index: 4, kind: input, shape index: {}]   ;;  %s443_s2 = inlined_call_operand.vmem [shape: f32[1,8], index: 2, kind: input, shape index: {}]   ;;  %s444_s6 = inlined_call_operand.vmem [shape: f32[8,8], index: 6, kind: output, shape index: {0}]   ;;  %s445_s5 = inlined_call_operand.vmem [shape: f32[1,32], index: 5, kind: input, shape index: {}]   ;;  %s446_s3 = inlined_call_operand.vmem [shape: f32[32,8], index: 3, kind: input, shape index: {}]   ;;  %s447_s8 = inlined_call_operand.vmem [shape: s32[8,1], index: 8, kind: output, shape index: {2}]   ;;  %s448_s7 = inlined_call_operand.vmem [shape: f32[8,8], index: 7, kind: output, shape index: {1}]  }
   0x1   :  { %309 = vmatprep.subr.bf16.mxu0 %v341_v0  ;;  %v340_v1 = vld [vmem:[%s440_s1] sm:$0xff]   ;;  %311 = vmatprep.mubr.msk.bf16.mxu0 %vm342_vm0, %v341_v0  ;;  %vm173_vm3 = vcmask 261120   ;;  %v177_v17 = vlaneseq  ;;  %v202_v29 = vld [vmem:[%s446_s3 + $0x8] sm:$0xff]  ;;  %v343_v31 = vmov 0.0|0.0   ;;  %v203_v32 = vld [vmem:[%s446_s3 + $0x10] sm:$0xff]  ;;  %vm279_vm6 = vcmask 7168  }
   0x2   :  { %v27_v2 = vld [vmem:[%s441_s0] sm:$0xff]  ;;  %315 = vmatprep.subr.mxu1 %v341_v0  ;;  %317 = vmatprep.mubr.msk.f32.mxu1 %vm342_vm0, %v341_v0  ;;  %v204_v33 = vld [vmem:[%s446_s3 + $0x18] sm:$0xff] }
   0x3   :  { %310 = vmatpush3.bf16.msra.mxu0 %v340_v1  ;;  %v28_v3 = vpack.c.bf16 %v27_v2, %v27_v2  ;;  %v91_v4 = vld [vmem:[%s442_s4] sm:$0xff]  ;;  %v178_v18 = vand.u32 127, %v177_v17  ;;  %v335_v34 = vpack.c.bf16 %v204_v33, %v203_v32 }
   0x4   :  { %316 = vmatpush3.msra.mxu1 %v91_v4  ;;  %v293_v5 = vld [vmem:[%s443_s2] ss:$0 sm:$0xff] }
   0x5   :  { %v297_v12 = vld [vmem:[%s445_s5] ss:$0 sm:$0xff]  ;;  %331 = vmatprep.subr.bf16.mxu1 %v343_v31 }
   0x6   :  { %312 = vmatmul.mubr.msk.bf16.vlgmr.msra.gmra.mrb[0].mxu0 %vm44_vm1, %v28_v3  ;;  %v201_v28 = vld [vmem:[%s446_s3] sm:$0xff] }
   0x7   :  { %v332_v30 = vpack.c.bf16 %v202_v29, %v201_v28 }
  0xd9   :  { %v82_v6 = vpop.f32.mrb[0].mxu0 }
  0xda   :  { %v83_v7 = vadd.f32 %v293_v5, %v82_v6  ;;  %v313_v8 = vpop.f32.mrb[1].mxu0 }
  0xdb   :  { %v85_v9 = vpop.f32.mrb[2].mxu0 }
  0xdc   :  { %v314_v10 = vpop.f32.mrb[3].mxu0  ;;  %89 = vst.msk [vmem:[%s444_s6] sm:$0xff] %vm88_vm2, %v83_v7  ;;  %318 = vmatmul.mubr.msk.f32.vlgmr.msra.gmra.mrb[0].mxu1 %vm88_vm2, %v83_v7 }
  0xdd   :  { %328 = vmatprep.mubr.msk.f32.mxu1 %vm342_vm0, %v341_v0  ;;  %333 = vmatpush3.bf16.msra.mxu1 %v332_v30 }
  0xde   :  { %334 = vmatprep.subr.bf16.mxu1 %v343_v31 }
  0xe1   :  { %336 = vmatpush3.bf16.msra.mxu1 %v335_v34 }
 0x1af   :  { %v161_v11 = vpop.f32.mrb[0].mxu1 }
 0x1b0   :  { %v165_v13 = vmul.f32 2.0, %v161_v11  ;;  %v319_v14 = vpop.f32.mrb[1].mxu1 }
 0x1b2   :  { %v172_v15 = vsub.f32 %v297_v12, %v165_v13 }
 0x1b4   :  { %v174_v16 = vsel %vm173_vm3, %v172_v15, inf }
 0x1b5   :  { %175 = vmin.xlane.f32.xlu0 %v174_v16 }
 0x242   :  { %v176_v19 = vpop.xlane.xlu0 %175 }
 0x243   :  { %vm179_vm4 = vcmp.le.f32.partialorder %v172_v15, %v176_v19 }
 0x244   :  { %v180_v20 = vsel %vm179_vm4, %v178_v18, 32 }
 0x245   :  { %v181_v21 = vsel %vm173_vm3, %v180_v20, 2147483647 }
 0x246   :  { %v183_v22 = vshra.s32 %v181_v21, 16  ;;  %v182_v24 = vand.u32 65535, %v181_v21 }
 0x248   :  { %v185_v23 = vcvt.s32.f32 %v183_v22  ;;  %v184_v26 = vcvt.s32.f32 %v182_v24 }
 0x24a   :  { %186 = vmin.xlane.f32.xlu0 %v185_v23 }
 0x2d7   :  { %v187_v25 = vpop.xlane.xlu0 %186 }
 0x2d8   :  { %vm188_vm5 = vcmp.eq.f32.partialorder %v185_v23, %v187_v25  ;;  %v193_v35 = vcvt.f32.s32 %v187_v25 }
 0x2d9   :  { %v189_v27 = vsel %vm188_vm5, %v184_v26, inf }
 0x2da   :  { %190 = vmin.xlane.f32.xlu1 %v189_v27  ;;  %v194_v37 = vshll.u32 %v193_v35, 16 }
 0x367   :  { %v191_v36 = vpop.xlane.xlu1 %190 }
 0x368   :  { %v192_v38 = vcvt.f32.s32 %v191_v36 }
 0x36a   :  { %v195_v39 = vadd.s32 %v194_v37, %v192_v38 }
 0x36c   :  { %vm196_vm7 = vcmp.lt.s32.totalorder %v195_v39, 31 }
 0x36d   :  { %v197_v40 = vsel %vm196_vm7, %v195_v39, 31 }
 0x36e   :  { %vm198_vm8 = vcmp.eq.s32.totalorder %v178_v18, %v197_v40  ;;  %280 = vst.msk [vmem:[%s447_s8] sm:$0xff] %vm279_vm6, %v197_v40 }
 0x36f   :  { %v298_v41 = vsel %vm198_vm8, 1.0, %v341_v0 }
 0x370   :  { %329 = vmatmul.mubr.msk.f32.vlgmr.msra.gmra.mrb[2].mxu1 %vm173_vm3, %v298_v41 }
 0x443   :  { %v274_v42 = vpop.f32.mrb[2].mxu1 }
 0x444   :  { %278 = vst.msk [vmem:[%s448_s7] sm:$0xff] %vm88_vm2, %v274_v42  ;;  %v330_v43 = vpop.f32.mrb[3].mxu1 }

// kernel: vqvae2_forward.17
= control target key start
LH: loop header
LB: loop body
LE: loop exit
PB: predicated region body
PF: predicated region fallthrough
CT: control target
= control target key end

     0   :  { %s1474_s27 = smov 0   ;;  %s1751_s0 = inlined_call_operand.vmem [shape: f32[2,16,16], index: 0, kind: input, shape index: {}]   ;;  %s1752_s1 = inlined_call_operand.vmem [shape: f32[16,1], index: 1, kind: input, shape index: {}]   ;;  %s1753_s2 = inlined_call_operand.vmem [shape: bf16[144,16], index: 2, kind: input, shape index: {}]   ;;  %s1754_s3 = inlined_call_operand.vmem [shape: f32[1,16], index: 3, kind: input, shape index: {}]   ;;  %s1755_s4 = inlined_call_operand.vmem [shape: bf16[2,144,8], index: 4, kind: input, shape index: {}]   ;;  %s1756_s5 = inlined_call_operand.vmem [shape: f32[2,1,8], index: 5, kind: input, shape index: {}]   ;;  %s1757_s6 = inlined_call_operand.vmem [shape: bf16[2,8,16], index: 6, kind: input, shape index: {}]   ;;  %s1758_s7 = inlined_call_operand.vmem [shape: f32[2,1,16], index: 7, kind: input, shape index: {}]   ;;  %s1759_s8 = inlined_call_operand.vmem [shape: f32[2,2,2,16], index: 8, kind: output, shape index: {}]  }
   0x1 LB: > { %s1172_s28 = sadd.s32 4294967295, %s1417_s27   ;;  %p1176_p0 = scmp.ge.s32.totalorder %s1417_s27, 1  ;;  %s1417_s27 = sphi %s1474_s27, %s18_s27  }
   0x2   : > { %p262_p1 = scmp.lt.s32.totalorder %s1417_s27, 3 }
   0x4   : > { %p263_p2 = pnand %p1176_p0, %p262_p1 }
   0x5   : > { %v307_v0 = vld [vmem:[%s1752_s1] sm:$0xff] (!%p263_p2)  ;;  %vm309_vm0 = vcmask (!%p263_p2), 130048   ;;  %v1419_v1 = vmov (!%p263_p2), 0   ;;  %v308_v2 = vld [vmem:[%s1752_s1 + $0x8] sm:$0xff] (!%p263_p2)  ;;  %v1420_v3 = vmov (!%p263_p2), 0.0   ;;  %v1386_v6 = vld [vmem:[%s1753_s2 + $0x10] sm:$0xff] (!%p263_p2)  }
   0x6   : > { %266 = sbr.rel (%p263_p2) target bundleno = 1699 (0x6a3), region = 52  ;;  %1278 = vset.pattern.permute.xlu0 (!%p263_p2), %v1419_v1  ;;  %502 = vmatprep.subr.bf16.mxu0 (!%p263_p2), %v1419_v1  ;;  %310 = vst.msk [vmem:[#allocation2] sm:$0xff] (!%p263_p2), %vm309_vm0, %v1420_v3  ;;  %311 = vst.msk [vmem:[#allocation2 + $0x18] sm:$0xff] (!%p263_p2), %vm309_vm0, %v1420_v3  ;;  %v1384_v4 = vld [vmem:[%s1753_s2] sm:$0xff] (!%p263_p2)   ;;  %v1385_v5 = vld [vmem:[%s1753_s2 + $0x8] sm:$0xff] (!%p263_p2)   ;;  %p296_p3 = scmp.lt.s32.totalorder (!%p263_p2), %s1172_s28, 1 }
   0x7   : > { %335 = vperm.xlu0 (!%p263_p2), %1278, %v307_v0   ;;  %721 = vmatprep.subr.bf16.mxu1 (!%p263_p2), %v1419_v1  ;;  %v1387_v7 = vld [vmem:[%s1753_s2 + $0x18] sm:$0xff] (!%p263_p2)   ;;  %v1388_v8 = vld [vmem:[%s1753_s2 + $0x20] sm:$0xff] (!%p263_p2)   ;;  %v1389_v15 = vld [vmem:[%s1753_s2 + $0x28] sm:$0xff] (!%p263_p2)   ;;  %s1421_s9 = smov (!%p263_p2), 48   ;;  %s1422_s12 = smov (!%p263_p2), 16   ;;  %vm419_vm1 = vcmask (!%p263_p2), 261120  }
   0x8   : > { %503 = vmatpush1.bf16.msra.mxu0 (!%p263_p2), %v1384_v4  ;;  %v1390_v16 = vld [vmem:[%s1753_s2 + $0x30] sm:$0xff] (!%p263_p2)   ;;  %v1391_v28 = vld [vmem:[%s1753_s2 + $0x38] sm:$0xff] (!%p263_p2)   ;;  %v1392_v31 = vld [vmem:[%s1753_s2 + $0x40] sm:$0xff] (!%p263_p2)   ;;  %s1423_s15 = smov (!%p263_p2), 80   ;;  %s1424_s16 = smov (!%p263_p2), 32   ;;  %vm422_vm2 = vcmask (!%p263_p2), 392192  }
   0x9   : > { %504 = vmatprep.subr.bf16.mxu0 (!%p263_p2), %v1419_v1  ;;  %s1425_s17 = smov (!%p263_p2), 112   ;;  %s1426_s18 = smov (!%p263_p2), 64   ;;  %vm425_vm3 = vcmask (!%p263_p2), 523264   ;;  %vm428_vm4 = vcmask (!%p263_p2), 654336   ;;  %vm431_vm5 = vcmask (!%p263_p2), 785408   ;;  %vm434_vm6 = vcmask (!%p263_p2), 916480  }
   0xa   : > { %s1427_s19 = smov (!%p263_p2), 96   ;;  %vm777_vm7 = vcmask (!%p263_p2), 1043456   ;;  %vm1428_vm8 = vmmov (!%p263_p2), 0   ;;  %vm773_vm9 = vcmask (!%p263_p2), 64512   ;;  %vm1111_vm10 = vcmask (!%p263_p2), 123904  }
   0xb   : > { %340 = vperm.xlu0 (!%p263_p2), %1278, %v308_v2  }
   0xc   : > { %505 = vmatpush1.bf16.msra.mxu0 (!%p263_p2), %v1385_v5 }
   0xd   : > { %506 = vmatprep.subr.bf16.mxu0 %v1419_v1  ;;  %s1761_s28 = smov (!%p296_p3, %s1172_s28), 1 }
   0xe   : > { %s1242_s21 = sshll.u32 %s1761_s28, 4 }
   0xf   : > { %s300_s24 = scalar_lea.vmem %s1751_s0, %s1242_s21 }
  0x10   : > { %507 = vmatpush1.bf16.msra.mxu0 %v1386_v6  ;;  %v312_v9 = vld [vmem:[%s300_s24] sm:$0xff]  ;;  %v313_v12 = vld [vmem:[%s300_s24 + $0x8] sm:$0xff] }
  0x11   : > { %508 = vmatprep.subr.bf16.mxu0 %v1419_v1 }
  0x14   : > { %509 = vmatpush1.bf16.msra.mxu0 %v1387_v7 }
  0x15   : > { %510 = vmatprep.subr.bf16.mxu0 %v1419_v1 }
  0x18   : > { %511 = vmatpush1.bf16.msra.mxu0 %v1388_v8 }
  0x19   : > { %512 = vmatprep.subr.bf16.mxu0 %v1419_v1 }
  0x1c   : > { %513 = vmatpush1.bf16.msra.mxu0 %v1389_v15 }
  0x1d   : > { %514 = vmatprep.subr.bf16.mxu0 %v1419_v1 }
  0x20   : > { %515 = vmatpush1.bf16.msra.mxu0 %v1390_v16 }
  0x21   : > { %516 = vmatprep.subr.bf16.mxu0 %v1419_v1 }
  0x24   : > { %517 = vmatpush1.bf16.msra.mxu0 %v1391_v28 }
  0x25   : > { %518 = vmatprep.subr.bf16.mxu0 %v1419_v1 }
  0x28   : > { %519 = vmatpush1.bf16.msra.mxu0 %v1392_v31 }
  0x29   : > { %1248 = vmatprep.subr.bf16.mxu0 %v1420_v3 }
  0x86   : > { %v1525_v10 = vpop.permute.xlu0 %335 }
  0x87   : > { %v343_v11 = vmul.f32 %v1525_v10, %v312_v9 }
  0x89   : > { %345 = vst.msk [vmem:[#allocation2 + $0x8] sm:$0xff] %vm309_vm0, %v343_v11 }
  0x8a   : > { %v1529_v13 = vpop.permute.xlu0 %340 }
  0x8b   : > { %v344_v14 = vmul.f32 %v1529_v13, %v313_v12 }
  0x8d   : > { %346 = vst.msk [vmem:[#allocation2 + $0x10] sm:$0xff] %vm309_vm0, %v344_v14 }
  0x90   : > { %v353_v17 = vld [vmem:[#allocation2 + $0x7] sm:$0xff] }
  0x91   : > { %v349_v23 = vld [vmem:[#allocation2 + $0x4] sm:$0xff] }
  0x92   : > { %v351_v30 = vld [vmem:[#allocation2 + $0x5] sm:$0xff] }
  0x93   : > { %v355_v36 = vld [vmem:[#allocation2 + $0x8] sm:$0xff] }
  0x94   : > { %v354_v18 = vld [vmem:[#allocation2 + $0xf] sm:$0xff]  ;;  %v347_v46 = vld [vmem:[#allocation2 + $0x3] sm:$0xff] }
  0x95   : > { %v352_v19 = vld [vmem:[#allocation2 + $0xd] sm:$0xff]  ;;  %v361_v20 = vld [vmem:[#allocation2 + $0x15] sm:$0xff]  ;;  %v1289_v21 = vpack.i.bf16 %v354_v18, %v353_v17  ;;  %v1393_v18 = vld [vmem:[%s1755_s4] sm:$0xff]  }
  0x96   : > { %v438_v22 = vpack.c.bf16 %v361_v20, %v352_v19  ;;  %v350_v24 = vld [vmem:[#allocation2 + $0xc] sm:$0xff]  ;;  %v1284_v32 = vpack.i.bf16 %v352_v19, %v351_v30  ;;  %v360_v33 = vld [vmem:[#allocation2 + $0x14] sm:$0xff]  ;;  %722 = vmatpush1.bf16.msra.mxu1 %v1393_v18 }
  0x97   : > { %v1279_v25 = vpack.i.bf16 %v350_v24, %v349_v23  ;;  %v357_v26 = vld [vmem:[#allocation2 + $0x9] sm:$0xff]  ;;  %v358_v27 = vld [vmem:[#allocation2 + $0x11] sm:$0xff]  ;;  %1290 = vrot.lane.b32.xlu0 %v1289_v21, %s1421_s9  ;;  %v1309_v35 = vpack.i.bf16 %v360_v33, %v350_v24  ;;  %723 = vmatprep.subr.bf16.mxu1 %v1419_v1  ;;  %v1181_v23 = vld [vmem:[%s1754_s3] ss:$0 sm:$0xff] }
  0x98   : > { %1191 = vmatprep.mubr.msk.bf16.mxu0 %vm309_vm0, %v438_v22  ;;  %v1299_v29 = vpack.i.bf16 %v358_v27, %v357_v26  ;;  %v356_v34 = vld [vmem:[#allocation2 + $0x10] sm:$0xff]  ;;  %v1394_v19 = vld [vmem:[%s1755_s4 + $0x8] sm:$0xff]   ;;  %v1396_v21 = vld [vmem:[%s1755_s4 + $0x18] sm:$0xff]  }
  0x99   : > { %1280 = vrot.lane.b32.xlu1 %v1279_v25, %s1422_s12  ;;  %v1294_v37 = vpack.i.bf16 %v356_v34, %v355_v36  ;;  %v348_v38 = vld [vmem:[#allocation2 + $0xb] sm:$0xff]  ;;  %v359_v39 = vld [vmem:[#allocation2 + $0x13] sm:$0xff]  ;;  %v1397_v22 = vld [vmem:[%s1755_s4 + $0x20] sm:$0xff]  }
  0x9a   : > { %v1304_v40 = vpack.i.bf16 %v359_v39, %v348_v38  ;;  %724 = vmatpush1.bf16.msra.mxu1 %v1394_v19  ;;  %v1395_v20 = vld [vmem:[%s1755_s4 + $0x10] sm:$0xff]   ;;  %v1398_v36 = vld [vmem:[%s1755_s4 + $0x28] sm:$0xff]  }
  0x9b   : > { %1300 = vrot.lane.b32.xlu0 %v1299_v29, %s1423_s15  ;;  %725 = vmatprep.subr.bf16.mxu1 %v1419_v1 }
  0x9d   : > { %1285 = vrot.lane.b32.xlu1 %v1284_v32, %s1424_s16 }
  0x9e   : > { %726 = vmatpush1.bf16.msra.mxu1 %v1395_v20 }
  0x9f   : > { %1310 = vrot.lane.b32.xlu0 %v1309_v35, %s1425_s17  ;;  %727 = vmatprep.subr.bf16.mxu1 %v1419_v1 }
  0xa1   : > { %1295 = vrot.lane.b32.xlu1 %v1294_v37, %s1426_s18  ;;  %v1399_v37 = vld [vmem:[%s1755_s4 + $0x30] sm:$0xff]  }
  0xa2   : > { %728 = vmatpush1.bf16.msra.mxu1 %v1396_v21 }
  0xa3   : > { %729 = vmatprep.subr.bf16.mxu1 %v1419_v1 }
  0xa5   : > { %1305 = vrot.lane.b32.xlu1 %v1304_v40, %s1427_s19 }
  0xa6   : > { %730 = vmatpush1.bf16.msra.mxu1 %v1397_v22 }
  0xa7   : > { %731 = vmatprep.subr.bf16.mxu1 %v1419_v1 }
  0xaa   : > { %732 = vmatpush1.bf16.msra.mxu1 %v1398_v36 }
  0xab   : > { %733 = vmatprep.subr.bf16.mxu1 %v1419_v1 }
  0xae   : > { %734 = vmatpush1.bf16.msra.mxu1 %v1399_v37 }
  0xaf   : > { %735 = vmatprep.subr.bf16.mxu1 %v1419_v1 }
 0x109   : > { %v1291_v41 = vpop.permute.xlu0 %1290 }
 0x10a   : > { %v1293_v54 = vunpack.i.h.bf16 %v1291_v41  ;;  %v1292_v55 = vunpack.i.l.bf16 %v1291_v41 }
 0x10b   : > { %v1281_v42 = vpop.permute.xlu1 %1280 }
 0x10c   : > { %v1283_v43 = vunpack.i.h.bf16 %v1281_v42  ;;  %v1282_v44 = vunpack.i.l.bf16 %v1281_v42 }
 0x10d   : > { %v1301_v47 = vpop.permute.xlu0 %1300 }
 0x10e   : > { %v417_v50 = vsel %vm309_vm0, %v347_v46, %v1282_v44  ;;  %v418_v51 = vsel %vm309_vm0, %v348_v38, %v1283_v43  ;;  %v1303_v0 = vunpack.i.h.bf16 %v1301_v47  ;;  %v1302_v2 = vunpack.i.l.bf16 %v1301_v47 }
 0x10f   : > { %v1286_v45 = vpop.permute.xlu1 %1285 }
 0x110   : > { %v1288_v48 = vunpack.i.h.bf16 %v1286_v45  ;;  %v1287_v49 = vunpack.i.l.bf16 %v1286_v45 }
 0x111   : > { %v1311_v61 = vpop.permute.xlu0 %1310 }
 0x112   : > { %v420_v52 = vsel %vm419_vm1, %v417_v50, %v1287_v49  ;;  %v421_v53 = vsel %vm419_vm1, %v418_v51, %v1288_v48  ;;  %v1313_v7 = vunpack.i.h.bf16 %v1311_v61  ;;  %v1312_v8 = vunpack.i.l.bf16 %v1311_v61  ;;  %v1400_v48 = vld [vmem:[%s1755_s4 + $0x38] sm:$0xff]  }
 0x113   : > { %v1296_v56 = vpop.permute.xlu1 %1295  ;;  %v423_v59 = vsel %vm422_vm2, %v420_v52, %v1292_v55  ;;  %v424_v60 = vsel %vm422_vm2, %v421_v53, %v1293_v54  ;;  %736 = vmatpush1.bf16.msra.mxu1 %v1400_v48  ;;  %v1401_v52 = vld [vmem:[%s1755_s4 + $0x40] sm:$0xff]  }
 0x114   : > { %v1298_v57 = vunpack.i.h.bf16 %v1296_v56  ;;  %v1297_v58 = vunpack.i.l.bf16 %v1296_v56  ;;  %737 = vmatprep.subr.bf16.mxu1 %v1419_v1 }
 0x116   : > { %v426_v62 = vsel %vm425_vm3, %v423_v59, %v1297_v58  ;;  %v427_v63 = vsel %vm425_vm3, %v424_v60, %v1298_v57 }
 0x117   : > { %v1306_v4 = vpop.permute.xlu1 %1305  ;;  %v429_v9 = vsel %vm428_vm4, %v426_v62, %v1302_v2  ;;  %v430_v11 = vsel %vm428_vm4, %v427_v63, %v1303_v0  ;;  %738 = vmatpush1.bf16.msra.mxu1 %v1401_v52 }
 0x118   : > { %v1308_v5 = vunpack.i.h.bf16 %v1306_v4  ;;  %v1307_v6 = vunpack.i.l.bf16 %v1306_v4  ;;  %1004 = vmatprep.subr.bf16.mxu1 %v1419_v1 }
 0x11a   : > { %v432_v12 = vsel %vm431_vm5, %v429_v9, %v1307_v6  ;;  %v433_v14 = vsel %vm431_vm5, %v430_v11, %v1308_v5 }
 0x11b   : > { %v435_v15 = vsel %vm434_vm6, %v432_v12, %v1312_v8  ;;  %v436_v16 = vsel %vm434_vm6, %v433_v14, %v1313_v7 }
 0x11c   : > { %v437_v17 = vpack.c.bf16 %v436_v16, %v435_v15 }
 0x11e   : > { %535 = vmatmul.mubr.bf16.vlgmr.msra.gmra.mrb[0].mxu0 %v437_v17 }
 0x11f   : > { %1250 = vmatprep.mubr.msk.bf16.mxu0 %vm1428_vm8, %v1420_v3 }
 0x1f1   : > { %v536_v24 = vpop.f32.mrb[0].mxu0 }
 0x1f2   : > { %v537_v25 = vadd.f32 %v1181_v23, %v536_v24  ;;  %v538_v26 = vpop.f32.mrb[1].mxu0 }
 0x1f3   : > { %v539_v27 = vpop.f32.mrb[2].mxu0 }
 0x1f4   : > { %543 = vst.msk [vmem:[#allocation3] sm:$0xff] %vm309_vm0, %v537_v25  ;;  %v540_v28 = vadd.f32 %v1181_v23, %v539_v27  ;;  %v541_v29 = vpop.f32.mrb[3].mxu0 }
 0x1f6   : > { %544 = vst.msk [vmem:[#allocation3 + $0x8] sm:$0xff] %vm309_vm0, %v540_v28 }
 0x1fb   : > { %v1596_v30 = vld [vmem:[#allocation3] sm:$0xff] }
 0x1fc   : > { %v547_v31 = vmax.f32 %v1596_v30, 0.0 }
 0x1fd   : > { %v1599_v32 = vld [vmem:[#allocation3 + $0x8] sm:$0xff] }
 0x1fe   : > { %v568_v33 = vmul.f32 %v547_v31, %v1525_v10  ;;  %v548_v34 = vmax.f32 %v1599_v32, 0.0 }
 0x200   : > { %570 = vst.msk [vmem:[#allocation2 + $0x8] sm:$0xff] %vm309_vm0, %v568_v33  ;;  %v569_v35 = vmul.f32 %v548_v34, %v1529_v13 }
 0x202   : > { %571 = vst.msk [vmem:[#allocation2 + $0x10] sm:$0xff] %vm309_vm0, %v569_v35 }
 0x207   : > { %v576_v38 = vld [vmem:[#allocation2 + $0x5] sm:$0xff] }
 0x208   : > { %v574_v39 = vld [vmem:[#allocation2 + $0x4] sm:$0xff] }
 0x209   : > { %v577_v40 = vld [vmem:[#allocation2 + $0xd] sm:$0xff]  ;;  %v586_v41 = vld [vmem:[#allocation2 + $0x15] sm:$0xff]  ;;  %v572_v6 = vld [vmem:[#allocation2 + $0x3] sm:$0xff] }
 0x20a   : > { %v575_v42 = vld [vmem:[#allocation2 + $0xc] sm:$0xff]  ;;  %v657_v43 = vpack.c.bf16 %v586_v41, %v577_v40  ;;  %v1319_v44 = vpack.i.bf16 %v577_v40, %v576_v38  ;;  %v585_v60 = vld [vmem:[#allocation2 + $0x14] sm:$0xff]  ;;  %v765_v41 = vld [vmem:[%s1757_s6] sm:$0xf] }
 0x20b   : > { %v1314_v45 = vpack.i.bf16 %v575_v42, %v574_v39  ;;  %v581_v46 = vld [vmem:[#allocation2 + $0x10] sm:$0xff]  ;;  %v580_v49 = vld [vmem:[#allocation2 + $0x8] sm:$0xff]  ;;  %v1344_v61 = vpack.i.bf16 %v585_v60, %v575_v42  ;;  %v779_v42 = vsel %vm777_vm7, %v765_v41, 0 }
 0x20c   : > { %1202 = vmatprep.mubr.msk.bf16.mxu1 %vm309_vm0, %v657_v43  ;;  %1320 = vrot.lane.b32.xlu0 %v1319_v44, %s1424_s16  ;;  %v579_v47 = vld [vmem:[#allocation2 + $0xf] sm:$0xff]  ;;  %v1329_v50 = vpack.i.bf16 %v581_v46, %v580_v49  ;;  %v578_v51 = vld [vmem:[#allocation2 + $0x7] sm:$0xff]  ;;  %v1192_v43 = vld [vmem:[%s1756_s5] ss:$0 sm:$0xff] }
 0x20d   : > { %1315 = vrot.lane.b32.xlu1 %v1314_v45, %s1422_s12  ;;  %v1324_v53 = vpack.i.bf16 %v579_v47, %v578_v51  ;;  %v573_v54 = vld [vmem:[#allocation2 + $0xb] sm:$0xff]  ;;  %v584_v55 = vld [vmem:[#allocation2 + $0x13] sm:$0xff]  ;;  %1249 = vmatpush3.bf16.msra.mxu0 %v779_v42 }
 0x20e   : > { %v582_v56 = vld [vmem:[#allocation2 + $0x9] sm:$0xff]  ;;  %v583_v57 = vld [vmem:[#allocation2 + $0x11] sm:$0xff]  ;;  %v1339_v58 = vpack.i.bf16 %v584_v55, %v573_v54  ;;  %1254 = vmatprep.subr.bf16.mxu0 %v1420_v3 }
 0x20f   : > { %v1334_v59 = vpack.i.bf16 %v583_v57, %v582_v56  ;;  %v1404_v55 = vld [vmem:[%s1755_s4 + $0x58] sm:$0xff]   ;;  %v1406_v56 = vld [vmem:[%s1755_s4 + $0x68] sm:$0xff]   ;;  %v1203_v57 = vld [vmem:[%s1758_s7] ss:$0 sm:$0xff] }
 0x210   : > { %1330 = vrot.lane.b32.xlu0 %v1329_v50, %s1426_s18 }
 0x211   : > { %1325 = vrot.lane.b32.xlu1 %v1324_v53, %s1421_s9  ;;  %v1402_v53 = vld [vmem:[%s1755_s4 + $0x48] sm:$0xff]  }
 0x214   : > { %1340 = vrot.lane.b32.xlu0 %v1339_v58, %s1427_s19 }
 0x215   : > { %1335 = vrot.lane.b32.xlu1 %v1334_v59, %s1423_s15 }
 0x219   : > { %1345 = vrot.lane.b32.xlu1 %v1344_v61, %s1425_s17 }
 0x27e   : > { %v1321_v62 = vpop.permute.xlu0 %1320 }
 0x27f   : > { %v1316_v63 = vpop.permute.xlu1 %1315  ;;  %v1323_v4 = vunpack.i.h.bf16 %v1321_v62  ;;  %v1322_v5 = vunpack.i.l.bf16 %v1321_v62 }
 0x280   : > { %v1318_v0 = vunpack.i.h.bf16 %v1316_v63  ;;  %v1317_v2 = vunpack.i.l.bf16 %v1316_v63 }
 0x282   : > { %v642_v7 = vsel %vm309_vm0, %v572_v6, %v1317_v2  ;;  %v643_v8 = vsel %vm309_vm0, %v573_v54, %v1318_v0  ;;  %v1331_v9 = vpop.permute.xlu0 %1330  ;;  %v1403_v54 = vld [vmem:[%s1755_s4 + $0x50] sm:$0xff]  }
 0x283   : > { %v1326_v11 = vpop.permute.xlu1 %1325  ;;  %v1333_v15 = vunpack.i.h.bf16 %v1331_v9  ;;  %v1332_v16 = vunpack.i.l.bf16 %v1331_v9  ;;  %v644_v17 = vsel %vm419_vm1, %v642_v7, %v1322_v5  ;;  %v645_v18 = vsel %vm419_vm1, %v643_v8, %v1323_v4  ;;  %v1408_v9 = vld [vmem:[%s1755_s4 + $0x78] sm:$0xff]  }
 0x284   : > { %v1328_v12 = vunpack.i.h.bf16 %v1326_v11  ;;  %v1327_v14 = vunpack.i.l.bf16 %v1326_v11 }
 0x286   : > { %v646_v19 = vsel %vm422_vm2, %v644_v17, %v1327_v14  ;;  %v647_v20 = vsel %vm422_vm2, %v645_v18, %v1328_v12  ;;  %v1341_v21 = vpop.permute.xlu0 %1340 }
 0x287   : > { %v1336_v22 = vpop.permute.xlu1 %1335  ;;  %v648_v25 = vsel %vm425_vm3, %v646_v19, %v1332_v16  ;;  %v649_v26 = vsel %vm425_vm3, %v647_v20, %v1333_v15  ;;  %v1343_v27 = vunpack.i.h.bf16 %v1341_v21  ;;  %v1342_v28 = vunpack.i.l.bf16 %v1341_v21  ;;  %v1409_v20 = vld [vmem:[%s1755_s4 + $0x80] sm:$0xff]  }
 0x288   : > { %v1338_v23 = vunpack.i.h.bf16 %v1336_v22  ;;  %v1337_v24 = vunpack.i.l.bf16 %v1336_v22 }
 0x28a   : > { %v650_v29 = vsel %vm428_vm4, %v648_v25, %v1337_v24  ;;  %v651_v31 = vsel %vm428_vm4, %v649_v26, %v1338_v23  ;;  %v1410_v24 = vld [vmem:[%s1755_s4 + $0x88] sm:$0xff]  }
 0x28b   : > { %v1346_v33 = vpop.permute.xlu1 %1345  ;;  %v652_v36 = vsel %vm431_vm5, %v650_v29, %v1342_v28  ;;  %v653_v37 = vsel %vm431_vm5, %v651_v31, %v1343_v27 }
 0x28c   : > { %v1348_v34 = vunpack.i.h.bf16 %v1346_v33  ;;  %v1347_v35 = vunpack.i.l.bf16 %v1346_v33 }
 0x28e   : > { %v654_v38 = vsel %vm434_vm6, %v652_v36, %v1347_v35  ;;  %v655_v39 = vsel %vm434_vm6, %v653_v37, %v1348_v34 }
 0x28f   : > { %v656_v40 = vpack.c.bf16 %v655_v39, %v654_v38 }
 0x291   : > { %754 = vmatmul.mubr.bf16.vlgmr.msra.gmra.mrb[0].mxu1 %v656_v40 }
 0x292   : > { %1005 = vmatpush1.bf16.msra.mxu1 %v1402_v53 }
 0x293   : > { %1006 = vmatprep.subr.bf16.mxu1 %v1419_v1 }
 0x296   : > { %1007 = vmatpush1.bf16.msra.mxu1 %v1403_v54 }
 0x297   : > { %1008 = vmatprep.subr.bf16.mxu1 %v1419_v1 }
 0x29a   : > { %1009 = vmatpush1.bf16.msra.mxu1 %v1404_v55 }
 0x29b   : > { %1010 = vmatprep.subr.bf16.mxu1 %v1419_v1 }
 0x364   : > { %v755_v44 = vpop.f32.mrb[0].mxu1 }
 0x365   : > { %v756_v45 = vadd.f32 %v1192_v43, %v755_v44  ;;  %v757_v46 = vpop.f32.mrb[1].mxu1 }
 0x366   : > { %v758_v47 = vpop.f32.mrb[2].mxu1 }
 0x367   : > { %v759_v48 = vadd.f32 %v1192_v43, %v758_v47  ;;  %v760_v49 = vpop.f32.mrb[3].mxu1  ;;  %v762_v50 = vmax.f32 %v756_v45, 0.0 }
 0x369   : > { %v763_v51 = vmax.f32 %v759_v48, 0.0 }
 0x36b   : > { %v764_v52 = vpack.c.bf16 %v763_v51, %v762_v50 }
 0x36d   : > { %1251 = vmatmul.mubr.msk.bf16.vlgmr.msra.gmra.mrb[4].mxu0 %vm773_vm9, %v764_v52 }
 0x36e   : > { %1256 = vmatprep.mubr.msk.bf16.mxu0 %vm1428_vm8, %v1420_v3  ;;  %v1405_v3 = vld [vmem:[%s1755_s4 + $0x60] sm:$0xff]  }
 0x36f   : > { %1011 = vmatpush1.bf16.msra.mxu1 %v1405_v3 }
 0x370   : > { %1012 = vmatprep.subr.bf16.mxu1 %v1419_v1 }
 0x373   : > { %1013 = vmatpush1.bf16.msra.mxu1 %v1406_v56 }
 0x374   : > { %1014 = vmatprep.subr.bf16.mxu1 %v1419_v1 }
 0x440   : > { %v815_v58 = vpop.f32.mrb[4].mxu0 }
 0x441   : > { %v816_v59 = vadd.f32 %v1203_v57, %v815_v58  ;;  %v1252_v60 = vpop.f32.mrb[5].mxu0 }
 0x442   : > { %v818_v61 = vpop.f32.mrb[6].mxu0 }
 0x443   : > { %v822_v62 = vadd.f32 %v816_v59, %v1596_v30  ;;  %v819_v63 = vadd.f32 %v1203_v57, %v818_v61  ;;  %v1253_v0 = vpop.f32.mrb[7].mxu0 }
 0x445   : > { %824 = vst.msk [vmem:[#allocation3] sm:$0xff] %vm309_vm0, %v822_v62  ;;  %v823_v2 = vadd.f32 %v819_v63, %v1599_v32  ;;  %v1407_v32 = vld [vmem:[%s1755_s4 + $0x70] sm:$0xff]  }
 0x446   : > { %1015 = vmatpush1.bf16.msra.mxu1 %v1407_v32 }
 0x447   : > { %825 = vst.msk [vmem:[#allocation3 + $0x8] sm:$0xff] %vm309_vm0, %v823_v2  ;;  %1016 = vmatprep.subr.bf16.mxu1 %v1419_v1 }
 0x44a   : > { %1017 = vmatpush1.bf16.msra.mxu1 %v1408_v9  ;;  %v1235_v9 = vld [vmem:[%s1757_s6 + $0x4] sm:$0xf] }
 0x44b   : > { %1018 = vmatprep.subr.bf16.mxu1 %v1419_v1 }
 0x44c   : > { %v1682_v4 = vld [vmem:[#allocation3] sm:$0xff] }
 0x44d   : > { %v828_v5 = vmax.f32 %v1682_v4, 0.0 }
 0x44e   : > { %v1685_v6 = vld [vmem:[#allocation3 + $0x8] sm:$0xff]  ;;  %1019 = vmatpush1.bf16.msra.mxu1 %v1409_v20 }
 0x44f   : > { %v851_v7 = vmul.f32 %v828_v5, %v1525_v10  ;;  %v829_v8 = vmax.f32 %v1685_v6, 0.0  ;;  %1020 = vmatprep.subr.bf16.mxu1 %v1419_v1 }
 0x451   : > { %853 = vst.msk [vmem:[#allocation2 + $0x8] sm:$0xff] %vm309_vm0, %v851_v7  ;;  %v852_v30 = vmul.f32 %v829_v8, %v1529_v13 }
 0x452   : > { %1021 = vmatpush1.bf16.msra.mxu1 %v1410_v24 }
 0x453   : > { %854 = vst.msk [vmem:[#allocation2 + $0x10] sm:$0xff] %vm309_vm0, %v852_v30 }
 0x458   : > { %v859_v10 = vld [vmem:[#allocation2 + $0x5] sm:$0xff] }
 0x459   : > { %v857_v11 = vld [vmem:[#allocation2 + $0x4] sm:$0xff] }
 0x45a   : > { %v860_v12 = vld [vmem:[#allocation2 + $0xd] sm:$0xff]  ;;  %v869_v14 = vld [vmem:[#allocation2 + $0x15] sm:$0xff]  ;;  %v855_v41 = vld [vmem:[#allocation2 + $0x3] sm:$0xff] }
 0x45b   : > { %v858_v15 = vld [vmem:[#allocation2 + $0xc] sm:$0xff]  ;;  %v1354_v13 = vpack.i.bf16 %v860_v12, %v859_v10  ;;  %v940_v16 = vpack.c.bf16 %v869_v14, %v860_v12  ;;  %v868_v34 = vld [vmem:[#allocation2 + $0x14] sm:$0xff]  ;;  %v1062_v10 = vsel %vm777_vm7, %v1235_v9, 0 }
 0x45c   : > { %v1349_v17 = vpack.i.bf16 %v858_v15, %v857_v11  ;;  %v864_v18 = vld [vmem:[#allocation2 + $0x10] sm:$0xff]  ;;  %v863_v21 = vld [vmem:[#allocation2 + $0x8] sm:$0xff]  ;;  %v1379_v35 = vpack.i.bf16 %v868_v34, %v858_v15  ;;  %1255 = vmatpush3.bf16.msra.mxu0 %v1062_v10  ;;  %v1224_v11 = vld [vmem:[%s1756_s5 + $0x1] ss:$0 sm:$0xff] }
 0x45d   : > { %1355 = vrot.lane.b32.xlu1 %v1354_v13, %s1424_s16  ;;  %1234 = vmatprep.mubr.msk.bf16.mxu1 %vm309_vm0, %v940_v16  ;;  %v862_v19 = vld [vmem:[#allocation2 + $0xf] sm:$0xff]  ;;  %v1364_v22 = vpack.i.bf16 %v864_v18, %v863_v21  ;;  %v861_v23 = vld [vmem:[#allocation2 + $0x7] sm:$0xff]  ;;  %v1237_v21 = vld [vmem:[%s1758_s7 + $0x1] ss:$0 sm:$0xff] }
 0x45e   : > { %1350 = vrot.lane.b32.xlu0 %v1349_v17, %s1422_s12  ;;  %v1359_v25 = vpack.i.bf16 %v862_v19, %v861_v23  ;;  %v856_v26 = vld [vmem:[#allocation2 + $0xb] sm:$0xff]  ;;  %v867_v27 = vld [vmem:[#allocation2 + $0x13] sm:$0xff] }
 0x45f   : > { %v865_v28 = vld [vmem:[#allocation2 + $0x9] sm:$0xff]  ;;  %v866_v29 = vld [vmem:[#allocation2 + $0x11] sm:$0xff]  ;;  %v1374_v31 = vpack.i.bf16 %v867_v27, %v856_v26 }
 0x460   : > { %v1369_v33 = vpack.i.bf16 %v866_v29, %v865_v28 }
 0x461   : > { %1365 = vrot.lane.b32.xlu1 %v1364_v22, %s1426_s18 }
 0x462   : > { %1360 = vrot.lane.b32.xlu0 %v1359_v25, %s1421_s9 }
 0x465   : > { %1375 = vrot.lane.b32.xlu1 %v1374_v31, %s1427_s19  ;;  %s1243_s19 = sshll.u32 %s1761_s28, 2 }
 0x466   : > { %1370 = vrot.lane.b32.xlu0 %v1369_v33, %s1423_s15  ;;  %s305_s29 = scalar_lea.vmem %s1759_s8, %s1243_s19 }
 0x46a   : > { %1380 = vrot.lane.b32.xlu0 %v1379_v35, %s1425_s17 }
 0x4cf   : > { %v1356_v36 = vpop.permute.xlu1 %1355 }
 0x4d0   : > { %v1351_v37 = vpop.permute.xlu0 %1350  ;;  %v1358_v39 = vunpack.i.h.bf16 %v1356_v36  ;;  %v1357_v40 = vunpack.i.l.bf16 %v1356_v36 }
 0x4d1   : > { %v1353_v1 = vunpack.i.h.bf16 %v1351_v37  ;;  %v1352_v38 = vunpack.i.l.bf16 %v1351_v37 }
 0x4d3   : > { %v925_v42 = vsel %vm309_vm0, %v855_v41, %v1352_v38  ;;  %v926_v43 = vsel %vm309_vm0, %v856_v26, %v1353_v1  ;;  %v1366_v44 = vpop.permute.xlu1 %1365 }
 0x4d4   : > { %v1361_v45 = vpop.permute.xlu0 %1360  ;;  %v1368_v48 = vunpack.i.h.bf16 %v1366_v44  ;;  %v1367_v49 = vunpack.i.l.bf16 %v1366_v44  ;;  %v927_v50 = vsel %vm419_vm1, %v925_v42, %v1357_v40  ;;  %v928_v51 = vsel %vm419_vm1, %v926_v43, %v1358_v39 }
 0x4d5   : > { %v1363_v46 = vunpack.i.h.bf16 %v1361_v45  ;;  %v1362_v47 = vunpack.i.l.bf16 %v1361_v45 }
 0x4d7   : > { %v929_v52 = vsel %vm422_vm2, %v927_v50, %v1362_v47  ;;  %v930_v53 = vsel %vm422_vm2, %v928_v51, %v1363_v46  ;;  %v1376_v54 = vpop.permute.xlu1 %1375 }
 0x4d8   : > { %v1371_v55 = vpop.permute.xlu0 %1370  ;;  %v931_v57 = vsel %vm425_vm3, %v929_v52, %v1367_v49  ;;  %v932_v58 = vsel %vm425_vm3, %v930_v53, %v1368_v48  ;;  %v1378_v59 = vunpack.i.h.bf16 %v1376_v54  ;;  %v1377_v60 = vunpack.i.l.bf16 %v1376_v54 }
 0x4d9   : > { %v1373_v3 = vunpack.i.h.bf16 %v1371_v55  ;;  %v1372_v56 = vunpack.i.l.bf16 %v1371_v55 }
 0x4db   : > { %v933_v61 = vsel %vm428_vm4, %v931_v57, %v1372_v56  ;;  %v934_v62 = vsel %vm428_vm4, %v932_v58, %v1373_v3 }
 0x4dc   : > { %v1381_v63 = vpop.permute.xlu0 %1380  ;;  %v935_v5 = vsel %vm431_vm5, %v933_v61, %v1377_v60  ;;  %v936_v7 = vsel %vm431_vm5, %v934_v62, %v1378_v59 }
 0x4dd   : > { %v1383_v0 = vunpack.i.h.bf16 %v1381_v63  ;;  %v1382_v2 = vunpack.i.l.bf16 %v1381_v63 }
 0x4df   : > { %v937_v8 = vsel %vm434_vm6, %v935_v5, %v1382_v2  ;;  %v938_v30 = vsel %vm434_vm6, %v936_v7, %v1383_v0 }
 0x4e0   : > { %v939_v32 = vpack.c.bf16 %v938_v30, %v937_v8 }
 0x4e2   : > { %1037 = vmatmul.mubr.bf16.vlgmr.msra.gmra.mrb[4].mxu1 %v939_v32 }
 0x5b5   : > { %v1038_v12 = vpop.f32.mrb[4].mxu1 }
 0x5b6   : > { %v1039_v14 = vadd.f32 %v1224_v11, %v1038_v12  ;;  %v1040_v15 = vpop.f32.mrb[5].mxu1 }
 0x5b7   : > { %v1041_v13 = vpop.f32.mrb[6].mxu1 }
 0x5b8   : > { %v1042_v16 = vadd.f32 %v1224_v11, %v1041_v13  ;;  %v1043_v17 = vpop.f32.mrb[7].mxu1  ;;  %v1045_v18 = vmax.f32 %v1039_v14, 0.0 }
 0x5ba   : > { %v1046_v19 = vmax.f32 %v1042_v16, 0.0 }
 0x5bc   : > { %v1047_v20 = vpack.c.bf16 %v1046_v19, %v1045_v18 }
 0x5be   : > { %1257 = vmatmul.mubr.msk.bf16.vlgmr.msra.gmra.mrb[8].mxu0 %vm773_vm9, %v1047_v20 }
 0x691   : > { %v1098_v22 = vpop.f32.mrb[8].mxu0 }
 0x692   : > { %v1099_v23 = vadd.f32 %v1237_v21, %v1098_v22  ;;  %v1258_v24 = vpop.f32.mrb[9].mxu0 }
 0x693   : > { %v1101_v25 = vpop.f32.mrb[10].mxu0 }
 0x694   : > { %v1105_v26 = vadd.f32 %v1099_v23, %v1682_v4  ;;  %v1102_v27 = vadd.f32 %v1237_v21, %v1101_v25  ;;  %v1259_v28 = vpop.f32.mrb[11].mxu0 }
 0x696   : > { %1107 = vst.msk [vmem:[#allocation3] sm:$0xff] %vm309_vm0, %v1105_v26  ;;  %v1106_v29 = vadd.f32 %v1102_v27, %v1685_v6 }
 0x698   : > { %1108 = vst.msk [vmem:[#allocation3 + $0x8] sm:$0xff] %vm309_vm0, %v1106_v29 }
 0x69d   : > { %v1109_v31 = vld [vmem:[#allocation3 + $0x5] sm:$0x3] }
 0x69e   : > { %v1110_v33 = vmax.f32 %v1109_v31, 0.0 }
 0x69f   : > { %v1113_v34 = vld [vmem:[#allocation3 + $0x9] sm:$0x3] }
 0x6a0   : > { %1112 = vst.msk [vmem:[%s305_s29] sm:$0x3] %vm1111_vm10, %v1110_v33  ;;  %v1114_v35 = vmax.f32 %v1113_v34, 0.0 }
 0x6a2   : > { %1239 = vst.msk [vmem:[%s305_s29 + $0x2] sm:$0x3] %vm1111_vm10, %v1114_v35 }
 0x6a3 PF: > { %s18_s27 = sadd.s32 1, %s1417_s27  }
 0x6a4   : > { %p15_p4 = scmp.ge.s32.totalorder %s18_s27, 4  }
 0x6a6   :  { %17 = sbr.rel (!%p15_p4) target bundleno = 1 (0x1), region = 87 }

// kernel: vqvae2_forward.19
= control target key start
LH: loop header
LB: loop body
LE: loop exit
PB: predicated region body
PF: predicated region fallthrough
CT: control target
= control target key end

     0   :  { %s571_s12 = smov 0   ;;  %s631_s0 = inlined_call_operand.vmem [shape: f32[2,26,8], index: 0, kind: input, shape index: {}]   ;;  %s632_s1 = inlined_call_operand.vmem [shape: bf16[72,32], index: 1, kind: input, shape index: {}]   ;;  %s633_s2 = inlined_call_operand.vmem [shape: f32[1,32], index: 2, kind: input, shape index: {}]   ;;  %s634_s3 = inlined_call_operand.vmem [shape: f32[2,2,2,32], index: 3, kind: output, shape index: {}]  }
   0x1 LB: > { %s429_s13 = sadd.s32 4294967295, %s539_s12   ;;  %p433_p0 = scmp.ge.s32.totalorder %s539_s12, 1  ;;  %s539_s12 = sphi %s571_s12, %s13_s12  }
   0x2   : > { %p137_p1 = scmp.lt.s32.totalorder %s539_s12, 3 }
   0x4   : > { %p138_p2 = pnand %p433_p0, %p137_p1 }
   0x5   : > { %p161_p3 = scmp.lt.s32.totalorder (!%p138_p2), %s429_s13, 1  ;;  %v528_v0 = vld [vmem:[%s632_s1] sm:$0xff] (!%p138_p2)   ;;  %v541_v1 = vmov (!%p138_p2), 0.0   ;;  %v529_v2 = vld [vmem:[%s632_s1 + $0x8] sm:$0xff] (!%p138_p2)   ;;  %v530_v5 = vld [vmem:[%s632_s1 + $0x10] sm:$0xff] (!%p138_p2)   ;;  %s542_s24 = smov (!%p138_p2), 8  }
   0x6   : > { %141 = sbr.rel (%p138_p2) target bundleno = 377 (0x179), region = 32  ;;  %456 = vmatprep.subr.bf16.mxu0 (!%p138_p2), %v541_v1  ;;  %v531_v15 = vld [vmem:[%s632_s1 + $0x18] sm:$0xff] (!%p138_p2)   ;;  %s543_s27 = smov (!%p138_p2), 24   ;;  %v532_v21 = vld [vmem:[%s632_s1 + $0x20] ss:$0 sps:$4 sm:$0xff] (!%p138_p2)   ;;  %vm321_vm0 = vcmask (!%p138_p2), 1043456  }
   0x7   : > { %457 = vmatpush3.bf16.msra.mxu0 (!%p138_p2), %v528_v0  ;;  %s544_s30 = smov (!%p138_p2), 16   ;;  %vm545_vm1 = vmmov (!%p138_p2), 0   ;;  %s546_s4 = smov (!%p138_p2), 32   ;;  %v323_v26 = vsel (!%p138_p2), %vm321_vm0, %v532_v21, 0  ;;  %vm249_vm2 = vcmask (!%p138_p2), 64512   ;;  %vm252_vm3 = vcmask (!%p138_p2), 130048  }
   0x8   : > { %458 = vmatprep.subr.bf16.mxu0 (!%p138_p2), %v541_v1  ;;  %466 = vmatprep.mubr.msk.bf16.mxu0 (!%p138_p2), %vm545_vm1, %v541_v1  ;;  %s547_s5 = smov (!%p138_p2), 40   ;;  %s548_s6 = smov (!%p138_p2), 48   ;;  %vm255_vm4 = vcmask (!%p138_p2), 195584   ;;  %vm258_vm5 = vcmask (!%p138_p2), 261120   ;;  %vm261_vm6 = vcmask (!%p138_p2), 326656   ;;  %vm264_vm7 = vcmask (!%p138_p2), 392192  }
   0x9   : > { %s549_s7 = smov (!%p138_p2), 56   ;;  %s550_s8 = smov (!%p138_p2), 64   ;;  %vm267_vm8 = vcmask (!%p138_p2), 457728   ;;  %vm270_vm9 = vcmask (!%p138_p2), 523264   ;;  %vm317_vm10 = vcmask (!%p138_p2), 588800   ;;  %vm369_vm11 = vcmask (!%p138_p2), 254976  }
   0xb   : > { %459 = vmatpush3.bf16.msra.mxu0 (!%p138_p2), %v529_v2 }
   0xc   : > { %460 = vmatprep.subr.bf16.mxu0 (!%p138_p2), %v541_v1 }
   0xd   : > { %s636_s13 = smov (!%p161_p3, %s429_s13), 1 }
   0xe   : > { %s448_s18 = sshll.u32 %s636_s13, 5  ;;  %s449_s11 = sshll.u32 %s636_s13, 2 }
   0xf   : > { %s591_s21 = scalar_lea.vmem %s631_s0, %s448_s18  ;;  %461 = vmatpush3.bf16.msra.mxu0 %v530_v5  ;;  %s170_s16 = scalar_lea.vmem %s634_s3, %s449_s11 }
  0x10   : > { %v175_v3 = vld [vmem:[%s591_s21 + $0x9] sm:$0xff]  ;;  %v174_v4 = vld [vmem:[%s591_s21 + $0x1] sm:$0xff]  ;;  %462 = vmatprep.subr.bf16.mxu0 %v541_v1  ;;  %v185_v23 = vld [vmem:[%s591_s21 + $0x11] sm:$0xff] }
  0x11   : > { %v488_v6 = vpack.i.bf16 %v175_v3, %v174_v4  ;;  %v178_v7 = vld [vmem:[%s591_s21 + $0x4] sm:$0xff]  ;;  %v179_v8 = vld [vmem:[%s591_s21 + $0xc] sm:$0xff]  ;;  %v518_v27 = vpack.i.bf16 %v185_v23, %v175_v3 }
  0x12   : > { %v176_v9 = vld [vmem:[%s591_s21 + $0x2] sm:$0xff]  ;;  %v498_v10 = vpack.i.bf16 %v179_v8, %v178_v7  ;;  %v177_v11 = vld [vmem:[%s591_s21 + $0xa] sm:$0xff]  ;;  %v186_v25 = vld [vmem:[%s591_s21 + $0x12] sm:$0xff] }
  0x13   : > { %v180_v12 = vld [vmem:[%s591_s21 + $0x5] sm:$0xff]  ;;  %v181_v13 = vld [vmem:[%s591_s21 + $0xd] sm:$0xff]  ;;  %489 = vrot.lane.b32.xlu0 %v488_v6, %s542_s24  ;;  %v493_v14 = vpack.i.bf16 %v177_v11, %v176_v9  ;;  %463 = vmatpush3.bf16.msra.mxu0 %v531_v15  ;;  %v523_v28 = vpack.i.bf16 %v186_v25, %v177_v11  ;;  %v438_v7 = vld [vmem:[%s633_s2] ss:$0 sm:$0xff] }
  0x14   : > { %499 = vrot.lane.b32.xlu1 %v498_v10, %s543_s27  ;;  %v503_v16 = vpack.i.bf16 %v181_v13, %v180_v12  ;;  %v182_v17 = vld [vmem:[%s591_s21 + $0x6] sm:$0xff]  ;;  %v183_v18 = vld [vmem:[%s591_s21 + $0xe] sm:$0xff]  ;;  %464 = vmatprep.subr.bf16.mxu0 %v541_v1 }
  0x15   : > { %v173_v19 = vld [vmem:[%s591_s21 + $0x8] sm:$0xff]  ;;  %v184_v20 = vld [vmem:[%s591_s21 + $0x10] sm:$0xff]  ;;  %v508_v22 = vpack.i.bf16 %v183_v18, %v182_v17  ;;  %v172_v33 = vld [vmem:[%s591_s21] sm:$0xff] }
  0x16   : > { %v513_v24 = vpack.i.bf16 %v184_v20, %v173_v19 }
  0x17   : > { %494 = vrot.lane.b32.xlu0 %v493_v14, %s544_s30  ;;  %465 = vmatpush3.bf16.msra.mxu0 %v323_v26 }
  0x18   : > { %504 = vrot.lane.b32.xlu1 %v503_v16, %s546_s4 }
  0x1b   : > { %509 = vrot.lane.b32.xlu0 %v508_v22, %s547_s5 }
  0x1c   : > { %514 = vrot.lane.b32.xlu1 %v513_v24, %s548_s6 }
  0x1f   : > { %519 = vrot.lane.b32.xlu0 %v518_v27, %s549_s7 }
  0x20   : > { %524 = vrot.lane.b32.xlu1 %v523_v28, %s550_s8 }
  0x85   : > { %v490_v29 = vpop.permute.xlu0 %489 }
  0x86   : > { %v500_v30 = vpop.permute.xlu1 %499  ;;  %v492_v31 = vunpack.i.h.bf16 %v490_v29  ;;  %v491_v32 = vunpack.i.l.bf16 %v490_v29 }
  0x87   : > { %v502_v35 = vunpack.i.h.bf16 %v500_v30  ;;  %v501_v36 = vunpack.i.l.bf16 %v500_v30 }
  0x88   : > { %v250_v40 = vsel %vm249_vm2, %v172_v33, %v491_v32  ;;  %v251_v41 = vsel %vm249_vm2, %v173_v19, %v492_v31 }
  0x89   : > { %v495_v34 = vpop.permute.xlu0 %494 }
  0x8a   : > { %v497_v37 = vunpack.i.h.bf16 %v495_v34  ;;  %v496_v38 = vunpack.i.l.bf16 %v495_v34  ;;  %v505_v39 = vpop.permute.xlu1 %504 }
  0x8b   : > { %v507_v42 = vunpack.i.h.bf16 %v505_v39  ;;  %v506_v43 = vunpack.i.l.bf16 %v505_v39 }
  0x8c   : > { %v253_v44 = vsel %vm252_vm3, %v250_v40, %v496_v38  ;;  %v254_v45 = vsel %vm252_vm3, %v251_v41, %v497_v37 }
  0x8d   : > { %v256_v46 = vsel %vm255_vm4, %v253_v44, %v501_v36  ;;  %v257_v47 = vsel %vm255_vm4, %v254_v45, %v502_v35  ;;  %v510_v48 = vpop.permute.xlu0 %509 }
  0x8e   : > { %v259_v49 = vsel %vm258_vm5, %v256_v46, %v506_v43  ;;  %v260_v50 = vsel %vm258_vm5, %v257_v47, %v507_v42  ;;  %v512_v51 = vunpack.i.h.bf16 %v510_v48  ;;  %v511_v52 = vunpack.i.l.bf16 %v510_v48  ;;  %v515_v53 = vpop.permute.xlu1 %514 }
  0x8f   : > { %v517_v54 = vunpack.i.h.bf16 %v515_v53  ;;  %v516_v55 = vunpack.i.l.bf16 %v515_v53 }
  0x90   : > { %v262_v56 = vsel %vm261_vm6, %v259_v49, %v511_v52  ;;  %v263_v57 = vsel %vm261_vm6, %v260_v50, %v512_v51 }
  0x91   : > { %v520_v58 = vpop.permute.xlu0 %519  ;;  %v265_v62 = vsel %vm264_vm7, %v262_v56, %v516_v55  ;;  %v266_v63 = vsel %vm264_vm7, %v263_v57, %v517_v54 }
  0x92   : > { %v522_v59 = vunpack.i.h.bf16 %v520_v58  ;;  %v521_v60 = vunpack.i.l.bf16 %v520_v58  ;;  %v525_v61 = vpop.permute.xlu1 %524 }
  0x93   : > { %v527_v0 = vunpack.i.h.bf16 %v525_v61  ;;  %v526_v1 = vunpack.i.l.bf16 %v525_v61 }
  0x94   : > { %v268_v2 = vsel %vm267_vm8, %v265_v62, %v521_v60  ;;  %v269_v3 = vsel %vm267_vm8, %v266_v63, %v522_v59 }
  0x95   : > { %v271_v4 = vsel %vm270_vm9, %v268_v2, %v526_v1  ;;  %v272_v5 = vsel %vm270_vm9, %v269_v3, %v527_v0 }
  0x96   : > { %v273_v6 = vpack.c.bf16 %v272_v5, %v271_v4 }
  0x98   : > { %467 = vmatmul.mubr.msk.bf16.vlgmr.msra.gmra.mrb[0].mxu0 %vm317_vm10, %v273_v6 }
 0x16b   : > { %v359_v8 = vpop.f32.mrb[0].mxu0 }
 0x16c   : > { %v360_v9 = vadd.f32 %v438_v7, %v359_v8  ;;  %v468_v10 = vpop.f32.mrb[1].mxu0 }
 0x16d   : > { %v362_v11 = vpop.f32.mrb[2].mxu0 }
 0x16e   : > { %366 = vst.msk [vmem:[#allocation2] sm:$0xff] %vm258_vm5, %v360_v9  ;;  %v363_v12 = vadd.f32 %v438_v7, %v362_v11  ;;  %v469_v13 = vpop.f32.mrb[3].mxu0 }
 0x170   : > { %367 = vst.msk [vmem:[#allocation2 + $0x8] sm:$0xff] %vm258_vm5, %v363_v12 }
 0x175   : > { %v368_v14 = vld [vmem:[#allocation2 + $0x5] sm:$0x3] }
 0x176   : > { %370 = vst.msk [vmem:[%s170_s16] sm:$0x3] %vm369_vm11, %v368_v14 }
 0x177   : > { %v371_v15 = vld [vmem:[#allocation2 + $0x9] sm:$0x3] }
 0x178   : > { %445 = vst.msk [vmem:[%s170_s16 + $0x2] sm:$0x3] %vm369_vm11, %v371_v15 }
 0x179 PF: > { %s13_s12 = sadd.s32 1, %s539_s12  }
 0x17a   : > { %p10_p4 = scmp.ge.s32.totalorder %s13_s12, 4  }
 0x17c   :  { %12 = sbr.rel (!%p10_p4) target bundleno = 1 (0x1), region = 63 }

// kernel: vqvae2_forward.20
= control target key start
LH: loop header
LB: loop body
LE: loop exit
PB: predicated region body
PF: predicated region fallthrough
CT: control target
= control target key end

     0   :  { %vm59_vm0 = vcmask 1043456   ;;  %vm52_vm1 = vcmask 195584   ;;  %vm112_vm2 = vcmask 64512   ;;  %vm230_vm3 = vcmask 261120   ;;  %s691_s1 = inlined_call_operand.vmem [shape: bf16[24,8], index: 1, kind: input, shape index: {}]   ;;  %s692_s0 = inlined_call_operand.vmem [shape: f32[32,24], index: 0, kind: input, shape index: {}]   ;;  %s693_s4 = inlined_call_operand.vmem [shape: f32[8,32], index: 4, kind: input, shape index: {}]   ;;  %s694_s2 = inlined_call_operand.vmem [shape: f32[1,8], index: 2, kind: input, shape index: {}]   ;;  %s695_s6 = inlined_call_operand.vmem [shape: f32[32,8], index: 6, kind: output, shape index: {0}]   ;;  %s696_s5 = inlined_call_operand.vmem [shape: f32[1,32], index: 5, kind: input, shape index: {}]   ;;  %s697_s3 = inlined_call_operand.vmem [shape: f32[32,8], index: 3, kind: input, shape index: {}]   ;;  %s698_s8 = inlined_call_operand.vmem [shape: s32[32,1], index: 8, kind: output, shape index: {2}]   ;;  %s699_s7 = inlined_call_operand.vmem [shape: f32[32,8], index: 7, kind: output, shape index: {1}]  }
   0x1   :  { %v530_v0 = vld [vmem:[%s691_s1] sm:$0xff]   ;;  %v531_v1 = vld [vmem:[%s691_s1 + $0x8] ss:$0 sps:$4 sm:$0xff]   ;;  %v29_v5 = vld [vmem:[%s692_s0 + $0x10] sm:$0xff]  ;;  %v243_v36 = vlaneseq  ;;  %vm438_vm12 = vcmask 7168  }
   0x2   :  { %v27_v2 = vld [vmem:[%s692_s0] sm:$0xff]  ;;  %v28_v3 = vld [vmem:[%s692_s0 + $0x8] sm:$0xff]  ;;  %490 = vmatprep.subr.bf16.mxu0 %v530_v0  ;;  %v30_v6 = vld [vmem:[%s692_s0 + $0x18] sm:$0xff]  ;;  %v61_v7 = vsel %vm59_vm0, %v531_v1, 0 }
   0x3   :  { %v31_v4 = vpack.c.bf16 %v28_v3, %v27_v2  ;;  %491 = vmatpush3.bf16.msra.mxu0 %v530_v0  ;;  %v32_v8 = vpack.c.bf16 %v30_v6, %v29_v5  ;;  %v118_v9 = vld [vmem:[%s693_s4] sm:$0xff]  ;;  %v629_v37 = vand.u32 127, %v243_v36 }
   0x4   :  { %528 = vmatprep.subr.msk.bf16.mxu0 %vm59_vm0, %v531_v1  ;;  %498 = vmatprep.subr.mxu1 %v118_v9  ;;  %v455_v10 = vld [vmem:[%s694_s2] ss:$0 sm:$0xff] }
   0x5   :  { %494 = vmatprep.mubr.msk.bf16.mxu0 %vm52_vm1, %v31_v4  ;;  %499 = vmatpush3.msra.mxu1 %v118_v9  ;;  %v464_v21 = vld [vmem:[%s696_s5] ss:$0 sm:$0xff] }
   0x7   :  { %493 = vmatpush3.bf16.msra.mxu0 %v61_v7 }
   0xa   :  { %495 = vmatmul.mubr.msk.bf16.vlgmr.msra.gmra.mrb[0].mxu0 %vm52_vm1, %v32_v8 }
  0xdd   :  { %v496_v11 = vpop.f32.mrb[0].mxu0 }
  0xde   :  { %v106_v12 = vadd.f32 %v496_v11, %v455_v10  ;;  %v97_v13 = vpop.f32.mrb[1].mxu0  ;;  %v334_v11 = vld [vmem:[%s697_s3 + $0x8] sm:$0xff] }
  0xdf   :  { %v98_v14 = vadd.f32 %v455_v10, %v97_v13  ;;  %v497_v15 = vpop.f32.mrb[2].mxu0  ;;  %v335_v13 = vld [vmem:[%s697_s3 + $0x10] sm:$0xff] }
  0xe0   :  { %115 = vst.msk [vmem:[%s695_s6 + $0x10] sm:$0xff] %vm112_vm2, %v106_v12  ;;  %v109_v16 = vadd.f32 %v497_v15, %v455_v10  ;;  %v100_v17 = vpop.f32.mrb[3].mxu0 }
  0xe1   :  { %113 = vst.msk [vmem:[%s695_s6] sm:$0xff] %vm112_vm2, %v98_v14  ;;  %v101_v18 = vadd.f32 %v455_v10, %v100_v17  ;;  %500 = vmatprep.mubr.msk.f32.mxu1 %vm112_vm2, %v98_v14  ;;  %v333_v10 = vld [vmem:[%s697_s3] sm:$0xff]  ;;  %v336_v14 = vld [vmem:[%s697_s3 + $0x18] sm:$0xff] }
  0xe2   :  { %116 = vst.msk [vmem:[%s695_s6 + $0x18] sm:$0xff] %vm112_vm2, %v109_v16  ;;  %v524_v15 = vpack.c.bf16 %v336_v14, %v335_v13 }
  0xe3   :  { %114 = vst.msk [vmem:[%s695_s6 + $0x8] sm:$0xff] %vm112_vm2, %v101_v18  ;;  %501 = vmatmul.mubr.msk.f32.vlgmr.msra.gmra.mrb[0].mxu1 %vm112_vm2, %v101_v18 }
  0xe4   :  { %503 = vmatprep.mubr.msk.f32.mxu1 %vm112_vm2, %v106_v12  ;;  %v520_v12 = vpack.c.bf16 %v334_v11, %v333_v10 }
  0xe6   :  { %521 = vmatprep.subr.bf16.mxu1 %v520_v12 }
  0xe7   :  { %504 = vmatmul.mubr.msk.f32.gmra.mrb[2].mxu1 %vm112_vm2, %v109_v16 }
  0xe8   :  { %523 = vmatpush3.bf16.msra.mxu1 %v520_v12 }
  0xe9   :  { %525 = vmatprep.subr.bf16.mxu1 %v524_v15 }
  0xec   :  { %527 = vmatpush3.bf16.msra.mxu1 %v524_v15 }
 0x1b6   :  { %v502_v19 = vpop.f32.mrb[0].mxu1 }
 0x1b7   :  { %v197_v20 = vpop.f32.mrb[1].mxu1  ;;  %v217_v22 = vmul.f32 2.0, %v502_v19 }
 0x1b8   :  { %v216_v23 = vmul.f32 2.0, %v197_v20 }
 0x1b9   :  { %v227_v30 = vsub.f32 %v464_v21, %v217_v22 }
 0x1ba   :  { %v505_v24 = vpop.f32.mrb[2].mxu1  ;;  %v226_v25 = vsub.f32 %v464_v21, %v216_v23 }
 0x1bb   :  { %v207_v26 = vpop.f32.mrb[3].mxu1  ;;  %v219_v27 = vmul.f32 2.0, %v505_v24  ;;  %v234_v32 = vsel %vm230_vm3, %v227_v30, inf }
 0x1bc   :  { %v218_v28 = vmul.f32 2.0, %v207_v26  ;;  %v231_v29 = vsel %vm230_vm3, %v226_v25, inf }
 0x1bd   :  { %232 = vmin.xlane.f32.xlu0 %v231_v29  ;;  %v229_v34 = vsub.f32 %v464_v21, %v219_v27 }
 0x1be   :  { %v228_v31 = vsub.f32 %v464_v21, %v218_v28 }
 0x1bf   :  { %v240_v35 = vsel %vm230_vm3, %v229_v34, inf }
 0x1c0   :  { %v237_v33 = vsel %vm230_vm3, %v228_v31, inf }
 0x1c1   :  { %235 = vmin.xlane.f32.xlu0 %v234_v32  ;;  %238 = vmin.xlane.f32.xlu1 %v237_v33 }
 0x1c5   :  { %241 = vmin.xlane.f32.xlu1 %v240_v35 }
 0x24a   :  { %v233_v38 = vpop.xlane.xlu0 %232 }
 0x24b   :  { %vm245_vm4 = vcmp.le.f32.partialorder %v226_v25, %v233_v38 }
 0x24c   :  { %v249_v39 = vsel %vm245_vm4, %v629_v37, 32 }
 0x24d   :  { %v253_v40 = vsel %vm230_vm3, %v249_v39, 2147483647 }
 0x24e   :  { %v236_v41 = vpop.xlane.xlu0 %235  ;;  %v239_v42 = vpop.xlane.xlu1 %238  ;;  %v255_v43 = vshra.s32 %v253_v40, 16  ;;  %v254_v58 = vand.u32 65535, %v253_v40 }
 0x24f   :  { %vm246_vm5 = vcmp.le.f32.partialorder %v227_v30, %v236_v41  ;;  %vm247_vm6 = vcmp.le.f32.partialorder %v228_v31, %v239_v42 }
 0x250   :  { %v250_v44 = vsel %vm246_vm5, %v629_v37, 32  ;;  %v251_v45 = vsel %vm247_vm6, %v629_v37, 32  ;;  %v257_v46 = vcvt.s32.f32 %v255_v43  ;;  %v256_v60 = vcvt.s32.f32 %v254_v58 }
 0x251   :  { %v268_v47 = vsel %vm230_vm3, %v250_v44, 2147483647  ;;  %v283_v48 = vsel %vm230_vm3, %v251_v45, 2147483647 }
 0x252   :  { %258 = vmin.xlane.f32.xlu0 %v257_v46  ;;  %v242_v49 = vpop.xlane.xlu1 %241  ;;  %v270_v50 = vshra.s32 %v268_v47, 16  ;;  %v285_v51 = vshra.s32 %v283_v48, 16  ;;  %v284_v61 = vand.u32 65535, %v283_v48  ;;  %v269_v62 = vand.u32 65535, %v268_v47 }
 0x253   :  { %vm248_vm7 = vcmp.le.f32.partialorder %v229_v34, %v242_v49  ;;  %v532_v34 = vmov 0.0  }
 0x254   :  { %v252_v52 = vsel %vm248_vm7, %v629_v37, 32  ;;  %v272_v53 = vcvt.s32.f32 %v270_v50  ;;  %v287_v54 = vcvt.s32.f32 %v285_v51  ;;  %v286_v2 = vcvt.s32.f32 %v284_v61 }
 0x255   :  { %v298_v55 = vsel %vm230_vm3, %v252_v52, 2147483647  ;;  %v271_v3 = vcvt.s32.f32 %v269_v62 }
 0x256   :  { %273 = vmin.xlane.f32.xlu1 %v272_v53  ;;  %288 = vmin.xlane.f32.xlu0 %v287_v54  ;;  %v300_v56 = vshra.s32 %v298_v55, 16  ;;  %v299_v4 = vand.u32 65535, %v298_v55 }
 0x258   :  { %v302_v57 = vcvt.s32.f32 %v300_v56  ;;  %v301_v8 = vcvt.s32.f32 %v299_v4 }
 0x25a   :  { %303 = vmin.xlane.f32.xlu1 %v302_v57 }
 0x2df   :  { %v259_v59 = vpop.xlane.xlu0 %258 }
 0x2e0   :  { %vm260_vm8 = vcmp.eq.f32.partialorder %v257_v46, %v259_v59  ;;  %v265_v16 = vcvt.f32.s32 %v259_v59 }
 0x2e1   :  { %v261_v63 = vsel %vm260_vm8, %v256_v60, inf }
 0x2e2   :  { %262 = vmin.xlane.f32.xlu0 %v261_v63  ;;  %v266_v20 = vshll.u32 %v265_v16, 16 }
 0x2e3   :  { %v289_v0 = vpop.xlane.xlu0 %288  ;;  %v274_v1 = vpop.xlane.xlu1 %273 }
 0x2e4   :  { %vm290_vm9 = vcmp.eq.f32.partialorder %v287_v54, %v289_v0  ;;  %vm275_vm10 = vcmp.eq.f32.partialorder %v272_v53, %v274_v1  ;;  %v295_v17 = vcvt.f32.s32 %v289_v0  ;;  %v280_v18 = vcvt.f32.s32 %v274_v1 }
 0x2e5   :  { %v291_v5 = vsel %vm290_vm9, %v286_v2, inf  ;;  %v276_v6 = vsel %vm275_vm10, %v271_v3, inf }
 0x2e6   :  { %292 = vmin.xlane.f32.xlu0 %v291_v5  ;;  %277 = vmin.xlane.f32.xlu1 %v276_v6  ;;  %v296_v23 = vshll.u32 %v295_v17, 16  ;;  %v281_v24 = vshll.u32 %v280_v18, 16 }
 0x2e7   :  { %v304_v7 = vpop.xlane.xlu1 %303 }
 0x2e8   :  { %vm305_vm11 = vcmp.eq.f32.partialorder %v302_v57, %v304_v7  ;;  %v310_v25 = vcvt.f32.s32 %v304_v7 }
 0x2e9   :  { %v306_v9 = vsel %vm305_vm11, %v301_v8, inf }
 0x2ea   :  { %307 = vmin.xlane.f32.xlu1 %v306_v9  ;;  %v311_v36 = vshll.u32 %v310_v25, 16 }
 0x36f   :  { %v263_v19 = vpop.xlane.xlu0 %262 }
 0x370   :  { %v264_v21 = vcvt.f32.s32 %v263_v19 }
 0x372   :  { %v267_v22 = vadd.s32 %v266_v20, %v264_v21 }
 0x373   :  { %v293_v26 = vpop.xlane.xlu0 %292  ;;  %v278_v27 = vpop.xlane.xlu1 %277 }
 0x374   :  { %vm313_vm13 = vcmp.lt.s32.totalorder %v267_v22, 31  ;;  %v294_v28 = vcvt.f32.s32 %v293_v26  ;;  %v279_v29 = vcvt.f32.s32 %v278_v27 }
 0x375   :  { %v314_v30 = vsel %vm313_vm13, %v267_v22, 31 }
 0x376   :  { %439 = vst.msk [vmem:[%s698_s8] sm:$0xff] %vm438_vm12, %v314_v30  ;;  %v297_v31 = vadd.s32 %v296_v23, %v294_v28  ;;  %v282_v32 = vadd.s32 %v281_v24, %v279_v29  ;;  %vm321_vm14 = vcmp.eq.s32.totalorder %v629_v37, %v314_v30 }
 0x377   :  { %v308_v33 = vpop.xlane.xlu1 %307  ;;  %v465_v35 = vsel %vm321_vm14, 1.0, %v532_v34 }
 0x378   :  { %vm317_vm15 = vcmp.lt.s32.totalorder %v297_v31, 31  ;;  %vm315_vm0 = vcmp.lt.s32.totalorder %v282_v32, 31  ;;  %v309_v38 = vcvt.f32.s32 %v308_v33  ;;  %514 = vmatprep.mubr.msk.f32.mxu1 %vm230_vm3, %v465_v35 }
 0x379   :  { %v318_v39 = vsel %vm317_vm15, %v297_v31, 31  ;;  %v316_v40 = vsel %vm315_vm0, %v282_v32, 31 }
 0x37a   :  { %441 = vst.msk [vmem:[%s698_s8 + $0x10] sm:$0xff] %vm438_vm12, %v318_v39  ;;  %vm322_vm1 = vcmp.eq.s32.totalorder %v629_v37, %v316_v40  ;;  %440 = vst.msk [vmem:[%s698_s8 + $0x8] sm:$0xff] %vm438_vm12, %v316_v40  ;;  %v312_v41 = vadd.s32 %v311_v36, %v309_v38  ;;  %vm323_vm4 = vcmp.eq.s32.totalorder %v629_v37, %v318_v39 }
 0x37b   :  { %v466_v42 = vsel %vm322_vm1, 1.0, %v532_v34  ;;  %v467_v43 = vsel %vm323_vm4, 1.0, %v532_v34 }
 0x37c   :  { %vm319_vm5 = vcmp.lt.s32.totalorder %v312_v41, 31  ;;  %515 = vmatmul.mubr.msk.f32.vlgmr.msra.gmra.mrb[4].mxu1 %vm230_vm3, %v466_v42 }
 0x37d   :  { %v320_v44 = vsel %vm319_vm5, %v312_v41, 31  ;;  %517 = vmatprep.mubr.msk.f32.mxu1 %vm230_vm3, %v467_v43 }
 0x37e   :  { %442 = vst.msk [vmem:[%s698_s8 + $0x18] sm:$0xff] %vm438_vm12, %v320_v44  ;;  %vm324_vm6 = vcmp.eq.s32.totalorder %v629_v37, %v320_v44 }
 0x37f   :  { %v468_v45 = vsel %vm324_vm6, 1.0, %v532_v34 }
 0x380   :  { %518 = vmatmul.mubr.msk.f32.gmra.mrb[6].mxu1 %vm230_vm3, %v468_v45 }
 0x44f   :  { %v516_v46 = vpop.f32.mrb[4].mxu1 }
 0x450   :  { %435 = vst.msk [vmem:[%s699_s7 + $0x8] sm:$0xff] %vm112_vm2, %v516_v46  ;;  %v415_v47 = vpop.f32.mrb[5].mxu1 }
 0x451   :  { %434 = vst.msk [vmem:[%s699_s7] sm:$0xff] %vm112_vm2, %v415_v47 }
 0x453   :  { %v519_v48 = vpop.f32.mrb[6].mxu1 }
 0x454   :  { %437 = vst.msk [vmem:[%s699_s7 + $0x18] sm:$0xff] %vm112_vm2, %v519_v48  ;;  %v425_v37 = vpop.f32.mrb[7].mxu1 }
 0x455   :  { %436 = vst.msk [vmem:[%s699_s7 + $0x10] sm:$0xff] %vm112_vm2, %v425_v37 }

// kernel: vqvae2_forward.24
= control target key start
LH: loop header
LB: loop body
LE: loop exit
PB: predicated region body
PF: predicated region fallthrough
CT: control target
= control target key end

     0   :  { %s797_s12 = smov 0   ;;  %s992_s0 = inlined_call_operand.vmem [shape: f32[2,50,16], index: 0, kind: input, shape index: {}]   ;;  %s993_s1 = inlined_call_operand.vmem [shape: bf16[144,32], index: 1, kind: input, shape index: {}]   ;;  %s994_s2 = inlined_call_operand.vmem [shape: f32[1,32], index: 2, kind: input, shape index: {}]   ;;  %s995_s3 = inlined_call_operand.vmem [shape: f32[2,4,4,32], index: 3, kind: output, shape index: {}]  }
   0x1 LB: > { %s620_s13 = sadd.s32 4294967295, %s767_s12   ;;  %p624_p0 = scmp.ge.s32.totalorder %s767_s12, 1  ;;  %s767_s12 = sphi %s797_s12, %s13_s12  }
   0x2   : > { %p137_p1 = scmp.lt.s32.totalorder %s767_s12, 3 }
   0x4   : > { %p138_p2 = pnand %p624_p0, %p137_p1 }
   0x5   : > { %p161_p3 = scmp.lt.s32.totalorder (!%p138_p2), %s620_s13, 1  ;;  %v752_v0 = vld [vmem:[%s993_s1] sm:$0xff] (!%p138_p2)   ;;  %v769_v1 = vmov (!%p138_p2), 0   ;;  %v753_v2 = vld [vmem:[%s993_s1 + $0x8] sm:$0xff] (!%p138_p2)   ;;  %v754_v3 = vld [vmem:[%s993_s1 + $0x10] sm:$0xff] (!%p138_p2)   ;;  %s770_s24 = smov (!%p138_p2), 32  }
   0x6   : > { %141 = sbr.rel (%p138_p2) target bundleno = 394 (0x18a), region = 32  ;;  %487 = vmatprep.subr.bf16.mxu0 (!%p138_p2), %v769_v1  ;;  %647 = vmatprep.subr.bf16.mxu1 (!%p138_p2), %v769_v1  ;;  %v755_v15 = vld [vmem:[%s993_s1 + $0x18] sm:$0xff] (!%p138_p2)   ;;  %s771_s27 = smov (!%p138_p2), 16   ;;  %v756_v22 = vld [vmem:[%s993_s1 + $0x20] sm:$0xff] (!%p138_p2)   ;;  %v757_v33 = vld [vmem:[%s993_s1 + $0x28] sm:$0xff] (!%p138_p2)   ;;  %vm351_vm0 = vcmask (!%p138_p2), 130048  }
   0x7   : > { %488 = vmatpush1.bf16.msra.mxu0 (!%p138_p2), %v752_v0  ;;  %656 = vmatpush1.bf16.msra.mxu1 (!%p138_p2), %v752_v0  ;;  %s772_s30 = smov (!%p138_p2), 48   ;;  %s773_s6 = smov (!%p138_p2), 64   ;;  %v758_v36 = vld [vmem:[%s993_s1 + $0x30] sm:$0xff] (!%p138_p2)   ;;  %v759_v46 = vld [vmem:[%s993_s1 + $0x38] sm:$0xff] (!%p138_p2)   ;;  %v760_v53 = vld [vmem:[%s993_s1 + $0x40] sm:$0xff] (!%p138_p2)   ;;  %vm357_vm1 = vcmask (!%p138_p2), 261120  }
   0x8   : > { %489 = vmatprep.subr.bf16.mxu0 (!%p138_p2), %v769_v1  ;;  %648 = vmatprep.subr.bf16.mxu1 (!%p138_p2), %v769_v1  ;;  %s774_s9 = smov (!%p138_p2), 80   ;;  %s775_s14 = smov (!%p138_p2), 96   ;;  %vm363_vm2 = vcmask (!%p138_p2), 392192   ;;  %vm369_vm3 = vcmask (!%p138_p2), 523264   ;;  %vm375_vm4 = vcmask (!%p138_p2), 654336   ;;  %vm381_vm5 = vcmask (!%p138_p2), 785408  }
   0x9   : > { %s776_s17 = smov (!%p138_p2), 112   ;;  %vm387_vm6 = vcmask (!%p138_p2), 916480   ;;  %vm552_vm7 = vcmask (!%p138_p2), 257024  }
   0xb   : > { %490 = vmatpush1.bf16.msra.mxu0 (!%p138_p2), %v753_v2  ;;  %657 = vmatpush1.bf16.msra.mxu1 (!%p138_p2), %v753_v2 }
   0xc   : > { %491 = vmatprep.subr.bf16.mxu0 (!%p138_p2), %v769_v1  ;;  %649 = vmatprep.subr.bf16.mxu1 (!%p138_p2), %v769_v1 }
   0xd   : > { %s997_s13 = smov (!%p161_p3, %s620_s13), 1 }
   0xe   : > { %s665_s18 = smul.u32 56, %s997_s13  ;;  %s646_s20 = sshll.u32 %s997_s13, 4 }
   0xf   : > { %492 = vmatpush1.bf16.msra.mxu0 %v754_v3  ;;  %658 = vmatpush1.bf16.msra.mxu1 %v754_v3  ;;  %s170_s23 = scalar_lea.vmem %s995_s3, %s646_s20 }
  0x10   : > { %s821_s21 = scalar_lea.vmem %s992_s0, %s665_s18  ;;  %493 = vmatprep.subr.bf16.mxu0 %v769_v1  ;;  %650 = vmatprep.subr.bf16.mxu1 %v769_v1 }
  0x11   : > { %v182_v4 = vld [vmem:[%s821_s21 + $0x2] sm:$0xff]  ;;  %v183_v5 = vld [vmem:[%s821_s21 + $0xa] sm:$0xff]  ;;  %v184_v9 = vld [vmem:[%s821_s21 + $0x12] sm:$0xff] }
  0x12   : > { %v177_v6 = vld [vmem:[%s821_s21 + $0x1] sm:$0xff]  ;;  %v692_v7 = vpack.i.bf16 %v183_v5, %v182_v4  ;;  %v178_v8 = vld [vmem:[%s821_s21 + $0x9] sm:$0xff]  ;;  %v179_v12 = vld [vmem:[%s821_s21 + $0x11] sm:$0xff] }
  0x13   : > { %v185_v10 = vld [vmem:[%s821_s21 + $0x1a] sm:$0xff]  ;;  %v682_v11 = vpack.i.bf16 %v178_v8, %v177_v6  ;;  %v187_v19 = vld [vmem:[%s821_s21 + $0x6] sm:$0xff]  ;;  %v849_v20 = vld [vmem:[%s821_s21 + $0xe] sm:$0xff]  ;;  %494 = vmatpush1.bf16.msra.mxu0 %v755_v15  ;;  %659 = vmatpush1.bf16.msra.mxu1 %v755_v15 }
  0x14   : > { %v180_v13 = vld [vmem:[%s821_s21 + $0x19] sm:$0xff]  ;;  %693 = vrot.lane.b32.xlu1 %v692_v7, %s770_s24  ;;  %v697_v14 = vpack.i.bf16 %v185_v10, %v184_v9  ;;  %v702_v23 = vpack.i.bf16 %v849_v20, %v187_v19  ;;  %v192_v26 = vld [vmem:[%s821_s21 + $0x7] sm:$0xff]  ;;  %v193_v27 = vld [vmem:[%s821_s21 + $0xf] sm:$0xff]  ;;  %495 = vmatprep.subr.bf16.mxu0 %v769_v1 }
  0x15   : > { %683 = vrot.lane.b32.xlu0 %v682_v11, %s771_s27  ;;  %v687_v16 = vpack.i.bf16 %v180_v13, %v179_v12  ;;  %v842_v17 = vld [vmem:[%s821_s21 + $0x16] sm:$0xff]  ;;  %v845_v18 = vld [vmem:[%s821_s21 + $0x1e] sm:$0xff]  ;;  %651 = vmatprep.subr.bf16.mxu1 %v769_v1  ;;  %v873_v31 = vld [vmem:[%s821_s21 + $0x8] sm:$0xff]  ;;  %v712_v32 = vpack.i.bf16 %v193_v27, %v192_v26 }
  0x16   : > { %v707_v21 = vpack.i.bf16 %v845_v18, %v842_v17  ;;  %v194_v24 = vld [vmem:[%s821_s21 + $0x17] sm:$0xff]  ;;  %v195_v25 = vld [vmem:[%s821_s21 + $0x1f] sm:$0xff]  ;;  %v199_v41 = vld [vmem:[%s821_s21 + $0xc] sm:$0xff]  ;;  %v394_v43 = vpack.c.bf16 %v842_v17, %v849_v20 }
  0x17   : > { %v717_v28 = vpack.i.bf16 %v195_v25, %v194_v24  ;;  %v869_v29 = vld [vmem:[%s821_s21 + $0x18] sm:$0xff]  ;;  %v197_v30 = vld [vmem:[%s821_s21 + $0x20] sm:$0xff]  ;;  %496 = vmatpush1.bf16.msra.mxu0 %v756_v22  ;;  %660 = vmatpush1.bf16.msra.mxu1 %v756_v22  ;;  %v880_v34 = vld [vmem:[%s821_s21 + $0x10] sm:$0xff] }
  0x18   : > { %698 = vrot.lane.b32.xlu1 %v697_v14, %s770_s24  ;;  %497 = vmatprep.subr.bf16.mxu0 %v769_v1  ;;  %v727_v35 = vpack.i.bf16 %v197_v30, %v869_v29  ;;  %v722_v37 = vpack.i.bf16 %v880_v34, %v873_v31  ;;  %v201_v38 = vld [vmem:[%s821_s21 + $0x1c] sm:$0xff]  ;;  %v202_v39 = vld [vmem:[%s821_s21 + $0x24] sm:$0xff]  ;;  %v200_v42 = vld [vmem:[%s821_s21 + $0x14] sm:$0xff] }
  0x19   : > { %688 = vrot.lane.b32.xlu0 %v687_v16, %s771_s27  ;;  %652 = vmatprep.subr.bf16.mxu1 %v769_v1  ;;  %v209_v40 = vld [vmem:[%s821_s21 + $0x26] sm:$0xff]  ;;  %v737_v45 = vpack.i.bf16 %v202_v39, %v201_v38  ;;  %v732_v47 = vpack.i.bf16 %v200_v42, %v199_v41  ;;  %v206_v48 = vld [vmem:[%s821_s21 + $0x1d] sm:$0xff]  ;;  %v205_v51 = vld [vmem:[%s821_s21 + $0x15] sm:$0xff] }
  0x1a   : > { %v396_v44 = vpack.c.bf16 %v209_v40, %v845_v18  ;;  %v207_v49 = vld [vmem:[%s821_s21 + $0x25] sm:$0xff]  ;;  %v204_v50 = vld [vmem:[%s821_s21 + $0xd] sm:$0xff]  ;;  %638 = vmatprep.mubr.msk.bf16.mxu0 %vm351_vm0, %v394_v43  ;;  %v181_v56 = vld [vmem:[%s821_s21 + $0x21] sm:$0xf] }
  0x1b   : > { %498 = vmatpush1.bf16.msra.mxu0 %v757_v33  ;;  %661 = vmatpush1.bf16.msra.mxu1 %v757_v33  ;;  %v747_v52 = vpack.i.bf16 %v207_v49, %v206_v48  ;;  %v742_v54 = vpack.i.bf16 %v205_v51, %v204_v50  ;;  %v186_v55 = vld [vmem:[%s821_s21 + $0x22] sm:$0xf]  ;;  %v196_v57 = vld [vmem:[%s821_s21 + $0x27] sm:$0xf]  ;;  %v203_v59 = vld [vmem:[%s821_s21 + $0x2c] sm:$0xf] }
  0x1c   : > { %708 = vrot.lane.b32.xlu1 %v707_v21, %s772_s30  ;;  %499 = vmatprep.subr.bf16.mxu0 %v769_v1  ;;  %v191_v58 = vld [vmem:[%s821_s21 + $0x26] sm:$0xf]  ;;  %v208_v61 = vld [vmem:[%s821_s21 + $0x2d] sm:$0xf] }
  0x1d   : > { %703 = vrot.lane.b32.xlu0 %v702_v23, %s772_s30  ;;  %653 = vmatprep.subr.bf16.mxu1 %v769_v1  ;;  %v198_v60 = vld [vmem:[%s821_s21 + $0x28] sm:$0xf]  ;;  %v172_v6 = vld [vmem:[%s821_s21] sm:$0xff]  ;;  %v934_v13 = vld [vmem:[%s821_s21 + $0x2e] sm:$0xf] }
  0x1e   : > { %639 = vmatprep.mubr.msk.bf16.mxu1 %vm351_vm0, %v396_v44  ;;  %v398_v24 = vpack.c.bf16 %v934_v13, %v934_v13 }
  0x1f   : > { %500 = vmatpush1.bf16.msra.mxu0 %v758_v36  ;;  %662 = vmatpush1.bf16.msra.mxu1 %v758_v36 }
  0x20   : > { %718 = vrot.lane.b32.xlu1 %v717_v28, %s773_s6  ;;  %501 = vmatprep.subr.bf16.mxu0 %v769_v1 }
  0x21   : > { %713 = vrot.lane.b32.xlu0 %v712_v32, %s773_s6  ;;  %654 = vmatprep.subr.bf16.mxu1 %v769_v1 }
  0x23   : > { %502 = vmatpush1.bf16.msra.mxu0 %v759_v46  ;;  %663 = vmatpush1.bf16.msra.mxu1 %v759_v46 }
  0x24   : > { %728 = vrot.lane.b32.xlu1 %v727_v35, %s774_s9  ;;  %503 = vmatprep.subr.bf16.mxu0 %v769_v1 }
  0x25   : > { %723 = vrot.lane.b32.xlu0 %v722_v37, %s774_s9  ;;  %655 = vmatprep.subr.bf16.mxu1 %v769_v1 }
  0x27   : > { %504 = vmatpush1.bf16.msra.mxu0 %v760_v53  ;;  %664 = vmatpush1.bf16.msra.mxu1 %v760_v53 }
  0x28   : > { %738 = vrot.lane.b32.xlu1 %v737_v45, %s775_s14 }
  0x29   : > { %733 = vrot.lane.b32.xlu0 %v732_v47, %s775_s14 }
  0x2c   : > { %748 = vrot.lane.b32.xlu1 %v747_v52, %s776_s17 }
  0x2d   : > { %743 = vrot.lane.b32.xlu0 %v742_v54, %s776_s17 }
  0x30   : > { %244 = vrot.lane.b32.xlu1 %v186_v55, %s770_s24 }
  0x31   : > { %224 = vrot.lane.b32.xlu0 %v181_v56, %s771_s27 }
  0x34   : > { %284 = vrot.lane.b32.xlu1 %v196_v57, %s773_s6 }
  0x35   : > { %264 = vrot.lane.b32.xlu0 %v191_v58, %s772_s30 }
  0x38   : > { %324 = vrot.lane.b32.xlu1 %v203_v59, %s775_s14 }
  0x39   : > { %304 = vrot.lane.b32.xlu0 %v198_v60, %s774_s9 }
  0x3d   : > { %344 = vrot.lane.b32.xlu0 %v208_v61, %s776_s17 }
  0x86   : > { %v694_v62 = vpop.permute.xlu1 %693 }
  0x87   : > { %v684_v63 = vpop.permute.xlu0 %683  ;;  %v696_v11 = vunpack.i.h.bf16 %v694_v62  ;;  %v695_v12 = vunpack.i.l.bf16 %v694_v62 }
  0x88   : > { %v686_v4 = vunpack.i.h.bf16 %v684_v63  ;;  %v685_v5 = vunpack.i.l.bf16 %v684_v63 }
  0x8a   : > { %v699_v0 = vpop.permute.xlu1 %698  ;;  %v352_v14 = vsel %vm351_vm0, %v172_v6, %v685_v5  ;;  %v353_v15 = vsel %vm351_vm0, %v873_v31, %v686_v4 }
  0x8b   : > { %v689_v1 = vpop.permute.xlu0 %688  ;;  %v701_v16 = vunpack.i.h.bf16 %v699_v0  ;;  %v700_v17 = vunpack.i.l.bf16 %v699_v0  ;;  %v358_v27 = vsel %vm357_vm1, %v352_v14, %v695_v12  ;;  %v359_v28 = vsel %vm357_vm1, %v353_v15, %v696_v11 }
  0x8c   : > { %v691_v7 = vunpack.i.h.bf16 %v689_v1  ;;  %v690_v8 = vunpack.i.l.bf16 %v689_v1 }
  0x8e   : > { %v709_v2 = vpop.permute.xlu1 %708  ;;  %v354_v18 = vsel %vm351_vm0, %v880_v34, %v690_v8  ;;  %v355_v19 = vsel %vm351_vm0, %v869_v29, %v691_v7 }
  0x8f   : > { %v704_v3 = vpop.permute.xlu0 %703  ;;  %v711_v21 = vunpack.i.h.bf16 %v709_v2  ;;  %v710_v22 = vunpack.i.l.bf16 %v709_v2  ;;  %v360_v30 = vsel %vm357_vm1, %v354_v18, %v700_v17  ;;  %v361_v29 = vsel %vm357_vm1, %v355_v19, %v701_v16 }
  0x90   : > { %v706_v25 = vunpack.i.h.bf16 %v704_v3  ;;  %v705_v26 = vunpack.i.l.bf16 %v704_v3  ;;  %v176_v3 = vld [vmem:[%s821_s21 + $0x20] sm:$0xf] }
  0x91   : > { %v366_v38 = vsel %vm363_vm2, %v360_v30, %v710_v22  ;;  %v367_v39 = vsel %vm363_vm2, %v361_v29, %v711_v21 }
  0x92   : > { %v719_v9 = vpop.permute.xlu1 %718  ;;  %v364_v43 = vsel %vm363_vm2, %v358_v27, %v705_v26  ;;  %v365_v44 = vsel %vm363_vm2, %v359_v28, %v706_v25 }
  0x93   : > { %v714_v10 = vpop.permute.xlu0 %713  ;;  %v721_v31 = vunpack.i.h.bf16 %v719_v9  ;;  %v720_v32 = vunpack.i.l.bf16 %v719_v9 }
  0x94   : > { %v716_v33 = vunpack.i.h.bf16 %v714_v10  ;;  %v715_v34 = vunpack.i.l.bf16 %v714_v10 }
  0x95   : > { %v372_v47 = vsel %vm369_vm3, %v366_v38, %v720_v32  ;;  %v373_v48 = vsel %vm369_vm3, %v367_v39, %v721_v31 }
  0x96   : > { %v729_v20 = vpop.permute.xlu1 %728  ;;  %v370_v51 = vsel %vm369_vm3, %v364_v43, %v715_v34  ;;  %v371_v52 = vsel %vm369_vm3, %v365_v44, %v716_v33 }
  0x97   : > { %v724_v23 = vpop.permute.xlu0 %723  ;;  %v731_v35 = vunpack.i.h.bf16 %v729_v20  ;;  %v730_v36 = vunpack.i.l.bf16 %v729_v20 }
  0x98   : > { %v726_v40 = vunpack.i.h.bf16 %v724_v23  ;;  %v725_v41 = vunpack.i.l.bf16 %v724_v23 }
  0x99   : > { %v378_v53 = vsel %vm375_vm4, %v372_v47, %v730_v36  ;;  %v379_v54 = vsel %vm375_vm4, %v373_v48, %v731_v35 }
  0x9a   : > { %v739_v37 = vpop.permute.xlu1 %738  ;;  %v376_v56 = vsel %vm375_vm4, %v370_v51, %v725_v41  ;;  %v377_v57 = vsel %vm375_vm4, %v371_v52, %v726_v40 }
  0x9b   : > { %v734_v42 = vpop.permute.xlu0 %733  ;;  %v741_v45 = vunpack.i.h.bf16 %v739_v37  ;;  %v740_v46 = vunpack.i.l.bf16 %v739_v37 }
  0x9c   : > { %v736_v49 = vunpack.i.h.bf16 %v734_v42  ;;  %v735_v50 = vunpack.i.l.bf16 %v734_v42 }
  0x9d   : > { %v384_v61 = vsel %vm381_vm5, %v378_v53, %v740_v46  ;;  %v385_v62 = vsel %vm381_vm5, %v379_v54, %v741_v45 }
  0x9e   : > { %v749_v55 = vpop.permute.xlu1 %748  ;;  %v382_v1 = vsel %vm381_vm5, %v376_v56, %v735_v50  ;;  %v383_v2 = vsel %vm381_vm5, %v377_v57, %v736_v49 }
  0x9f   : > { %v751_v58 = vunpack.i.h.bf16 %v749_v55  ;;  %v750_v59 = vunpack.i.l.bf16 %v749_v55  ;;  %v744_v60 = vpop.permute.xlu0 %743 }
  0xa0   : > { %v746_v63 = vunpack.i.h.bf16 %v744_v60  ;;  %v745_v0 = vunpack.i.l.bf16 %v744_v60 }
  0xa1   : > { %v390_v4 = vsel %vm387_vm6, %v384_v61, %v750_v59  ;;  %v391_v5 = vsel %vm387_vm6, %v385_v62, %v751_v58 }
  0xa2   : > { %v245_v6 = vpop.permute.xlu1 %244  ;;  %v388_v7 = vsel %vm387_vm6, %v382_v1, %v745_v0  ;;  %v389_v8 = vsel %vm387_vm6, %v383_v2, %v746_v63  ;;  %v395_v9 = vpack.c.bf16 %v391_v5, %v390_v4 }
  0xa3   : > { %v225_v10 = vpop.permute.xlu0 %224  ;;  %v393_v11 = vpack.c.bf16 %v389_v8, %v388_v7 }
  0xa4   : > { %v356_v12 = vsel %vm351_vm0, %v176_v3, %v225_v10  ;;  %528 = vmatmul.mubr.bf16.vlgmr.msra.gmra.mrb[0].mxu1 %v395_v9 }
  0xa5   : > { %520 = vmatmul.mubr.bf16.vlgmr.msra.gmra.mrb[0].mxu0 %v393_v11  ;;  %640 = vmatprep.mubr.msk.bf16.mxu1 %vm351_vm0, %v398_v24  ;;  %v362_v14 = vsel %vm357_vm1, %v356_v12, %v245_v6  ;;  %v628_v24 = vld [vmem:[%s994_s2] ss:$0 sm:$0xff] }
  0xa6   : > { %v285_v13 = vpop.permute.xlu1 %284 }
  0xa7   : > { %v265_v15 = vpop.permute.xlu0 %264 }
  0xa8   : > { %v368_v16 = vsel %vm363_vm2, %v362_v14, %v265_v15 }
  0xa9   : > { %v374_v17 = vsel %vm369_vm3, %v368_v16, %v285_v13 }
  0xaa   : > { %v325_v20 = vpop.permute.xlu1 %324 }
  0xab   : > { %v305_v18 = vpop.permute.xlu0 %304 }
  0xac   : > { %v380_v19 = vsel %vm375_vm4, %v374_v17, %v305_v18 }
  0xad   : > { %v386_v21 = vsel %vm381_vm5, %v380_v19, %v325_v20 }
  0xaf   : > { %v345_v22 = vpop.permute.xlu0 %344 }
  0xb0   : > { %v392_v23 = vsel %vm387_vm6, %v386_v21, %v345_v22 }
  0xb1   : > { %v397_v25 = vpack.c.bf16 %v392_v23, %v392_v23 }
  0xb3   : > { %536 = vmatmul.mubr.bf16.gmra.mrb[4].mxu1 %v397_v25 }
 0x177   : > { %v529_v26 = vpop.f32.mrb[0].mxu1 }
 0x178   : > { %v521_v27 = vpop.f32.mrb[0].mxu0  ;;  %v530_v28 = vadd.f32 %v628_v24, %v529_v26  ;;  %v531_v30 = vpop.f32.mrb[1].mxu1 }
 0x179   : > { %v522_v29 = vadd.f32 %v628_v24, %v521_v27  ;;  %v523_v31 = vpop.f32.mrb[1].mxu0  ;;  %v532_v32 = vpop.f32.mrb[2].mxu1 }
 0x17a   : > { %v545_v33 = vmax.f32 %v530_v28, 0.0  ;;  %v524_v34 = vpop.f32.mrb[2].mxu0  ;;  %v533_v35 = vadd.f32 %v628_v24, %v532_v32  ;;  %v534_v36 = vpop.f32.mrb[3].mxu1 }
 0x17b   : > { %v543_v37 = vmax.f32 %v522_v29, 0.0  ;;  %v525_v38 = vadd.f32 %v628_v24, %v524_v34  ;;  %v526_v39 = vpop.f32.mrb[3].mxu0 }
 0x17c   : > { %550 = vst.msk [vmem:[#allocation2 + $0x10] sm:$0xff] %vm357_vm1, %v545_v33  ;;  %v546_v40 = vmax.f32 %v533_v35, 0.0 }
 0x17d   : > { %548 = vst.msk [vmem:[#allocation2] sm:$0xff] %vm357_vm1, %v543_v37  ;;  %v544_v41 = vmax.f32 %v525_v38, 0.0 }
 0x17e   : > { %551 = vst.msk [vmem:[#allocation2 + $0x18] sm:$0xff] %vm357_vm1, %v546_v40 }
 0x17f   : > { %549 = vst.msk [vmem:[#allocation2 + $0x8] sm:$0xff] %vm357_vm1, %v544_v41 }
 0x183   : > { %v559_v42 = vld [vmem:[#allocation2 + $0x13] sm:$0xf] }
 0x184   : > { %642 = vst.msk [vmem:[%s170_s23 + $0x8] sm:$0xf] %vm552_vm7, %v559_v42 }
 0x185   : > { %v562_v43 = vld [vmem:[#allocation2 + $0x19] sm:$0xf] }
 0x186   : > { %v537_v44 = vpop.f32.mrb[4].mxu1  ;;  %v554_v45 = vld [vmem:[#allocation2 + $0x7] sm:$0xf]  ;;  %v556_v46 = vld [vmem:[#allocation2 + $0xd] sm:$0xf] }
 0x187   : > { %643 = vst.msk [vmem:[%s170_s23 + $0xc] sm:$0xf] %vm552_vm7, %v562_v43  ;;  %555 = vst.msk [vmem:[%s170_s23] sm:$0xf] %vm552_vm7, %v554_v45  ;;  %v539_v47 = vpop.f32.mrb[5].mxu1 }
 0x188   : > { %641 = vst.msk [vmem:[%s170_s23 + $0x4] sm:$0xf] %vm552_vm7, %v556_v46  ;;  %v540_v48 = vpop.f32.mrb[6].mxu1 }
 0x189   : > { %v541_v49 = vpop.f32.mrb[7].mxu1 }
 0x18a PF: > { %s13_s12 = sadd.s32 1, %s767_s12  }
 0x18b   : > { %p10_p4 = scmp.ge.s32.totalorder %s13_s12, 4  }
 0x18d   :  { %12 = sbr.rel (!%p10_p4) target bundleno = 1 (0x1), region = 65 }

// kernel: vqvae2_forward.21
= control target key start
LH: loop header
LB: loop body
LE: loop exit
PB: predicated region body
PF: predicated region fallthrough
CT: control target
= control target key end

     0   :  { %s1444_s27 = smov 0   ;;  %s1688_s0 = inlined_call_operand.vmem [shape: f32[2,16,8], index: 0, kind: input, shape index: {}]   ;;  %s1689_s1 = inlined_call_operand.vmem [shape: f32[16,1], index: 1, kind: input, shape index: {}]   ;;  %s1690_s2 = inlined_call_operand.vmem [shape: bf16[72,8], index: 2, kind: input, shape index: {}]   ;;  %s1691_s3 = inlined_call_operand.vmem [shape: f32[1,8], index: 3, kind: input, shape index: {}]   ;;  %s1692_s4 = inlined_call_operand.vmem [shape: bf16[2,72,8], index: 4, kind: input, shape index: {}]   ;;  %s1693_s5 = inlined_call_operand.vmem [shape: f32[2,1,8], index: 5, kind: input, shape index: {}]   ;;  %s1694_s6 = inlined_call_operand.vmem [shape: bf16[2,8,8], index: 6, kind: input, shape index: {}]   ;;  %s1695_s7 = inlined_call_operand.vmem [shape: f32[2,1,8], index: 7, kind: input, shape index: {}]   ;;  %s1696_s8 = inlined_call_operand.vmem [shape: f32[2,2,2,8], index: 8, kind: output, shape index: {}]  }
   0x1 LB: > { %s1098_s28 = sadd.s32 4294967295, %s1386_s27   ;;  %p1102_p0 = scmp.ge.s32.totalorder %s1386_s27, 1  ;;  %s1386_s27 = sphi %s1444_s27, %s18_s27  }
   0x2   : > { %p262_p1 = scmp.lt.s32.totalorder %s1386_s27, 3 }
   0x4   : > { %p263_p2 = pnand %p1102_p0, %p262_p1 }
   0x5   : > { %v307_v0 = vld [vmem:[%s1689_s1] sm:$0xff] (!%p263_p2)  ;;  %vm309_vm0 = vcmask (!%p263_p2), 64512   ;;  %v1388_v1 = vmov (!%p263_p2), 0   ;;  %v308_v2 = vld [vmem:[%s1689_s1 + $0x8] sm:$0xff] (!%p263_p2)  ;;  %v1389_v3 = vmov (!%p263_p2), 0.0   ;;  %p296_p3 = scmp.lt.s32.totalorder (!%p263_p2), %s1098_s28, 1 }
   0x6   : > { %266 = sbr.rel (%p263_p2) target bundleno = 1703 (0x6a7), region = 52  ;;  %1244 = vset.pattern.permute.xlu0 (!%p263_p2), %v1388_v1  ;;  %310 = vst.msk [vmem:[#allocation2] sm:$0xff] (!%p263_p2), %vm309_vm0, %v1389_v3  ;;  %311 = vst.msk [vmem:[#allocation2 + $0x18] sm:$0xff] (!%p263_p2), %vm309_vm0, %v1389_v3  ;;  %1171 = vmatprep.subr.bf16.mxu0 (!%p263_p2), %v1389_v3  ;;  %v1365_v10 = vld [vmem:[%s1690_s2] sm:$0xff] (!%p263_p2)   ;;  %v1366_v11 = vld [vmem:[%s1690_s2 + $0x8] sm:$0xff] (!%p263_p2)   ;;  %s1390_s19 = smov (!%p263_p2), 24  }
   0x7   : > { %326 = vperm.xlu0 (!%p263_p2), %1244, %v307_v0   ;;  %1185 = vmatprep.subr.bf16.mxu1 (!%p263_p2), %v1389_v3  ;;  %s1391_s20 = smov (!%p263_p2), 8   ;;  %v1367_v21 = vld [vmem:[%s1690_s2 + $0x10] sm:$0xff] (!%p263_p2)   ;;  %v1368_v25 = vld [vmem:[%s1690_s2 + $0x18] sm:$0xff] (!%p263_p2)   ;;  %s1392_s25 = smov (!%p263_p2), 40   ;;  %v1369_v29 = vld [vmem:[%s1690_s2 + $0x20] ss:$0 sps:$4 sm:$0xff] (!%p263_p2)  }
   0x8   : > { %1172 = vmatpush3.bf16.msra.mxu0 (!%p263_p2), %v1365_v10  ;;  %s1393_s26 = smov (!%p263_p2), 16   ;;  %vm476_vm1 = vcmask (!%p263_p2), 1043456   ;;  %vm1394_vm2 = vmmov (!%p263_p2), 0   ;;  %s1395_s9 = smov (!%p263_p2), 56   ;;  %vm417_vm3 = vcmask (!%p263_p2), 130048   ;;  %vm420_vm4 = vcmask (!%p263_p2), 195584  }
   0x9   : > { %1173 = vmatprep.subr.bf16.mxu0 (!%p263_p2), %v1389_v3  ;;  %v478_v34 = vsel (!%p263_p2), %vm476_vm1, %v1369_v29, 0  ;;  %1181 = vmatprep.mubr.msk.bf16.mxu0 (!%p263_p2), %vm1394_vm2, %v1389_v3  ;;  %s1396_s10 = smov (!%p263_p2), 32   ;;  %s1398_s12 = smov (!%p263_p2), 64   ;;  %vm423_vm5 = vcmask (!%p263_p2), 261120   ;;  %vm426_vm6 = vcmask (!%p263_p2), 326656   ;;  %vm429_vm7 = vcmask (!%p263_p2), 392192  }
   0xa   : > { %1195 = vmatprep.mubr.msk.bf16.mxu1 (!%p263_p2), %vm1394_vm2, %v1389_v3  ;;  %vm432_vm8 = vcmask (!%p263_p2), 457728   ;;  %vm435_vm9 = vcmask (!%p263_p2), 523264   ;;  %vm472_vm10 = vcmask (!%p263_p2), 588800   ;;  %vm1037_vm11 = vcmask (!%p263_p2), 58368  }
   0xb   : > { %331 = vperm.xlu0 (!%p263_p2), %1244, %v308_v2  }
   0xc   : > { %1174 = vmatpush3.bf16.msra.mxu0 (!%p263_p2), %v1366_v11 }
   0xd   : > { %s1698_s28 = smov (!%p296_p3, %s1098_s28), 1  ;;  %1175 = vmatprep.subr.bf16.mxu0 %v1389_v3 }
   0xe   : > { %s1147_s11 = sshll.u32 %s1698_s28, 4 }
   0xf   : > { %s300_s14 = scalar_lea.vmem %s1688_s0, %s1147_s11  ;;  %s1397_s11 = smov 48  }
  0x10   : > { %v312_v4 = vld [vmem:[%s300_s14] sm:$0xff]  ;;  %v313_v7 = vld [vmem:[%s300_s14 + $0x8] sm:$0xff]  ;;  %1176 = vmatpush3.bf16.msra.mxu0 %v1367_v21 }
  0x11   : > { %1177 = vmatprep.subr.bf16.mxu0 %v1389_v3 }
  0x14   : > { %1178 = vmatpush3.bf16.msra.mxu0 %v1368_v25 }
  0x15   : > { %1179 = vmatprep.subr.bf16.mxu0 %v1389_v3 }
  0x18   : > { %1180 = vmatpush3.bf16.msra.mxu0 %v478_v34  ;;  %v1372_v34 = vld [vmem:[%s1692_s4 + $0x10] sm:$0xff]  }
  0x19   : > { %1199 = vmatprep.subr.bf16.mxu0 %v1389_v3 }
  0x86   : > { %v1470_v5 = vpop.permute.xlu0 %326 }
  0x87   : > { %v334_v6 = vmul.f32 %v1470_v5, %v312_v4 }
  0x89   : > { %336 = vst.msk [vmem:[#allocation2 + $0x8] sm:$0xff] %vm309_vm0, %v334_v6 }
  0x8a   : > { %v1474_v8 = vpop.permute.xlu0 %331 }
  0x8b   : > { %v335_v9 = vmul.f32 %v1474_v8, %v313_v7 }
  0x8d   : > { %337 = vst.msk [vmem:[#allocation2 + $0x10] sm:$0xff] %vm309_vm0, %v335_v9 }
  0x90   : > { %v344_v12 = vld [vmem:[#allocation2 + $0x7] sm:$0xff] }
  0x91   : > { %v340_v14 = vld [vmem:[#allocation2 + $0x4] sm:$0xff] }
  0x92   : > { %v342_v22 = vld [vmem:[#allocation2 + $0x5] sm:$0xff] }
  0x93   : > { %v346_v28 = vld [vmem:[#allocation2 + $0x8] sm:$0xff] }
  0x94   : > { %v345_v13 = vld [vmem:[#allocation2 + $0xf] sm:$0xff]  ;;  %v338_v43 = vld [vmem:[#allocation2 + $0x3] sm:$0xff] }
  0x95   : > { %v341_v15 = vld [vmem:[#allocation2 + $0xc] sm:$0xff]  ;;  %v1255_v16 = vpack.i.bf16 %v345_v13, %v344_v12  ;;  %v351_v26 = vld [vmem:[#allocation2 + $0x14] sm:$0xff] }
  0x96   : > { %v1245_v17 = vpack.i.bf16 %v341_v15, %v340_v14  ;;  %v348_v18 = vld [vmem:[#allocation2 + $0x9] sm:$0xff]  ;;  %v349_v19 = vld [vmem:[#allocation2 + $0x11] sm:$0xff]  ;;  %v1275_v30 = vpack.i.bf16 %v351_v26, %v341_v15 }
  0x97   : > { %v343_v20 = vld [vmem:[#allocation2 + $0xd] sm:$0xff]  ;;  %1256 = vrot.lane.b32.xlu0 %v1255_v16, %s1390_s19  ;;  %v1265_v23 = vpack.i.bf16 %v349_v19, %v348_v18  ;;  %v352_v36 = vld [vmem:[#allocation2 + $0x15] sm:$0xff]  ;;  %v1370_v19 = vld [vmem:[%s1692_s4] sm:$0xff]  }
  0x98   : > { %1246 = vrot.lane.b32.xlu1 %v1245_v17, %s1391_s20  ;;  %v1250_v24 = vpack.i.bf16 %v343_v20, %v342_v22  ;;  %v347_v27 = vld [vmem:[#allocation2 + $0x10] sm:$0xff]  ;;  %v1280_v37 = vpack.i.bf16 %v352_v36, %v343_v20  ;;  %1186 = vmatpush3.bf16.msra.mxu1 %v1370_v19  ;;  %v1107_v20 = vld [vmem:[%s1691_s3] ss:$0 sm:$0xff] }
  0x99   : > { %v1260_v31 = vpack.i.bf16 %v347_v27, %v346_v28  ;;  %v339_v32 = vld [vmem:[#allocation2 + $0xb] sm:$0xff]  ;;  %v350_v33 = vld [vmem:[#allocation2 + $0x13] sm:$0xff]  ;;  %1187 = vmatprep.subr.bf16.mxu1 %v1389_v3 }
  0x9a   : > { %v1270_v35 = vpack.i.bf16 %v350_v33, %v339_v32  ;;  %v1371_v33 = vld [vmem:[%s1692_s4 + $0x8] sm:$0xff]  }
  0x9b   : > { %1266 = vrot.lane.b32.xlu0 %v1265_v23, %s1392_s25 }
  0x9c   : > { %1251 = vrot.lane.b32.xlu1 %v1250_v24, %s1393_s26  ;;  %1188 = vmatpush3.bf16.msra.mxu1 %v1371_v33 }
  0x9d   : > { %1189 = vmatprep.subr.bf16.mxu1 %v1389_v3 }
  0x9f   : > { %1276 = vrot.lane.b32.xlu0 %v1275_v30, %s1395_s9 }
  0xa0   : > { %1261 = vrot.lane.b32.xlu1 %v1260_v31, %s1396_s10  ;;  %1190 = vmatpush3.bf16.msra.mxu1 %v1372_v34 }
  0xa1   : > { %1191 = vmatprep.subr.bf16.mxu1 %v1389_v3 }
  0xa4   : > { %1271 = vrot.lane.b32.xlu1 %v1270_v35, %s1397_s11 }
  0xa8   : > { %1281 = vrot.lane.b32.xlu1 %v1280_v37, %s1398_s12 }
 0x109   : > { %v1257_v39 = vpop.permute.xlu0 %1256 }
 0x10a   : > { %v1247_v38 = vpop.permute.xlu1 %1246  ;;  %v1259_v51 = vunpack.i.h.bf16 %v1257_v39  ;;  %v1258_v52 = vunpack.i.l.bf16 %v1257_v39 }
 0x10b   : > { %v1249_v40 = vunpack.i.h.bf16 %v1247_v38  ;;  %v1248_v41 = vunpack.i.l.bf16 %v1247_v38 }
 0x10d   : > { %v415_v46 = vsel %vm309_vm0, %v338_v43, %v1248_v41  ;;  %v416_v47 = vsel %vm309_vm0, %v339_v32, %v1249_v40  ;;  %v1267_v48 = vpop.permute.xlu0 %1266  ;;  %v1373_v43 = vld [vmem:[%s1692_s4 + $0x18] sm:$0xff]  }
 0x10e   : > { %v1252_v42 = vpop.permute.xlu1 %1251  ;;  %v1269_v60 = vunpack.i.h.bf16 %v1267_v48  ;;  %v1268_v61 = vunpack.i.l.bf16 %v1267_v48  ;;  %1192 = vmatpush3.bf16.msra.mxu1 %v1373_v43  ;;  %v718_v43 = vld [vmem:[%s1694_s6] sm:$0xf] }
 0x10f   : > { %v1254_v44 = vunpack.i.h.bf16 %v1252_v42  ;;  %v1253_v45 = vunpack.i.l.bf16 %v1252_v42  ;;  %1193 = vmatprep.subr.bf16.mxu1 %v1389_v3 }
 0x111   : > { %v418_v49 = vsel %vm417_vm3, %v415_v46, %v1253_v45  ;;  %v419_v50 = vsel %vm417_vm3, %v416_v47, %v1254_v44  ;;  %v1277_v63 = vpop.permute.xlu0 %1276 }
 0x112   : > { %v1262_v53 = vpop.permute.xlu1 %1261  ;;  %v421_v56 = vsel %vm420_vm4, %v418_v49, %v1258_v52  ;;  %v422_v57 = vsel %vm420_vm4, %v419_v50, %v1259_v51  ;;  %v1279_v9 = vunpack.i.h.bf16 %v1277_v63  ;;  %v1278_v10 = vunpack.i.l.bf16 %v1277_v63  ;;  %v1374_v49 = vld [vmem:[%s1692_s4 + $0x20] ss:$0 sps:$4 sm:$0xff]  }
 0x113   : > { %v1264_v54 = vunpack.i.h.bf16 %v1262_v53  ;;  %v1263_v55 = vunpack.i.l.bf16 %v1262_v53  ;;  %v672_v53 = vsel %vm476_vm1, %v1374_v49, 0 }
 0x114   : > { %1194 = vmatpush3.bf16.msra.mxu1 %v672_v53 }
 0x115   : > { %v424_v58 = vsel %vm423_vm5, %v421_v56, %v1263_v55  ;;  %v425_v59 = vsel %vm423_vm5, %v422_v57, %v1264_v54  ;;  %1205 = vmatprep.subr.bf16.mxu1 %v1389_v3 }
 0x116   : > { %v1272_v62 = vpop.permute.xlu1 %1271  ;;  %v427_v2 = vsel %vm426_vm6, %v424_v58, %v1268_v61  ;;  %v428_v4 = vsel %vm426_vm6, %v425_v59, %v1269_v60 }
 0x117   : > { %v1274_v0 = vunpack.i.h.bf16 %v1272_v62  ;;  %v1273_v1 = vunpack.i.l.bf16 %v1272_v62 }
 0x119   : > { %v430_v6 = vsel %vm429_vm7, %v427_v2, %v1273_v1  ;;  %v431_v7 = vsel %vm429_vm7, %v428_v4, %v1274_v0 }
 0x11a   : > { %v1282_v11 = vpop.permute.xlu1 %1281  ;;  %v433_v14 = vsel %vm432_vm8, %v430_v6, %v1278_v10  ;;  %v434_v15 = vsel %vm432_vm8, %v431_v7, %v1279_v9 }
 0x11b   : > { %v1284_v12 = vunpack.i.h.bf16 %v1282_v11  ;;  %v1283_v13 = vunpack.i.l.bf16 %v1282_v11 }
 0x11d   : > { %v436_v16 = vsel %vm435_vm9, %v433_v14, %v1283_v13  ;;  %v437_v17 = vsel %vm435_vm9, %v434_v15, %v1284_v12 }
 0x11e   : > { %v438_v18 = vpack.c.bf16 %v437_v17, %v436_v16 }
 0x120   : > { %1182 = vmatmul.mubr.msk.bf16.vlgmr.msra.gmra.mrb[0].mxu0 %vm472_vm10, %v438_v18 }
 0x121   : > { %1201 = vmatprep.mubr.msk.bf16.mxu0 %vm1394_vm2, %v1389_v3 }
 0x1f3   : > { %v514_v21 = vpop.f32.mrb[0].mxu0 }
 0x1f4   : > { %v515_v22 = vadd.f32 %v1107_v20, %v514_v21  ;;  %v1183_v23 = vpop.f32.mrb[1].mxu0 }
 0x1f5   : > { %v517_v24 = vpop.f32.mrb[2].mxu0 }
 0x1f6   : > { %521 = vst.msk [vmem:[#allocation3] sm:$0xff] %vm309_vm0, %v515_v22  ;;  %v518_v25 = vadd.f32 %v1107_v20, %v517_v24  ;;  %v1184_v26 = vpop.f32.mrb[3].mxu0 }
 0x1f8   : > { %522 = vst.msk [vmem:[#allocation3 + $0x8] sm:$0xff] %vm309_vm0, %v518_v25 }
 0x1fd   : > { %v1539_v27 = vld [vmem:[#allocation3] sm:$0xff] }
 0x1fe   : > { %v525_v28 = vmax.f32 %v1539_v27, 0.0 }
 0x1ff   : > { %v1542_v29 = vld [vmem:[#allocation3 + $0x8] sm:$0xff] }
 0x200   : > { %v537_v30 = vmul.f32 %v525_v28, %v1470_v5  ;;  %v526_v31 = vmax.f32 %v1542_v29, 0.0 }
 0x202   : > { %539 = vst.msk [vmem:[#allocation2 + $0x8] sm:$0xff] %vm309_vm0, %v537_v30  ;;  %v538_v32 = vmul.f32 %v526_v31, %v1474_v8 }
 0x204   : > { %540 = vst.msk [vmem:[#allocation2 + $0x10] sm:$0xff] %vm309_vm0, %v538_v32 }
 0x209   : > { %v545_v35 = vld [vmem:[#allocation2 + $0x5] sm:$0xff] }
 0x20a   : > { %v543_v37 = vld [vmem:[#allocation2 + $0x4] sm:$0xff] }
 0x20b   : > { %v546_v36 = vld [vmem:[#allocation2 + $0xd] sm:$0xff]  ;;  %v555_v57 = vld [vmem:[#allocation2 + $0x15] sm:$0xff]  ;;  %v541_v2 = vld [vmem:[#allocation2 + $0x3] sm:$0xff] }
 0x20c   : > { %v544_v38 = vld [vmem:[#allocation2 + $0xc] sm:$0xff]  ;;  %v1290_v39 = vpack.i.bf16 %v546_v36, %v545_v35  ;;  %v554_v56 = vld [vmem:[#allocation2 + $0x14] sm:$0xff]  ;;  %v1320_v59 = vpack.i.bf16 %v555_v57, %v546_v36 }
 0x20d   : > { %v1285_v40 = vpack.i.bf16 %v544_v38, %v543_v37  ;;  %v550_v41 = vld [vmem:[#allocation2 + $0x10] sm:$0xff]  ;;  %v549_v44 = vld [vmem:[#allocation2 + $0x8] sm:$0xff]  ;;  %v1315_v58 = vpack.i.bf16 %v554_v56, %v544_v38  ;;  %v1121_v56 = vld [vmem:[%s1695_s7] ss:$0 sm:$0xff] }
 0x20e   : > { %v548_v42 = vld [vmem:[#allocation2 + $0xf] sm:$0xff]  ;;  %1291 = vrot.lane.b32.xlu1 %v1290_v39, %s1393_s26  ;;  %v547_v45 = vld [vmem:[#allocation2 + $0x7] sm:$0xff]  ;;  %v1300_v46 = vpack.i.bf16 %v550_v41, %v549_v44  ;;  %v730_v44 = vsel %vm476_vm1, %v718_v43, 0 }
 0x20f   : > { %1286 = vrot.lane.b32.xlu0 %v1285_v40, %s1391_s20  ;;  %v1295_v47 = vpack.i.bf16 %v548_v42, %v547_v45  ;;  %v551_v48 = vld [vmem:[#allocation2 + $0x9] sm:$0xff]  ;;  %v552_v50 = vld [vmem:[#allocation2 + $0x11] sm:$0xff]  ;;  %1200 = vmatpush3.bf16.msra.mxu0 %v730_v44  ;;  %v1114_v45 = vld [vmem:[%s1693_s5] ss:$0 sm:$0xff] }
 0x210   : > { %v542_v51 = vld [vmem:[#allocation2 + $0xb] sm:$0xff]  ;;  %v553_v52 = vld [vmem:[#allocation2 + $0x13] sm:$0xff]  ;;  %v1305_v54 = vpack.i.bf16 %v552_v50, %v551_v48  ;;  %1219 = vmatprep.subr.bf16.mxu0 %v1389_v3 }
 0x211   : > { %v1310_v55 = vpack.i.bf16 %v553_v52, %v542_v51 }
 0x212   : > { %1301 = vrot.lane.b32.xlu1 %v1300_v46, %s1396_s10 }
 0x213   : > { %1296 = vrot.lane.b32.xlu0 %v1295_v47, %s1390_s19 }
 0x216   : > { %1311 = vrot.lane.b32.xlu1 %v1310_v55, %s1397_s11  ;;  %v1375_v55 = vld [vmem:[%s1692_s4 + $0x24] sm:$0xff]  }
 0x217   : > { %1306 = vrot.lane.b32.xlu0 %v1305_v54, %s1392_s25 }
 0x21a   : > { %1321 = vrot.lane.b32.xlu1 %v1320_v59, %s1398_s12 }
 0x21b   : > { %1316 = vrot.lane.b32.xlu0 %v1315_v58, %s1395_s9 }
 0x280   : > { %v1292_v60 = vpop.permute.xlu1 %1291 }
 0x281   : > { %v1287_v61 = vpop.permute.xlu0 %1286  ;;  %v1294_v0 = vunpack.i.h.bf16 %v1292_v60  ;;  %v1293_v1 = vunpack.i.l.bf16 %v1292_v60 }
 0x282   : > { %v1289_v62 = vunpack.i.h.bf16 %v1287_v61  ;;  %v1288_v63 = vunpack.i.l.bf16 %v1287_v61 }
 0x284   : > { %v618_v4 = vsel %vm309_vm0, %v541_v2, %v1288_v63  ;;  %v619_v6 = vsel %vm309_vm0, %v542_v51, %v1289_v62  ;;  %v1302_v7 = vpop.permute.xlu1 %1301 }
 0x285   : > { %v1297_v9 = vpop.permute.xlu0 %1296  ;;  %v1304_v12 = vunpack.i.h.bf16 %v1302_v7  ;;  %v1303_v13 = vunpack.i.l.bf16 %v1302_v7  ;;  %v620_v14 = vsel %vm417_vm3, %v618_v4, %v1293_v1  ;;  %v621_v15 = vsel %vm417_vm3, %v619_v6, %v1294_v0 }
 0x286   : > { %v1299_v10 = vunpack.i.h.bf16 %v1297_v9  ;;  %v1298_v11 = vunpack.i.l.bf16 %v1297_v9  ;;  %v1377_v9 = vld [vmem:[%s1692_s4 + $0x34] sm:$0xff]  }
 0x288   : > { %v622_v16 = vsel %vm420_vm4, %v620_v14, %v1298_v11  ;;  %v623_v17 = vsel %vm420_vm4, %v621_v15, %v1299_v10  ;;  %v1312_v19 = vpop.permute.xlu1 %1311 }
 0x289   : > { %v1307_v18 = vpop.permute.xlu0 %1306  ;;  %v624_v22 = vsel %vm423_vm5, %v622_v16, %v1303_v13  ;;  %v625_v23 = vsel %vm423_vm5, %v623_v17, %v1304_v12  ;;  %v1314_v24 = vunpack.i.h.bf16 %v1312_v19  ;;  %v1313_v25 = vunpack.i.l.bf16 %v1312_v19  ;;  %v1378_v16 = vld [vmem:[%s1692_s4 + $0x3c] sm:$0xff]  }
 0x28a   : > { %v1309_v20 = vunpack.i.h.bf16 %v1307_v18  ;;  %v1308_v21 = vunpack.i.l.bf16 %v1307_v18 }
 0x28c   : > { %v626_v26 = vsel %vm426_vm6, %v624_v22, %v1308_v21  ;;  %v627_v28 = vsel %vm426_vm6, %v625_v23, %v1309_v20  ;;  %v1322_v31 = vpop.permute.xlu1 %1321  ;;  %v1379_v22 = vld [vmem:[%s1692_s4 + $0x44] ss:$0 sps:$4 sm:$0xff]  }
 0x28d   : > { %v1317_v30 = vpop.permute.xlu0 %1316  ;;  %v1324_v34 = vunpack.i.h.bf16 %v1322_v31  ;;  %v1323_v35 = vunpack.i.l.bf16 %v1322_v31  ;;  %v628_v36 = vsel %vm429_vm7, %v626_v26, %v1313_v25  ;;  %v629_v37 = vsel %vm429_vm7, %v627_v28, %v1314_v24 }
 0x28e   : > { %v1319_v32 = vunpack.i.h.bf16 %v1317_v30  ;;  %v1318_v33 = vunpack.i.l.bf16 %v1317_v30  ;;  %v928_v26 = vsel %vm476_vm1, %v1379_v22, 0 }
 0x290   : > { %v630_v38 = vsel %vm432_vm8, %v628_v36, %v1318_v33  ;;  %v631_v39 = vsel %vm432_vm8, %v629_v37, %v1319_v32 }
 0x291   : > { %v632_v40 = vsel %vm435_vm9, %v630_v38, %v1323_v35  ;;  %v633_v41 = vsel %vm435_vm9, %v631_v39, %v1324_v34 }
 0x292   : > { %v634_v42 = vpack.c.bf16 %v633_v41, %v632_v40 }
 0x294   : > { %1196 = vmatmul.mubr.msk.bf16.vlgmr.msra.gmra.mrb[0].mxu1 %vm472_vm10, %v634_v42 }
 0x295   : > { %1215 = vmatprep.mubr.msk.bf16.mxu1 %vm1394_vm2, %v1389_v3  ;;  %1206 = vmatpush3.bf16.msra.mxu1 %v1375_v55 }
 0x296   : > { %1207 = vmatprep.subr.bf16.mxu1 %v1389_v3 }
 0x367   : > { %v708_v46 = vpop.f32.mrb[0].mxu1 }
 0x368   : > { %v709_v47 = vadd.f32 %v1114_v45, %v708_v46  ;;  %v1197_v48 = vpop.f32.mrb[1].mxu1 }
 0x369   : > { %v711_v49 = vpop.f32.mrb[2].mxu1 }
 0x36a   : > { %v712_v50 = vadd.f32 %v1114_v45, %v711_v49  ;;  %v1198_v51 = vpop.f32.mrb[3].mxu1  ;;  %v715_v52 = vmax.f32 %v709_v47, 0.0 }
 0x36c   : > { %v716_v53 = vmax.f32 %v712_v50, 0.0 }
 0x36e   : > { %v717_v54 = vpack.c.bf16 %v716_v53, %v715_v52 }
 0x370   : > { %1202 = vmatmul.mubr.msk.bf16.vlgmr.msra.gmra.mrb[4].mxu0 %vm309_vm0, %v717_v54 }
 0x371   : > { %1221 = vmatprep.mubr.msk.bf16.mxu0 %vm1394_vm2, %v1389_v3 }
 0x443   : > { %v766_v57 = vpop.f32.mrb[4].mxu0 }
 0x444   : > { %v767_v58 = vadd.f32 %v1121_v56, %v766_v57  ;;  %v1203_v59 = vpop.f32.mrb[5].mxu0 }
 0x445   : > { %v769_v60 = vpop.f32.mrb[6].mxu0 }
 0x446   : > { %v773_v61 = vadd.f32 %v767_v58, %v1539_v27  ;;  %v770_v62 = vadd.f32 %v1121_v56, %v769_v60  ;;  %v1204_v63 = vpop.f32.mrb[7].mxu0 }
 0x448   : > { %775 = vst.msk [vmem:[#allocation3] sm:$0xff] %vm309_vm0, %v773_v61  ;;  %v774_v0 = vadd.f32 %v770_v62, %v1542_v29  ;;  %v1376_v29 = vld [vmem:[%s1692_s4 + $0x2c] sm:$0xff]  }
 0x449   : > { %1208 = vmatpush3.bf16.msra.mxu1 %v1376_v29 }
 0x44a   : > { %776 = vst.msk [vmem:[#allocation3 + $0x8] sm:$0xff] %vm309_vm0, %v774_v0  ;;  %1209 = vmatprep.subr.bf16.mxu1 %v1389_v3 }
 0x44d   : > { %1210 = vmatpush3.bf16.msra.mxu1 %v1377_v9 }
 0x44e   : > { %1211 = vmatprep.subr.bf16.mxu1 %v1389_v3 }
 0x44f   : > { %v1615_v1 = vld [vmem:[#allocation3] sm:$0xff] }
 0x450   : > { %v779_v2 = vmax.f32 %v1615_v1, 0.0 }
 0x451   : > { %v1618_v4 = vld [vmem:[#allocation3 + $0x8] sm:$0xff]  ;;  %1212 = vmatpush3.bf16.msra.mxu1 %v1378_v16 }
 0x452   : > { %v793_v6 = vmul.f32 %v779_v2, %v1470_v5  ;;  %v780_v7 = vmax.f32 %v1618_v4, 0.0  ;;  %1213 = vmatprep.subr.bf16.mxu1 %v1389_v3 }
 0x454   : > { %795 = vst.msk [vmem:[#allocation2 + $0x8] sm:$0xff] %vm309_vm0, %v793_v6  ;;  %v794_v27 = vmul.f32 %v780_v7, %v1474_v8 }
 0x455   : > { %1214 = vmatpush3.bf16.msra.mxu1 %v928_v26 }
 0x456   : > { %796 = vst.msk [vmem:[#allocation2 + $0x10] sm:$0xff] %vm309_vm0, %v794_v27 }
 0x45b   : > { %v801_v5 = vld [vmem:[#allocation2 + $0x5] sm:$0xff] }
 0x45c   : > { %v799_v11 = vld [vmem:[#allocation2 + $0x4] sm:$0xff] }
 0x45d   : > { %v802_v10 = vld [vmem:[#allocation2 + $0xd] sm:$0xff]  ;;  %v811_v32 = vld [vmem:[#allocation2 + $0x15] sm:$0xff]  ;;  %v797_v40 = vld [vmem:[#allocation2 + $0x3] sm:$0xff] }
 0x45e   : > { %v800_v8 = vld [vmem:[#allocation2 + $0xc] sm:$0xff]  ;;  %v1330_v12 = vpack.i.bf16 %v802_v10, %v801_v5  ;;  %v810_v31 = vld [vmem:[#allocation2 + $0x14] sm:$0xff]  ;;  %v1360_v34 = vpack.i.bf16 %v811_v32, %v802_v10 }
 0x45f   : > { %v1325_v13 = vpack.i.bf16 %v800_v8, %v799_v11  ;;  %v806_v14 = vld [vmem:[#allocation2 + $0x10] sm:$0xff]  ;;  %v805_v17 = vld [vmem:[#allocation2 + $0x8] sm:$0xff]  ;;  %v1355_v33 = vpack.i.bf16 %v810_v31, %v800_v8 }
 0x460   : > { %v804_v15 = vld [vmem:[#allocation2 + $0xf] sm:$0xff]  ;;  %1331 = vrot.lane.b32.xlu1 %v1330_v12, %s1393_s26  ;;  %v803_v18 = vld [vmem:[#allocation2 + $0x7] sm:$0xff]  ;;  %v1340_v19 = vpack.i.bf16 %v806_v14, %v805_v17 }
 0x461   : > { %1326 = vrot.lane.b32.xlu0 %v1325_v13, %s1391_s20  ;;  %v1335_v20 = vpack.i.bf16 %v804_v15, %v803_v18  ;;  %v807_v21 = vld [vmem:[#allocation2 + $0x9] sm:$0xff]  ;;  %v808_v23 = vld [vmem:[#allocation2 + $0x11] sm:$0xff]  ;;  %v1140_v13 = vld [vmem:[%s1694_s6 + $0x4] sm:$0xf] }
 0x462   : > { %v798_v24 = vld [vmem:[#allocation2 + $0xb] sm:$0xff]  ;;  %v809_v25 = vld [vmem:[#allocation2 + $0x13] sm:$0xff]  ;;  %v1345_v28 = vpack.i.bf16 %v808_v23, %v807_v21  ;;  %v988_v14 = vsel %vm476_vm1, %v1140_v13, 0  ;;  %v1133_v15 = vld [vmem:[%s1693_s5 + $0x1] ss:$0 sm:$0xff] }
 0x463   : > { %v1350_v30 = vpack.i.bf16 %v809_v25, %v798_v24  ;;  %1220 = vmatpush3.bf16.msra.mxu0 %v988_v14  ;;  %v1142_v25 = vld [vmem:[%s1695_s7 + $0x1] ss:$0 sm:$0xff] }
 0x464   : > { %1341 = vrot.lane.b32.xlu1 %v1340_v19, %s1396_s10 }
 0x465   : > { %1336 = vrot.lane.b32.xlu0 %v1335_v20, %s1390_s19 }
 0x468   : > { %1351 = vrot.lane.b32.xlu1 %v1350_v30, %s1397_s11  ;;  %s1148_s11 = sshll.u32 %s1698_s28, 2 }
 0x469   : > { %1346 = vrot.lane.b32.xlu0 %v1345_v28, %s1392_s25  ;;  %s305_s18 = scalar_lea.vmem %s1696_s8, %s1148_s11 }
 0x46c   : > { %1361 = vrot.lane.b32.xlu1 %v1360_v34, %s1398_s12 }
 0x46d   : > { %1356 = vrot.lane.b32.xlu0 %v1355_v33, %s1395_s9 }
 0x4d2   : > { %v1332_v3 = vpop.permute.xlu1 %1331 }
 0x4d3   : > { %v1327_v35 = vpop.permute.xlu0 %1326  ;;  %v1334_v38 = vunpack.i.h.bf16 %v1332_v3  ;;  %v1333_v39 = vunpack.i.l.bf16 %v1332_v3 }
 0x4d4   : > { %v1329_v36 = vunpack.i.h.bf16 %v1327_v35  ;;  %v1328_v37 = vunpack.i.l.bf16 %v1327_v35 }
 0x4d6   : > { %v874_v41 = vsel %vm309_vm0, %v797_v40, %v1328_v37  ;;  %v875_v42 = vsel %vm309_vm0, %v798_v24, %v1329_v36  ;;  %v1342_v43 = vpop.permute.xlu1 %1341 }
 0x4d7   : > { %v1337_v44 = vpop.permute.xlu0 %1336  ;;  %v1344_v47 = vunpack.i.h.bf16 %v1342_v43  ;;  %v1343_v48 = vunpack.i.l.bf16 %v1342_v43  ;;  %v876_v49 = vsel %vm417_vm3, %v874_v41, %v1333_v39  ;;  %v877_v50 = vsel %vm417_vm3, %v875_v42, %v1334_v38 }
 0x4d8   : > { %v1339_v45 = vunpack.i.h.bf16 %v1337_v44  ;;  %v1338_v46 = vunpack.i.l.bf16 %v1337_v44 }
 0x4da   : > { %v878_v51 = vsel %vm420_vm4, %v876_v49, %v1338_v46  ;;  %v879_v52 = vsel %vm420_vm4, %v877_v50, %v1339_v45  ;;  %v1352_v54 = vpop.permute.xlu1 %1351 }
 0x4db   : > { %v1347_v53 = vpop.permute.xlu0 %1346  ;;  %v880_v57 = vsel %vm423_vm5, %v878_v51, %v1343_v48  ;;  %v881_v58 = vsel %vm423_vm5, %v879_v52, %v1344_v47  ;;  %v1354_v59 = vunpack.i.h.bf16 %v1352_v54  ;;  %v1353_v60 = vunpack.i.l.bf16 %v1352_v54 }
 0x4dc   : > { %v1349_v55 = vunpack.i.h.bf16 %v1347_v53  ;;  %v1348_v56 = vunpack.i.l.bf16 %v1347_v53 }
 0x4de   : > { %v882_v61 = vsel %vm426_vm6, %v880_v57, %v1348_v56  ;;  %v883_v62 = vsel %vm426_vm6, %v881_v58, %v1349_v55  ;;  %v1362_v0 = vpop.permute.xlu1 %1361 }
 0x4df   : > { %v1357_v63 = vpop.permute.xlu0 %1356  ;;  %v1364_v7 = vunpack.i.h.bf16 %v1362_v0  ;;  %v1363_v27 = vunpack.i.l.bf16 %v1362_v0  ;;  %v884_v29 = vsel %vm429_vm7, %v882_v61, %v1353_v60  ;;  %v885_v9 = vsel %vm429_vm7, %v883_v62, %v1354_v59 }
 0x4e0   : > { %v1359_v2 = vunpack.i.h.bf16 %v1357_v63  ;;  %v1358_v6 = vunpack.i.l.bf16 %v1357_v63 }
 0x4e2   : > { %v886_v5 = vsel %vm432_vm8, %v884_v29, %v1358_v6  ;;  %v887_v10 = vsel %vm432_vm8, %v885_v9, %v1359_v2 }
 0x4e3   : > { %v888_v11 = vsel %vm435_vm9, %v886_v5, %v1363_v27  ;;  %v889_v8 = vsel %vm435_vm9, %v887_v10, %v1364_v7 }
 0x4e4   : > { %v890_v12 = vpack.c.bf16 %v889_v8, %v888_v11 }
 0x4e6   : > { %1216 = vmatmul.mubr.msk.bf16.vlgmr.msra.gmra.mrb[4].mxu1 %vm472_vm10, %v890_v12 }
 0x5b9   : > { %v964_v16 = vpop.f32.mrb[4].mxu1 }
 0x5ba   : > { %v965_v17 = vadd.f32 %v1133_v15, %v964_v16  ;;  %v1217_v18 = vpop.f32.mrb[5].mxu1 }
 0x5bb   : > { %v967_v19 = vpop.f32.mrb[6].mxu1 }
 0x5bc   : > { %v968_v20 = vadd.f32 %v1133_v15, %v967_v19  ;;  %v1218_v21 = vpop.f32.mrb[7].mxu1  ;;  %v971_v22 = vmax.f32 %v965_v17, 0.0 }
 0x5be   : > { %v972_v23 = vmax.f32 %v968_v20, 0.0 }
 0x5c0   : > { %v973_v24 = vpack.c.bf16 %v972_v23, %v971_v22 }
 0x5c2   : > { %1222 = vmatmul.mubr.msk.bf16.vlgmr.msra.gmra.mrb[8].mxu0 %vm309_vm0, %v973_v24 }
 0x695   : > { %v1024_v26 = vpop.f32.mrb[8].mxu0 }
 0x696   : > { %v1025_v28 = vadd.f32 %v1142_v25, %v1024_v26  ;;  %v1223_v30 = vpop.f32.mrb[9].mxu0 }
 0x697   : > { %v1027_v31 = vpop.f32.mrb[10].mxu0 }
 0x698   : > { %v1031_v32 = vadd.f32 %v1025_v28, %v1615_v1  ;;  %v1028_v33 = vadd.f32 %v1142_v25, %v1027_v31  ;;  %v1224_v34 = vpop.f32.mrb[11].mxu0 }
 0x69a   : > { %1033 = vst.msk [vmem:[#allocation3] sm:$0xff] %vm309_vm0, %v1031_v32  ;;  %v1032_v3 = vadd.f32 %v1028_v33, %v1618_v4 }
 0x69c   : > { %1034 = vst.msk [vmem:[#allocation3 + $0x8] sm:$0xff] %vm309_vm0, %v1032_v3 }
 0x6a1   : > { %v1035_v35 = vld [vmem:[#allocation3 + $0x5] sm:$0x3] }
 0x6a2   : > { %v1036_v36 = vmax.f32 %v1035_v35, 0.0 }
 0x6a3   : > { %v1039_v37 = vld [vmem:[#allocation3 + $0x9] sm:$0x3] }
 0x6a4   : > { %1038 = vst.msk [vmem:[%s305_s18] sm:$0x3] %vm1037_vm11, %v1036_v36  ;;  %v1040_v38 = vmax.f32 %v1039_v37, 0.0 }
 0x6a6   : > { %1144 = vst.msk [vmem:[%s305_s18 + $0x2] sm:$0x3] %vm1037_vm11, %v1040_v38 }
 0x6a7 PF: > { %s18_s27 = sadd.s32 1, %s1386_s27  }
 0x6a8   : > { %p15_p4 = scmp.ge.s32.totalorder %s18_s27, 4  }
 0x6aa   :  { %17 = sbr.rel (!%p15_p4) target bundleno = 1 (0x1), region = 87 }

// kernel: vqvae2_forward.25
= control target key start
LH: loop header
LB: loop body
LE: loop exit
PB: predicated region body
PF: predicated region fallthrough
CT: control target
= control target key end

     0   :  { %s1424_s12 = smov 0   ;;  %s1792_s0 = inlined_call_operand.vmem [shape: f32[2,122,8], index: 0, kind: input, shape index: {}]   ;;  %s1793_s1 = inlined_call_operand.vmem [shape: bf16[72,12], index: 1, kind: input, shape index: {}]   ;;  %s1794_s2 = inlined_call_operand.vmem [shape: f32[1,12], index: 2, kind: input, shape index: {}]   ;;  %s1795_s3 = inlined_call_operand.vmem [shape: f32[2,8,8,12], index: 3, kind: output, shape index: {}]  }
   0x1 LB: > { %s1030_s13 = sadd.s32 4294967295, %s1392_s12   ;;  %p1034_p0 = scmp.ge.s32.totalorder %s1392_s12, 1  ;;  %s1392_s12 = sphi %s1424_s12, %s13_s12  }
   0x2   : > { %p137_p1 = scmp.lt.s32.totalorder %s1392_s12, 3 }
   0x4   : > { %p138_p2 = pnand %p1034_p0, %p137_p1 }
   0x5   : > { %p161_p3 = scmp.lt.s32.totalorder (!%p138_p2), %s1030_s13, 1  ;;  %v1381_v0 = vld [vmem:[%s1793_s1] sm:$0xff] (!%p138_p2)   ;;  %v1394_v1 = vmov (!%p138_p2), 0.0   ;;  %v1382_v2 = vld [vmem:[%s1793_s1 + $0x8] sm:$0xff] (!%p138_p2)   ;;  %v1383_v5 = vld [vmem:[%s1793_s1 + $0x10] sm:$0xff] (!%p138_p2)   ;;  %s1395_s24 = smov (!%p138_p2), 24  }
   0x6   : > { %141 = sbr.rel (%p138_p2) target bundleno = 462 (0x1ce), region = 32  ;;  %1075 = vmatprep.subr.bf16.mxu0 (!%p138_p2), %v1394_v1  ;;  %1113 = vmatprep.subr.bf16.mxu1 (!%p138_p2), %v1394_v1  ;;  %s1396_s25 = smov (!%p138_p2), 8   ;;  %vm1399_vm0 = vmmov (!%p138_p2), 0   ;;  %v1384_v48 = vld [vmem:[%s1793_s1 + $0x18] sm:$0xff] (!%p138_p2)   ;;  %v1385_v49 = vld [vmem:[%s1793_s1 + $0x20] ss:$0 sps:$4 sm:$0xff] (!%p138_p2)  }
   0x7   : > { %1076 = vmatpush3.bf16.msra.mxu0 (!%p138_p2), %v1381_v0  ;;  %1118 = vmatpush3.bf16.msra.mxu1 (!%p138_p2), %v1381_v0  ;;  %s1397_s26 = smov (!%p138_p2), 32   ;;  %s1398_s27 = smov (!%p138_p2), 16   ;;  %vm845_vm1 = vcmask (!%p138_p2), 1043456   ;;  %vm661_vm2 = vcmask (!%p138_p2), 64512   ;;  %vm675_vm3 = vcmask (!%p138_p2), 130048   ;;  %vm689_vm4 = vcmask (!%p138_p2), 195584  }
   0x8   : > { %1077 = vmatprep.subr.bf16.mxu0 (!%p138_p2), %v1394_v1  ;;  %1114 = vmatprep.subr.bf16.mxu1 (!%p138_p2), %v1394_v1  ;;  %s1400_s28 = smov (!%p138_p2), 48   ;;  %s1401_s29 = smov (!%p138_p2), 40   ;;  %v847_v53 = vsel (!%p138_p2), %vm845_vm1, %v1385_v49, 0  ;;  %vm703_vm5 = vcmask (!%p138_p2), 261120   ;;  %vm717_vm6 = vcmask (!%p138_p2), 326656   ;;  %vm731_vm7 = vcmask (!%p138_p2), 392192  }
   0x9   : > { %1085 = vmatprep.mubr.msk.bf16.mxu0 (!%p138_p2), %vm1399_vm0, %v1394_v1  ;;  %1101 = vmatprep.mubr.msk.bf16.mxu1 (!%p138_p2), %vm1399_vm0, %v1394_v1  ;;  %s1402_s30 = smov (!%p138_p2), 64   ;;  %s1403_s4 = smov (!%p138_p2), 56   ;;  %vm745_vm8 = vcmask (!%p138_p2), 457728   ;;  %vm759_vm9 = vcmask (!%p138_p2), 523264   ;;  %vm823_vm10 = vcmask (!%p138_p2), 588800   ;;  %vm937_vm11 = vcmask (!%p138_p2), 97280  }
   0xb   : > { %1078 = vmatpush3.bf16.msra.mxu0 (!%p138_p2), %v1382_v2  ;;  %1119 = vmatpush3.bf16.msra.mxu1 (!%p138_p2), %v1382_v2 }
   0xc   : > { %1079 = vmatprep.subr.bf16.mxu0 (!%p138_p2), %v1394_v1  ;;  %1115 = vmatprep.subr.bf16.mxu1 (!%p138_p2), %v1394_v1 }
   0xd   : > { %s1797_s13 = smov (!%p161_p3, %s1030_s13), 1 }
   0xe   : > { %s1061_s18 = sshll.u32 %s1797_s13, 7  ;;  %s1062_s11 = sshll.u32 %s1797_s13, 6 }
   0xf   : > { %s1448_s21 = scalar_lea.vmem %s1792_s0, %s1061_s18  ;;  %1080 = vmatpush3.bf16.msra.mxu0 %v1383_v5  ;;  %1120 = vmatpush3.bf16.msra.mxu1 %v1383_v5  ;;  %s1763_s16 = scalar_lea.vmem %s1795_s3, %s1062_s11 }
  0x10   : > { %v200_v3 = vld [vmem:[%s1448_s21 + $0x12] sm:$0xff]  ;;  %v199_v4 = vld [vmem:[%s1448_s21 + $0xa] sm:$0xff]  ;;  %v198_v7 = vld [vmem:[%s1448_s21 + $0x2] sm:$0xff]  ;;  %1081 = vmatprep.subr.bf16.mxu0 %v1394_v1  ;;  %1116 = vmatprep.subr.bf16.mxu1 %v1394_v1 }
  0x11   : > { %v1151_v6 = vpack.i.bf16 %v200_v3, %v199_v4  ;;  %v185_v8 = vld [vmem:[%s1448_s21 + $0x1] sm:$0xff]  ;;  %v186_v9 = vld [vmem:[%s1448_s21 + $0x9] sm:$0xff]  ;;  %v214_v12 = vld [vmem:[%s1448_s21 + $0x13] sm:$0xff]  ;;  %v1146_v14 = vpack.i.bf16 %v199_v4, %v198_v7 }
  0x12   : > { %v1141_v10 = vpack.i.bf16 %v186_v9, %v185_v8  ;;  %v213_v11 = vld [vmem:[%s1448_s21 + $0xb] sm:$0xff]  ;;  %v227_v15 = vld [vmem:[%s1448_s21 + $0x14] sm:$0xff]  ;;  %v228_v16 = vld [vmem:[%s1448_s21 + $0x1c] sm:$0xff] }
  0x13   : > { %1152 = vrot.lane.b32.xlu1 %v1151_v6, %s1395_s24  ;;  %v1156_v13 = vpack.i.bf16 %v214_v12, %v213_v11  ;;  %v226_v17 = vld [vmem:[%s1448_s21 + $0xc] sm:$0xff]  ;;  %v1166_v18 = vpack.i.bf16 %v228_v16, %v227_v15  ;;  %v254_v20 = vld [vmem:[%s1448_s21 + $0x16] sm:$0xff]  ;;  %v255_v21 = vld [vmem:[%s1448_s21 + $0x1e] sm:$0xff]  ;;  %1082 = vmatpush3.bf16.msra.mxu0 %v1384_v48 }
  0x14   : > { %1142 = vrot.lane.b32.xlu0 %v1141_v10, %s1396_s25  ;;  %v1161_v19 = vpack.i.bf16 %v227_v15, %v226_v17  ;;  %v241_v22 = vld [vmem:[%s1448_s21 + $0x15] sm:$0xff]  ;;  %v242_v23 = vld [vmem:[%s1448_s21 + $0x1d] sm:$0xff]  ;;  %v1176_v24 = vpack.i.bf16 %v255_v21, %v254_v20  ;;  %v1493_v37 = vld [vmem:[%s1448_s21 + $0x2c] sm:$0xff]  ;;  %1121 = vmatpush3.bf16.msra.mxu1 %v1384_v48 }
  0x15   : > { %v201_v25 = vld [vmem:[%s1448_s21 + $0x1a] sm:$0xff]  ;;  %v1171_v26 = vpack.i.bf16 %v242_v23, %v241_v22  ;;  %v187_v27 = vld [vmem:[%s1448_s21 + $0x11] sm:$0xff]  ;;  %v216_v32 = vld [vmem:[%s1448_s21 + $0x23] sm:$0xff]  ;;  %1083 = vmatprep.subr.bf16.mxu0 %v1394_v1  ;;  %1117 = vmatprep.subr.bf16.mxu1 %v1394_v1 }
  0x16   : > { %v188_v28 = vld [vmem:[%s1448_s21 + $0x19] sm:$0xff]  ;;  %v1186_v29 = vpack.i.bf16 %v201_v25, %v200_v3  ;;  %v202_v33 = vld [vmem:[%s1448_s21 + $0x22] sm:$0xff]  ;;  %v257_v41 = vld [vmem:[%s1448_s21 + $0x2e] sm:$0xff] }
  0x17   : > { %1157 = vrot.lane.b32.xlu1 %v1156_v13, %s1397_s26  ;;  %v1181_v30 = vpack.i.bf16 %v188_v28, %v187_v27  ;;  %v215_v31 = vld [vmem:[%s1448_s21 + $0x1b] sm:$0xff]  ;;  %v1191_v35 = vpack.i.bf16 %v202_v33, %v201_v25  ;;  %v229_v36 = vld [vmem:[%s1448_s21 + $0x24] sm:$0xff]  ;;  %v244_v43 = vld [vmem:[%s1448_s21 + $0x2d] sm:$0xff]  ;;  %1084 = vmatpush3.bf16.msra.mxu0 %v847_v53 }
  0x18   : > { %1147 = vrot.lane.b32.xlu0 %v1146_v14, %s1398_s27  ;;  %v1196_v34 = vpack.i.bf16 %v216_v32, %v215_v31  ;;  %v1206_v38 = vpack.i.bf16 %v1493_v37, %v229_v36  ;;  %v1201_v39 = vpack.i.bf16 %v229_v36, %v228_v16  ;;  %v256_v40 = vld [vmem:[%s1448_s21 + $0x26] sm:$0xff]  ;;  %1122 = vmatpush3.bf16.msra.mxu1 %v847_v53  ;;  %v208_v60 = vld [vmem:[%s1448_s21 + $0x52] sm:$0xff]  ;;  %v236_v12 = vld [vmem:[%s1448_s21 + $0x5c] sm:$0xff] }
  0x19   : > { %v243_v42 = vld [vmem:[%s1448_s21 + $0x25] sm:$0xff]  ;;  %v1216_v44 = vpack.i.bf16 %v257_v41, %v256_v40  ;;  %v204_v61 = vld [vmem:[%s1448_s21 + $0x32] sm:$0xff]  ;;  %v232_v13 = vld [vmem:[%s1448_s21 + $0x3c] sm:$0xff] }
  0x1a   : > { %v193_v45 = vld [vmem:[%s1448_s21 + $0x41] sm:$0xff]  ;;  %v194_v46 = vld [vmem:[%s1448_s21 + $0x49] sm:$0xff]  ;;  %v1211_v47 = vpack.i.bf16 %v244_v43, %v243_v42  ;;  %v222_v2 = vld [vmem:[%s1448_s21 + $0x53] sm:$0xff] }
  0x1b   : > { %1167 = vrot.lane.b32.xlu1 %v1166_v18, %s1400_s28  ;;  %v189_v50 = vld [vmem:[%s1448_s21 + $0x21] sm:$0xff]  ;;  %v190_v51 = vld [vmem:[%s1448_s21 + $0x29] sm:$0xff]  ;;  %v1226_v52 = vpack.i.bf16 %v194_v46, %v193_v45  ;;  %v218_v4 = vld [vmem:[%s1448_s21 + $0x33] sm:$0xff] }
  0x1c   : > { %1162 = vrot.lane.b32.xlu0 %v1161_v19, %s1401_s29  ;;  %v1221_v54 = vpack.i.bf16 %v190_v51, %v189_v50  ;;  %v1518_v55 = vld [vmem:[%s1448_s21 + $0x42] sm:$0xff]  ;;  %v207_v56 = vld [vmem:[%s1448_s21 + $0x4a] sm:$0xff]  ;;  %v235_v8 = vld [vmem:[%s1448_s21 + $0x54] sm:$0xff] }
  0x1d   : > { %v203_v57 = vld [vmem:[%s1448_s21 + $0x2a] sm:$0xff]  ;;  %v1236_v58 = vpack.i.bf16 %v207_v56, %v1518_v55  ;;  %v1246_v62 = vpack.i.bf16 %v208_v60, %v207_v56  ;;  %v231_v9 = vld [vmem:[%s1448_s21 + $0x34] sm:$0xff]  ;;  %v1276_v14 = vpack.i.bf16 %v236_v12, %v235_v8  ;;  %v250_v17 = vld [vmem:[%s1448_s21 + $0x5d] sm:$0xff] }
  0x1e   : > { %v1231_v59 = vpack.i.bf16 %v203_v57, %v202_v33  ;;  %v1241_v63 = vpack.i.bf16 %v204_v61, %v203_v57  ;;  %v221_v0 = vld [vmem:[%s1448_s21 + $0x4b] sm:$0xff]  ;;  %v1261_v11 = vpack.i.bf16 %v231_v9, %v1493_v37  ;;  %v1271_v15 = vpack.i.bf16 %v232_v13, %v231_v9  ;;  %v249_v16 = vld [vmem:[%s1448_s21 + $0x55] sm:$0xff]  ;;  %v246_v19 = vld [vmem:[%s1448_s21 + $0x3d] sm:$0xff] }
  0x1f   : > { %1177 = vrot.lane.b32.xlu1 %v1176_v24, %s1402_s30  ;;  %v217_v3 = vld [vmem:[%s1448_s21 + $0x2b] sm:$0xff]  ;;  %v1256_v5 = vpack.i.bf16 %v222_v2, %v221_v0  ;;  %v245_v18 = vld [vmem:[%s1448_s21 + $0x35] sm:$0xff]  ;;  %v1286_v20 = vpack.i.bf16 %v250_v17, %v249_v16  ;;  %v263_v23 = vld [vmem:[%s1448_s21 + $0x5e] sm:$0xff] }
  0x20   : > { %1172 = vrot.lane.b32.xlu0 %v1171_v26, %s1403_s4  ;;  %v1251_v6 = vpack.i.bf16 %v218_v4, %v217_v3  ;;  %v1537_v7 = vld [vmem:[%s1448_s21 + $0x4c] sm:$0xff]  ;;  %v1281_v21 = vpack.i.bf16 %v246_v19, %v245_v18  ;;  %v262_v22 = vld [vmem:[%s1448_s21 + $0x56] sm:$0xff]  ;;  %v259_v25 = vld [vmem:[%s1448_s21 + $0x3e] sm:$0xff] }
  0x21   : > { %v1266_v10 = vpack.i.bf16 %v235_v8, %v1537_v7  ;;  %v258_v24 = vld [vmem:[%s1448_s21 + $0x36] sm:$0xff]  ;;  %v1296_v26 = vpack.i.bf16 %v263_v23, %v262_v22  ;;  %v224_v42 = vld [vmem:[%s1448_s21 + $0x63] sm:$0xff]  ;;  %v239_v51 = vld [vmem:[%s1448_s21 + $0x6c] sm:$0xff] }
  0x22   : > { %v1291_v27 = vpack.i.bf16 %v259_v25, %v258_v24  ;;  %v195_v28 = vld [vmem:[%s1448_s21 + $0x51] sm:$0xff]  ;;  %v192_v31 = vld [vmem:[%s1448_s21 + $0x39] sm:$0xff]  ;;  %v233_v48 = vld [vmem:[%s1448_s21 + $0x44] sm:$0xff] }
  0x23   : > { %1187 = vrot.lane.b32.xlu1 %v1186_v29, %s1398_s27  ;;  %v196_v29 = vld [vmem:[%s1448_s21 + $0x59] sm:$0xff]  ;;  %v1341_v50 = vpack.i.bf16 %v233_v48, %v232_v13  ;;  %v1351_v53 = vpack.i.bf16 %v1537_v7, %v233_v48  ;;  %v247_v56 = vld [vmem:[%s1448_s21 + $0x45] sm:$0xff]  ;;  %v248_v57 = vld [vmem:[%s1448_s21 + $0x4d] sm:$0xff] }
  0x24   : > { %1182 = vrot.lane.b32.xlu0 %v1181_v30, %s1396_s25  ;;  %v191_v30 = vld [vmem:[%s1448_s21 + $0x31] sm:$0xff]  ;;  %v1306_v32 = vpack.i.bf16 %v196_v29, %v195_v28  ;;  %v223_v41 = vld [vmem:[%s1448_s21 + $0x5b] sm:$0xff]  ;;  %v238_v8 = vld [vmem:[%s1448_s21 + $0x6c] sm:$0xf] }
  0x25   : > { %v1301_v33 = vpack.i.bf16 %v192_v31, %v191_v30  ;;  %v219_v43 = vld [vmem:[%s1448_s21 + $0x3b] sm:$0xff]  ;;  %v1336_v45 = vpack.i.bf16 %v224_v42, %v223_v41  ;;  %v240_v7 = vld [vmem:[%s1448_s21 + $0x74] sm:$0xf]  ;;  %v173_v16 = vld [vmem:[%s1448_s21 + $0x8] sm:$0xff] }
  0x26   : > { %v210_v3 = vld [vmem:[%s1448_s21 + $0x62] sm:$0xf]  ;;  %v266_v9 = vld [vmem:[%s1448_s21 + $0x76] sm:$0xf] }
  0x27   : > { %1197 = vrot.lane.b32.xlu1 %v1196_v34, %s1397_s26  ;;  %v209_v34 = vld [vmem:[%s1448_s21 + $0x5a] sm:$0xff] }
  0x28   : > { %1192 = vrot.lane.b32.xlu0 %v1191_v35, %s1395_s24  ;;  %v205_v35 = vld [vmem:[%s1448_s21 + $0x3a] sm:$0xff]  ;;  %v1316_v36 = vpack.i.bf16 %v209_v34, %v208_v60  ;;  %v264_v60 = vld [vmem:[%s1448_s21 + $0x66] sm:$0xff] }
  0x29   : > { %v1311_v37 = vpack.i.bf16 %v205_v35, %v204_v61  ;;  %v1321_v40 = vpack.i.bf16 %v1518_v55, %v205_v35  ;;  %v252_v55 = vld [vmem:[%s1448_s21 + $0x6d] sm:$0xff]  ;;  %v197_v4 = vld [vmem:[%s1448_s21 + $0x61] sm:$0xf] }
  0x2a   : > { %v265_v61 = vld [vmem:[%s1448_s21 + $0x6e] sm:$0xff] }
  0x2b   : > { %1207 = vrot.lane.b32.xlu1 %v1206_v38, %s1400_s28  ;;  %v211_v38 = vld [vmem:[%s1448_s21 + $0x62] sm:$0xff]  ;;  %v1376_v0 = vpack.i.bf16 %v265_v61, %v264_v60 }
  0x2c   : > { %1202 = vrot.lane.b32.xlu0 %v1201_v39, %s1401_s29  ;;  %v1326_v39 = vpack.i.bf16 %v211_v38, %v209_v34 }
  0x2f   : > { %1217 = vrot.lane.b32.xlu1 %v1216_v44, %s1402_s30  ;;  %v220_v44 = vld [vmem:[%s1448_s21 + $0x43] sm:$0xff] }
  0x30   : > { %1212 = vrot.lane.b32.xlu0 %v1211_v47, %s1403_s4  ;;  %v1331_v46 = vpack.i.bf16 %v220_v44, %v219_v43  ;;  %v237_v47 = vld [vmem:[%s1448_s21 + $0x64] sm:$0xff] }
  0x31   : > { %v1346_v49 = vpack.i.bf16 %v237_v47, %v236_v12 }
  0x33   : > { %1227 = vrot.lane.b32.xlu1 %v1226_v52, %s1396_s25  ;;  %v1356_v52 = vpack.i.bf16 %v239_v51, %v237_v47 }
  0x34   : > { %1222 = vrot.lane.b32.xlu0 %v1221_v54, %s1396_s25  ;;  %v251_v54 = vld [vmem:[%s1448_s21 + $0x65] sm:$0xff] }
  0x37   : > { %1237 = vrot.lane.b32.xlu1 %v1236_v58, %s1398_s27  ;;  %v1366_v58 = vpack.i.bf16 %v252_v55, %v251_v54  ;;  %v175_v54 = vld [vmem:[%s1448_s21 + $0x18] sm:$0xff] }
  0x38   : > { %1232 = vrot.lane.b32.xlu0 %v1231_v59, %s1398_s27  ;;  %v1361_v59 = vpack.i.bf16 %v248_v57, %v247_v56 }
  0x3b   : > { %1247 = vrot.lane.b32.xlu1 %v1246_v62, %s1395_s24  ;;  %v260_v62 = vld [vmem:[%s1448_s21 + $0x46] sm:$0xff] }
  0x3c   : > { %1242 = vrot.lane.b32.xlu0 %v1241_v63, %s1395_s24  ;;  %v261_v63 = vld [vmem:[%s1448_s21 + $0x4e] sm:$0xff] }
  0x3d   : > { %v1371_v2 = vpack.i.bf16 %v261_v63, %v260_v62 }
  0x3f   : > { %1257 = vrot.lane.b32.xlu1 %v1256_v5, %s1397_s26  ;;  %v225_v5 = vld [vmem:[%s1448_s21 + $0x6b] sm:$0xf] }
  0x40   : > { %1252 = vrot.lane.b32.xlu0 %v1251_v6, %s1397_s26  ;;  %v212_v6 = vld [vmem:[%s1448_s21 + $0x6a] sm:$0xf] }
  0x43   : > { %1267 = vrot.lane.b32.xlu1 %v1266_v10, %s1401_s29  ;;  %v253_v10 = vld [vmem:[%s1448_s21 + $0x75] sm:$0xf] }
  0x44   : > { %1262 = vrot.lane.b32.xlu0 %v1261_v11, %s1401_s29 }
  0x47   : > { %1277 = vrot.lane.b32.xlu1 %v1276_v14, %s1400_s28 }
  0x48   : > { %1272 = vrot.lane.b32.xlu0 %v1271_v15, %s1400_s28  ;;  %v172_v15 = vld [vmem:[%s1448_s21] sm:$0xff] }
  0x4b   : > { %1287 = vrot.lane.b32.xlu1 %v1286_v20, %s1403_s4 }
  0x4c   : > { %1282 = vrot.lane.b32.xlu0 %v1281_v21, %s1403_s4 }
  0x4f   : > { %1297 = vrot.lane.b32.xlu1 %v1296_v26, %s1402_s30 }
  0x50   : > { %1292 = vrot.lane.b32.xlu0 %v1291_v27, %s1402_s30 }
  0x53   : > { %1307 = vrot.lane.b32.xlu1 %v1306_v32, %s1396_s25 }
  0x54   : > { %1302 = vrot.lane.b32.xlu0 %v1301_v33, %s1396_s25 }
  0x57   : > { %1317 = vrot.lane.b32.xlu1 %v1316_v36, %s1398_s27 }
  0x58   : > { %1312 = vrot.lane.b32.xlu0 %v1311_v37, %s1398_s27 }
  0x5b   : > { %1327 = vrot.lane.b32.xlu1 %v1326_v39, %s1395_s24 }
  0x5c   : > { %1322 = vrot.lane.b32.xlu0 %v1321_v40, %s1395_s24 }
  0x5f   : > { %1337 = vrot.lane.b32.xlu1 %v1336_v45, %s1397_s26 }
  0x60   : > { %1332 = vrot.lane.b32.xlu0 %v1331_v46, %s1397_s26 }
  0x63   : > { %1347 = vrot.lane.b32.xlu1 %v1346_v49, %s1401_s29 }
  0x64   : > { %1342 = vrot.lane.b32.xlu0 %v1341_v50, %s1401_s29 }
  0x67   : > { %1357 = vrot.lane.b32.xlu1 %v1356_v52, %s1400_s28 }
  0x68   : > { %1352 = vrot.lane.b32.xlu0 %v1351_v53, %s1400_s28  ;;  %v174_v53 = vld [vmem:[%s1448_s21 + $0x10] sm:$0xff] }
  0x6b   : > { %1367 = vrot.lane.b32.xlu1 %v1366_v58, %s1403_s4 }
  0x6c   : > { %1362 = vrot.lane.b32.xlu0 %v1361_v59, %s1403_s4 }
  0x6f   : > { %1377 = vrot.lane.b32.xlu1 %v1376_v0, %s1402_s30 }
  0x70   : > { %1372 = vrot.lane.b32.xlu0 %v1371_v2, %s1402_s30 }
  0x73   : > { %356 = vrot.lane.b32.xlu1 %v210_v3, %s1398_s27 }
  0x74   : > { %304 = vrot.lane.b32.xlu0 %v197_v4, %s1396_s25 }
  0x77   : > { %449 = vrot.lane.b32.xlu1 %v225_v5, %s1397_s26 }
  0x78   : > { %397 = vrot.lane.b32.xlu0 %v212_v6, %s1395_s24 }
  0x7b   : > { %542 = vrot.lane.b32.xlu1 %v240_v7, %s1400_s28 }
  0x7c   : > { %501 = vrot.lane.b32.xlu0 %v238_v8, %s1401_s29 }
  0x7f   : > { %646 = vrot.lane.b32.xlu1 %v266_v9, %s1402_s30 }
  0x80   : > { %594 = vrot.lane.b32.xlu0 %v253_v10, %s1403_s4 }
  0x85   : > { %v1153_v11 = vpop.permute.xlu1 %1152 }
  0x86   : > { %v1143_v12 = vpop.permute.xlu0 %1142  ;;  %v1155_v23 = vunpack.i.h.bf16 %v1153_v11  ;;  %v1154_v24 = vunpack.i.l.bf16 %v1153_v11 }
  0x87   : > { %v1145_v13 = vunpack.i.h.bf16 %v1143_v12  ;;  %v1144_v14 = vunpack.i.l.bf16 %v1143_v12 }
  0x89   : > { %v1158_v17 = vpop.permute.xlu1 %1157  ;;  %v662_v25 = vsel %vm661_vm2, %v172_v15, %v1144_v14  ;;  %v663_v26 = vsel %vm661_vm2, %v173_v16, %v1145_v13 }
  0x8a   : > { %v1148_v18 = vpop.permute.xlu0 %1147  ;;  %v1160_v19 = vunpack.i.h.bf16 %v1158_v17  ;;  %v1159_v20 = vunpack.i.l.bf16 %v1158_v17 }
  0x8b   : > { %v1150_v21 = vunpack.i.h.bf16 %v1148_v18  ;;  %v1149_v22 = vunpack.i.l.bf16 %v1148_v18 }
  0x8d   : > { %v676_v27 = vsel %vm675_vm3, %v662_v25, %v1149_v22  ;;  %v677_v28 = vsel %vm675_vm3, %v663_v26, %v1150_v21  ;;  %v1168_v29 = vpop.permute.xlu1 %1167 }
  0x8e   : > { %v690_v30 = vsel %vm689_vm4, %v676_v27, %v1154_v24  ;;  %v691_v31 = vsel %vm689_vm4, %v677_v28, %v1155_v23  ;;  %v1163_v32 = vpop.permute.xlu0 %1162  ;;  %v1170_v37 = vunpack.i.h.bf16 %v1168_v29  ;;  %v1169_v38 = vunpack.i.l.bf16 %v1168_v29 }
  0x8f   : > { %v1165_v33 = vunpack.i.h.bf16 %v1163_v32  ;;  %v1164_v34 = vunpack.i.l.bf16 %v1163_v32  ;;  %v704_v35 = vsel %vm703_vm5, %v690_v30, %v1159_v20  ;;  %v705_v36 = vsel %vm703_vm5, %v691_v31, %v1160_v19 }
  0x91   : > { %v718_v39 = vsel %vm717_vm6, %v704_v35, %v1164_v34  ;;  %v719_v40 = vsel %vm717_vm6, %v705_v36, %v1165_v33  ;;  %v1178_v41 = vpop.permute.xlu1 %1177 }
  0x92   : > { %v1180_v42 = vunpack.i.h.bf16 %v1178_v41  ;;  %v1179_v43 = vunpack.i.l.bf16 %v1178_v41  ;;  %v1173_v44 = vpop.permute.xlu0 %1172  ;;  %v732_v47 = vsel %vm731_vm7, %v718_v39, %v1169_v38  ;;  %v733_v48 = vsel %vm731_vm7, %v719_v40, %v1170_v37 }
  0x93   : > { %v1175_v45 = vunpack.i.h.bf16 %v1173_v44  ;;  %v1174_v46 = vunpack.i.l.bf16 %v1173_v44  ;;  %v180_v44 = vld [vmem:[%s1448_s21 + $0x40] sm:$0xff] }
  0x95   : > { %v746_v49 = vsel %vm745_vm8, %v732_v47, %v1174_v46  ;;  %v747_v50 = vsel %vm745_vm8, %v733_v48, %v1175_v45  ;;  %v1188_v51 = vpop.permute.xlu1 %1187  ;;  %v181_v45 = vld [vmem:[%s1448_s21 + $0x48] sm:$0xff] }
  0x96   : > { %v1183_v52 = vpop.permute.xlu0 %1182  ;;  %v760_v55 = vsel %vm759_vm9, %v746_v49, %v1179_v43  ;;  %v761_v56 = vsel %vm759_vm9, %v747_v50, %v1180_v42  ;;  %v1190_v60 = vunpack.i.h.bf16 %v1188_v51  ;;  %v1189_v61 = vunpack.i.l.bf16 %v1188_v51  ;;  %v176_v51 = vld [vmem:[%s1448_s21 + $0x20] sm:$0xff] }
  0x97   : > { %v1185_v57 = vunpack.i.h.bf16 %v1183_v52  ;;  %v1184_v58 = vunpack.i.l.bf16 %v1183_v52  ;;  %v773_v59 = vpack.c.bf16 %v761_v56, %v760_v55  ;;  %v177_v52 = vld [vmem:[%s1448_s21 + $0x28] sm:$0xff] }
  0x99   : > { %v664_v62 = vsel %vm661_vm2, %v174_v53, %v1184_v58  ;;  %v665_v63 = vsel %vm661_vm2, %v175_v54, %v1185_v57  ;;  %1086 = vmatmul.mubr.msk.bf16.vlgmr.msra.gmra.mrb[0].mxu0 %vm823_vm10, %v773_v59  ;;  %v1198_v0 = vpop.permute.xlu1 %1197 }
  0x9a   : > { %v1193_v2 = vpop.permute.xlu0 %1192  ;;  %1089 = vmatprep.mubr.msk.bf16.mxu0 %vm1399_vm0, %v1394_v1  ;;  %v1200_v5 = vunpack.i.h.bf16 %v1198_v0  ;;  %v1199_v6 = vunpack.i.l.bf16 %v1198_v0  ;;  %v678_v7 = vsel %vm675_vm3, %v664_v62, %v1189_v61  ;;  %v679_v8 = vsel %vm675_vm3, %v665_v63, %v1190_v60 }
  0x9b   : > { %v1195_v3 = vunpack.i.h.bf16 %v1193_v2  ;;  %v1194_v4 = vunpack.i.l.bf16 %v1193_v2 }
  0x9d   : > { %v692_v9 = vsel %vm689_vm4, %v678_v7, %v1194_v4  ;;  %v693_v10 = vsel %vm689_vm4, %v679_v8, %v1195_v3  ;;  %v1208_v11 = vpop.permute.xlu1 %1207 }
  0x9e   : > { %v1203_v12 = vpop.permute.xlu0 %1202  ;;  %v1210_v15 = vunpack.i.h.bf16 %v1208_v11  ;;  %v1209_v16 = vunpack.i.l.bf16 %v1208_v11  ;;  %v706_v17 = vsel %vm703_vm5, %v692_v9, %v1199_v6  ;;  %v707_v18 = vsel %vm703_vm5, %v693_v10, %v1200_v5 }
  0x9f   : > { %v1205_v13 = vunpack.i.h.bf16 %v1203_v12  ;;  %v1204_v14 = vunpack.i.l.bf16 %v1203_v12 }
  0xa1   : > { %v720_v19 = vsel %vm717_vm6, %v706_v17, %v1204_v14  ;;  %v721_v20 = vsel %vm717_vm6, %v707_v18, %v1205_v13  ;;  %v1218_v21 = vpop.permute.xlu1 %1217 }
  0xa2   : > { %v1220_v22 = vunpack.i.h.bf16 %v1218_v21  ;;  %v1219_v23 = vunpack.i.l.bf16 %v1218_v21  ;;  %v1213_v24 = vpop.permute.xlu0 %1212  ;;  %v734_v27 = vsel %vm731_vm7, %v720_v19, %v1209_v16  ;;  %v735_v28 = vsel %vm731_vm7, %v721_v20, %v1210_v15 }
  0xa3   : > { %v1215_v25 = vunpack.i.h.bf16 %v1213_v24  ;;  %v1214_v26 = vunpack.i.l.bf16 %v1213_v24 }
  0xa5   : > { %v748_v29 = vsel %vm745_vm8, %v734_v27, %v1214_v26  ;;  %v749_v30 = vsel %vm745_vm8, %v735_v28, %v1215_v25  ;;  %v1228_v31 = vpop.permute.xlu1 %1227 }
  0xa6   : > { %v1223_v32 = vpop.permute.xlu0 %1222  ;;  %v762_v33 = vsel %vm759_vm9, %v748_v29, %v1219_v23  ;;  %v763_v34 = vsel %vm759_vm9, %v749_v30, %v1220_v22  ;;  %v1230_v42 = vunpack.i.h.bf16 %v1228_v31  ;;  %v1229_v43 = vunpack.i.l.bf16 %v1228_v31 }
  0xa7   : > { %v774_v35 = vpack.c.bf16 %v763_v34, %v762_v33  ;;  %v1225_v46 = vunpack.i.h.bf16 %v1223_v32  ;;  %v1224_v47 = vunpack.i.l.bf16 %v1223_v32 }
  0xa8   : > { %v670_v58 = vsel %vm661_vm2, %v180_v44, %v1229_v43  ;;  %v671_v59 = vsel %vm661_vm2, %v181_v45, %v1230_v42 }
  0xa9   : > { %1090 = vmatmul.mubr.msk.bf16.gmra.mrb[4].mxu0 %vm823_vm10, %v774_v35  ;;  %v1238_v36 = vpop.permute.xlu1 %1237  ;;  %v666_v62 = vsel %vm661_vm2, %v176_v51, %v1224_v47  ;;  %v667_v63 = vsel %vm661_vm2, %v177_v52, %v1225_v46 }
  0xaa   : > { %v1233_v37 = vpop.permute.xlu0 %1232  ;;  %1093 = vmatprep.mubr.msk.bf16.mxu0 %vm1399_vm0, %v1394_v1  ;;  %v1240_v48 = vunpack.i.h.bf16 %v1238_v36  ;;  %v1239_v49 = vunpack.i.l.bf16 %v1238_v36 }
  0xab   : > { %v1235_v53 = vunpack.i.h.bf16 %v1233_v37  ;;  %v1234_v54 = vunpack.i.l.bf16 %v1233_v37 }
  0xac   : > { %v684_v0 = vsel %vm675_vm3, %v670_v58, %v1239_v49  ;;  %v685_v2 = vsel %vm675_vm3, %v671_v59, %v1240_v48 }
  0xad   : > { %v1248_v38 = vpop.permute.xlu1 %1247  ;;  %v680_v4 = vsel %vm675_vm3, %v666_v62, %v1234_v54  ;;  %v681_v5 = vsel %vm675_vm3, %v667_v63, %v1235_v53 }
  0xae   : > { %v1243_v39 = vpop.permute.xlu0 %1242  ;;  %v1250_v56 = vunpack.i.h.bf16 %v1248_v38  ;;  %v1249_v57 = vunpack.i.l.bf16 %v1248_v38 }
  0xaf   : > { %v1245_v60 = vunpack.i.h.bf16 %v1243_v39  ;;  %v1244_v61 = vunpack.i.l.bf16 %v1243_v39 }
  0xb0   : > { %v698_v9 = vsel %vm689_vm4, %v684_v0, %v1249_v57  ;;  %v699_v10 = vsel %vm689_vm4, %v685_v2, %v1250_v56 }
  0xb1   : > { %v1258_v40 = vpop.permute.xlu1 %1257  ;;  %v694_v13 = vsel %vm689_vm4, %v680_v4, %v1244_v61  ;;  %v695_v14 = vsel %vm689_vm4, %v681_v5, %v1245_v60  ;;  %v182_v4 = vld [vmem:[%s1448_s21 + $0x50] sm:$0xff]  ;;  %v183_v5 = vld [vmem:[%s1448_s21 + $0x58] sm:$0xff] }
  0xb2   : > { %v1253_v41 = vpop.permute.xlu0 %1252  ;;  %v1260_v6 = vunpack.i.h.bf16 %v1258_v40  ;;  %v1259_v7 = vunpack.i.l.bf16 %v1258_v40 }
  0xb3   : > { %v1255_v11 = vunpack.i.h.bf16 %v1253_v41  ;;  %v1254_v12 = vunpack.i.l.bf16 %v1253_v41 }
  0xb4   : > { %v712_v22 = vsel %vm703_vm5, %v698_v9, %v1259_v7  ;;  %v713_v23 = vsel %vm703_vm5, %v699_v10, %v1260_v6 }
  0xb5   : > { %v1268_v50 = vpop.permute.xlu1 %1267  ;;  %v708_v27 = vsel %vm703_vm5, %v694_v13, %v1254_v12  ;;  %v709_v28 = vsel %vm703_vm5, %v695_v14, %v1255_v11  ;;  %v178_v11 = vld [vmem:[%s1448_s21 + $0x30] sm:$0xff]  ;;  %v179_v12 = vld [vmem:[%s1448_s21 + $0x38] sm:$0xff] }
  0xb6   : > { %v1263_v55 = vpop.permute.xlu0 %1262  ;;  %v1270_v15 = vunpack.i.h.bf16 %v1268_v50  ;;  %v1269_v16 = vunpack.i.l.bf16 %v1268_v50 }
  0xb7   : > { %v1265_v17 = vunpack.i.h.bf16 %v1263_v55  ;;  %v1264_v18 = vunpack.i.l.bf16 %v1263_v55 }
  0xb8   : > { %v726_v31 = vsel %vm717_vm6, %v712_v22, %v1269_v16  ;;  %v727_v32 = vsel %vm717_vm6, %v713_v23, %v1270_v15 }
  0xb9   : > { %v1278_v3 = vpop.permute.xlu1 %1277  ;;  %v722_v35 = vsel %vm717_vm6, %v708_v27, %v1264_v18  ;;  %v723_v36 = vsel %vm717_vm6, %v709_v28, %v1265_v17 }
  0xba   : > { %v1273_v8 = vpop.permute.xlu0 %1272  ;;  %v1280_v19 = vunpack.i.h.bf16 %v1278_v3  ;;  %v1279_v20 = vunpack.i.l.bf16 %v1278_v3 }
  0xbb   : > { %v1275_v24 = vunpack.i.h.bf16 %v1273_v8  ;;  %v1274_v25 = vunpack.i.l.bf16 %v1273_v8 }
  0xbc   : > { %v740_v37 = vsel %vm731_vm7, %v726_v31, %v1279_v20  ;;  %v741_v38 = vsel %vm731_vm7, %v727_v32, %v1280_v19 }
  0xbd   : > { %v1288_v21 = vpop.permute.xlu1 %1287  ;;  %v736_v40 = vsel %vm731_vm7, %v722_v35, %v1274_v25  ;;  %v737_v41 = vsel %vm731_vm7, %v723_v36, %v1275_v24 }
  0xbe   : > { %v1283_v26 = vpop.permute.xlu0 %1282  ;;  %v1290_v29 = vunpack.i.h.bf16 %v1288_v21  ;;  %v1289_v30 = vunpack.i.l.bf16 %v1288_v21 }
  0xbf   : > { %v1285_v33 = vunpack.i.h.bf16 %v1283_v26  ;;  %v1284_v34 = vunpack.i.l.bf16 %v1283_v26 }
  0xc0   : > { %v754_v45 = vsel %vm745_vm8, %v740_v37, %v1289_v30  ;;  %v755_v46 = vsel %vm745_vm8, %v741_v38, %v1290_v29 }
  0xc1   : > { %v1298_v39 = vpop.permute.xlu1 %1297  ;;  %v750_v49 = vsel %vm745_vm8, %v736_v40, %v1284_v34  ;;  %v751_v50 = vsel %vm745_vm8, %v737_v41, %v1285_v33 }
  0xc2   : > { %v1300_v42 = vunpack.i.h.bf16 %v1298_v39  ;;  %v1299_v43 = vunpack.i.l.bf16 %v1298_v39  ;;  %v1293_v44 = vpop.permute.xlu0 %1292 }
  0xc3   : > { %v1295_v47 = vunpack.i.h.bf16 %v1293_v44  ;;  %v1294_v48 = vunpack.i.l.bf16 %v1293_v44 }
  0xc4   : > { %v768_v51 = vsel %vm759_vm9, %v754_v45, %v1299_v43  ;;  %v769_v52 = vsel %vm759_vm9, %v755_v46, %v1300_v42 }
  0xc5   : > { %v777_v53 = vpack.c.bf16 %v769_v52, %v768_v51  ;;  %v764_v54 = vsel %vm759_vm9, %v750_v49, %v1294_v48  ;;  %v765_v55 = vsel %vm759_vm9, %v751_v50, %v1295_v47  ;;  %v1308_v56 = vpop.permute.xlu1 %1307 }
  0xc6   : > { %v775_v57 = vpack.c.bf16 %v765_v55, %v764_v54  ;;  %v1303_v58 = vpop.permute.xlu0 %1302  ;;  %v1310_v2 = vunpack.i.h.bf16 %v1308_v56  ;;  %v1309_v3 = vunpack.i.l.bf16 %v1308_v56 }
  0xc7   : > { %1102 = vmatmul.mubr.msk.bf16.vlgmr.msra.gmra.mrb[0].mxu1 %vm823_vm10, %v777_v53  ;;  %v1305_v6 = vunpack.i.h.bf16 %v1303_v58  ;;  %v1304_v7 = vunpack.i.l.bf16 %v1303_v58 }
  0xc8   : > { %1094 = vmatmul.mubr.msk.bf16.gmra.mrb[8].mxu0 %vm823_vm10, %v775_v57  ;;  %1105 = vmatprep.mubr.msk.bf16.mxu1 %vm1399_vm0, %v1394_v1  ;;  %v672_v18 = vsel %vm661_vm2, %v182_v4, %v1309_v3  ;;  %v673_v19 = vsel %vm661_vm2, %v183_v5, %v1310_v2 }
  0xc9   : > { %v1318_v59 = vpop.permute.xlu1 %1317  ;;  %1097 = vmatprep.mubr.msk.bf16.mxu0 %vm1399_vm0, %v1394_v1  ;;  %v668_v22 = vsel %vm661_vm2, %v178_v11, %v1304_v7  ;;  %v669_v23 = vsel %vm661_vm2, %v179_v12, %v1305_v6 }
  0xca   : > { %v1313_v60 = vpop.permute.xlu0 %1312  ;;  %v1320_v8 = vunpack.i.h.bf16 %v1318_v59  ;;  %v1319_v9 = vunpack.i.l.bf16 %v1318_v59 }
  0xcb   : > { %v1315_v13 = vunpack.i.h.bf16 %v1313_v60  ;;  %v1314_v14 = vunpack.i.l.bf16 %v1313_v60 }
  0xcc   : > { %v686_v24 = vsel %vm675_vm3, %v672_v18, %v1319_v9  ;;  %v687_v25 = vsel %vm675_vm3, %v673_v19, %v1320_v8 }
  0xcd   : > { %v1328_v61 = vpop.permute.xlu1 %1327  ;;  %v682_v27 = vsel %vm675_vm3, %v668_v22, %v1314_v14  ;;  %v683_v28 = vsel %vm675_vm3, %v669_v23, %v1315_v13  ;;  %v184_v13 = vld [vmem:[%s1448_s21 + $0x60] sm:$0xf] }
  0xce   : > { %v1323_v62 = vpop.permute.xlu0 %1322  ;;  %v1330_v16 = vunpack.i.h.bf16 %v1328_v61  ;;  %v1329_v17 = vunpack.i.l.bf16 %v1328_v61 }
  0xcf   : > { %v1325_v20 = vunpack.i.h.bf16 %v1323_v62  ;;  %v1324_v21 = vunpack.i.l.bf16 %v1323_v62 }
  0xd0   : > { %v700_v32 = vsel %vm689_vm4, %v686_v24, %v1329_v17  ;;  %v701_v33 = vsel %vm689_vm4, %v687_v25, %v1330_v16 }
  0xd1   : > { %v1338_v63 = vpop.permute.xlu1 %1337  ;;  %v696_v36 = vsel %vm689_vm4, %v682_v27, %v1324_v21  ;;  %v697_v37 = vsel %vm689_vm4, %v683_v28, %v1325_v20 }
  0xd2   : > { %v1333_v0 = vpop.permute.xlu0 %1332  ;;  %v1340_v29 = vunpack.i.h.bf16 %v1338_v63  ;;  %v1339_v30 = vunpack.i.l.bf16 %v1338_v63 }
  0xd3   : > { %v1335_v34 = vunpack.i.h.bf16 %v1333_v0  ;;  %v1334_v35 = vunpack.i.l.bf16 %v1333_v0 }
  0xd4   : > { %v714_v45 = vsel %vm703_vm5, %v700_v32, %v1339_v30  ;;  %v715_v46 = vsel %vm703_vm5, %v701_v33, %v1340_v29 }
  0xd5   : > { %v1348_v10 = vpop.permute.xlu1 %1347  ;;  %v710_v50 = vsel %vm703_vm5, %v696_v36, %v1334_v35  ;;  %v711_v51 = vsel %vm703_vm5, %v697_v37, %v1335_v34  ;;  %v1039_v34 = vld [vmem:[%s1794_s2] ss:$0 sm:$0xff] }
  0xd6   : > { %v1343_v15 = vpop.permute.xlu0 %1342  ;;  %v1350_v38 = vunpack.i.h.bf16 %v1348_v10  ;;  %v1349_v39 = vunpack.i.l.bf16 %v1348_v10 }
  0xd7   : > { %v1345_v40 = vunpack.i.h.bf16 %v1343_v15  ;;  %v1344_v41 = vunpack.i.l.bf16 %v1343_v15 }
  0xd8   : > { %v728_v54 = vsel %vm717_vm6, %v714_v45, %v1349_v39  ;;  %v729_v55 = vsel %vm717_vm6, %v715_v46, %v1350_v38 }
  0xd9   : > { %v1358_v26 = vpop.permute.xlu1 %1357  ;;  %v724_v58 = vsel %vm717_vm6, %v710_v50, %v1344_v41  ;;  %v725_v59 = vsel %vm717_vm6, %v711_v51, %v1345_v40 }
  0xda   : > { %v1353_v31 = vpop.permute.xlu0 %1352  ;;  %v1360_v42 = vunpack.i.h.bf16 %v1358_v26  ;;  %v1359_v43 = vunpack.i.l.bf16 %v1358_v26 }
  0xdb   : > { %v1355_v47 = vunpack.i.h.bf16 %v1353_v31  ;;  %v1354_v48 = vunpack.i.l.bf16 %v1353_v31 }
  0xdc   : > { %v742_v60 = vsel %vm731_vm7, %v728_v54, %v1359_v43  ;;  %v743_v61 = vsel %vm731_vm7, %v729_v55, %v1360_v42 }
  0xdd   : > { %v1368_v44 = vpop.permute.xlu1 %1367  ;;  %v738_v63 = vsel %vm731_vm7, %v724_v58, %v1354_v48  ;;  %v739_v0 = vsel %vm731_vm7, %v725_v59, %v1355_v47 }
  0xde   : > { %v1363_v49 = vpop.permute.xlu0 %1362  ;;  %v1370_v52 = vunpack.i.h.bf16 %v1368_v44  ;;  %v1369_v53 = vunpack.i.l.bf16 %v1368_v44 }
  0xdf   : > { %v1365_v56 = vunpack.i.h.bf16 %v1363_v49  ;;  %v1364_v57 = vunpack.i.l.bf16 %v1363_v49 }
  0xe0   : > { %v756_v5 = vsel %vm745_vm8, %v742_v60, %v1369_v53  ;;  %v757_v6 = vsel %vm745_vm8, %v743_v61, %v1370_v52 }
  0xe1   : > { %v1378_v62 = vpop.permute.xlu1 %1377  ;;  %v752_v9 = vsel %vm745_vm8, %v738_v63, %v1364_v57  ;;  %v753_v10 = vsel %vm745_vm8, %v739_v0, %v1365_v56 }
  0xe2   : > { %v1380_v2 = vunpack.i.h.bf16 %v1378_v62  ;;  %v1379_v3 = vunpack.i.l.bf16 %v1378_v62  ;;  %v1373_v4 = vpop.permute.xlu0 %1372 }
  0xe3   : > { %v1375_v7 = vunpack.i.h.bf16 %v1373_v4  ;;  %v1374_v8 = vunpack.i.l.bf16 %v1373_v4 }
  0xe4   : > { %v770_v11 = vsel %vm759_vm9, %v756_v5, %v1379_v3  ;;  %v771_v12 = vsel %vm759_vm9, %v757_v6, %v1380_v2 }
  0xe5   : > { %v778_v14 = vpack.c.bf16 %v771_v12, %v770_v11  ;;  %v766_v15 = vsel %vm759_vm9, %v752_v9, %v1374_v8  ;;  %v767_v16 = vsel %vm759_vm9, %v753_v10, %v1375_v7  ;;  %v357_v17 = vpop.permute.xlu1 %356 }
  0xe6   : > { %v776_v18 = vpack.c.bf16 %v767_v16, %v766_v15  ;;  %v305_v19 = vpop.permute.xlu0 %304 }
  0xe7   : > { %v674_v20 = vsel %vm661_vm2, %v184_v13, %v305_v19  ;;  %1106 = vmatmul.mubr.msk.bf16.gmra.mrb[4].mxu1 %vm823_vm10, %v778_v14 }
  0xe8   : > { %1098 = vmatmul.mubr.msk.bf16.gmra.mrb[12].mxu0 %vm823_vm10, %v776_v18  ;;  %1109 = vmatprep.mubr.msk.bf16.mxu1 %vm1399_vm0, %v1394_v1  ;;  %v688_v22 = vsel %vm675_vm3, %v674_v20, %v357_v17 }
  0xe9   : > { %v450_v21 = vpop.permute.xlu1 %449 }
  0xea   : > { %v398_v23 = vpop.permute.xlu0 %397 }
  0xeb   : > { %v702_v24 = vsel %vm689_vm4, %v688_v22, %v398_v23 }
  0xec   : > { %v716_v26 = vsel %vm703_vm5, %v702_v24, %v450_v21 }
  0xed   : > { %v543_v25 = vpop.permute.xlu1 %542 }
  0xee   : > { %v502_v27 = vpop.permute.xlu0 %501 }
  0xef   : > { %v730_v28 = vsel %vm717_vm6, %v716_v26, %v502_v27 }
  0xf0   : > { %v744_v30 = vsel %vm731_vm7, %v730_v28, %v543_v25 }
  0xf1   : > { %v647_v29 = vpop.permute.xlu1 %646 }
  0xf2   : > { %v595_v31 = vpop.permute.xlu0 %594 }
  0xf3   : > { %v758_v32 = vsel %vm745_vm8, %v744_v30, %v595_v31 }
  0xf4   : > { %v772_v1 = vsel %vm759_vm9, %v758_v32, %v647_v29 }
  0xf5   : > { %v779_v33 = vpack.c.bf16 %v772_v1, %v772_v1 }
  0xf7   : > { %1110 = vmatmul.mubr.msk.bf16.gmra.mrb[8].mxu1 %vm823_vm10, %v779_v33 }
 0x16c   : > { %v883_v35 = vpop.f32.mrb[0].mxu0 }
 0x16d   : > { %v1087_v36 = vpop.f32.mrb[1].mxu0 }
 0x16e   : > { %v886_v37 = vpop.f32.mrb[2].mxu0 }
 0x16f   : > { %v887_v38 = vadd.f32 %v1039_v34, %v886_v37  ;;  %v1088_v39 = vpop.f32.mrb[3].mxu0 }
 0x171   : > { %939 = vst.msk [vmem:[#allocation2 + $0x8] sm:$0xff] %vm937_vm11, %v887_v38 }
 0x17c   : > { %v891_v40 = vpop.f32.mrb[4].mxu0 }
 0x17d   : > { %v892_v41 = vadd.f32 %v1039_v34, %v891_v40  ;;  %v1091_v42 = vpop.f32.mrb[5].mxu0 }
 0x17e   : > { %v894_v43 = vpop.f32.mrb[6].mxu0 }
 0x17f   : > { %940 = vst.msk [vmem:[#allocation2 + $0x10] sm:$0xff] %vm937_vm11, %v892_v41  ;;  %v895_v44 = vadd.f32 %v1039_v34, %v894_v43  ;;  %v1092_v45 = vpop.f32.mrb[7].mxu0 }
 0x181   : > { %941 = vst.msk [vmem:[#allocation2 + $0x18] sm:$0xff] %vm937_vm11, %v895_v44 }
 0x186   : > { %v952_v46 = vld [vmem:[#allocation2 + $0xb] sm:$0xff] }
 0x187   : > { %953 = vst.msk [vmem:[%s1763_s16] sm:$0xff] %vm937_vm11, %v952_v46 }
 0x188   : > { %v954_v47 = vld [vmem:[#allocation2 + $0x15] sm:$0xff] }
 0x189   : > { %1052 = vst.msk [vmem:[%s1763_s16 + $0x8] sm:$0xff] %vm937_vm11, %v954_v47 }
 0x19a   : > { %v915_v48 = vpop.f32.mrb[0].mxu1 }
 0x19b   : > { %v899_v49 = vpop.f32.mrb[8].mxu0  ;;  %v916_v50 = vadd.f32 %v1039_v34, %v915_v48  ;;  %v1103_v51 = vpop.f32.mrb[1].mxu1 }
 0x19c   : > { %v900_v52 = vadd.f32 %v1039_v34, %v899_v49  ;;  %v1095_v53 = vpop.f32.mrb[9].mxu0  ;;  %v918_v54 = vpop.f32.mrb[2].mxu1 }
 0x19d   : > { %946 = vst.msk [vmem:[#allocation2 + $0x40] sm:$0xff] %vm937_vm11, %v916_v50  ;;  %v902_v55 = vpop.f32.mrb[10].mxu0  ;;  %v919_v56 = vadd.f32 %v1039_v34, %v918_v54  ;;  %v1104_v57 = vpop.f32.mrb[3].mxu1 }
 0x19e   : > { %942 = vst.msk [vmem:[#allocation2 + $0x20] sm:$0xff] %vm937_vm11, %v900_v52  ;;  %v903_v58 = vadd.f32 %v1039_v34, %v902_v55  ;;  %v1096_v59 = vpop.f32.mrb[11].mxu0 }
 0x19f   : > { %947 = vst.msk [vmem:[#allocation2 + $0x48] sm:$0xff] %vm937_vm11, %v919_v56 }
 0x1a0   : > { %943 = vst.msk [vmem:[#allocation2 + $0x28] sm:$0xff] %vm937_vm11, %v903_v58 }
 0x1a5   : > { %v957_v60 = vld [vmem:[#allocation2 + $0x1f] sm:$0xff] }
 0x1a6   : > { %1053 = vst.msk [vmem:[%s1763_s16 + $0x10] sm:$0xff] %vm937_vm11, %v957_v60  ;;  %v969_v61 = vld [vmem:[#allocation2 + $0x47] sm:$0xff] }
 0x1a7   : > { %1057 = vst.msk [vmem:[%s1763_s16 + $0x30] sm:$0xff] %vm937_vm11, %v969_v61 }
 0x1ba   : > { %v923_v62 = vpop.f32.mrb[4].mxu1 }
 0x1bb   : > { %v907_v63 = vpop.f32.mrb[12].mxu0  ;;  %v924_v0 = vadd.f32 %v1039_v34, %v923_v62  ;;  %v1107_v2 = vpop.f32.mrb[5].mxu1 }
 0x1bc   : > { %v908_v3 = vadd.f32 %v1039_v34, %v907_v63  ;;  %v1099_v4 = vpop.f32.mrb[13].mxu0  ;;  %v926_v5 = vpop.f32.mrb[6].mxu1 }
 0x1bd   : > { %948 = vst.msk [vmem:[#allocation2 + $0x50] sm:$0xff] %vm937_vm11, %v924_v0  ;;  %v910_v6 = vpop.f32.mrb[14].mxu0  ;;  %v927_v7 = vadd.f32 %v1039_v34, %v926_v5  ;;  %v1108_v8 = vpop.f32.mrb[7].mxu1 }
 0x1be   : > { %944 = vst.msk [vmem:[#allocation2 + $0x30] sm:$0xff] %vm937_vm11, %v908_v3  ;;  %v911_v9 = vadd.f32 %v1039_v34, %v910_v6  ;;  %v1100_v10 = vpop.f32.mrb[15].mxu0 }
 0x1bf   : > { %949 = vst.msk [vmem:[#allocation2 + $0x58] sm:$0xff] %vm937_vm11, %v927_v7 }
 0x1c0   : > { %945 = vst.msk [vmem:[#allocation2 + $0x38] sm:$0xff] %vm937_vm11, %v911_v9 }
 0x1c5   : > { %v960_v11 = vld [vmem:[#allocation2 + $0x29] sm:$0xff] }
 0x1c6   : > { %1054 = vst.msk [vmem:[%s1763_s16 + $0x18] sm:$0xff] %vm937_vm11, %v960_v11  ;;  %v972_v12 = vld [vmem:[#allocation2 + $0x51] sm:$0xff] }
 0x1c7   : > { %v963_v13 = vld [vmem:[#allocation2 + $0x33] sm:$0xff]  ;;  %v966_v14 = vld [vmem:[#allocation2 + $0x3d] sm:$0xff]  ;;  %1058 = vst.msk [vmem:[%s1763_s16 + $0x38] sm:$0xff] %vm937_vm11, %v972_v12 }
 0x1c8   : > { %1055 = vst.msk [vmem:[%s1763_s16 + $0x20] sm:$0xff] %vm937_vm11, %v963_v13  ;;  %1056 = vst.msk [vmem:[%s1763_s16 + $0x28] sm:$0xff] %vm937_vm11, %v966_v14 }
 0x1ca   : > { %v931_v15 = vpop.f32.mrb[8].mxu1 }
 0x1cb   : > { %v1111_v16 = vpop.f32.mrb[9].mxu1 }
 0x1cc   : > { %v934_v17 = vpop.f32.mrb[10].mxu1 }
 0x1cd   : > { %v1112_v18 = vpop.f32.mrb[11].mxu1 }
 0x1ce PF: > { %s13_s12 = sadd.s32 1, %s1392_s12  }
 0x1cf   : > { %p10_p4 = scmp.ge.s32.totalorder %s13_s12, 4  }
 0x1d1   :  { %12 = sbr.rel (!%p10_p4) target bundleno = 1 (0x1), region = 69 }

</bundles_post_ra>
